<compile_context>
chip_gen: v7x
topology: tpu7x:2x2x1
jax: 0.10.0
libtpu: 0.0.40
codegen_flags: <defaults>
</compile_context>

<pallas_src>
import numpy as np

import jax
import jax.numpy as jnp
from jax import lax
from jax.experimental import pallas as pl
from jax.experimental.pallas import tpu as pltpu

IMG = 16            # spatial size of each image
CCONV = 8           # encoder conv output channels
F_ENC = 10          # encoder feature dim (Discriminator(20) -> 2 * 10)
HIDDEN = 64         # discriminator hidden width
VERS = 7            # number of "versions" per set (hardcoded in the module)
NB = 16             # padded encoding batch: 2*VERS = 14 -> 16 (2 sublane tiles)

NGROUPS = 2         # conv/FC channel groups
GSIZE = CCONV // NGROUPS        # 4 channels per group
GWIDTH = GSIZE * 384            # 1536 lanes per grouped FC slab

# Flat "stride-18" image layout used inside the kernel:
#   pixel (h, w) of image n lives at ximg[n, BASE + ROWSTRIDE*h + w].
# The 2 spare zero columns per row plus the zero margins provide the conv
# zero-padding for free: every 3x3 tap becomes a constant lane shift.
ROWSTRIDE = IMG + 2             # 18
BASE = 64                       # left margin (>= 19 so every tap shift stays in range)
NCOLS = 512                     # total flat width (lane-tile aligned)
WSTART = 32                     # conv-output window start: window covers cols [32, 416)
WWIDTH = 384                    # conv-output window width (3 lane tiles)
TAPS = [(dh, dw) for dh in range(3) for dw in range(3)]

# 1-D SMEM scalar vector layout: [72 conv weights (tap-major) | 8 conv biases | b2]
SCAL_WCONV = 0
SCAL_BCONV = 9 * CCONV          # 72
SCAL_B2 = SCAL_BCONV + CCONV    # 80
SCAL_LEN = SCAL_B2 + 1          # 81


# ------------------------------ fused kernel ------------------------------ #

def fused_kernel(ximg_ref, scal_ref, wfck_ref, bias_ref, w1w2_ref, sel_ref,
                 res_ref, kl_ref):
    f32 = jnp.float32
    bf16 = jnp.bfloat16

    # --- Encoder: 3x3 conv as shifted VPU MACs (tap-outer, channel groups) ---
    # Non-pixel positions of the conv window hold garbage after bias/ReLU;
    # the re-indexed FC weight wfck is zero there, so they never contribute.
    enc = bias_ref[0:1, 0:F_ENC]                         # bfc, broadcast over rows
    for g in range(NGROUPS):
        accs = [None] * GSIZE
        for t, (dh, dw) in enumerate(TAPS):
            start = WSTART + ROWSTRIDE * (dh - 1) + (dw - 1)
            x = ximg_ref[:, start:start + WWIDTH]        # (16, 384) shifted view, 1 per (g, tap)
            for cc in range(GSIZE):
                w = scal_ref[SCAL_WCONV + t * CCONV + g * GSIZE + cc]   # SMEM scalar
                term = x * w
                accs[cc] = term if t == 0 else accs[cc] + term
        relu = [jnp.maximum(accs[cc] + scal_ref[SCAL_BCONV + g * GSIZE + cc], 0.0)
                for cc in range(GSIZE)]
        gacc = jnp.concatenate(relu, axis=1)             # (16, 1536), lane-tile aligned
        # Grouped FC contraction (kept f32: enc feeds the KL/softmax path).
        enc = enc + lax.dot_general(gacc, wfck_ref[g],
                                    (((1,), (1,)), ((), ())),
                                    preferred_element_type=f32)   # (16, 10)

    # --- Discriminator over all 4*V*V ordered pairs (bf16 MXU, f32 acc) ------
    # cat([l, r]) @ W1 == l @ W1[:10] + r @ W1[10:]; w1w2[:10] holds both halves
    # side by side so one (16,10)x(10,128) matmul yields AB = [A | B].
    enc_b = enc.astype(bf16)
    w1ab = w1w2_ref[0:F_ENC, :]                          # (10, 128) bf16
    AB = jnp.dot(enc_b, w1ab, preferred_element_type=f32)            # (16, 128)
    ABstack = jnp.concatenate([AB[:, :HIDDEN], AB[:, HIDDEN:]], axis=0)  # (32, 64)
    # One merged one-hot selector expands A/B to the 196 ordered pairs without
    # materializing a (196, 20) pairs array anywhere.
    h = jnp.dot(sel_ref[...], ABstack.astype(bf16),
                preferred_element_type=f32)              # (196, 64)
    h = jnp.maximum(h + bias_ref[1:2, 0:HIDDEN], 0.0)
    # Second layer produced lane-dense as (1, 196) instead of (196, 1).
    w2t = w1w2_ref[F_ENC:F_ENC + 1, 0:HIDDEN]            # (1, 64) bf16
    logits = lax.dot_general(w2t, h.astype(bf16),
                             (((1,), (1,)), ((), ())),
                             preferred_element_type=f32)             # (1, 196)
    res_ref[...] = logits + scal_ref[SCAL_B2]

    # --- KL divergences over all pairs of the 14 encodings (f32 throughout) --
    # torch: kl_div(log softmax(e_i), softmax(e_j), reduction='mean')
    #      = (1/F_ENC) * sum_k p_j[k] * (log p_j[k] - log p_i[k])
    m = jnp.max(enc, axis=1, keepdims=True)
    ex = jnp.exp(enc - m)
    den = jnp.sum(ex, axis=1, keepdims=True)
    p = ex / den
    logp = (enc - m) - jnp.log(den)
    # term2[i, j] = sum_k logp[i, k] * p[j, k];  its diagonal is term1[j].
    term2 = lax.dot_general(logp, p, (((1,), (1,)), ((), ())),
                            preferred_element_type=f32)  # (16, 16)
    ri = lax.broadcasted_iota(jnp.int32, (NB, NB), 0)
    ci = lax.broadcasted_iota(jnp.int32, (NB, NB), 1)
    eye = (ri == ci).astype(f32)
    term1 = jnp.sum(term2 * eye, axis=0, keepdims=True)  # (1, 16)
    kl_ref[...] = (term1 - term2) * (1.0 / F_ENC)


# ------------------------------ host wrappers ------------------------------ #

@jax.jit
def mutual_info_forward(set_1, set_2, kp):
    """set_1, set_2: (V, 1, 1, IMG, IMG) float32; kp: kernel-ready params."""
    V = set_1.shape[0]
    NV = 2 * V
    NRES = 4 * V * V

    # Stride-18 flat, zero-margined, row-padded image slab (tiny XLA prep that
    # should fuse into a single pad-of-reshape-of-pad-of-concat fusion).
    imgs = jnp.concatenate([set_1.reshape(V, IMG, IMG),
                            set_2.reshape(V, IMG, IMG)], axis=0)        # (14,16,16)
    imgs = jnp.pad(imgs, ((0, NB - NV), (0, 0), (0, ROWSTRIDE - IMG)))  # (16,16,18)
    flat = imgs.reshape(NB, IMG * ROWSTRIDE)                            # (16,288)
    ximg = jnp.pad(flat, ((0, 0), (BASE, NCOLS - BASE - IMG * ROWSTRIDE)))  # (16,512)

    vm = pl.BlockSpec(memory_space=pltpu.MemorySpace.VMEM)
    sm = pl.BlockSpec(memory_space=pltpu.MemorySpace.SMEM)

    res2d, klf = pl.pallas_call(
        fused_kernel,
        out_shape=(jax.ShapeDtypeStruct((1, NRES), jnp.float32),
                   jax.ShapeDtypeStruct((NB, NB), jnp.float32)),
        in_specs=[vm,   # ximg  (16, 512)  f32
                  sm,   # scal  (81,)      f32  conv w + conv b + b2
                  vm,   # wfck  (2, 10, 1536) f32 grouped FC weights
                  vm,   # bias  (2, 128)   f32  [bfc | b1]
                  vm,   # w1w2  (16, 128)  bf16 [w1a|w1b ; w2^T]
                  vm],  # sel   (196, 32)  bf16 merged pair selector
        out_specs=(vm, vm),
    )(ximg, kp["scal"], kp["wfck"], kp["bias"], kp["w1w2"], kp["sel"])

    results = res2d.reshape(NRES)
    KL_1 = klf[:V, :V].reshape(V * V)
    KL_2 = klf[V:NV, V:NV].reshape(V * V)
    # decs_1 / decs_2 are always empty lists in the reference forward().
    return results, KL_1, KL_2, [], []
    # TODO(synk): BCEWithLogitsLoss / Adam optimizer are training-only state
    # and are not exercised by forward(); intentionally not implemented.


def init_params():
    """Synthetic Encoder / Discriminator weights (deterministic, logical layout)."""
    ks = jax.random.split(jax.random.PRNGKey(42), 8)
    return {
        "wconv": 0.10 * jax.random.normal(ks[0], (9, CCONV), jnp.float32),
        "bconv": 0.10 * jax.random.normal(ks[1], (CCONV,), jnp.float32),
        # FC weight indexed channel-major: row = c*256 + h*16 + w (PyTorch .view)
        "wfc":   0.02 * jax.random.normal(ks[2], (CCONV * IMG * IMG, F_ENC), jnp.float32),
        "bfc":   0.10 * jax.random.normal(ks[3], (1, F_ENC), jnp.float32),
        "w1":    0.10 * jax.random.normal(ks[4], (2 * F_ENC, HIDDEN), jnp.float32),
        "b1":    0.10 * jax.random.normal(ks[5], (1, HIDDEN), jnp.float32),
        "w2":    0.10 * jax.random.normal(ks[6], (HIDDEN, 1), jnp.float32),
        "b2":    0.10 * jax.random.normal(ks[7], (1, 1), jnp.float32),
    }


def prepare_params(params):
    """One-time conversion of logical weights into kernel-friendly layouts."""
    # FC weight re-indexed to the stride-18 window layout and grouped by 4
    # channels: wfck[g, f, cc*384 + (32 + 18h + w)] = wfc[(4g+cc)*256 + 16h + w, f],
    # zero at non-pixel window positions.
    w4 = params["wfc"].reshape(CCONV, IMG, IMG, F_ENC)          # [c, h, w, f]
    w4 = jnp.transpose(w4, (0, 3, 1, 2))                        # [c, f, h, w]
    w4 = jnp.pad(w4, ((0, 0), (0, 0), (0, 0), (0, ROWSTRIDE - IMG)))
    wf = w4.reshape(CCONV, F_ENC, IMG * ROWSTRIDE)              # [c, f, 18h+w]
    wf = jnp.pad(wf, ((0, 0), (0, 0),
                      (BASE - WSTART,
                       WWIDTH - (BASE - WSTART) - IMG * ROWSTRIDE)))   # (8,10,384)
    wfck = wf.reshape(NGROUPS, GSIZE, F_ENC, WWIDTH)
    wfck = jnp.transpose(wfck, (0, 2, 1, 3)).reshape(NGROUPS, F_ENC, GWIDTH)

    # Flat SMEM scalar vector: conv weights (tap-major), conv biases, b2.
    scal = jnp.concatenate([params["wconv"].reshape(-1),
                            params["bconv"].reshape(-1),
                            params["b2"].reshape(-1)]).astype(jnp.float32)   # (81,)

    # Bias slab (f32): row 0 = bfc (lanes 0..9), row 1 = b1 (lanes 0..63).
    bias = jnp.zeros((2, 128), jnp.float32)
    bias = bias.at[0, :F_ENC].set(params["bfc"].reshape(F_ENC))
    bias = bias.at[1, :HIDDEN].set(params["b1"].reshape(HIDDEN))

    # Merged discriminator weights (bf16): rows 0..9 = [W1[:10] | W1[10:]],
    # row 10 lanes 0..63 = W2^T.
    w1w2 = jnp.zeros((NB, 128), jnp.float32)
    w1w2 = w1w2.at[:F_ENC, :HIDDEN].set(params["w1"][:F_ENC, :])
    w1w2 = w1w2.at[:F_ENC, HIDDEN:].set(params["w1"][F_ENC:, :])
    w1w2 = w1w2.at[F_ENC, :HIDDEN].set(params["w2"].reshape(HIDDEN))
    w1w2 = w1w2.astype(jnp.bfloat16)

    # Merged one-hot selector (196, 32): cols [0,16) pick the A row (left
    # encoding), cols [16,32) pick the B row (right encoding), in the block
    # order (E1,E1), (E2,E2), (E1,E2), (E2,E1); i (left) outer, j (right) inner.
    nres = 4 * VERS * VERS
    sel = np.zeros((nres, 2 * NB), np.float32)
    r = 0
    for (lo, ro) in ((0, 0), (VERS, VERS), (0, VERS), (VERS, 0)):
        for i in range(VERS):
            for j in range(VERS):
                sel[r, lo + i] = 1.0
                sel[r, NB + ro + j] = 1.0
                r += 1

    return {
        "scal": scal,                               # (81,)        SMEM scalars
        "wfck": wfck,                               # (2, 10, 1536) f32
        "bias": bias,                               # (2, 128)      f32
        "w1w2": w1w2,                               # (16, 128)     bf16
        "sel": jnp.asarray(sel, jnp.bfloat16),      # (196, 32)     bf16
    }


# -------------------- pure-JAX reference (for self-check) ------------------ #

def reference_forward(set_1, set_2, params):
    V = set_1.shape[0]
    P = lax.Precision.HIGHEST
    imgs = jnp.concatenate([set_1.reshape(V, IMG, IMG),
                            set_2.reshape(V, IMG, IMG)], axis=0)
    xp = jnp.pad(imgs, ((0, 0), (1, 1), (1, 1)))
    cols = jnp.stack([xp[:, dh:dh + IMG, dw:dw + IMG]
                      for dh in range(3) for dw in range(3)], axis=-1)   # (2V,16,16,9)
    conv = jnp.einsum("nhwt,tc->nchw", cols, params["wconv"], precision=P)
    conv = jnp.maximum(conv + params["bconv"].reshape(1, CCONV, 1, 1), 0.0)
    feat = conv.reshape(2 * V, CCONV * IMG * IMG)                        # channel-major
    enc = jnp.dot(feat, params["wfc"], precision=P) + params["bfc"]
    E1, E2 = enc[:V], enc[V:]

    def block_logits(EA, EB):
        left = jnp.repeat(EA, V, axis=0)
        right = jnp.tile(EB, (V, 1))
        pairs = jnp.concatenate([left, right], axis=1)
        h = jnp.maximum(jnp.dot(pairs, params["w1"], precision=P) + params["b1"], 0.0)
        return (jnp.dot(h, params["w2"], precision=P) + params["b2"]).reshape(V * V)

    results = jnp.concatenate([block_logits(E1, E1), block_logits(E2, E2),
                               block_logits(E1, E2), block_logits(E2, E1)])

    def kl_block(E):
        p = jax.nn.softmax(E, axis=1)
        logp = jax.nn.log_softmax(E, axis=1)
        t1 = jnp.sum(p * logp, axis=1)                                   # (V,)
        t2 = jnp.einsum("ik,jk->ij", logp, p, precision=P)               # (V,V)
        return ((t1[None, :] - t2) / F_ENC).reshape(V * V)

    return results, kl_block(E1), kl_block(E2)


# ------------------------------------ main --------------------------------- #

if __name__ == "__main__":
    key = jax.random.PRNGKey(0)
    k1, k2 = jax.random.split(key)
    set_1 = jax.random.normal(k1, (VERS, 1, 1, IMG, IMG), jnp.float32)
    set_2 = jax.random.normal(k2, (VERS, 1, 1, IMG, IMG), jnp.float32)

    params = init_params()
    kparams = prepare_params(params)

    results, KL_1, KL_2, decs_1, decs_2 = mutual_info_forward(set_1, set_2, kparams)
    jax.block_until_ready((results, KL_1, KL_2))

    assert results.shape == (VERS * VERS * 4,)   # 196
    assert KL_1.shape == (VERS * VERS,)          # 49
    assert KL_2.shape == (VERS * VERS,)          # 49

    # Self-check against a pure-JAX reference of the same synthetic model.
    r_ref, kl1_ref, kl2_ref = reference_forward(set_1, set_2, params)
    np.testing.assert_allclose(np.asarray(results), np.asarray(r_ref),
                               rtol=5e-2, atol=5e-3)
    np.testing.assert_allclose(np.asarray(KL_1), np.asarray(kl1_ref),
                               rtol=5e-2, atol=1e-3)
    np.testing.assert_allclose(np.asarray(KL_2), np.asarray(kl2_ref),
                               rtol=5e-2, atol=1e-3)

    print("KERNEL_OK")
</pallas_src>

<mosaic_0001>
module attributes {stable_mosaic.version = 11 : i64} {
  func.func @fused_kernel(%arg0: memref<16x512xf32, #tpu.memory_space<vmem>>, %arg1: memref<81xf32, #tpu.memory_space<smem>>, %arg2: memref<2x10x1536xf32, #tpu.memory_space<vmem>>, %arg3: memref<2x128xf32, #tpu.memory_space<vmem>>, %arg4: memref<16x128xbf16, #tpu.memory_space<vmem>>, %arg5: memref<196x32xbf16, #tpu.memory_space<vmem>>, %arg6: memref<1x196xf32, #tpu.memory_space<vmem>>, %arg7: memref<16x16xf32, #tpu.memory_space<vmem>>) attributes {dimension_semantics = [], scalar_prefetch = 0 : i64, scratch_operands = 0 : i64, tpu.core_type = #tpu.core_type<tc>} {
    %c0 = arith.constant 0 : index
    %c0_0 = arith.constant 0 : index
    %0 = vector.load %arg3[%c0, %c0_0] : memref<2x128xf32, #tpu.memory_space<vmem>>, vector<1x10xf32>
    %c0_1 = arith.constant 0 : index
    %c13 = arith.constant 13 : index
    %1 = vector.load %arg0[%c0_1, %c13] : memref<16x512xf32, #tpu.memory_space<vmem>>, vector<16x384xf32>
    %c0_2 = arith.constant 0 : index
    %2 = memref.load %arg1[%c0_2] : memref<81xf32, #tpu.memory_space<smem>>
    %3 = vector.broadcast %2 : f32 to vector<16x384xf32>
    %4 = arith.mulf %1, %3 : vector<16x384xf32>
    %c1 = arith.constant 1 : index
    %5 = memref.load %arg1[%c1] : memref<81xf32, #tpu.memory_space<smem>>
    %6 = vector.broadcast %5 : f32 to vector<16x384xf32>
    %7 = arith.mulf %1, %6 : vector<16x384xf32>
    %c2 = arith.constant 2 : index
    %8 = memref.load %arg1[%c2] : memref<81xf32, #tpu.memory_space<smem>>
    %9 = vector.broadcast %8 : f32 to vector<16x384xf32>
    %10 = arith.mulf %1, %9 : vector<16x384xf32>
    %c3 = arith.constant 3 : index
    %11 = memref.load %arg1[%c3] : memref<81xf32, #tpu.memory_space<smem>>
    %12 = vector.broadcast %11 : f32 to vector<16x384xf32>
    %13 = arith.mulf %1, %12 : vector<16x384xf32>
    %c0_3 = arith.constant 0 : index
    %c14 = arith.constant 14 : index
    %14 = vector.load %arg0[%c0_3, %c14] : memref<16x512xf32, #tpu.memory_space<vmem>>, vector<16x384xf32>
    %c8 = arith.constant 8 : index
    %15 = memref.load %arg1[%c8] : memref<81xf32, #tpu.memory_space<smem>>
    %16 = vector.broadcast %15 : f32 to vector<16x384xf32>
    %17 = arith.mulf %14, %16 : vector<16x384xf32>
    %18 = arith.addf %4, %17 : vector<16x384xf32>
    %c9 = arith.constant 9 : index
    %19 = memref.load %arg1[%c9] : memref<81xf32, #tpu.memory_space<smem>>
    %20 = vector.broadcast %19 : f32 to vector<16x384xf32>
    %21 = arith.mulf %14, %20 : vector<16x384xf32>
    %22 = arith.addf %7, %21 : vector<16x384xf32>
    %c10 = arith.constant 10 : index
    %23 = memref.load %arg1[%c10] : memref<81xf32, #tpu.memory_space<smem>>
    %24 = vector.broadcast %23 : f32 to vector<16x384xf32>
    %25 = arith.mulf %14, %24 : vector<16x384xf32>
    %26 = arith.addf %10, %25 : vector<16x384xf32>
    %c11 = arith.constant 11 : index
    %27 = memref.load %arg1[%c11] : memref<81xf32, #tpu.memory_space<smem>>
    %28 = vector.broadcast %27 : f32 to vector<16x384xf32>
    %29 = arith.mulf %14, %28 : vector<16x384xf32>
    %30 = arith.addf %13, %29 : vector<16x384xf32>
    %c0_4 = arith.constant 0 : index
    %c15 = arith.constant 15 : index
    %31 = vector.load %arg0[%c0_4, %c15] : memref<16x512xf32, #tpu.memory_space<vmem>>, vector<16x384xf32>
    %c16 = arith.constant 16 : index
    %32 = memref.load %arg1[%c16] : memref<81xf32, #tpu.memory_space<smem>>
    %33 = vector.broadcast %32 : f32 to vector<16x384xf32>
    %34 = arith.mulf %31, %33 : vector<16x384xf32>
    %35 = arith.addf %18, %34 : vector<16x384xf32>
    %c17 = arith.constant 17 : index
    %36 = memref.load %arg1[%c17] : memref<81xf32, #tpu.memory_space<smem>>
    %37 = vector.broadcast %36 : f32 to vector<16x384xf32>
    %38 = arith.mulf %31, %37 : vector<16x384xf32>
    %39 = arith.addf %22, %38 : vector<16x384xf32>
    %c18 = arith.constant 18 : index
    %40 = memref.load %arg1[%c18] : memref<81xf32, #tpu.memory_space<smem>>
    %41 = vector.broadcast %40 : f32 to vector<16x384xf32>
    %42 = arith.mulf %31, %41 : vector<16x384xf32>
    %43 = arith.addf %26, %42 : vector<16x384xf32>
    %c19 = arith.constant 19 : index
    %44 = memref.load %arg1[%c19] : memref<81xf32, #tpu.memory_space<smem>>
    %45 = vector.broadcast %44 : f32 to vector<16x384xf32>
    %46 = arith.mulf %31, %45 : vector<16x384xf32>
    %47 = arith.addf %30, %46 : vector<16x384xf32>
    %c0_5 = arith.constant 0 : index
    %c31 = arith.constant 31 : index
    %48 = vector.load %arg0[%c0_5, %c31] : memref<16x512xf32, #tpu.memory_space<vmem>>, vector<16x384xf32>
    %c24 = arith.constant 24 : index
    %49 = memref.load %arg1[%c24] : memref<81xf32, #tpu.memory_space<smem>>
    %50 = vector.broadcast %49 : f32 to vector<16x384xf32>
    %51 = arith.mulf %48, %50 : vector<16x384xf32>
    %52 = arith.addf %35, %51 : vector<16x384xf32>
    %c25 = arith.constant 25 : index
    %53 = memref.load %arg1[%c25] : memref<81xf32, #tpu.memory_space<smem>>
    %54 = vector.broadcast %53 : f32 to vector<16x384xf32>
    %55 = arith.mulf %48, %54 : vector<16x384xf32>
    %56 = arith.addf %39, %55 : vector<16x384xf32>
    %c26 = arith.constant 26 : index
    %57 = memref.load %arg1[%c26] : memref<81xf32, #tpu.memory_space<smem>>
    %58 = vector.broadcast %57 : f32 to vector<16x384xf32>
    %59 = arith.mulf %48, %58 : vector<16x384xf32>
    %60 = arith.addf %43, %59 : vector<16x384xf32>
    %c27 = arith.constant 27 : index
    %61 = memref.load %arg1[%c27] : memref<81xf32, #tpu.memory_space<smem>>
    %62 = vector.broadcast %61 : f32 to vector<16x384xf32>
    %63 = arith.mulf %48, %62 : vector<16x384xf32>
    %64 = arith.addf %47, %63 : vector<16x384xf32>
    %c0_6 = arith.constant 0 : index
    %c32 = arith.constant 32 : index
    %65 = vector.load %arg0[%c0_6, %c32] : memref<16x512xf32, #tpu.memory_space<vmem>>, vector<16x384xf32>
    %c32_7 = arith.constant 32 : index
    %66 = memref.load %arg1[%c32_7] : memref<81xf32, #tpu.memory_space<smem>>
    %67 = vector.broadcast %66 : f32 to vector<16x384xf32>
    %68 = arith.mulf %65, %67 : vector<16x384xf32>
    %69 = arith.addf %52, %68 : vector<16x384xf32>
    %c33 = arith.constant 33 : index
    %70 = memref.load %arg1[%c33] : memref<81xf32, #tpu.memory_space<smem>>
    %71 = vector.broadcast %70 : f32 to vector<16x384xf32>
    %72 = arith.mulf %65, %71 : vector<16x384xf32>
    %73 = arith.addf %56, %72 : vector<16x384xf32>
    %c34 = arith.constant 34 : index
    %74 = memref.load %arg1[%c34] : memref<81xf32, #tpu.memory_space<smem>>
    %75 = vector.broadcast %74 : f32 to vector<16x384xf32>
    %76 = arith.mulf %65, %75 : vector<16x384xf32>
    %77 = arith.addf %60, %76 : vector<16x384xf32>
    %c35 = arith.constant 35 : index
    %78 = memref.load %arg1[%c35] : memref<81xf32, #tpu.memory_space<smem>>
    %79 = vector.broadcast %78 : f32 to vector<16x384xf32>
    %80 = arith.mulf %65, %79 : vector<16x384xf32>
    %81 = arith.addf %64, %80 : vector<16x384xf32>
    %c0_8 = arith.constant 0 : index
    %c33_9 = arith.constant 33 : index
    %82 = vector.load %arg0[%c0_8, %c33_9] : memref<16x512xf32, #tpu.memory_space<vmem>>, vector<16x384xf32>
    %c40 = arith.constant 40 : index
    %83 = memref.load %arg1[%c40] : memref<81xf32, #tpu.memory_space<smem>>
    %84 = vector.broadcast %83 : f32 to vector<16x384xf32>
    %85 = arith.mulf %82, %84 : vector<16x384xf32>
    %86 = arith.addf %69, %85 : vector<16x384xf32>
    %c41 = arith.constant 41 : index
    %87 = memref.load %arg1[%c41] : memref<81xf32, #tpu.memory_space<smem>>
    %88 = vector.broadcast %87 : f32 to vector<16x384xf32>
    %89 = arith.mulf %82, %88 : vector<16x384xf32>
    %90 = arith.addf %73, %89 : vector<16x384xf32>
    %c42 = arith.constant 42 : index
    %91 = memref.load %arg1[%c42] : memref<81xf32, #tpu.memory_space<smem>>
    %92 = vector.broadcast %91 : f32 to vector<16x384xf32>
    %93 = arith.mulf %82, %92 : vector<16x384xf32>
    %94 = arith.addf %77, %93 : vector<16x384xf32>
    %c43 = arith.constant 43 : index
    %95 = memref.load %arg1[%c43] : memref<81xf32, #tpu.memory_space<smem>>
    %96 = vector.broadcast %95 : f32 to vector<16x384xf32>
    %97 = arith.mulf %82, %96 : vector<16x384xf32>
    %98 = arith.addf %81, %97 : vector<16x384xf32>
    %c0_10 = arith.constant 0 : index
    %c49 = arith.constant 49 : index
    %99 = vector.load %arg0[%c0_10, %c49] : memref<16x512xf32, #tpu.memory_space<vmem>>, vector<16x384xf32>
    %c48 = arith.constant 48 : index
    %100 = memref.load %arg1[%c48] : memref<81xf32, #tpu.memory_space<smem>>
    %101 = vector.broadcast %100 : f32 to vector<16x384xf32>
    %102 = arith.mulf %99, %101 : vector<16x384xf32>
    %103 = arith.addf %86, %102 : vector<16x384xf32>
    %c49_11 = arith.constant 49 : index
    %104 = memref.load %arg1[%c49_11] : memref<81xf32, #tpu.memory_space<smem>>
    %105 = vector.broadcast %104 : f32 to vector<16x384xf32>
    %106 = arith.mulf %99, %105 : vector<16x384xf32>
    %107 = arith.addf %90, %106 : vector<16x384xf32>
    %c50 = arith.constant 50 : index
    %108 = memref.load %arg1[%c50] : memref<81xf32, #tpu.memory_space<smem>>
    %109 = vector.broadcast %108 : f32 to vector<16x384xf32>
    %110 = arith.mulf %99, %109 : vector<16x384xf32>
    %111 = arith.addf %94, %110 : vector<16x384xf32>
    %c51 = arith.constant 51 : index
    %112 = memref.load %arg1[%c51] : memref<81xf32, #tpu.memory_space<smem>>
    %113 = vector.broadcast %112 : f32 to vector<16x384xf32>
    %114 = arith.mulf %99, %113 : vector<16x384xf32>
    %115 = arith.addf %98, %114 : vector<16x384xf32>
    %c0_12 = arith.constant 0 : index
    %c50_13 = arith.constant 50 : index
    %116 = vector.load %arg0[%c0_12, %c50_13] : memref<16x512xf32, #tpu.memory_space<vmem>>, vector<16x384xf32>
    %c56 = arith.constant 56 : index
    %117 = memref.load %arg1[%c56] : memref<81xf32, #tpu.memory_space<smem>>
    %118 = vector.broadcast %117 : f32 to vector<16x384xf32>
    %119 = arith.mulf %116, %118 : vector<16x384xf32>
    %120 = arith.addf %103, %119 : vector<16x384xf32>
    %c57 = arith.constant 57 : index
    %121 = memref.load %arg1[%c57] : memref<81xf32, #tpu.memory_space<smem>>
    %122 = vector.broadcast %121 : f32 to vector<16x384xf32>
    %123 = arith.mulf %116, %122 : vector<16x384xf32>
    %124 = arith.addf %107, %123 : vector<16x384xf32>
    %c58 = arith.constant 58 : index
    %125 = memref.load %arg1[%c58] : memref<81xf32, #tpu.memory_space<smem>>
    %126 = vector.broadcast %125 : f32 to vector<16x384xf32>
    %127 = arith.mulf %116, %126 : vector<16x384xf32>
    %128 = arith.addf %111, %127 : vector<16x384xf32>
    %c59 = arith.constant 59 : index
    %129 = memref.load %arg1[%c59] : memref<81xf32, #tpu.memory_space<smem>>
    %130 = vector.broadcast %129 : f32 to vector<16x384xf32>
    %131 = arith.mulf %116, %130 : vector<16x384xf32>
    %132 = arith.addf %115, %131 : vector<16x384xf32>
    %c0_14 = arith.constant 0 : index
    %c51_15 = arith.constant 51 : index
    %133 = vector.load %arg0[%c0_14, %c51_15] : memref<16x512xf32, #tpu.memory_space<vmem>>, vector<16x384xf32>
    %c64 = arith.constant 64 : index
    %134 = memref.load %arg1[%c64] : memref<81xf32, #tpu.memory_space<smem>>
    %135 = vector.broadcast %134 : f32 to vector<16x384xf32>
    %136 = arith.mulf %133, %135 : vector<16x384xf32>
    %137 = arith.addf %120, %136 : vector<16x384xf32>
    %c65 = arith.constant 65 : index
    %138 = memref.load %arg1[%c65] : memref<81xf32, #tpu.memory_space<smem>>
    %139 = vector.broadcast %138 : f32 to vector<16x384xf32>
    %140 = arith.mulf %133, %139 : vector<16x384xf32>
    %141 = arith.addf %124, %140 : vector<16x384xf32>
    %c66 = arith.constant 66 : index
    %142 = memref.load %arg1[%c66] : memref<81xf32, #tpu.memory_space<smem>>
    %143 = vector.broadcast %142 : f32 to vector<16x384xf32>
    %144 = arith.mulf %133, %143 : vector<16x384xf32>
    %145 = arith.addf %128, %144 : vector<16x384xf32>
    %c67 = arith.constant 67 : index
    %146 = memref.load %arg1[%c67] : memref<81xf32, #tpu.memory_space<smem>>
    %147 = vector.broadcast %146 : f32 to vector<16x384xf32>
    %148 = arith.mulf %133, %147 : vector<16x384xf32>
    %149 = arith.addf %132, %148 : vector<16x384xf32>
    %c72 = arith.constant 72 : index
    %150 = memref.load %arg1[%c72] : memref<81xf32, #tpu.memory_space<smem>>
    %151 = vector.broadcast %150 : f32 to vector<16x384xf32>
    %152 = arith.addf %137, %151 : vector<16x384xf32>
    %cst = arith.constant 0.000000e+00 : f32
    %153 = vector.broadcast %cst : f32 to vector<16x384xf32>
    %154 = arith.maximumf %152, %153 : vector<16x384xf32>
    %c73 = arith.constant 73 : index
    %155 = memref.load %arg1[%c73] : memref<81xf32, #tpu.memory_space<smem>>
    %156 = vector.broadcast %155 : f32 to vector<16x384xf32>
    %157 = arith.addf %141, %156 : vector<16x384xf32>
    %cst_16 = arith.constant 0.000000e+00 : f32
    %158 = vector.broadcast %cst_16 : f32 to vector<16x384xf32>
    %159 = arith.maximumf %157, %158 : vector<16x384xf32>
    %c74 = arith.constant 74 : index
    %160 = memref.load %arg1[%c74] : memref<81xf32, #tpu.memory_space<smem>>
    %161 = vector.broadcast %160 : f32 to vector<16x384xf32>
    %162 = arith.addf %145, %161 : vector<16x384xf32>
    %cst_17 = arith.constant 0.000000e+00 : f32
    %163 = vector.broadcast %cst_17 : f32 to vector<16x384xf32>
    %164 = arith.maximumf %162, %163 : vector<16x384xf32>
    %c75 = arith.constant 75 : index
    %165 = memref.load %arg1[%c75] : memref<81xf32, #tpu.memory_space<smem>>
    %166 = vector.broadcast %165 : f32 to vector<16x384xf32>
    %167 = arith.addf %149, %166 : vector<16x384xf32>
    %cst_18 = arith.constant 0.000000e+00 : f32
    %168 = vector.broadcast %cst_18 : f32 to vector<16x384xf32>
    %169 = arith.maximumf %167, %168 : vector<16x384xf32>
    %170 = tpu.concatenate %154, %159, %164, %169 in 1 : vector<16x384xf32>, vector<16x384xf32>, vector<16x384xf32>, vector<16x384xf32> -> vector<16x1536xf32>
    %c0_19 = arith.constant 0 : index
    %c0_20 = arith.constant 0 : index
    %c0_21 = arith.constant 0 : index
    %171 = vector.load %arg2[%c0_19, %c0_20, %c0_21] : memref<2x10x1536xf32, #tpu.memory_space<vmem>>, vector<1x10x1536xf32>
    %172 = vector.shape_cast %171 : vector<1x10x1536xf32> to vector<10x1536xf32>
    %cst_22 = arith.constant dense<0.000000e+00> : vector<16x10xf32>
    %173 = tpu.matmul %170, %172, %cst_22 {dimension_numbers = #tpu.dot_dimension_numbers<[1], [1], [0], [0], [0, 0, 1, 0], [], []>} : vector<16x1536xf32>, vector<10x1536xf32>, vector<16x10xf32> -> vector<16x10xf32>
    %174 = vector.broadcast %0 : vector<1x10xf32> to vector<16x10xf32>
    %175 = arith.addf %174, %173 : vector<16x10xf32>
    %c0_23 = arith.constant 0 : index
    %c13_24 = arith.constant 13 : index
    %176 = vector.load %arg0[%c0_23, %c13_24] : memref<16x512xf32, #tpu.memory_space<vmem>>, vector<16x384xf32>
    %c4 = arith.constant 4 : index
    %177 = memref.load %arg1[%c4] : memref<81xf32, #tpu.memory_space<smem>>
    %178 = vector.broadcast %177 : f32 to vector<16x384xf32>
    %179 = arith.mulf %176, %178 : vector<16x384xf32>
    %c5 = arith.constant 5 : index
    %180 = memref.load %arg1[%c5] : memref<81xf32, #tpu.memory_space<smem>>
    %181 = vector.broadcast %180 : f32 to vector<16x384xf32>
    %182 = arith.mulf %176, %181 : vector<16x384xf32>
    %c6 = arith.constant 6 : index
    %183 = memref.load %arg1[%c6] : memref<81xf32, #tpu.memory_space<smem>>
    %184 = vector.broadcast %183 : f32 to vector<16x384xf32>
    %185 = arith.mulf %176, %184 : vector<16x384xf32>
    %c7 = arith.constant 7 : index
    %186 = memref.load %arg1[%c7] : memref<81xf32, #tpu.memory_space<smem>>
    %187 = vector.broadcast %186 : f32 to vector<16x384xf32>
    %188 = arith.mulf %176, %187 : vector<16x384xf32>
    %c0_25 = arith.constant 0 : index
    %c14_26 = arith.constant 14 : index
    %189 = vector.load %arg0[%c0_25, %c14_26] : memref<16x512xf32, #tpu.memory_space<vmem>>, vector<16x384xf32>
    %c12 = arith.constant 12 : index
    %190 = memref.load %arg1[%c12] : memref<81xf32, #tpu.memory_space<smem>>
    %191 = vector.broadcast %190 : f32 to vector<16x384xf32>
    %192 = arith.mulf %189, %191 : vector<16x384xf32>
    %193 = arith.addf %179, %192 : vector<16x384xf32>
    %c13_27 = arith.constant 13 : index
    %194 = memref.load %arg1[%c13_27] : memref<81xf32, #tpu.memory_space<smem>>
    %195 = vector.broadcast %194 : f32 to vector<16x384xf32>
    %196 = arith.mulf %189, %195 : vector<16x384xf32>
    %197 = arith.addf %182, %196 : vector<16x384xf32>
    %c14_28 = arith.constant 14 : index
    %198 = memref.load %arg1[%c14_28] : memref<81xf32, #tpu.memory_space<smem>>
    %199 = vector.broadcast %198 : f32 to vector<16x384xf32>
    %200 = arith.mulf %189, %199 : vector<16x384xf32>
    %201 = arith.addf %185, %200 : vector<16x384xf32>
    %c15_29 = arith.constant 15 : index
    %202 = memref.load %arg1[%c15_29] : memref<81xf32, #tpu.memory_space<smem>>
    %203 = vector.broadcast %202 : f32 to vector<16x384xf32>
    %204 = arith.mulf %189, %203 : vector<16x384xf32>
    %205 = arith.addf %188, %204 : vector<16x384xf32>
    %c0_30 = arith.constant 0 : index
    %c15_31 = arith.constant 15 : index
    %206 = vector.load %arg0[%c0_30, %c15_31] : memref<16x512xf32, #tpu.memory_space<vmem>>, vector<16x384xf32>
    %c20 = arith.constant 20 : index
    %207 = memref.load %arg1[%c20] : memref<81xf32, #tpu.memory_space<smem>>
    %208 = vector.broadcast %207 : f32 to vector<16x384xf32>
    %209 = arith.mulf %206, %208 : vector<16x384xf32>
    %210 = arith.addf %193, %209 : vector<16x384xf32>
    %c21 = arith.constant 21 : index
    %211 = memref.load %arg1[%c21] : memref<81xf32, #tpu.memory_space<smem>>
    %212 = vector.broadcast %211 : f32 to vector<16x384xf32>
    %213 = arith.mulf %206, %212 : vector<16x384xf32>
    %214 = arith.addf %197, %213 : vector<16x384xf32>
    %c22 = arith.constant 22 : index
    %215 = memref.load %arg1[%c22] : memref<81xf32, #tpu.memory_space<smem>>
    %216 = vector.broadcast %215 : f32 to vector<16x384xf32>
    %217 = arith.mulf %206, %216 : vector<16x384xf32>
    %218 = arith.addf %201, %217 : vector<16x384xf32>
    %c23 = arith.constant 23 : index
    %219 = memref.load %arg1[%c23] : memref<81xf32, #tpu.memory_space<smem>>
    %220 = vector.broadcast %219 : f32 to vector<16x384xf32>
    %221 = arith.mulf %206, %220 : vector<16x384xf32>
    %222 = arith.addf %205, %221 : vector<16x384xf32>
    %c0_32 = arith.constant 0 : index
    %c31_33 = arith.constant 31 : index
    %223 = vector.load %arg0[%c0_32, %c31_33] : memref<16x512xf32, #tpu.memory_space<vmem>>, vector<16x384xf32>
    %c28 = arith.constant 28 : index
    %224 = memref.load %arg1[%c28] : memref<81xf32, #tpu.memory_space<smem>>
    %225 = vector.broadcast %224 : f32 to vector<16x384xf32>
    %226 = arith.mulf %223, %225 : vector<16x384xf32>
    %227 = arith.addf %210, %226 : vector<16x384xf32>
    %c29 = arith.constant 29 : index
    %228 = memref.load %arg1[%c29] : memref<81xf32, #tpu.memory_space<smem>>
    %229 = vector.broadcast %228 : f32 to vector<16x384xf32>
    %230 = arith.mulf %223, %229 : vector<16x384xf32>
    %231 = arith.addf %214, %230 : vector<16x384xf32>
    %c30 = arith.constant 30 : index
    %232 = memref.load %arg1[%c30] : memref<81xf32, #tpu.memory_space<smem>>
    %233 = vector.broadcast %232 : f32 to vector<16x384xf32>
    %234 = arith.mulf %223, %233 : vector<16x384xf32>
    %235 = arith.addf %218, %234 : vector<16x384xf32>
    %c31_34 = arith.constant 31 : index
    %236 = memref.load %arg1[%c31_34] : memref<81xf32, #tpu.memory_space<smem>>
    %237 = vector.broadcast %236 : f32 to vector<16x384xf32>
    %238 = arith.mulf %223, %237 : vector<16x384xf32>
    %239 = arith.addf %222, %238 : vector<16x384xf32>
    %c0_35 = arith.constant 0 : index
    %c32_36 = arith.constant 32 : index
    %240 = vector.load %arg0[%c0_35, %c32_36] : memref<16x512xf32, #tpu.memory_space<vmem>>, vector<16x384xf32>
    %c36 = arith.constant 36 : index
    %241 = memref.load %arg1[%c36] : memref<81xf32, #tpu.memory_space<smem>>
    %242 = vector.broadcast %241 : f32 to vector<16x384xf32>
    %243 = arith.mulf %240, %242 : vector<16x384xf32>
    %244 = arith.addf %227, %243 : vector<16x384xf32>
    %c37 = arith.constant 37 : index
    %245 = memref.load %arg1[%c37] : memref<81xf32, #tpu.memory_space<smem>>
    %246 = vector.broadcast %245 : f32 to vector<16x384xf32>
    %247 = arith.mulf %240, %246 : vector<16x384xf32>
    %248 = arith.addf %231, %247 : vector<16x384xf32>
    %c38 = arith.constant 38 : index
    %249 = memref.load %arg1[%c38] : memref<81xf32, #tpu.memory_space<smem>>
    %250 = vector.broadcast %249 : f32 to vector<16x384xf32>
    %251 = arith.mulf %240, %250 : vector<16x384xf32>
    %252 = arith.addf %235, %251 : vector<16x384xf32>
    %c39 = arith.constant 39 : index
    %253 = memref.load %arg1[%c39] : memref<81xf32, #tpu.memory_space<smem>>
    %254 = vector.broadcast %253 : f32 to vector<16x384xf32>
    %255 = arith.mulf %240, %254 : vector<16x384xf32>
    %256 = arith.addf %239, %255 : vector<16x384xf32>
    %c0_37 = arith.constant 0 : index
    %c33_38 = arith.constant 33 : index
    %257 = vector.load %arg0[%c0_37, %c33_38] : memref<16x512xf32, #tpu.memory_space<vmem>>, vector<16x384xf32>
    %c44 = arith.constant 44 : index
    %258 = memref.load %arg1[%c44] : memref<81xf32, #tpu.memory_space<smem>>
    %259 = vector.broadcast %258 : f32 to vector<16x384xf32>
    %260 = arith.mulf %257, %259 : vector<16x384xf32>
    %261 = arith.addf %244, %260 : vector<16x384xf32>
    %c45 = arith.constant 45 : index
    %262 = memref.load %arg1[%c45] : memref<81xf32, #tpu.memory_space<smem>>
    %263 = vector.broadcast %262 : f32 to vector<16x384xf32>
    %264 = arith.mulf %257, %263 : vector<16x384xf32>
    %265 = arith.addf %248, %264 : vector<16x384xf32>
    %c46 = arith.constant 46 : index
    %266 = memref.load %arg1[%c46] : memref<81xf32, #tpu.memory_space<smem>>
    %267 = vector.broadcast %266 : f32 to vector<16x384xf32>
    %268 = arith.mulf %257, %267 : vector<16x384xf32>
    %269 = arith.addf %252, %268 : vector<16x384xf32>
    %c47 = arith.constant 47 : index
    %270 = memref.load %arg1[%c47] : memref<81xf32, #tpu.memory_space<smem>>
    %271 = vector.broadcast %270 : f32 to vector<16x384xf32>
    %272 = arith.mulf %257, %271 : vector<16x384xf32>
    %273 = arith.addf %256, %272 : vector<16x384xf32>
    %c0_39 = arith.constant 0 : index
    %c49_40 = arith.constant 49 : index
    %274 = vector.load %arg0[%c0_39, %c49_40] : memref<16x512xf32, #tpu.memory_space<vmem>>, vector<16x384xf32>
    %c52 = arith.constant 52 : index
    %275 = memref.load %arg1[%c52] : memref<81xf32, #tpu.memory_space<smem>>
    %276 = vector.broadcast %275 : f32 to vector<16x384xf32>
    %277 = arith.mulf %274, %276 : vector<16x384xf32>
    %278 = arith.addf %261, %277 : vector<16x384xf32>
    %c53 = arith.constant 53 : index
    %279 = memref.load %arg1[%c53] : memref<81xf32, #tpu.memory_space<smem>>
    %280 = vector.broadcast %279 : f32 to vector<16x384xf32>
    %281 = arith.mulf %274, %280 : vector<16x384xf32>
    %282 = arith.addf %265, %281 : vector<16x384xf32>
    %c54 = arith.constant 54 : index
    %283 = memref.load %arg1[%c54] : memref<81xf32, #tpu.memory_space<smem>>
    %284 = vector.broadcast %283 : f32 to vector<16x384xf32>
    %285 = arith.mulf %274, %284 : vector<16x384xf32>
    %286 = arith.addf %269, %285 : vector<16x384xf32>
    %c55 = arith.constant 55 : index
    %287 = memref.load %arg1[%c55] : memref<81xf32, #tpu.memory_space<smem>>
    %288 = vector.broadcast %287 : f32 to vector<16x384xf32>
    %289 = arith.mulf %274, %288 : vector<16x384xf32>
    %290 = arith.addf %273, %289 : vector<16x384xf32>
    %c0_41 = arith.constant 0 : index
    %c50_42 = arith.constant 50 : index
    %291 = vector.load %arg0[%c0_41, %c50_42] : memref<16x512xf32, #tpu.memory_space<vmem>>, vector<16x384xf32>
    %c60 = arith.constant 60 : index
    %292 = memref.load %arg1[%c60] : memref<81xf32, #tpu.memory_space<smem>>
    %293 = vector.broadcast %292 : f32 to vector<16x384xf32>
    %294 = arith.mulf %291, %293 : vector<16x384xf32>
    %295 = arith.addf %278, %294 : vector<16x384xf32>
    %c61 = arith.constant 61 : index
    %296 = memref.load %arg1[%c61] : memref<81xf32, #tpu.memory_space<smem>>
    %297 = vector.broadcast %296 : f32 to vector<16x384xf32>
    %298 = arith.mulf %291, %297 : vector<16x384xf32>
    %299 = arith.addf %282, %298 : vector<16x384xf32>
    %c62 = arith.constant 62 : index
    %300 = memref.load %arg1[%c62] : memref<81xf32, #tpu.memory_space<smem>>
    %301 = vector.broadcast %300 : f32 to vector<16x384xf32>
    %302 = arith.mulf %291, %301 : vector<16x384xf32>
    %303 = arith.addf %286, %302 : vector<16x384xf32>
    %c63 = arith.constant 63 : index
    %304 = memref.load %arg1[%c63] : memref<81xf32, #tpu.memory_space<smem>>
    %305 = vector.broadcast %304 : f32 to vector<16x384xf32>
    %306 = arith.mulf %291, %305 : vector<16x384xf32>
    %307 = arith.addf %290, %306 : vector<16x384xf32>
    %c0_43 = arith.constant 0 : index
    %c51_44 = arith.constant 51 : index
    %308 = vector.load %arg0[%c0_43, %c51_44] : memref<16x512xf32, #tpu.memory_space<vmem>>, vector<16x384xf32>
    %c68 = arith.constant 68 : index
    %309 = memref.load %arg1[%c68] : memref<81xf32, #tpu.memory_space<smem>>
    %310 = vector.broadcast %309 : f32 to vector<16x384xf32>
    %311 = arith.mulf %308, %310 : vector<16x384xf32>
    %312 = arith.addf %295, %311 : vector<16x384xf32>
    %c69 = arith.constant 69 : index
    %313 = memref.load %arg1[%c69] : memref<81xf32, #tpu.memory_space<smem>>
    %314 = vector.broadcast %313 : f32 to vector<16x384xf32>
    %315 = arith.mulf %308, %314 : vector<16x384xf32>
    %316 = arith.addf %299, %315 : vector<16x384xf32>
    %c70 = arith.constant 70 : index
    %317 = memref.load %arg1[%c70] : memref<81xf32, #tpu.memory_space<smem>>
    %318 = vector.broadcast %317 : f32 to vector<16x384xf32>
    %319 = arith.mulf %308, %318 : vector<16x384xf32>
    %320 = arith.addf %303, %319 : vector<16x384xf32>
    %c71 = arith.constant 71 : index
    %321 = memref.load %arg1[%c71] : memref<81xf32, #tpu.memory_space<smem>>
    %322 = vector.broadcast %321 : f32 to vector<16x384xf32>
    %323 = arith.mulf %308, %322 : vector<16x384xf32>
    %324 = arith.addf %307, %323 : vector<16x384xf32>
    %c76 = arith.constant 76 : index
    %325 = memref.load %arg1[%c76] : memref<81xf32, #tpu.memory_space<smem>>
    %326 = vector.broadcast %325 : f32 to vector<16x384xf32>
    %327 = arith.addf %312, %326 : vector<16x384xf32>
    %cst_45 = arith.constant 0.000000e+00 : f32
    %328 = vector.broadcast %cst_45 : f32 to vector<16x384xf32>
    %329 = arith.maximumf %327, %328 : vector<16x384xf32>
    %c77 = arith.constant 77 : index
    %330 = memref.load %arg1[%c77] : memref<81xf32, #tpu.memory_space<smem>>
    %331 = vector.broadcast %330 : f32 to vector<16x384xf32>
    %332 = arith.addf %316, %331 : vector<16x384xf32>
    %cst_46 = arith.constant 0.000000e+00 : f32
    %333 = vector.broadcast %cst_46 : f32 to vector<16x384xf32>
    %334 = arith.maximumf %332, %333 : vector<16x384xf32>
    %c78 = arith.constant 78 : index
    %335 = memref.load %arg1[%c78] : memref<81xf32, #tpu.memory_space<smem>>
    %336 = vector.broadcast %335 : f32 to vector<16x384xf32>
    %337 = arith.addf %320, %336 : vector<16x384xf32>
    %cst_47 = arith.constant 0.000000e+00 : f32
    %338 = vector.broadcast %cst_47 : f32 to vector<16x384xf32>
    %339 = arith.maximumf %337, %338 : vector<16x384xf32>
    %c79 = arith.constant 79 : index
    %340 = memref.load %arg1[%c79] : memref<81xf32, #tpu.memory_space<smem>>
    %341 = vector.broadcast %340 : f32 to vector<16x384xf32>
    %342 = arith.addf %324, %341 : vector<16x384xf32>
    %cst_48 = arith.constant 0.000000e+00 : f32
    %343 = vector.broadcast %cst_48 : f32 to vector<16x384xf32>
    %344 = arith.maximumf %342, %343 : vector<16x384xf32>
    %345 = tpu.concatenate %329, %334, %339, %344 in 1 : vector<16x384xf32>, vector<16x384xf32>, vector<16x384xf32>, vector<16x384xf32> -> vector<16x1536xf32>
    %c1_49 = arith.constant 1 : index
    %c0_50 = arith.constant 0 : index
    %c0_51 = arith.constant 0 : index
    %346 = vector.load %arg2[%c1_49, %c0_50, %c0_51] : memref<2x10x1536xf32, #tpu.memory_space<vmem>>, vector<1x10x1536xf32>
    %347 = vector.shape_cast %346 : vector<1x10x1536xf32> to vector<10x1536xf32>
    %cst_52 = arith.constant dense<0.000000e+00> : vector<16x10xf32>
    %348 = tpu.matmul %345, %347, %cst_52 {dimension_numbers = #tpu.dot_dimension_numbers<[1], [1], [0], [0], [0, 0, 1, 0], [], []>} : vector<16x1536xf32>, vector<10x1536xf32>, vector<16x10xf32> -> vector<16x10xf32>
    %349 = arith.addf %175, %348 : vector<16x10xf32>
    %350 = arith.truncf %349 : vector<16x10xf32> to vector<16x10xbf16>
    %c0_53 = arith.constant 0 : index
    %c0_54 = arith.constant 0 : index
    %351 = vector.load %arg4[%c0_53, %c0_54] : memref<16x128xbf16, #tpu.memory_space<vmem>>, vector<10x128xbf16>
    %cst_55 = arith.constant dense<0.000000e+00> : vector<16x128xf32>
    %352 = tpu.matmul %350, %351, %cst_55 {dimension_numbers = #tpu.dot_dimension_numbers<[1], [0], [0], [1], [0, 0, 1, 1], [], []>} : vector<16x10xbf16>, vector<10x128xbf16>, vector<16x128xf32> -> vector<16x128xf32>
    %353 = vector.extract_strided_slice %352 {offsets = [0, 0], sizes = [16, 64], strides = [1, 1]} : vector<16x128xf32> to vector<16x64xf32>
    %354 = vector.extract_strided_slice %352 {offsets = [0, 64], sizes = [16, 64], strides = [1, 1]} : vector<16x128xf32> to vector<16x64xf32>
    %355 = tpu.concatenate %353, %354 in 0 : vector<16x64xf32>, vector<16x64xf32> -> vector<32x64xf32>
    %c0_56 = arith.constant 0 : index
    %c0_57 = arith.constant 0 : index
    %356 = vector.load %arg5[%c0_56, %c0_57] : memref<196x32xbf16, #tpu.memory_space<vmem>>, vector<196x32xbf16>
    %357 = arith.truncf %355 : vector<32x64xf32> to vector<32x64xbf16>
    %cst_58 = arith.constant dense<0.000000e+00> : vector<196x64xf32>
    %358 = tpu.matmul %356, %357, %cst_58 {dimension_numbers = #tpu.dot_dimension_numbers<[1], [0], [0], [1], [0, 0, 1, 1], [], []>} : vector<196x32xbf16>, vector<32x64xbf16>, vector<196x64xf32> -> vector<196x64xf32>
    %c1_59 = arith.constant 1 : index
    %c0_60 = arith.constant 0 : index
    %359 = vector.load %arg3[%c1_59, %c0_60] : memref<2x128xf32, #tpu.memory_space<vmem>>, vector<1x64xf32>
    %360 = vector.broadcast %359 : vector<1x64xf32> to vector<196x64xf32>
    %361 = arith.addf %358, %360 : vector<196x64xf32>
    %cst_61 = arith.constant 0.000000e+00 : f32
    %362 = vector.broadcast %cst_61 : f32 to vector<196x64xf32>
    %363 = arith.maximumf %361, %362 : vector<196x64xf32>
    %c10_62 = arith.constant 10 : index
    %c0_63 = arith.constant 0 : index
    %364 = vector.load %arg4[%c10_62, %c0_63] : memref<16x128xbf16, #tpu.memory_space<vmem>>, vector<1x64xbf16>
    %365 = arith.truncf %363 : vector<196x64xf32> to vector<196x64xbf16>
    %cst_64 = arith.constant dense<0.000000e+00> : vector<1x196xf32>
    %366 = tpu.matmul %364, %365, %cst_64 {dimension_numbers = #tpu.dot_dimension_numbers<[1], [1], [0], [0], [0, 0, 1, 0], [], []>} : vector<1x64xbf16>, vector<196x64xbf16>, vector<1x196xf32> -> vector<1x196xf32>
    %c80 = arith.constant 80 : index
    %367 = memref.load %arg1[%c80] : memref<81xf32, #tpu.memory_space<smem>>
    %368 = vector.broadcast %367 : f32 to vector<1x196xf32>
    %369 = arith.addf %366, %368 : vector<1x196xf32>
    %c0_65 = arith.constant 0 : index
    %c0_66 = arith.constant 0 : index
    %370 = vector.load %arg6[%c0_65, %c0_66] : memref<1x196xf32, #tpu.memory_space<vmem>>, vector<1x196xf32>
    tpu.vector_store %arg6[%c0_65, %c0_66], %369 {strides = array<i32>} : memref<1x196xf32, #tpu.memory_space<vmem>>, vector<1x196xf32>,
    %cst_67 = arith.constant dense<0xFF800000> : vector<16xf32>
    %371 = vector.multi_reduction <maximumf>, %349, %cst_67 [1] : vector<16x10xf32> to vector<16xf32>
    %372 = vector.shape_cast %371 : vector<16xf32> to vector<16x1xf32>
    %373 = vector.broadcast %372 : vector<16x1xf32> to vector<16x10xf32>
    %374 = arith.subf %349, %373 : vector<16x10xf32>
    %375 = math.exp %374 : vector<16x10xf32>
    %cst_68 = arith.constant dense<0.000000e+00> : vector<16xf32>
    %376 = vector.multi_reduction <add>, %375, %cst_68 [1] : vector<16x10xf32> to vector<16xf32>
    %377 = vector.shape_cast %376 : vector<16xf32> to vector<16x1xf32>
    %378 = vector.broadcast %377 : vector<16x1xf32> to vector<16x10xf32>
    %379 = arith.divf %375, %378 : vector<16x10xf32>
    %380 = vector.broadcast %372 : vector<16x1xf32> to vector<16x10xf32>
    %381 = arith.subf %349, %380 : vector<16x10xf32>
    %382 = math.log %377 : vector<16x1xf32>
    %383 = vector.broadcast %382 : vector<16x1xf32> to vector<16x10xf32>
    %384 = arith.subf %381, %383 : vector<16x10xf32>
    %cst_69 = arith.constant dense<0.000000e+00> : vector<16x16xf32>
    %385 = tpu.matmul %384, %379, %cst_69 {dimension_numbers = #tpu.dot_dimension_numbers<[1], [1], [0], [0], [0, 0, 1, 0], [], []>} : vector<16x10xf32>, vector<16x10xf32>, vector<16x16xf32> -> vector<16x16xf32>
    %386 = tpu.iota {dimensions = array<i32: 0>} : vector<16x16xi32>
    %387 = tpu.iota {dimensions = array<i32: 1>} : vector<16x16xi32>
    %388 = arith.cmpi eq, %386, %387 : vector<16x16xi32>
    %389 = arith.extui %388 : vector<16x16xi1> to vector<16x16xi32>
    %390 = arith.sitofp %389 : vector<16x16xi32> to vector<16x16xf32>
    %391 = arith.mulf %385, %390 : vector<16x16xf32>
    %cst_70 = arith.constant dense<0.000000e+00> : vector<16xf32>
    %392 = vector.multi_reduction <add>, %391, %cst_70 [0] : vector<16x16xf32> to vector<16xf32>
    %393 = vector.shape_cast %392 : vector<16xf32> to vector<1x16xf32>
    %394 = vector.broadcast %393 : vector<1x16xf32> to vector<16x16xf32>
    %395 = arith.subf %394, %385 : vector<16x16xf32>
    %cst_71 = arith.constant 1.000000e-01 : f32
    %396 = vector.broadcast %cst_71 : f32 to vector<16x16xf32>
    %397 = arith.mulf %395, %396 : vector<16x16xf32>
    %c0_72 = arith.constant 0 : index
    %c0_73 = arith.constant 0 : index
    %398 = vector.load %arg7[%c0_72, %c0_73] : memref<16x16xf32, #tpu.memory_space<vmem>>, vector<16x16xf32>
    tpu.vector_store %arg7[%c0_72, %c0_73], %397 {strides = array<i32>} : memref<16x16xf32, #tpu.memory_space<vmem>>, vector<16x16xf32>,
    return
  }
}

</mosaic_0001>

<bundles_post_ra>
// kernel: mutual_info_forward.1
= control target key start
LH: loop header
LB: loop body
LE: loop exit
PB: predicated region body
PF: predicated region fallthrough
CT: control target
= control target key end

     0   :  { %13 = vsyncpa [#allocation4], 0  ;;  %s11514_s0 = inlined_call_operand.vmem [shape: f32[16,512], index: 0, kind: input, shape index: {}]   ;;  %s11515_s1 = inlined_call_operand.vmem [shape: f32[81], index: 1, kind: input, shape index: {}]   ;;  %s11516_s2 = inlined_call_operand.vmem [shape: f32[2,10,1536], index: 2, kind: input, shape index: {}]   ;;  %s11517_s3 = inlined_call_operand.vmem [shape: f32[2,128], index: 3, kind: input, shape index: {}]   ;;  %s11518_s4 = inlined_call_operand.vmem [shape: bf16[16,128], index: 4, kind: input, shape index: {}]   ;;  %s11519_s5 = inlined_call_operand.vmem [shape: bf16[196,32], index: 5, kind: input, shape index: {}]   ;;  %s11520_s6 = inlined_call_operand.hbm [shape: f32[1,196], index: 6, kind: output, shape index: {0}]   ;;  %s11521_s7 = inlined_call_operand.vmem [shape: f32[16,16], index: 7, kind: output, shape index: {1}]  }
   0x1   :  { %14 = vsyncpa [#allocation3], 0  ;;  %s23_s26 = sshll.u32 %s11515_s1, 4  ;;  %s24_s26 = int_to_ptr.vmem [resolvable:$true] %s23_s26 }
   0x2   :  { %s6338_s27 = scalar_lea.vmem %s24_s26, 16  ;;  %p6343_p1 = scmp.lt.s32.totalorder %s24_s26, %s24_s26 }
   0x3   :  { %p6339_p0 = scmp.ne.s32.totalorder %s24_s26, %s6338_s27  ;;  %p6344_p2 = scmp.lt.s32.totalorder %s6338_s27, %s6338_s27 }
   0x5   :  { %p6345_p3 = por %p6344_p2, %p6343_p1 }
   0x7   :  { %p6346_p4 = pnand %p6345_p3, %p6339_p0 }
   0x9   :  { %6349 = shalt.err (!%p6346_p4)
}
   0xa   :  { %s6376_s28 = smov [#allocation2]  }
   0xb   :  { %26 = dma.vmem_to_smem %s24_s26, 16, %s6376_s28, [#allocation4]  }
   0xc   :  { %6372 = dma.done.wait [#allocation4], 16  }
   0xd   :  { %6373 = vsyncadd [#allocation4], 4294967280 }
   0xe   :  { %38 = sfence }
   0xf   :  { %s5765_s29 = sld [smem:[#allocation2 + $0x8]]  ;;  %v6438_v0 = vld [vmem:[%s11514_s0 + $0x18] sm:$0xff]  ;;  %v6443_v1 = vld [vmem:[%s11514_s0 + $0x8] sm:$0xff]  ;;  %v6448_v3 = vld [vmem:[%s11514_s0 + $0x10] sm:$0xff]  ;;  %s6377_s15 = smov 127   ;;  %vm123_vm0 = vcmask 1039360  }
  0x10   :  { %s5769_s30 = sld [smem:[#allocation2 + $0x10]]  ;;  %v6453_v4 = vld [vmem:[%s11514_s0] sm:$0xff]  ;;  %v6468_v12 = vld [vmem:[%s11514_s0 + $0x28] sm:$0xff]  ;;  %s6378_s19 = smov 126   ;;  %v6477_v15 = vld [vmem:[%s11514_s0 + $0x30] sm:$0xff]  ;;  %vm348_vm1 = vcmask 1031168  }
  0x11   :  { %s5773_s16 = sld [smem:[#allocation2 + $0x18]]  ;;  %v6486_v18 = vld [vmem:[%s11514_s0 + $0x38] sm:$0xff]  ;;  %s6379_s24 = smov 110   ;;  %v6499_v24 = vld [vmem:[%s11514_s0 + $0x20] sm:$0xff]  ;;  %vm573_vm2 = vcmask 900096   ;;  %vm798_vm3 = vcmask 891904  }
  0x12   :  { %s5777_s27 = sld [smem:[#allocation2 + $0x20]]  ;;  %s5766_s28 = sld [smem:[#allocation2 + $0x9]]  ;;  %vm1023_vm4 = vcmask 883712   ;;  %vm1248_vm5 = vcmask 752640   ;;  %vm1473_vm6 = vcmask 744448   ;;  %vm1698_vm7 = vcmask 736256  }
  0x13   :  { %s5770_s8 = sld [smem:[#allocation2 + $0x11]]  ;;  %s6381_s9 = smov 108   ;;  %vm1985_vm8 = vcmask 941056   ;;  %vm5123_vm9 = vcmask 1044480   ;;  %vm6387_vm10 = vmmov 0   ;;  %vm5119_vm11 = vcmask 80896  }
  0x14   :  { %s5785_s1 = sld [smem:[#allocation2 + $0x30]]  ;;  %s6382_s10 = smov 92   ;;  %vm5271_vm12 = vcmask 261120   ;;  %vm5492_vm13 = vcmask 523264   ;;  %vm6043_vm14 = vmpackc.low %vm5119_vm11, %vm5119_vm11 }
  0x15   :  { %v90_v2 = vstv %s5765_s29  ;;  %s6380_s29 = smov 109   ;;  %s5774_s11 = sld [smem:[#allocation2 + $0x19]] }
  0x16   :  { %v94_v5 = vmul.f32 %v90_v2, %v6438_v0  ;;  %v92_v6 = vmul.f32 %v90_v2, %v6443_v1  ;;  %v93_v7 = vmul.f32 %v90_v2, %v6448_v3  ;;  %v91_v8 = vmul.f32 %v90_v2, %v6453_v4  ;;  %s5789_s12 = sld [smem:[#allocation2 + $0x38]]  ;;  %s6383_s13 = smov 91  }
  0x17   :  { %v315_v9 = vstv %s5769_s30  ;;  %v96_v16 = vmul.f32 %v90_v2, %v6468_v12  ;;  %v97_v17 = vmul.f32 %v90_v2, %v6477_v15  ;;  %v540_v19 = vstv %s5773_s16  ;;  %s5781_s30 = sld [smem:[#allocation2 + $0x28]]  ;;  %s5778_s14 = sld [smem:[#allocation2 + $0x21]] }
  0x18   :  { %113 = vrot.lane.b32.xlu1 %v94_v5, %s6377_s15  ;;  %109 = vrot.lane.b32.xlu0 %v92_v6, %s6377_s15  ;;  %v317_v10 = vmul.f32 %v315_v9, %v6443_v1  ;;  %v318_v11 = vmul.f32 %v315_v9, %v6448_v3  ;;  %v319_v13 = vmul.f32 %v315_v9, %v6438_v0  ;;  %v6509_v29 = vstv %s5777_s27  ;;  %s5793_s16 = sld [smem:[#allocation2 + $0x40]]  ;;  %s6384_s17 = smov 90  }
  0x19   :  { %v316_v14 = vmul.f32 %v315_v9, %v6453_v4  ;;  %v98_v20 = vmul.f32 %v90_v2, %v6486_v18  ;;  %v542_v21 = vmul.f32 %v540_v19, %v6443_v1  ;;  %v543_v22 = vmul.f32 %v540_v19, %v6448_v3  ;;  %s5782_s18 = sld [smem:[#allocation2 + $0x29]]  ;;  %s5767_s23 = sld [smem:[#allocation2 + $0xa]] }
  0x1a   :  { %v544_v23 = vmul.f32 %v540_v19, %v6438_v0  ;;  %v95_v25 = vmul.f32 %v90_v2, %v6499_v24  ;;  %v541_v26 = vmul.f32 %v540_v19, %v6453_v4  ;;  %v321_v27 = vmul.f32 %v315_v9, %v6468_v12  ;;  %s5786_s20 = sld [smem:[#allocation2 + $0x31]]  ;;  %s5771_s25 = sld [smem:[#allocation2 + $0x12]] }
  0x1b   :  { %v322_v28 = vmul.f32 %v315_v9, %v6477_v15  ;;  %v323_v30 = vmul.f32 %v315_v9, %v6486_v18  ;;  %v767_v31 = vmul.f32 %v6509_v29, %v6443_v1  ;;  %v768_v32 = vmul.f32 %v6509_v29, %v6448_v3  ;;  %s5790_s21 = sld [smem:[#allocation2 + $0x39]]  ;;  %s49_s26 = sld [smem:[#allocation2]] }
  0x1c   :  { %111 = vrot.lane.b32.xlu0 %v93_v7, %s6377_s15  ;;  %107 = vrot.lane.b32.xlu1 %v91_v8, %s6377_s15  ;;  %v769_v33 = vmul.f32 %v6509_v29, %v6438_v0  ;;  %v320_v34 = vmul.f32 %v315_v9, %v6499_v24  ;;  %v766_v35 = vmul.f32 %v6509_v29, %v6453_v4  ;;  %v6527_v36 = vstv %s5766_s28  ;;  %s5794_s22 = sld [smem:[#allocation2 + $0x41]]  ;;  %s5797_s27 = sld [smem:[#allocation2 + $0x48]] }
  0x1d   :  { %v148_v37 = vmul.f32 %v6527_v36, %v6453_v4  ;;  %v149_v38 = vmul.f32 %v6527_v36, %v6443_v1  ;;  %v150_v39 = vmul.f32 %v6527_v36, %v6448_v3  ;;  %v546_v40 = vmul.f32 %v540_v19, %v6468_v12  ;;  %s5775_s28 = sld [smem:[#allocation2 + $0x1a]] }
  0x1e   :  { %v547_v41 = vmul.f32 %v540_v19, %v6477_v15  ;;  %v548_v42 = vmul.f32 %v540_v19, %v6486_v18  ;;  %v6544_v43 = vstv %s5781_s30  ;;  %v545_v47 = vmul.f32 %v540_v19, %v6499_v24  ;;  %s5779_s30 = sld [smem:[#allocation2 + $0x22]] }
  0x1f   :  { %v992_v44 = vmul.f32 %v6544_v43, %v6443_v1  ;;  %v993_v45 = vmul.f32 %v6544_v43, %v6448_v3  ;;  %v994_v46 = vmul.f32 %v6544_v43, %v6438_v0  ;;  %v6557_v48 = vstv %s5770_s8  ;;  %s5768_s8 = sld [smem:[#allocation2 + $0xb]] }
  0x20   :  { %334 = vrot.lane.b32.xlu0 %v317_v10, %s6378_s19  ;;  %336 = vrot.lane.b32.xlu1 %v318_v11, %s6378_s19  ;;  %v991_v49 = vmul.f32 %v6544_v43, %v6453_v4  ;;  %v373_v50 = vmul.f32 %v6557_v48, %v6453_v4  ;;  %v374_v51 = vmul.f32 %v6557_v48, %v6443_v1  ;;  %v6577_v55 = vstv %s5785_s1  ;;  %s5783_s1 = sld [smem:[#allocation2 + $0x2a]] }
  0x21   :  { %v375_v52 = vmul.f32 %v6557_v48, %v6448_v3  ;;  %v771_v53 = vmul.f32 %v6509_v29, %v6468_v12  ;;  %v772_v54 = vmul.f32 %v6509_v29, %v6477_v15  ;;  %v773_v56 = vmul.f32 %v6509_v29, %v6486_v18 }
  0x22   :  { %v1217_v57 = vmul.f32 %v6577_v55, %v6443_v1  ;;  %v1218_v58 = vmul.f32 %v6577_v55, %v6448_v3  ;;  %v1219_v59 = vmul.f32 %v6577_v55, %v6438_v0  ;;  %v770_v60 = vmul.f32 %v6509_v29, %v6499_v24 }
  0x23   :  { %v1216_v61 = vmul.f32 %v6577_v55, %v6453_v4  ;;  %v152_v62 = vmul.f32 %v6527_v36, %v6499_v24  ;;  %v153_v63 = vmul.f32 %v6527_v36, %v6468_v12  ;;  %v6603_v2 = vstv %s5774_s11  ;;  %s5811_s11 = sld [smem:[#allocation2 + $0x15]] }
  0x24   :  { %338 = vrot.lane.b32.xlu0 %v319_v13, %s6378_s19  ;;  %332 = vrot.lane.b32.xlu1 %v316_v14, %s6378_s19  ;;  %v154_v5 = vmul.f32 %v6527_v36, %v6477_v15  ;;  %v598_v6 = vmul.f32 %v6603_v2, %v6453_v4  ;;  %v599_v7 = vmul.f32 %v6603_v2, %v6443_v1  ;;  %v6623_v11 = vstv %s5789_s12  ;;  %s5826_s12 = sld [smem:[#allocation2 + $0x34]] }
  0x25   :  { %v600_v8 = vmul.f32 %v6603_v2, %v6448_v3  ;;  %v996_v9 = vmul.f32 %v6544_v43, %v6468_v12  ;;  %v997_v10 = vmul.f32 %v6544_v43, %v6477_v15  ;;  %v998_v13 = vmul.f32 %v6544_v43, %v6486_v18 }
  0x26   :  { %v1442_v14 = vmul.f32 %v6623_v11, %v6443_v1  ;;  %v995_v19 = vmul.f32 %v6544_v43, %v6499_v24  ;;  %v379_v29 = vmul.f32 %v6557_v48, %v6477_v15  ;;  %v1223_v43 = vmul.f32 %v6577_v55, %v6486_v18 }
  0x28   :  { %117 = vrot.lane.b32.xlu0 %v96_v16, %s6377_s15  ;;  %119 = vrot.lane.b32.xlu1 %v97_v17, %s6377_s15  ;;  %v1443_v16 = vmul.f32 %v6623_v11, %v6448_v3  ;;  %v1444_v17 = vmul.f32 %v6623_v11, %v6438_v0 }
  0x2c   :  { %121 = vrot.lane.b32.xlu0 %v98_v20, %s6377_s15  ;;  %559 = vrot.lane.b32.xlu1 %v542_v21, %s6379_s24  ;;  %v1441_v20 = vmul.f32 %v6623_v11, %v6453_v4 }
  0x30   :  { %561 = vrot.lane.b32.xlu0 %v543_v22, %s6379_s24  ;;  %563 = vrot.lane.b32.xlu1 %v544_v23, %s6379_s24  ;;  %v377_v23 = vmul.f32 %v6557_v48, %v6499_v24 }
  0x34   :  { %115 = vrot.lane.b32.xlu0 %v95_v25, %s6377_s15  ;;  %557 = vrot.lane.b32.xlu1 %v541_v26, %s6379_s24  ;;  %v378_v25 = vmul.f32 %v6557_v48, %v6468_v12  ;;  %v6653_v26 = vstv %s5778_s14  ;;  %s5780_s14 = sld [smem:[#allocation2 + $0x23]] }
  0x38   :  { %342 = vrot.lane.b32.xlu0 %v321_v27, %s6378_s19  ;;  %344 = vrot.lane.b32.xlu1 %v322_v28, %s6378_s19 }
  0x3c   :  { %346 = vrot.lane.b32.xlu0 %v323_v30, %s6378_s19  ;;  %784 = vrot.lane.b32.xlu1 %v767_v31, %s6380_s29  ;;  %v823_v30 = vmul.f32 %v6653_v26, %v6453_v4 }
  0x40   :  { %786 = vrot.lane.b32.xlu0 %v768_v32, %s6380_s29  ;;  %788 = vrot.lane.b32.xlu1 %v769_v33, %s6380_s29  ;;  %v824_v33 = vmul.f32 %v6653_v26, %v6443_v1 }
  0x44   :  { %340 = vrot.lane.b32.xlu0 %v320_v34, %s6378_s19  ;;  %782 = vrot.lane.b32.xlu1 %v766_v35, %s6380_s29  ;;  %v825_v34 = vmul.f32 %v6653_v26, %v6448_v3 }
  0x48   :  { %164 = vrot.lane.b32.xlu0 %v148_v37, %s6377_s15  ;;  %166 = vrot.lane.b32.xlu1 %v149_v38, %s6377_s15  ;;  %v1221_v38 = vmul.f32 %v6577_v55, %v6468_v12 }
  0x4c   :  { %168 = vrot.lane.b32.xlu0 %v150_v39, %s6377_s15  ;;  %567 = vrot.lane.b32.xlu1 %v546_v40, %s6379_s24  ;;  %v1222_v39 = vmul.f32 %v6577_v55, %v6477_v15  ;;  %v6685_v40 = vstv %s5793_s16  ;;  %s5830_s16 = sld [smem:[#allocation2 + $0x3c]] }
  0x50   :  { %569 = vrot.lane.b32.xlu0 %v547_v41, %s6379_s24  ;;  %571 = vrot.lane.b32.xlu1 %v548_v42, %s6379_s24 }
  0x54   :  { %1009 = vrot.lane.b32.xlu0 %v992_v44, %s6381_s9  ;;  %1011 = vrot.lane.b32.xlu1 %v993_v45, %s6381_s9  ;;  %v1667_v44 = vmul.f32 %v6685_v40, %v6443_v1 }
  0x58   :  { %1013 = vrot.lane.b32.xlu0 %v994_v46, %s6381_s9  ;;  %565 = vrot.lane.b32.xlu1 %v545_v47, %s6379_s24  ;;  %v1668_v47 = vmul.f32 %v6685_v40, %v6448_v3 }
  0x5c   :  { %1007 = vrot.lane.b32.xlu0 %v991_v49, %s6381_s9  ;;  %389 = vrot.lane.b32.xlu1 %v373_v50, %s6378_s19  ;;  %v1669_v49 = vmul.f32 %v6685_v40, %v6438_v0 }
  0x60   :  { %391 = vrot.lane.b32.xlu0 %v374_v51, %s6378_s19  ;;  %393 = vrot.lane.b32.xlu1 %v375_v52, %s6378_s19  ;;  %v1220_v52 = vmul.f32 %v6577_v55, %v6499_v24 }
  0x64   :  { %792 = vrot.lane.b32.xlu0 %v771_v53, %s6380_s29  ;;  %794 = vrot.lane.b32.xlu1 %v772_v54, %s6380_s29  ;;  %v1666_v53 = vmul.f32 %v6685_v40, %v6453_v4 }
  0x68   :  { %796 = vrot.lane.b32.xlu0 %v773_v56, %s6380_s29  ;;  %1234 = vrot.lane.b32.xlu1 %v1217_v57, %s6382_s10  ;;  %v151_v57 = vmul.f32 %v6527_v36, %v6438_v0 }
  0x6c   :  { %1236 = vrot.lane.b32.xlu0 %v1218_v58, %s6382_s10  ;;  %1238 = vrot.lane.b32.xlu1 %v1219_v59, %s6382_s10  ;;  %v602_v58 = vmul.f32 %v6603_v2, %v6499_v24 }
  0x70   :  { %790 = vrot.lane.b32.xlu0 %v770_v60, %s6380_s29  ;;  %1232 = vrot.lane.b32.xlu1 %v1216_v61, %s6382_s10  ;;  %v603_v60 = vmul.f32 %v6603_v2, %v6468_v12  ;;  %v604_v61 = vmul.f32 %v6603_v2, %v6477_v15 }
  0x74   :  { %172 = vrot.lane.b32.xlu0 %v152_v62, %s6377_s15  ;;  %174 = vrot.lane.b32.xlu1 %v153_v63, %s6377_s15  ;;  %v6737_v62 = vstv %s5782_s18  ;;  %s5772_s18 = sld [smem:[#allocation2 + $0x13]] }
  0x78   :  { %176 = vrot.lane.b32.xlu0 %v154_v5, %s6377_s15  ;;  %614 = vrot.lane.b32.xlu1 %v598_v6, %s6379_s24  ;;  %v1048_v6 = vmul.f32 %v6737_v62, %v6453_v4 }
  0x7c   :  { %616 = vrot.lane.b32.xlu0 %v599_v7, %s6379_s24  ;;  %618 = vrot.lane.b32.xlu1 %v600_v8, %s6379_s24  ;;  %v1049_v7 = vmul.f32 %v6737_v62, %v6443_v1 }
  0x80   :  { %1017 = vrot.lane.b32.xlu0 %v996_v9, %s6381_s9  ;;  %1019 = vrot.lane.b32.xlu1 %v997_v10, %s6381_s9  ;;  %v1050_v10 = vmul.f32 %v6737_v62, %v6448_v3 }
  0x84   :  { %1021 = vrot.lane.b32.xlu0 %v998_v13, %s6381_s9  ;;  %1459 = vrot.lane.b32.xlu1 %v1442_v14, %s6383_s13  ;;  %v1446_v13 = vmul.f32 %v6623_v11, %v6468_v12 }
  0x88   :  { %1461 = vrot.lane.b32.xlu0 %v1443_v16, %s6383_s13  ;;  %1463 = vrot.lane.b32.xlu1 %v1444_v17, %s6383_s13  ;;  %v1447_v17 = vmul.f32 %v6623_v11, %v6477_v15 }
  0x8a   :  { %v6643_v21 = vpop.permute.xlu1 %113  ;;  %v6645_v22 = vpop.permute.xlu0 %109 }
  0x8c   :  { %1015 = vrot.lane.b32.xlu0 %v995_v19, %s6381_s9  ;;  %1457 = vrot.lane.b32.xlu1 %v1441_v20, %s6383_s13  ;;  %v1448_v19 = vmul.f32 %v6623_v11, %v6486_v18 }
  0x8e   :  { %v6655_v27 = vpop.permute.xlu0 %111  ;;  %v6657_v28 = vpop.permute.xlu1 %107 }
  0x90   :  { %397 = vrot.lane.b32.xlu0 %v377_v23, %s6378_s19  ;;  %399 = vrot.lane.b32.xlu1 %v378_v25, %s6378_s19  ;;  %v1445_v25 = vmul.f32 %v6623_v11, %v6499_v24 }
  0x92   :  { %v6665_v31 = vpop.permute.xlu0 %334  ;;  %v6667_v32 = vpop.permute.xlu1 %336 }
  0x94   :  { %401 = vrot.lane.b32.xlu0 %v379_v29, %s6378_s19  ;;  %839 = vrot.lane.b32.xlu1 %v823_v30, %s6380_s29  ;;  %v376_v29 = vmul.f32 %v6557_v48, %v6438_v0 }
  0x96   :  { %v6675_v35 = vpop.permute.xlu0 %338  ;;  %v6677_v37 = vpop.permute.xlu1 %332 }
  0x98   :  { %841 = vrot.lane.b32.xlu0 %v824_v33, %s6380_s29  ;;  %843 = vrot.lane.b32.xlu1 %v825_v34, %s6380_s29  ;;  %v827_v34 = vmul.f32 %v6653_v26, %v6499_v24 }
  0x9a   :  { %v6687_v41 = vpop.permute.xlu0 %117  ;;  %v6689_v42 = vpop.permute.xlu1 %119 }
  0x9c   :  { %1242 = vrot.lane.b32.xlu0 %v1221_v38, %s6382_s10  ;;  %1244 = vrot.lane.b32.xlu1 %v1222_v39, %s6382_s10  ;;  %v828_v38 = vmul.f32 %v6653_v26, %v6468_v12  ;;  %v6789_v39 = vstv %s5786_s20  ;;  %s5795_s20 = sld [smem:[#allocation2 + $0x42]] }
  0x9e   :  { %v6697_v45 = vpop.permute.xlu0 %121  ;;  %v6699_v46 = vpop.permute.xlu1 %559 }
  0xa0   :  { %1246 = vrot.lane.b32.xlu0 %v1223_v43, %s6382_s10  ;;  %1684 = vrot.lane.b32.xlu1 %v1667_v44, %s6384_s17  ;;  %v829_v44 = vmul.f32 %v6653_v26, %v6477_v15 }
  0xa2   :  { %v6707_v50 = vpop.permute.xlu0 %561  ;;  %v6709_v51 = vpop.permute.xlu1 %563 }
  0xa4   :  { %1686 = vrot.lane.b32.xlu0 %v1668_v47, %s6384_s17  ;;  %1688 = vrot.lane.b32.xlu1 %v1669_v49, %s6384_s17  ;;  %v1273_v47 = vmul.f32 %v6789_v39, %v6453_v4 }
  0xa6   :  { %v6717_v54 = vpop.permute.xlu0 %115  ;;  %v6719_v56 = vpop.permute.xlu1 %557 }
  0xa7   :  { %11835 = vst [vmem:[#allocation8_spill] sm:$0xff] %v6717_v54  ;;  %v6959_v54 = vstv %s49_s26  ;;  %s5776_s26 = sld [smem:[#allocation2 + $0x1b]] }
  0xa8   :  { %1240 = vrot.lane.b32.xlu0 %v1220_v52, %s6382_s10  ;;  %1682 = vrot.lane.b32.xlu1 %v1666_v53, %s6384_s17  ;;  %v1274_v53 = vmul.f32 %v6789_v39, %v6443_v1 }
  0xaa   :  { %v6727_v59 = vpop.permute.xlu0 %342  ;;  %v6729_v55 = vpop.permute.xlu1 %344 }
  0xac   :  { %170 = vrot.lane.b32.xlu0 %v151_v57, %s6377_s15  ;;  %622 = vrot.lane.b32.xlu1 %v602_v58, %s6379_s24  ;;  %v1275_v57 = vmul.f32 %v6789_v39, %v6448_v3 }
  0xae   :  { %v6739_v63 = vpop.permute.xlu0 %346  ;;  %v6741_v5 = vpop.permute.xlu1 %784 }
  0xb0   :  { %624 = vrot.lane.b32.xlu0 %v603_v60, %s6379_s24  ;;  %626 = vrot.lane.b32.xlu1 %v604_v61, %s6379_s24  ;;  %v1671_v61 = vmul.f32 %v6685_v40, %v6468_v12 }
  0xb2   :  { %v6749_v8 = vpop.permute.xlu0 %786  ;;  %v6751_v9 = vpop.permute.xlu1 %788 }
  0xb4   :  { %1064 = vrot.lane.b32.xlu0 %v1048_v6, %s6381_s9  ;;  %1066 = vrot.lane.b32.xlu1 %v1049_v7, %s6381_s9  ;;  %v1672_v6 = vmul.f32 %v6685_v40, %v6477_v15 }
  0xb6   :  { %v6759_v14 = vpop.permute.xlu0 %340  ;;  %v6761_v16 = vpop.permute.xlu1 %782 }
  0xb7   :  { %11836 = vst [vmem:[#allocation9_spill] sm:$0xff] %v6759_v14 }
  0xb8   :  { %1068 = vrot.lane.b32.xlu0 %v1050_v10, %s6381_s9  ;;  %1467 = vrot.lane.b32.xlu1 %v1446_v13, %s6383_s13  ;;  %v1673_v13 = vmul.f32 %v6685_v40, %v6486_v18 }
  0xba   :  { %v6769_v20 = vpop.permute.xlu0 %164  ;;  %v6771_v23 = vpop.permute.xlu1 %166 }
  0xbb   :  { %11837 = vst [vmem:[#allocation10_spill] sm:$0xff] %v6769_v20  ;;  %11838 = vst [vmem:[#allocation11_spill] sm:$0xff] %v6771_v23 }
  0xbc   :  { %1469 = vrot.lane.b32.xlu0 %v1447_v17, %s6383_s13  ;;  %1471 = vrot.lane.b32.xlu1 %v1448_v19, %s6383_s13  ;;  %v1670_v17 = vmul.f32 %v6685_v40, %v6499_v24  ;;  %v1052_v40 = vmul.f32 %v6737_v62, %v6499_v24 }
  0xbe   :  { %v6779_v30 = vpop.permute.xlu0 %168  ;;  %v6781_v33 = vpop.permute.xlu1 %567 }
  0xbf   :  { %11839 = vst [vmem:[#allocation12_spill] sm:$0xff] %v6779_v30 }
  0xc0   :  { %1465 = vrot.lane.b32.xlu0 %v1445_v25, %s6383_s13  ;;  %395 = vrot.lane.b32.xlu1 %v376_v29, %s6378_s19  ;;  %v155_v29 = vmul.f32 %v6527_v36, %v6486_v18 }
  0xc2   :  { %v6791_v11 = vpop.permute.xlu0 %569  ;;  %v6793_v43 = vpop.permute.xlu1 %571 }
  0xc3   :  { %11840 = vst [vmem:[#allocation13_spill] sm:$0xff] %v6793_v43 }
  0xc4   :  { %847 = vrot.lane.b32.xlu0 %v827_v34, %s6380_s29  ;;  %849 = vrot.lane.b32.xlu1 %v828_v38, %s6380_s29  ;;  %v601_v34 = vmul.f32 %v6603_v2, %v6438_v0 }
  0xc6   :  { %v6801_v49 = vpop.permute.xlu0 %1009  ;;  %v6803_v52 = vpop.permute.xlu1 %1011 }
  0xc8   :  { %851 = vrot.lane.b32.xlu0 %v829_v44, %s6380_s29  ;;  %1289 = vrot.lane.b32.xlu1 %v1273_v47, %s6382_s10  ;;  %v1053_v47 = vmul.f32 %v6737_v62, %v6468_v12 }
  0xca   :  { %v6811_v58 = vpop.permute.xlu0 %1013  ;;  %v6813_v60 = vpop.permute.xlu1 %565 }
  0xcb   :  { %11841 = vst [vmem:[#allocation14_spill] sm:$0xff] %v6813_v60 }
  0xcc   :  { %1291 = vrot.lane.b32.xlu0 %v1274_v53, %s6382_s10  ;;  %1293 = vrot.lane.b32.xlu1 %v1275_v57, %s6382_s10  ;;  %v6851_v53 = vstv %s5790_s21  ;;  %s5784_s21 = sld [smem:[#allocation2 + $0x2b]] }
  0xce   :  { %v6821_v7 = vpop.permute.xlu0 %1007  ;;  %v6823_v10 = vpop.permute.xlu1 %389 }
  0xcf   :  { %11842 = vst [vmem:[#allocation15_spill] sm:$0xff] %v6821_v7  ;;  %11843 = vst [vmem:[#allocation16_spill] sm:$0xff] %v6823_v10 }
  0xd0   :  { %1692 = vrot.lane.b32.xlu0 %v1671_v61, %s6384_s17  ;;  %1694 = vrot.lane.b32.xlu1 %v1672_v6, %s6384_s17  ;;  %v1054_v61 = vmul.f32 %v6737_v62, %v6477_v15  ;;  %v1498_v6 = vmul.f32 %v6851_v53, %v6453_v4 }
  0xd2   :  { %v6831_v19 = vpop.permute.xlu0 %391  ;;  %v6833_v25 = vpop.permute.xlu1 %393 }
  0xd3   :  { %11844 = vst [vmem:[#allocation17_spill] sm:$0xff] %v6831_v19  ;;  %11845 = vst [vmem:[#allocation18_spill] sm:$0xff] %v6833_v25 }
  0xd4   :  { %1696 = vrot.lane.b32.xlu0 %v1673_v13, %s6384_s17  ;;  %1690 = vrot.lane.b32.xlu1 %v1670_v17, %s6384_s17 }
  0xd6   :  { %v6841_v38 = vpop.permute.xlu0 %792  ;;  %v6843_v44 = vpop.permute.xlu1 %794 }
  0xd8   :  { %178 = vrot.lane.b32.xlu0 %v155_v29, %s6377_s15  ;;  %620 = vrot.lane.b32.xlu1 %v601_v34, %s6379_s24  ;;  %v1499_v29 = vmul.f32 %v6851_v53, %v6443_v1  ;;  %v1500_v34 = vmul.f32 %v6851_v53, %v6448_v3 }
  0xda   :  { %v6853_v36 = vpop.permute.xlu0 %796  ;;  %v6855_v57 = vpop.permute.xlu1 %1234 }
  0xdb   :  { %11846 = vst [vmem:[#allocation19_spill] sm:$0xff] %v6853_v36 }
  0xdc   :  { %1072 = vrot.lane.b32.xlu0 %v1052_v40, %s6381_s9  ;;  %1074 = vrot.lane.b32.xlu1 %v1053_v47, %s6381_s9 }
  0xde   :  { %v6863_v13 = vpop.permute.xlu0 %1236  ;;  %v6865_v17 = vpop.permute.xlu1 %1238 }
  0xe0   :  { %1076 = vrot.lane.b32.xlu0 %v1054_v61, %s6381_s9  ;;  %1514 = vrot.lane.b32.xlu1 %v1498_v6, %s6383_s13  ;;  %v380_v61 = vmul.f32 %v6557_v48, %v6486_v18  ;;  %v826_v6 = vmul.f32 %v6653_v26, %v6438_v0 }
  0xe2   :  { %v6873_v40 = vpop.permute.xlu0 %790  ;;  %v6875_v47 = vpop.permute.xlu1 %1232 }
  0xe3   :  { %11847 = vst [vmem:[#allocation20_spill] sm:$0xff] %v6873_v40  ;;  %11848 = vst [vmem:[#allocation21_spill] sm:$0xff] %v6875_v47  ;;  %v1277_v40 = vmul.f32 %v6789_v39, %v6499_v24 }
  0xe4   :  { %1516 = vrot.lane.b32.xlu0 %v1499_v29, %s6383_s13  ;;  %1518 = vrot.lane.b32.xlu1 %v1500_v34, %s6383_s13  ;;  %v1278_v29 = vmul.f32 %v6789_v39, %v6468_v12  ;;  %v6893_v34 = vstv %s5794_s22  ;;  %s5788_s22 = sld [smem:[#allocation2 + $0x33]] }
  0xe6   :  { %v6883_v25 = vpop.permute.xlu0 %172  ;;  %v6885_v10 = vpop.permute.xlu1 %174 }
  0xe7   :  { %11849 = vst [vmem:[#allocation22_spill] sm:$0xff] %v6883_v25  ;;  %11850 = vst [vmem:[#allocation23_spill] sm:$0xff] %v6885_v10 }
  0xe8   :  { %403 = vrot.lane.b32.xlu0 %v380_v61, %s6378_s19  ;;  %845 = vrot.lane.b32.xlu1 %v826_v6, %s6380_s29  ;;  %v1279_v61 = vmul.f32 %v6789_v39, %v6477_v15  ;;  %v1723_v6 = vmul.f32 %v6893_v34, %v6453_v4 }
  0xea   :  { %v6895_v48 = vpop.permute.xlu0 %176  ;;  %v6897_v19 = vpop.permute.xlu1 %614 }
  0xeb   :  { %11851 = vst [vmem:[#allocation24_spill] sm:$0xff] %v6895_v48  ;;  %11852 = vst [vmem:[#allocation25_spill] sm:$0xff] %v6897_v19  ;;  %v1724_v19 = vmul.f32 %v6893_v34, %v6443_v1 }
  0xec   :  { %1297 = vrot.lane.b32.xlu0 %v1277_v40, %s6382_s10  ;;  %1299 = vrot.lane.b32.xlu1 %v1278_v29, %s6382_s10  ;;  %v1725_v40 = vmul.f32 %v6893_v34, %v6448_v3  ;;  %v6915_v29 = vstv %s5767_s23  ;;  %s5792_s23 = sld [smem:[#allocation2 + $0x3b]] }
  0xed   :  { %v207_v30 = vmul.f32 %v6915_v29, %v6438_v0 }
  0xee   :  { %v6905_v25 = vpop.permute.xlu0 %616  ;;  %v6907_v10 = vpop.permute.xlu1 %618 }
  0xef   :  { %11853 = vst [vmem:[#allocation26_spill] sm:$0xff] %v6905_v25  ;;  %11854 = vst [vmem:[#allocation27_spill] sm:$0xff] %v6907_v10 }
  0xf0   :  { %1301 = vrot.lane.b32.xlu0 %v1279_v61, %s6382_s10  ;;  %1739 = vrot.lane.b32.xlu1 %v1723_v6, %s6384_s17  ;;  %v205_v61 = vmul.f32 %v6915_v29, %v6443_v1  ;;  %v206_v6 = vmul.f32 %v6915_v29, %v6448_v3 }
  0xf2   :  { %v6917_v48 = vpop.permute.xlu0 %1017  ;;  %v6919_v60 = vpop.permute.xlu1 %1019 }
  0xf3   :  { %11855 = vst [vmem:[#allocation28_spill] sm:$0xff] %v6917_v48 }
  0xf4   :  { %1741 = vrot.lane.b32.xlu0 %v1724_v19, %s6384_s17  ;;  %1743 = vrot.lane.b32.xlu1 %v1725_v40, %s6384_s17  ;;  %v605_v19 = vmul.f32 %v6603_v2, %v6486_v18  ;;  %v1503_v2 = vmul.f32 %v6851_v53, %v6468_v12 }
  0xf6   :  { %v6927_v10 = vpop.permute.xlu0 %1021  ;;  %v6929_v25 = vpop.permute.xlu1 %1459 }
  0xf7   :  { %11856 = vst [vmem:[#allocation29_spill] sm:$0xff] %v6927_v10  ;;  %11857 = vst [vmem:[#allocation30_spill] sm:$0xff] %v6929_v25 }
  0xf8   :  { %222 = vrot.lane.b32.xlu0 %v205_v61, %s6377_s15  ;;  %224 = vrot.lane.b32.xlu1 %v206_v6, %s6377_s15  ;;  %v1051_v61 = vmul.f32 %v6737_v62, %v6438_v0  ;;  %v1502_v6 = vmul.f32 %v6851_v53, %v6499_v24 }
  0xfa   :  { %v6937_v40 = vpop.permute.xlu0 %1461  ;;  %v6939_v20 = vpop.permute.xlu1 %1463 }
  0xfb   :  { %11858 = vst [vmem:[#allocation31_spill] sm:$0xff] %v6937_v40  ;;  %11859 = vst [vmem:[#allocation32_spill] sm:$0xff] %v6939_v20 }
  0xfc   :  { %226 = vrot.lane.b32.xlu0 %v207_v30, %s6377_s15  ;;  %628 = vrot.lane.b32.xlu1 %v605_v19, %s6379_s24  ;;  %v1504_v30 = vmul.f32 %v6851_v53, %v6477_v15  ;;  %v6957_v19 = vstv %s5771_s25  ;;  %s5787_s25 = sld [smem:[#allocation2 + $0x32]] }
  0xfe   :  { %v6947_v23 = vpop.permute.xlu0 %1015  ;;  %v6949_v14 = vpop.permute.xlu1 %1457 }
  0xff   :  { %11860 = vst [vmem:[#allocation33_spill] sm:$0xff] %v6947_v23  ;;  %11861 = vst [vmem:[#allocation34_spill] sm:$0xff] %v6949_v14  ;;  %v54_v23 = vmul.f32 %v6959_v54, %v6438_v0 }
 0x100   :  { %1070 = vrot.lane.b32.xlu0 %v1051_v61, %s6381_s9  ;;  %1522 = vrot.lane.b32.xlu1 %v1502_v6, %s6383_s13  ;;  %v204_v61 = vmul.f32 %v6915_v29, %v6453_v4  ;;  %v430_v6 = vmul.f32 %v6957_v19, %v6443_v1 }
 0x102   :  { %v6961_v47 = vpop.permute.xlu0 %397  ;;  %v6963_v7 = vpop.permute.xlu1 %399 }
 0x103   :  { %11862 = vst [vmem:[#allocation35_spill] sm:$0xff] %v6961_v47  ;;  %11863 = vst [vmem:[#allocation36_spill] sm:$0xff] %v6963_v7  ;;  %v141_v47 = vadd.f32 %v6643_v21, %v54_v23 }
 0x104   :  { %1524 = vrot.lane.b32.xlu0 %v1503_v2, %s6383_s13  ;;  %1526 = vrot.lane.b32.xlu1 %v1504_v30, %s6383_s13  ;;  %v431_v2 = vmul.f32 %v6957_v19, %v6448_v3  ;;  %v432_v30 = vmul.f32 %v6957_v19, %v6438_v0 }
 0x106   :  { %v6973_v14 = vpop.permute.xlu0 %401  ;;  %v6975_v25 = vpop.permute.xlu1 %839 }
 0x107   :  { %11864 = vst [vmem:[#allocation37_spill] sm:$0xff] %v6973_v14  ;;  %11865 = vst [vmem:[#allocation38_spill] sm:$0xff] %v6975_v25  ;;  %v366_v14 = vadd.f32 %v6675_v35, %v141_v47  ;;  %v1727_v47 = vmul.f32 %v6893_v34, %v6499_v24 }
 0x108   :  { %220 = vrot.lane.b32.xlu0 %v204_v61, %s6377_s15  ;;  %447 = vrot.lane.b32.xlu1 %v430_v6, %s6378_s19  ;;  %v830_v61 = vmul.f32 %v6653_v26, %v6486_v18  ;;  %v1276_v6 = vmul.f32 %v6789_v39, %v6438_v0  ;;  %v1728_v26 = vmul.f32 %v6893_v34, %v6468_v12 }
 0x109   :  { %v591_v25 = vadd.f32 %v6709_v51, %v366_v14 }
 0x10a   :  { %v6984_v7 = vpop.permute.xlu0 %841  ;;  %v6986_v40 = vpop.permute.xlu1 %843 }
 0x10b   :  { %11866 = vst [vmem:[#allocation39_spill] sm:$0xff] %v6984_v7  ;;  %11867 = vst [vmem:[#allocation40_spill] sm:$0xff] %v6986_v40  ;;  %v816_v40 = vadd.f32 %v6751_v9, %v591_v25  ;;  %v1729_v25 = vmul.f32 %v6893_v34, %v6477_v15 }
 0x10c   :  { %449 = vrot.lane.b32.xlu0 %v431_v2, %s6378_s19  ;;  %451 = vrot.lane.b32.xlu1 %v432_v30, %s6378_s19 }
 0x10d   :  { %v1041_v2 = vadd.f32 %v6811_v58, %v816_v40  ;;  %v7020_v40 = vstv %s5797_s27  ;;  %s5810_s27 = sld [smem:[#allocation2 + $0x14]] }
 0x10e   :  { %v6996_v48 = vpop.permute.xlu0 %1242  ;;  %v6998_v23 = vpop.permute.xlu1 %1244 }
 0x10f   :  { %11868 = vst [vmem:[#allocation41_spill] sm:$0xff] %v6996_v48  ;;  %11869 = vst [vmem:[#allocation42_spill] sm:$0xff] %v6998_v23  ;;  %v1266_v7 = vadd.f32 %v6865_v17, %v1041_v2 }
 0x110   :  { %853 = vrot.lane.b32.xlu0 %v830_v61, %s6380_s29  ;;  %1295 = vrot.lane.b32.xlu1 %v1276_v6, %s6382_s10  ;;  %v429_v61 = vmul.f32 %v6957_v19, %v6453_v4 }
 0x111   :  { %v1491_v6 = vadd.f32 %v6939_v20, %v1266_v7 }
 0x112   :  { %v7008_v14 = vpop.permute.xlu0 %1246  ;;  %v7010_v30 = vpop.permute.xlu1 %1684 }
 0x113   :  { %11870 = vst [vmem:[#allocation43_spill] sm:$0xff] %v7008_v14  ;;  %11871 = vst [vmem:[#allocation44_spill] sm:$0xff] %v7010_v30  ;;  %v7036_v30 = vstv %s5775_s28  ;;  %s5814_s28 = sld [smem:[#allocation2 + $0x1c]] }
 0x114   :  { %1747 = vrot.lane.b32.xlu0 %v1727_v47, %s6384_s17  ;;  %1749 = vrot.lane.b32.xlu1 %v1728_v26, %s6384_s17  ;;  %v209_v47 = vmul.f32 %v6915_v29, %v6468_v12  ;;  %v210_v26 = vmul.f32 %v6915_v29, %v6477_v15 }
 0x116   :  { %v7022_v48 = vpop.permute.xlu0 %1686  ;;  %v7024_v23 = vpop.permute.xlu1 %1688 }
 0x117   :  { %11872 = vst [vmem:[#allocation45_spill] sm:$0xff] %v7022_v48  ;;  %11873 = vst [vmem:[#allocation46_spill] sm:$0xff] %v7024_v23  ;;  %v1716_v2 = vadd.f32 %v7024_v23, %v1491_v6 }
 0x118   :  { %1751 = vrot.lane.b32.xlu0 %v1729_v25, %s6384_s17  ;;  %445 = vrot.lane.b32.xlu1 %v429_v61, %s6378_s19  ;;  %v211_v25 = vmul.f32 %v6915_v29, %v6486_v18  ;;  %v655_v61 = vmul.f32 %v7036_v30, %v6443_v1 }
 0x119   :  { %v7034_v7 = vadd.f32 %v7020_v40, %v1716_v2 }
 0x11a   :  { %v7038_v48 = vpop.permute.xlu0 %1240  ;;  %v7040_v20 = vpop.permute.xlu1 %1682 }
 0x11b   :  { %11874 = vst [vmem:[#allocation47_spill] sm:$0xff] %v7034_v7  ;;  %11875 = vst [vmem:[#allocation48_spill] sm:$0xff] %v7038_v48  ;;  %v656_v7 = vmul.f32 %v7036_v30, %v6448_v3 }
 0x11c   :  { %11876 = vst [vmem:[#allocation49_spill] sm:$0xff] %v7040_v20  ;;  %230 = vrot.lane.b32.xlu0 %v209_v47, %s6377_s15  ;;  %232 = vrot.lane.b32.xlu1 %v210_v26, %s6377_s15  ;;  %v657_v47 = vmul.f32 %v7036_v30, %v6438_v0 }
 0x11e   :  { %v7048_v6 = vpop.permute.xlu0 %170  ;;  %v7050_v2 = vpop.permute.xlu1 %622 }
 0x11f   :  { %11877 = vst [vmem:[#allocation50_spill] sm:$0xff] %v7048_v6  ;;  %11878 = vst [vmem:[#allocation51_spill] sm:$0xff] %v7050_v2  ;;  %v1055_v2 = vmul.f32 %v6737_v62, %v6486_v18 }
 0x120   :  { %234 = vrot.lane.b32.xlu0 %v211_v25, %s6377_s15  ;;  %672 = vrot.lane.b32.xlu1 %v655_v61, %s6379_s24  ;;  %v1501_v25 = vmul.f32 %v6851_v53, %v6438_v0 }
 0x122   :  { %v7058_v26 = vpop.permute.xlu0 %624  ;;  %v7060_v48 = vpop.permute.xlu1 %626 }
 0x123   :  { %11879 = vst [vmem:[#allocation52_spill] sm:$0xff] %v7058_v26  ;;  %11880 = vst [vmem:[#allocation53_spill] sm:$0xff] %v7060_v48 }
 0x124   :  { %674 = vrot.lane.b32.xlu0 %v656_v7, %s6379_s24  ;;  %676 = vrot.lane.b32.xlu1 %v657_v47, %s6379_s24  ;;  %v208_v7 = vmul.f32 %v6915_v29, %v6499_v24  ;;  %v654_v47 = vmul.f32 %v7036_v30, %v6453_v4 }
 0x126   :  { %v7068_v61 = vpop.permute.xlu0 %1064  ;;  %v7070_v6 = vpop.permute.xlu1 %1066 }
 0x127   :  { %11881 = vst [vmem:[#allocation54_spill] sm:$0xff] %v7068_v61  ;;  %11882 = vst [vmem:[#allocation55_spill] sm:$0xff] %v7070_v6  ;;  %v434_v61 = vmul.f32 %v6957_v19, %v6468_v12 }
 0x128   :  { %1078 = vrot.lane.b32.xlu0 %v1055_v2, %s6381_s9  ;;  %1520 = vrot.lane.b32.xlu1 %v1501_v25, %s6383_s13  ;;  %v435_v2 = vmul.f32 %v6957_v19, %v6477_v15  ;;  %v7088_v25 = vstv %s5779_s30  ;;  %s5818_s30 = sld [smem:[#allocation2 + $0x24]] }
 0x129   :  { %v881_v20 = vmul.f32 %v7088_v25, %v6448_v3 }
 0x12a   :  { %v7078_v48 = vpop.permute.xlu0 %1068  ;;  %v7080_v62 = vpop.permute.xlu1 %1467 }
 0x12b   :  { %11883 = vst [vmem:[#allocation56_spill] sm:$0xff] %v7078_v48  ;;  %11884 = vst [vmem:[#allocation57_spill] sm:$0xff] %v7080_v62 }
 0x12c   :  { %228 = vrot.lane.b32.xlu0 %v208_v7, %s6377_s15  ;;  %670 = vrot.lane.b32.xlu1 %v654_v47, %s6379_s24  ;;  %v436_v7 = vmul.f32 %v6957_v19, %v6486_v18  ;;  %v880_v47 = vmul.f32 %v7088_v25, %v6443_v1 }
 0x12e   :  { %v7090_v29 = vpop.permute.xlu0 %1469  ;;  %v7092_v6 = vpop.permute.xlu1 %1471 }
 0x12f   :  { %11885 = vst [vmem:[#allocation58_spill] sm:$0xff] %v7090_v29  ;;  %11886 = vst [vmem:[#allocation59_spill] sm:$0xff] %v7092_v6 }
 0x130   :  { %455 = vrot.lane.b32.xlu0 %v434_v61, %s6378_s19  ;;  %457 = vrot.lane.b32.xlu1 %v435_v2, %s6378_s19  ;;  %v882_v61 = vmul.f32 %v7088_v25, %v6438_v0  ;;  %v58_v2 = vmul.f32 %v6959_v54, %v6486_v18 }
 0x132   :  { %v7100_v48 = vpop.permute.xlu0 %1465  ;;  %v7102_v26 = vpop.permute.xlu1 %395 }
 0x133   :  { %11887 = vst [vmem:[#allocation60_spill] sm:$0xff] %v7100_v48  ;;  %11888 = vst [vmem:[#allocation61_spill] sm:$0xff] %v7102_v26  ;;  %v145_v26 = vadd.f32 %v6697_v45, %v58_v2 }
 0x134   :  { %459 = vrot.lane.b32.xlu0 %v436_v7, %s6378_s19  ;;  %897 = vrot.lane.b32.xlu1 %v880_v47, %s6380_s29  ;;  %v1280_v7 = vmul.f32 %v6789_v39, %v6486_v18  ;;  %v1726_v47 = vmul.f32 %v6893_v34, %v6438_v0  ;;  %v879_v39 = vmul.f32 %v7088_v25, %v6453_v4 }
 0x136   :  { %v7112_v62 = vpop.permute.xlu0 %847  ;;  %v7114_v29 = vpop.permute.xlu1 %849 }
 0x137   :  { %11889 = vst [vmem:[#allocation62_spill] sm:$0xff] %v7112_v62  ;;  %11890 = vst [vmem:[#allocation63_spill] sm:$0xff] %v7114_v29  ;;  %v370_v62 = vadd.f32 %v6739_v63, %v145_v26 }
 0x138   :  { %899 = vrot.lane.b32.xlu0 %v881_v20, %s6380_s29  ;;  %901 = vrot.lane.b32.xlu1 %v882_v61, %s6380_s29  ;;  %v433_v20 = vmul.f32 %v6957_v19, %v6499_v24  ;;  %v7135_v61 = vstv %s5768_s8  ;;  %s5807_s8 = sld [smem:[#allocation2 + $0xd]] }
 0x139   :  { %v595_v0 = vadd.f32 %v6793_v43, %v370_v62  ;;  %v260_v19 = vmul.f32 %v7135_v61, %v6453_v4  ;;  %v659_v4 = vmul.f32 %v7036_v30, %v6468_v12 }
 0x13a   :  { %v7123_v48 = vpop.permute.xlu0 %851  ;;  %v7125_v23 = vpop.permute.xlu1 %1289 }
 0x13b   :  { %11891 = vst [vmem:[#allocation64_spill] sm:$0xff] %v7123_v48  ;;  %11892 = vst [vmem:[#allocation65_spill] sm:$0xff] %v7125_v23  ;;  %v820_v26 = vadd.f32 %v6853_v36, %v595_v0  ;;  %v350_v36 = vsel %vm348_vm1, %v6665_v31, %v6667_v32 }
 0x13c   :  { %1303 = vrot.lane.b32.xlu0 %v1280_v7, %s6382_s10  ;;  %1745 = vrot.lane.b32.xlu1 %v1726_v47, %s6384_s17  ;;  %v261_v7 = vmul.f32 %v7135_v61, %v6443_v1 }
 0x13d   :  { %v1045_v62 = vadd.f32 %v6927_v10, %v820_v26  ;;  %v124_v10 = vsel %vm123_vm0, %v6657_v28, %v6645_v22 }
 0x13e   :  { %v7137_v2 = vpop.permute.xlu0 %1291  ;;  %v7139_v48 = vpop.permute.xlu1 %1293 }
 0x13f   :  { %11893 = vst [vmem:[#allocation66_spill] sm:$0xff] %v7137_v2  ;;  %11894 = vst [vmem:[#allocation67_spill] sm:$0xff] %v7139_v48  ;;  %v1270_v48 = vadd.f32 %v7008_v14, %v1045_v62 }
 0x140   :  { %453 = vrot.lane.b32.xlu0 %v433_v20, %s6378_s19  ;;  %895 = vrot.lane.b32.xlu1 %v879_v39, %s6380_s29  ;;  %v262_v20 = vmul.f32 %v7135_v61, %v6448_v3  ;;  %v661_v3 = vmul.f32 %v7036_v30, %v6486_v18 }
 0x141   :  { %v1495_v1 = vadd.f32 %v7092_v6, %v1270_v48  ;;  %v7175_v48 = vstv %s5783_s1  ;;  %s5791_s1 = sld [smem:[#allocation2 + $0x3a]] }
 0x142   :  { %v7149_v47 = vpop.permute.xlu0 %1692  ;;  %v7151_v23 = vpop.permute.xlu1 %1694 }
 0x144   :  { %276 = vrot.lane.b32.xlu0 %v260_v19, %s6377_s15  ;;  %278 = vrot.lane.b32.xlu1 %v261_v7, %s6377_s15  ;;  %v660_v19 = vmul.f32 %v7036_v30, %v6477_v15 }
 0x146   :  { %v7161_v39 = vpop.permute.xlu0 %1696  ;;  %v7163_v0 = vpop.permute.xlu1 %1690 }
 0x147   :  { %11895 = vst [vmem:[#allocation68_spill] sm:$0xff] %v7161_v39  ;;  %11896 = vst [vmem:[#allocation69_spill] sm:$0xff] %v7163_v0  ;;  %v1720_v26 = vadd.f32 %v7161_v39, %v1495_v1  ;;  %v7193_v1 = vld [vmem:[%s11514_s0 + $0x10] sm:$0xff] }
 0x148   :  { %280 = vrot.lane.b32.xlu0 %v262_v20, %s6377_s15  ;;  %680 = vrot.lane.b32.xlu1 %v659_v4, %s6379_s24  ;;  %v7186_v20 = vld [vmem:[%s11514_s0 + $0x8] sm:$0xff] }
 0x149   :  { %v7173_v7 = vadd.f32 %v7020_v40, %v1720_v26  ;;  %v1105_v4 = vmul.f32 %v7186_v20, %v7175_v48  ;;  %v1106_v26 = vmul.f32 %v7193_v1, %v7175_v48 }
 0x14a   :  { %v7177_v62 = vpop.permute.xlu0 %178  ;;  %v7179_v2 = vpop.permute.xlu1 %620 }
 0x14b   :  { %11897 = vst [vmem:[#allocation70_spill] sm:$0xff] %v7173_v7  ;;  %11898 = vst [vmem:[#allocation71_spill] sm:$0xff] %v7177_v62  ;;  %v7206_v7 = vld [vmem:[%s11514_s0 + $0x18] sm:$0xff]  ;;  %v1505_v62 = vmul.f32 %v6851_v53, %v6486_v18  ;;  %v7227_v53 = vstv %s5772_s18  ;;  %s5819_s18 = sld [smem:[#allocation2 + $0x25]] }
 0x14c   :  { %11899 = vst [vmem:[#allocation72_spill] sm:$0xff] %v7179_v2  ;;  %682 = vrot.lane.b32.xlu0 %v660_v19, %s6379_s24  ;;  %684 = vrot.lane.b32.xlu1 %v661_v3, %s6379_s24  ;;  %v1107_v2 = vmul.f32 %v7206_v7, %v7175_v48 }
 0x14e   :  { %v7197_v19 = vpop.permute.xlu0 %1072  ;;  %v7199_v3 = vpop.permute.xlu1 %1074 }
 0x14f   :  { %11900 = vst [vmem:[#allocation73_spill] sm:$0xff] %v7197_v19  ;;  %11901 = vst [vmem:[#allocation74_spill] sm:$0xff] %v7199_v3 }
 0x150   :  { %1122 = vrot.lane.b32.xlu0 %v1105_v4, %s6381_s9  ;;  %1124 = vrot.lane.b32.xlu1 %v1106_v26, %s6381_s9  ;;  %v658_v4 = vmul.f32 %v7036_v30, %v6499_v24  ;;  %v7223_v26 = vld [vmem:[%s11514_s0] sm:$0xff] }
 0x151   :  { %v1104_v3 = vmul.f32 %v7223_v26, %v7175_v48  ;;  %v485_v30 = vmul.f32 %v7223_v26, %v7227_v53 }
 0x152   :  { %v7212_v29 = vpop.permute.xlu0 %1076  ;;  %v7214_v19 = vpop.permute.xlu1 %1514 }
 0x153   :  { %11902 = vst [vmem:[#allocation75_spill] sm:$0xff] %v7212_v29  ;;  %11903 = vst [vmem:[#allocation76_spill] sm:$0xff] %v7214_v19 }
 0x154   :  { %1126 = vrot.lane.b32.xlu0 %v1107_v2, %s6381_s9  ;;  %1528 = vrot.lane.b32.xlu1 %v1505_v62, %s6383_s13  ;;  %v486_v2 = vmul.f32 %v7186_v20, %v7227_v53 }
 0x156   :  { %v7229_v29 = vpop.permute.xlu0 %1516  ;;  %v7231_v19 = vpop.permute.xlu1 %1518 }
 0x157   :  { %11904 = vst [vmem:[#allocation77_spill] sm:$0xff] %v7229_v29  ;;  %11905 = vst [vmem:[#allocation78_spill] sm:$0xff] %v7231_v19 }
 0x158   :  { %678 = vrot.lane.b32.xlu0 %v658_v4, %s6379_s24  ;;  %1120 = vrot.lane.b32.xlu1 %v1104_v3, %s6381_s9  ;;  %v487_v4 = vmul.f32 %v7193_v1, %v7227_v53  ;;  %v884_v3 = vmul.f32 %v7088_v25, %v6468_v12 }
 0x15a   :  { %v7239_v62 = vpop.permute.xlu0 %403  ;;  %v7241_v0 = vpop.permute.xlu1 %845 }
 0x15b   :  { %11906 = vst [vmem:[#allocation79_spill] sm:$0xff] %v7239_v62  ;;  %11907 = vst [vmem:[#allocation80_spill] sm:$0xff] %v7241_v0  ;;  %v885_v0 = vmul.f32 %v7088_v25, %v6477_v15 }
 0x15c   :  { %501 = vrot.lane.b32.xlu0 %v485_v30, %s6378_s19  ;;  %503 = vrot.lane.b32.xlu1 %v486_v2, %s6378_s19  ;;  %v886_v30 = vmul.f32 %v7088_v25, %v6486_v18  ;;  %v7259_v2 = vstv %s5787_s25  ;;  %s5796_s25 = sld [smem:[#allocation2 + $0x43]] }
 0x15d   :  { %v1330_v12 = vmul.f32 %v7186_v20, %v7259_v2 }
 0x15e   :  { %v7249_v19 = vpop.permute.xlu0 %1297  ;;  %v7251_v29 = vpop.permute.xlu1 %1299 }
 0x15f   :  { %11908 = vst [vmem:[#allocation81_spill] sm:$0xff] %v7249_v19  ;;  %11909 = vst [vmem:[#allocation82_spill] sm:$0xff] %v7251_v29 }
 0x160   :  { %505 = vrot.lane.b32.xlu0 %v487_v4, %s6378_s19  ;;  %905 = vrot.lane.b32.xlu1 %v884_v3, %s6380_s29  ;;  %v1331_v4 = vmul.f32 %v7193_v1, %v7259_v2 }
 0x162   :  { %v7261_v62 = vpop.permute.xlu0 %1301  ;;  %v7263_v39 = vpop.permute.xlu1 %1739 }
 0x163   :  { %11910 = vst [vmem:[#allocation83_spill] sm:$0xff] %v7261_v62  ;;  %11911 = vst [vmem:[#allocation84_spill] sm:$0xff] %v7263_v39  ;;  %v1332_v62 = vmul.f32 %v7206_v7, %v7259_v2 }
 0x164   :  { %907 = vrot.lane.b32.xlu0 %v885_v0, %s6380_s29  ;;  %909 = vrot.lane.b32.xlu1 %v886_v30, %s6380_s29  ;;  %v1730_v0 = vmul.f32 %v6893_v34, %v6486_v18  ;;  %v264_v18 = vmul.f32 %v7135_v61, %v6499_v24  ;;  %v7302_v34 = vld [vmem:[%s11514_s0 + $0x28] sm:$0xff] }
 0x166   :  { %v7271_v15 = vpop.permute.xlu0 %1741  ;;  %v7273_v3 = vpop.permute.xlu1 %1743 }
 0x167   :  { %11912 = vst [vmem:[#allocation85_spill] sm:$0xff] %v7271_v15  ;;  %11913 = vst [vmem:[#allocation86_spill] sm:$0xff] %v7273_v3 }
 0x168   :  { %1347 = vrot.lane.b32.xlu0 %v1330_v12, %s6382_s10  ;;  %1349 = vrot.lane.b32.xlu1 %v1331_v4, %s6382_s10  ;;  %v883_v12 = vmul.f32 %v7088_v25, %v6499_v24  ;;  %v1329_v4 = vmul.f32 %v7223_v26, %v7259_v2  ;;  %v265_v25 = vmul.f32 %v7302_v34, %v7135_v61  ;;  %v7317_v24 = vld [vmem:[%s11514_s0 + $0x30] sm:$0xff] }
 0x16a   :  { %v7281_v30 = vpop.permute.xlu0 %222  ;;  %v7283_v19 = vpop.permute.xlu1 %224 }
 0x16b   :  { %11914 = vst [vmem:[#allocation87_spill] sm:$0xff] %v7281_v30  ;;  %11915 = vst [vmem:[#allocation88_spill] sm:$0xff] %v7283_v19 }
 0x16c   :  { %1351 = vrot.lane.b32.xlu0 %v1332_v62, %s6382_s10  ;;  %1753 = vrot.lane.b32.xlu1 %v1730_v0, %s6384_s17  ;;  %v7306_v62 = vstv %s5776_s26  ;;  %s5806_s26 = sld [smem:[#allocation2 + $0xc]] }
 0x16e   :  { %v7291_v29 = vpop.permute.xlu0 %226  ;;  %v7293_v3 = vpop.permute.xlu1 %628 }
 0x16f   :  { %11916 = vst [vmem:[#allocation89_spill] sm:$0xff] %v7291_v29  ;;  %11917 = vst [vmem:[#allocation90_spill] sm:$0xff] %v7293_v3 }
 0x170   :  { %903 = vrot.lane.b32.xlu0 %v883_v12, %s6380_s29  ;;  %1345 = vrot.lane.b32.xlu1 %v1329_v4, %s6382_s10  ;;  %v266_v12 = vmul.f32 %v7317_v24, %v7135_v61  ;;  %v710_v4 = vmul.f32 %v7223_v26, %v7306_v62 }
 0x172   :  { %v7308_v0 = vpop.permute.xlu0 %1070  ;;  %v7310_v3 = vpop.permute.xlu1 %1522 }
 0x173   :  { %11918 = vst [vmem:[#allocation91_spill] sm:$0xff] %v7308_v0  ;;  %11919 = vst [vmem:[#allocation92_spill] sm:$0xff] %v7310_v3 }
 0x174   :  { %284 = vrot.lane.b32.xlu0 %v264_v18, %s6377_s15  ;;  %286 = vrot.lane.b32.xlu1 %v265_v25, %s6377_s15  ;;  %v711_v18 = vmul.f32 %v7186_v20, %v7306_v62  ;;  %v712_v25 = vmul.f32 %v7193_v1, %v7306_v62 }
 0x176   :  { %v7323_v29 = vpop.permute.xlu0 %1524  ;;  %v7325_v0 = vpop.permute.xlu1 %1526 }
 0x177   :  { %11920 = vst [vmem:[#allocation93_spill] sm:$0xff] %v7323_v29  ;;  %11921 = vst [vmem:[#allocation94_spill] sm:$0xff] %v7325_v0  ;;  %v1109_v0 = vmul.f32 %v7302_v34, %v7175_v48 }
 0x178   :  { %288 = vrot.lane.b32.xlu0 %v266_v12, %s6377_s15  ;;  %726 = vrot.lane.b32.xlu1 %v710_v4, %s6379_s24  ;;  %v1110_v12 = vmul.f32 %v7317_v24, %v7175_v48  ;;  %v7343_v4 = vstv %s5791_s1  ;;  %s5822_s1 = sld [smem:[#allocation2 + $0x2c]] }
 0x17a   :  { %v7333_v30 = vpop.permute.xlu0 %220  ;;  %v7335_v19 = vpop.permute.xlu1 %447 }
 0x17b   :  { %11922 = vst [vmem:[#allocation95_spill] sm:$0xff] %v7333_v30  ;;  %11923 = vst [vmem:[#allocation96_spill] sm:$0xff] %v7335_v19  ;;  %v1555_v19 = vmul.f32 %v7186_v20, %v7343_v4 }
 0x17c   :  { %728 = vrot.lane.b32.xlu0 %v711_v18, %s6379_s24  ;;  %730 = vrot.lane.b32.xlu1 %v712_v25, %s6379_s24  ;;  %v7354_v18 = vld [vmem:[%s11514_s0 + $0x38] sm:$0xff] }
 0x17d   :  { %v1111_v25 = vmul.f32 %v7354_v18, %v7175_v48 }
 0x17e   :  { %v7345_v3 = vpop.permute.xlu0 %449  ;;  %v7347_v29 = vpop.permute.xlu1 %451 }
 0x17f   :  { %11924 = vst [vmem:[#allocation97_spill] sm:$0xff] %v7345_v3  ;;  %11925 = vst [vmem:[#allocation98_spill] sm:$0xff] %v7347_v29 }
 0x180   :  { %1130 = vrot.lane.b32.xlu0 %v1109_v0, %s6381_s9  ;;  %1132 = vrot.lane.b32.xlu1 %v1110_v12, %s6381_s9  ;;  %v1556_v0 = vmul.f32 %v7193_v1, %v7343_v4  ;;  %v1557_v12 = vmul.f32 %v7206_v7, %v7343_v4 }
 0x182   :  { %v7360_v30 = vpop.permute.xlu0 %853  ;;  %v7362_v3 = vpop.permute.xlu1 %1295 }
 0x183   :  { %11926 = vst [vmem:[#allocation99_spill] sm:$0xff] %v7360_v30  ;;  %11927 = vst [vmem:[#allocation100_spill] sm:$0xff] %v7362_v3  ;;  %v1554_v3 = vmul.f32 %v7223_v26, %v7343_v4 }
 0x184   :  { %1134 = vrot.lane.b32.xlu0 %v1111_v25, %s6381_s9  ;;  %1572 = vrot.lane.b32.xlu1 %v1555_v19, %s6383_s13  ;;  %v7379_v25 = vld [vmem:[%s11514_s0 + $0x20] sm:$0xff] }
 0x185   :  { %v1108_v19 = vmul.f32 %v7379_v25, %v7175_v48 }
 0x186   :  { %v7370_v29 = vpop.permute.xlu0 %1747  ;;  %v7372_v39 = vpop.permute.xlu1 %1749 }
 0x187   :  { %11928 = vst [vmem:[#allocation101_spill] sm:$0xff] %v7370_v29  ;;  %11929 = vst [vmem:[#allocation102_spill] sm:$0xff] %v7372_v39  ;;  %v7395_v39 = vstv %s5780_s14  ;;  %s5815_s14 = sld [smem:[#allocation2 + $0x1d]] }
 0x188   :  { %1574 = vrot.lane.b32.xlu0 %v1556_v0, %s6383_s13  ;;  %1576 = vrot.lane.b32.xlu1 %v1557_v12, %s6383_s13  ;;  %v489_v0 = vmul.f32 %v7379_v25, %v7227_v53  ;;  %v490_v12 = vmul.f32 %v7302_v34, %v7227_v53 }
 0x18a   :  { %v7385_v30 = vpop.permute.xlu0 %1751  ;;  %v7387_v29 = vpop.permute.xlu1 %445 }
 0x18b   :  { %11930 = vst [vmem:[#allocation103_spill] sm:$0xff] %v7385_v30  ;;  %11931 = vst [vmem:[#allocation104_spill] sm:$0xff] %v7387_v29 }
 0x18c   :  { %1128 = vrot.lane.b32.xlu0 %v1108_v19, %s6381_s9  ;;  %1570 = vrot.lane.b32.xlu1 %v1554_v3, %s6383_s13  ;;  %v491_v19 = vmul.f32 %v7317_v24, %v7227_v53  ;;  %v935_v3 = vmul.f32 %v7223_v26, %v7395_v39 }
 0x18e   :  { %v7397_v48 = vpop.permute.xlu0 %230  ;;  %v7399_v15 = vpop.permute.xlu1 %232 }
 0x18f   :  { %11932 = vst [vmem:[#allocation105_spill] sm:$0xff] %v7397_v48  ;;  %11933 = vst [vmem:[#allocation106_spill] sm:$0xff] %v7399_v15 }
 0x190   :  { %509 = vrot.lane.b32.xlu0 %v489_v0, %s6378_s19  ;;  %511 = vrot.lane.b32.xlu1 %v490_v12, %s6378_s19  ;;  %v936_v0 = vmul.f32 %v7186_v20, %v7395_v39  ;;  %v937_v12 = vmul.f32 %v7193_v1, %v7395_v39 }
 0x192   :  { %v7407_v29 = vpop.permute.xlu0 %234  ;;  %v7409_v30 = vpop.permute.xlu1 %672 }
 0x193   :  { %11934 = vst [vmem:[#allocation107_spill] sm:$0xff] %v7407_v29  ;;  %11935 = vst [vmem:[#allocation108_spill] sm:$0xff] %v7409_v30  ;;  %v1334_v30 = vmul.f32 %v7302_v34, %v7259_v2 }
 0x194   :  { %513 = vrot.lane.b32.xlu0 %v491_v19, %s6378_s19  ;;  %951 = vrot.lane.b32.xlu1 %v935_v3, %s6380_s29  ;;  %v1335_v19 = vmul.f32 %v7317_v24, %v7259_v2  ;;  %v7427_v3 = vstv %s5795_s20  ;;  %s9471_s20 = sld [smem:[#allocation2 + $0x46]] }
 0x196   :  { %v7417_v48 = vpop.permute.xlu0 %674  ;;  %v7419_v15 = vpop.permute.xlu1 %676 }
 0x197   :  { %11936 = vst [vmem:[#allocation109_spill] sm:$0xff] %v7417_v48  ;;  %11937 = vst [vmem:[#allocation110_spill] sm:$0xff] %v7419_v15 }
 0x198   :  { %953 = vrot.lane.b32.xlu0 %v936_v0, %s6380_s29  ;;  %955 = vrot.lane.b32.xlu1 %v937_v12, %s6380_s29  ;;  %v1336_v0 = vmul.f32 %v7354_v18, %v7259_v2  ;;  %v1780_v12 = vmul.f32 %v7186_v20, %v7427_v3 }
 0x19a   :  { %v7429_v29 = vpop.permute.xlu0 %1078  ;;  %v7431_v6 = vpop.permute.xlu1 %1520 }
 0x19b   :  { %11938 = vst [vmem:[#allocation111_spill] sm:$0xff] %v7429_v29  ;;  %11939 = vst [vmem:[#allocation112_spill] sm:$0xff] %v7431_v6  ;;  %v1781_v29 = vmul.f32 %v7193_v1, %v7427_v3 }
 0x19c   :  { %1355 = vrot.lane.b32.xlu0 %v1334_v30, %s6382_s10  ;;  %1357 = vrot.lane.b32.xlu1 %v1335_v19, %s6382_s10  ;;  %v1782_v30 = vmul.f32 %v7206_v7, %v7427_v3 }
 0x19e   :  { %v7439_v15 = vpop.permute.xlu0 %228  ;;  %v7441_v48 = vpop.permute.xlu1 %670 }
 0x19f   :  { %11940 = vst [vmem:[#allocation113_spill] sm:$0xff] %v7439_v15  ;;  %11941 = vst [vmem:[#allocation114_spill] sm:$0xff] %v7441_v48  ;;  %v1333_v48 = vmul.f32 %v7379_v25, %v7259_v2 }
 0x1a0   :  { %1359 = vrot.lane.b32.xlu0 %v1336_v0, %s6382_s10  ;;  %1797 = vrot.lane.b32.xlu1 %v1780_v12, %s6384_s17  ;;  %v1779_v0 = vmul.f32 %v7223_v26, %v7427_v3 }
 0x1a2   :  { %v7449_v19 = vpop.permute.xlu0 %455  ;;  %v7451_v6 = vpop.permute.xlu1 %457 }
 0x1a3   :  { %11942 = vst [vmem:[#allocation115_spill] sm:$0xff] %v7449_v19  ;;  %11943 = vst [vmem:[#allocation116_spill] sm:$0xff] %v7451_v6 }
 0x1a4   :  { %1799 = vrot.lane.b32.xlu0 %v1781_v29, %s6384_s17  ;;  %1801 = vrot.lane.b32.xlu1 %v1782_v30, %s6384_s17  ;;  %v263_v29 = vmul.f32 %v7206_v7, %v7135_v61  ;;  %v714_v30 = vmul.f32 %v7379_v25, %v7306_v62 }
 0x1a6   :  { %v7459_v12 = vpop.permute.xlu0 %459  ;;  %v7461_v15 = vpop.permute.xlu1 %897 }
 0x1a7   :  { %11944 = vst [vmem:[#allocation117_spill] sm:$0xff] %v7459_v12  ;;  %11945 = vst [vmem:[#allocation118_spill] sm:$0xff] %v7461_v15  ;;  %v715_v15 = vmul.f32 %v7302_v34, %v7306_v62 }
 0x1a8   :  { %1353 = vrot.lane.b32.xlu0 %v1333_v48, %s6382_s10  ;;  %1795 = vrot.lane.b32.xlu1 %v1779_v0, %s6384_s17  ;;  %v716_v48 = vmul.f32 %v7317_v24, %v7306_v62  ;;  %v7479_v0 = vstv %s5784_s21  ;;  %s5762_s21 = sld [smem:[#allocation2 + $0x1]] }
 0x1aa   :  { %v7469_v19 = vpop.permute.xlu0 %899  ;;  %v7471_v2 = vpop.permute.xlu1 %901 }
 0x1ab   :  { %11946 = vst [vmem:[#allocation119_spill] sm:$0xff] %v7469_v19  ;;  %11947 = vst [vmem:[#allocation120_spill] sm:$0xff] %v7471_v2 }
 0x1ac   :  { %282 = vrot.lane.b32.xlu0 %v263_v29, %s6377_s15  ;;  %734 = vrot.lane.b32.xlu1 %v714_v30, %s6379_s24  ;;  %v1160_v29 = vmul.f32 %v7223_v26, %v7479_v0  ;;  %v1161_v30 = vmul.f32 %v7186_v20, %v7479_v0 }
 0x1ae   :  { %v7481_v12 = vpop.permute.xlu0 %1303  ;;  %v7483_v6 = vpop.permute.xlu1 %1745 }
 0x1af   :  { %11948 = vst [vmem:[#allocation121_spill] sm:$0xff] %v7481_v12  ;;  %11949 = vst [vmem:[#allocation122_spill] sm:$0xff] %v7483_v6  ;;  %v1162_v12 = vmul.f32 %v7193_v1, %v7479_v0 }
 0x1b0   :  { %736 = vrot.lane.b32.xlu0 %v715_v15, %s6379_s24  ;;  %738 = vrot.lane.b32.xlu1 %v716_v48, %s6379_s24  ;;  %v1559_v15 = vmul.f32 %v7302_v34, %v7343_v4 }
 0x1b2   :  { %v7491_v2 = vpop.permute.xlu0 %453  ;;  %v7493_v19 = vpop.permute.xlu1 %895 }
 0x1b3   :  { %11950 = vst [vmem:[#allocation123_spill] sm:$0xff] %v7491_v2  ;;  %11951 = vst [vmem:[#allocation124_spill] sm:$0xff] %v7493_v19  ;;  %v1560_v19 = vmul.f32 %v7317_v24, %v7343_v4 }
 0x1b4   :  { %1176 = vrot.lane.b32.xlu0 %v1160_v29, %s6381_s9  ;;  %1178 = vrot.lane.b32.xlu1 %v1161_v30, %s6381_s9  ;;  %v1561_v29 = vmul.f32 %v7354_v18, %v7343_v4 }
 0x1b6   :  { %v7501_v48 = vpop.permute.xlu0 %276  ;;  %v7503_v6 = vpop.permute.xlu1 %278 }
 0x1b7   :  { %11952 = vst [vmem:[#allocation125_spill] sm:$0xff] %v7501_v48  ;;  %11953 = vst [vmem:[#allocation126_spill] sm:$0xff] %v7503_v6 }
 0x1b8   :  { %1180 = vrot.lane.b32.xlu0 %v1162_v12, %s6381_s9  ;;  %1580 = vrot.lane.b32.xlu1 %v1559_v15, %s6383_s13  ;;  %v1558_v12 = vmul.f32 %v7379_v25, %v7343_v4  ;;  %v488_v15 = vmul.f32 %v7206_v7, %v7227_v53 }
 0x1ba   :  { %v7511_v30 = vpop.permute.xlu0 %280  ;;  %v7513_v2 = vpop.permute.xlu1 %680 }
 0x1bb   :  { %11954 = vst [vmem:[#allocation127_spill] sm:$0xff] %v7511_v30  ;;  %11955 = vst [vmem:[#allocation128_spill] sm:$0xff] %v7513_v2  ;;  %v939_v2 = vmul.f32 %v7379_v25, %v7395_v39 }
 0x1bc   :  { %1582 = vrot.lane.b32.xlu0 %v1560_v19, %s6383_s13  ;;  %1584 = vrot.lane.b32.xlu1 %v1561_v29, %s6383_s13  ;;  %v940_v19 = vmul.f32 %v7302_v34, %v7395_v39  ;;  %v7531_v29 = vstv %s5788_s22  ;;  %s5834_s22 = sld [smem:[#allocation2 + $0x44]] }
 0x1be   :  { %v7521_v48 = vpop.permute.xlu0 %682  ;;  %v7523_v6 = vpop.permute.xlu1 %684 }
 0x1bf   :  { %11956 = vst [vmem:[#allocation129_spill] sm:$0xff] %v7521_v48  ;;  %11957 = vst [vmem:[#allocation130_spill] sm:$0xff] %v7523_v6 }
 0x1c0   :  { %1578 = vrot.lane.b32.xlu0 %v1558_v12, %s6383_s13  ;;  %507 = vrot.lane.b32.xlu1 %v488_v15, %s6378_s19  ;;  %v941_v12 = vmul.f32 %v7317_v24, %v7395_v39  ;;  %v1385_v15 = vmul.f32 %v7223_v26, %v7531_v29 }
 0x1c2   :  { %v7533_v4 = vpop.permute.xlu0 %1122  ;;  %v7535_v30 = vpop.permute.xlu1 %1124 }
 0x1c3   :  { %11958 = vst [vmem:[#allocation131_spill] sm:$0xff] %v7533_v4  ;;  %11959 = vst [vmem:[#allocation132_spill] sm:$0xff] %v7535_v30  ;;  %v1386_v4 = vmul.f32 %v7186_v20, %v7531_v29 }
 0x1c4   :  { %959 = vrot.lane.b32.xlu0 %v939_v2, %s6380_s29  ;;  %961 = vrot.lane.b32.xlu1 %v940_v19, %s6380_s29  ;;  %v1387_v2 = vmul.f32 %v7193_v1, %v7531_v29 }
 0x1c6   :  { %v7543_v6 = vpop.permute.xlu0 %1126  ;;  %v7545_v48 = vpop.permute.xlu1 %1528 }
 0x1c7   :  { %11960 = vst [vmem:[#allocation133_spill] sm:$0xff] %v7543_v6  ;;  %11961 = vst [vmem:[#allocation134_spill] sm:$0xff] %v7545_v48  ;;  %v1784_v6 = vmul.f32 %v7302_v34, %v7427_v3 }
 0x1c8   :  { %963 = vrot.lane.b32.xlu0 %v941_v12, %s6380_s29  ;;  %1401 = vrot.lane.b32.xlu1 %v1385_v15, %s6382_s10  ;;  %v1785_v12 = vmul.f32 %v7317_v24, %v7427_v3 }
 0x1ca   :  { %v7553_v19 = vpop.permute.xlu0 %678  ;;  %v7555_v30 = vpop.permute.xlu1 %1120 }
 0x1cb   :  { %11962 = vst [vmem:[#allocation135_spill] sm:$0xff] %v7553_v19  ;;  %11963 = vst [vmem:[#allocation136_spill] sm:$0xff] %v7555_v30  ;;  %v1786_v30 = vmul.f32 %v7354_v18, %v7427_v3 }
 0x1cc   :  { %1403 = vrot.lane.b32.xlu0 %v1386_v4, %s6382_s10  ;;  %1405 = vrot.lane.b32.xlu1 %v1387_v2, %s6382_s10  ;;  %v1783_v4 = vmul.f32 %v7379_v25, %v7427_v3  ;;  %v1164_v3 = vmul.f32 %v7379_v25, %v7479_v0 }
 0x1ce   :  { %v7563_v15 = vpop.permute.xlu0 %501  ;;  %v7565_v48 = vpop.permute.xlu1 %503 }
 0x1cf   :  { %11964 = vst [vmem:[#allocation137_spill] sm:$0xff] %v7563_v15  ;;  %11965 = vst [vmem:[#allocation138_spill] sm:$0xff] %v7565_v48 }
 0x1d0   :  { %1805 = vrot.lane.b32.xlu0 %v1784_v6, %s6384_s17  ;;  %1807 = vrot.lane.b32.xlu1 %v1785_v12, %s6384_s17  ;;  %v267_v6 = vmul.f32 %v7354_v18, %v7135_v61  ;;  %v713_v12 = vmul.f32 %v7206_v7, %v7306_v62 }
 0x1d2   :  { %v7573_v2 = vpop.permute.xlu0 %505  ;;  %v7575_v19 = vpop.permute.xlu1 %905 }
 0x1d3   :  { %11966 = vst [vmem:[#allocation139_spill] sm:$0xff] %v7573_v2  ;;  %11967 = vst [vmem:[#allocation140_spill] sm:$0xff] %v7575_v19 }
 0x1d4   :  { %1809 = vrot.lane.b32.xlu0 %v1786_v30, %s6384_s17  ;;  %1803 = vrot.lane.b32.xlu1 %v1783_v4, %s6384_s17  ;;  %v1165_v30 = vmul.f32 %v7302_v34, %v7479_v0  ;;  %v7593_v4 = vstv %s5792_s23  ;;  %s5831_s23 = sld [smem:[#allocation2 + $0x3d]] }
 0x1d6   :  { %v7583_v15 = vpop.permute.xlu0 %907  ;;  %v7585_v48 = vpop.permute.xlu1 %909 }
 0x1d7   :  { %11968 = vst [vmem:[#allocation141_spill] sm:$0xff] %v7583_v15  ;;  %11969 = vst [vmem:[#allocation142_spill] sm:$0xff] %v7585_v48 }
 0x1d8   :  { %290 = vrot.lane.b32.xlu0 %v267_v6, %s6377_s15  ;;  %732 = vrot.lane.b32.xlu1 %v713_v12, %s6379_s24  ;;  %v1166_v6 = vmul.f32 %v7317_v24, %v7479_v0  ;;  %v1610_v12 = vmul.f32 %v7223_v26, %v7593_v4 }
 0x1da   :  { %v7595_v61 = vpop.permute.xlu0 %1347  ;;  %v7597_v19 = vpop.permute.xlu1 %1349 }
 0x1db   :  { %11970 = vst [vmem:[#allocation143_spill] sm:$0xff] %v7595_v61  ;;  %11971 = vst [vmem:[#allocation144_spill] sm:$0xff] %v7597_v19  ;;  %v1611_v61 = vmul.f32 %v7186_v20, %v7593_v4 }
 0x1dc   :  { %1184 = vrot.lane.b32.xlu0 %v1164_v3, %s6381_s9  ;;  %1186 = vrot.lane.b32.xlu1 %v1165_v30, %s6381_s9  ;;  %v1612_v3 = vmul.f32 %v7193_v1, %v7593_v4 }
 0x1de   :  { %v7605_v48 = vpop.permute.xlu0 %1351  ;;  %v7607_v15 = vpop.permute.xlu1 %1753 }
 0x1df   :  { %11972 = vst [vmem:[#allocation145_spill] sm:$0xff] %v7605_v48  ;;  %11973 = vst [vmem:[#allocation146_spill] sm:$0xff] %v7607_v15 }
 0x1e0   :  { %1188 = vrot.lane.b32.xlu0 %v1166_v6, %s6381_s9  ;;  %1626 = vrot.lane.b32.xlu1 %v1610_v12, %s6383_s13  ;;  %v492_v6 = vmul.f32 %v7354_v18, %v7227_v53  ;;  %v938_v12 = vmul.f32 %v7206_v7, %v7395_v39 }
 0x1e2   :  { %v7615_v30 = vpop.permute.xlu0 %903  ;;  %v7617_v19 = vpop.permute.xlu1 %1345 }
 0x1e3   :  { %11974 = vst [vmem:[#allocation147_spill] sm:$0xff] %v7615_v30  ;;  %11975 = vst [vmem:[#allocation148_spill] sm:$0xff] %v7617_v19  ;;  %v1389_v19 = vmul.f32 %v7379_v25, %v7531_v29 }
 0x1e4   :  { %1628 = vrot.lane.b32.xlu0 %v1611_v61, %s6383_s13  ;;  %1630 = vrot.lane.b32.xlu1 %v1612_v3, %s6383_s13  ;;  %v1390_v61 = vmul.f32 %v7302_v34, %v7531_v29  ;;  %v7635_v3 = vstv %s5796_s25  ;;  %s5835_s25 = sld [smem:[#allocation2 + $0x45]] }
 0x1e6   :  { %v7625_v48 = vpop.permute.xlu0 %284  ;;  %v7627_v2 = vpop.permute.xlu1 %286 }
 0x1e7   :  { %11976 = vst [vmem:[#allocation149_spill] sm:$0xff] %v7625_v48  ;;  %11977 = vst [vmem:[#allocation150_spill] sm:$0xff] %v7627_v2 }
 0x1e8   :  { %515 = vrot.lane.b32.xlu0 %v492_v6, %s6378_s19  ;;  %957 = vrot.lane.b32.xlu1 %v938_v12, %s6380_s29  ;;  %v1391_v6 = vmul.f32 %v7317_v24, %v7531_v29  ;;  %v1835_v12 = vmul.f32 %v7223_v26, %v7635_v3 }
 0x1ea   :  { %v7637_v53 = vpop.permute.xlu0 %288  ;;  %v7639_v30 = vpop.permute.xlu1 %726 }
 0x1eb   :  { %11978 = vst [vmem:[#allocation151_spill] sm:$0xff] %v7637_v53  ;;  %11979 = vst [vmem:[#allocation152_spill] sm:$0xff] %v7639_v30  ;;  %v1836_v30 = vmul.f32 %v7186_v20, %v7635_v3 }
 0x1ec   :  { %1409 = vrot.lane.b32.xlu0 %v1389_v19, %s6382_s10  ;;  %1411 = vrot.lane.b32.xlu1 %v1390_v61, %s6382_s10  ;;  %v1837_v19 = vmul.f32 %v7193_v1, %v7635_v3 }
 0x1ee   :  { %v7647_v48 = vpop.permute.xlu0 %728  ;;  %v7649_v2 = vpop.permute.xlu1 %730 }
 0x1ef   :  { %11980 = vst [vmem:[#allocation153_spill] sm:$0xff] %v7647_v48  ;;  %11981 = vst [vmem:[#allocation154_spill] sm:$0xff] %v7649_v2 }
 0x1f0   :  { %1413 = vrot.lane.b32.xlu0 %v1391_v6, %s6382_s10  ;;  %1851 = vrot.lane.b32.xlu1 %v1835_v12, %s6384_s17  ;;  %v717_v6 = vmul.f32 %v7354_v18, %v7306_v62  ;;  %v1163_v12 = vmul.f32 %v7206_v7, %v7479_v0 }
 0x1f2   :  { %v7657_v61 = vpop.permute.xlu0 %1130  ;;  %v7659_v53 = vpop.permute.xlu1 %1132 }
 0x1f3   :  { %11982 = vst [vmem:[#allocation155_spill] sm:$0xff] %v7657_v61  ;;  %11983 = vst [vmem:[#allocation156_spill] sm:$0xff] %v7659_v53  ;;  %v1614_v61 = vmul.f32 %v7379_v25, %v7593_v4 }
 0x1f4   :  { %1853 = vrot.lane.b32.xlu0 %v1836_v30, %s6384_s17  ;;  %1855 = vrot.lane.b32.xlu1 %v1837_v19, %s6384_s17  ;;  %v1615_v30 = vmul.f32 %v7302_v34, %v7593_v4  ;;  %v7677_v19 = vstv %s5806_s26  ;;  %s5808_s26 = sld [smem:[#allocation2 + $0xe]] }
 0x1f6   :  { %v7667_v2 = vpop.permute.xlu0 %1134  ;;  %v7669_v48 = vpop.permute.xlu1 %1572 }
 0x1f7   :  { %11984 = vst [vmem:[#allocation157_spill] sm:$0xff] %v7667_v2  ;;  %11985 = vst [vmem:[#allocation158_spill] sm:$0xff] %v7669_v48 }
 0x1f8   :  { %740 = vrot.lane.b32.xlu0 %v717_v6, %s6379_s24  ;;  %1182 = vrot.lane.b32.xlu1 %v1163_v12, %s6381_s9  ;;  %v1616_v6 = vmul.f32 %v7317_v24, %v7593_v4  ;;  %v2629_v12 = vmul.f32 %v7186_v20, %v7677_v19 }
 0x1fa   :  { %v7679_v62 = vpop.permute.xlu0 %1574  ;;  %v7681_v53 = vpop.permute.xlu1 %1576 }
 0x1fb   :  { %11986 = vst [vmem:[#allocation159_spill] sm:$0xff] %v7679_v62  ;;  %11987 = vst [vmem:[#allocation160_spill] sm:$0xff] %v7681_v53  ;;  %v2630_v53 = vmul.f32 %v7193_v1, %v7677_v19 }
 0x1fc   :  { %1634 = vrot.lane.b32.xlu0 %v1614_v61, %s6383_s13  ;;  %1636 = vrot.lane.b32.xlu1 %v1615_v30, %s6383_s13  ;;  %v2631_v61 = vmul.f32 %v7206_v7, %v7677_v19 }
 0x1fe   :  { %v7689_v48 = vpop.permute.xlu0 %1128  ;;  %v7691_v2 = vpop.permute.xlu1 %1570 }
 0x1ff   :  { %11988 = vst [vmem:[#allocation161_spill] sm:$0xff] %v7689_v48  ;;  %11989 = vst [vmem:[#allocation162_spill] sm:$0xff] %v7691_v2  ;;  %v2628_v2 = vmul.f32 %v7223_v26, %v7677_v19 }
 0x200   :  { %1638 = vrot.lane.b32.xlu0 %v1616_v6, %s6383_s13  ;;  %2646 = vrot.lane.b32.xlu1 %v2629_v12, %s6377_s15  ;;  %v942_v6 = vmul.f32 %v7354_v18, %v7395_v39  ;;  %v1840_v39 = vmul.f32 %v7302_v34, %v7635_v3 }
 0x202   :  { %v7699_v30 = vpop.permute.xlu0 %509  ;;  %v7701_v62 = vpop.permute.xlu1 %511 }
 0x203   :  { %11990 = vst [vmem:[#allocation163_spill] sm:$0xff] %v7699_v30  ;;  %11991 = vst [vmem:[#allocation164_spill] sm:$0xff] %v7701_v62 }
 0x204   :  { %2648 = vrot.lane.b32.xlu0 %v2630_v53, %s6377_s15  ;;  %2650 = vrot.lane.b32.xlu1 %v2631_v61, %s6377_s15  ;;  %v1388_v53 = vmul.f32 %v7206_v7, %v7531_v29  ;;  %v1839_v61 = vmul.f32 %v7379_v25, %v7635_v3 }
 0x206   :  { %v7709_v12 = vpop.permute.xlu0 %513  ;;  %v7711_v48 = vpop.permute.xlu1 %951 }
 0x207   :  { %11992 = vst [vmem:[#allocation165_spill] sm:$0xff] %v7709_v12  ;;  %11993 = vst [vmem:[#allocation166_spill] sm:$0xff] %v7711_v48 }
 0x208   :  { %2644 = vrot.lane.b32.xlu0 %v2628_v2, %s6377_s15  ;;  %965 = vrot.lane.b32.xlu1 %v942_v6, %s6380_s29  ;;  %v1841_v2 = vmul.f32 %v7317_v24, %v7635_v3  ;;  %v7729_v6 = vstv %s5810_s27  ;;  %s5812_s27 = sld [smem:[#allocation2 + $0x16]] }
 0x20a   :  { %v7719_v30 = vpop.permute.xlu0 %953  ;;  %v7721_v62 = vpop.permute.xlu1 %955 }
 0x20b   :  { %11994 = vst [vmem:[#allocation167_spill] sm:$0xff] %v7719_v30  ;;  %11995 = vst [vmem:[#allocation168_spill] sm:$0xff] %v7721_v62 }
 0x20c   :  { %1407 = vrot.lane.b32.xlu0 %v1388_v53, %s6382_s10  ;;  %1859 = vrot.lane.b32.xlu1 %v1839_v61, %s6384_s17  ;;  %v2853_v53 = vmul.f32 %v7186_v20, %v7729_v6  ;;  %v2854_v61 = vmul.f32 %v7193_v1, %v7729_v6 }
 0x20e   :  { %v7731_v48 = vpop.permute.xlu0 %1355  ;;  %v7733_v12 = vpop.permute.xlu1 %1357 }
 0x20f   :  { %11996 = vst [vmem:[#allocation169_spill] sm:$0xff] %v7731_v48  ;;  %11997 = vst [vmem:[#allocation170_spill] sm:$0xff] %v7733_v12  ;;  %v2855_v48 = vmul.f32 %v7206_v7, %v7729_v6 }
 0x210   :  { %1861 = vrot.lane.b32.xlu0 %v1840_v39, %s6384_s17  ;;  %1863 = vrot.lane.b32.xlu1 %v1841_v2, %s6384_s17  ;;  %v2852_v39 = vmul.f32 %v7223_v26, %v7729_v6 }
 0x212   :  { %v7741_v62 = vpop.permute.xlu0 %1359  ;;  %v7743_v30 = vpop.permute.xlu1 %1797 }
 0x213   :  { %11998 = vst [vmem:[#allocation171_spill] sm:$0xff] %v7741_v62  ;;  %11999 = vst [vmem:[#allocation172_spill] sm:$0xff] %v7743_v30 }
 0x214   :  { %2870 = vrot.lane.b32.xlu0 %v2853_v53, %s6378_s19  ;;  %2872 = vrot.lane.b32.xlu1 %v2854_v61, %s6378_s19  ;;  %v1167_v53 = vmul.f32 %v7354_v18, %v7479_v0  ;;  %v1613_v61 = vmul.f32 %v7206_v7, %v7593_v4 }
 0x216   :  { %v7751_v2 = vpop.permute.xlu0 %1799  ;;  %v7753_v12 = vpop.permute.xlu1 %1801 }
 0x217   :  { %12000 = vst [vmem:[#allocation173_spill] sm:$0xff] %v7751_v2  ;;  %12001 = vst [vmem:[#allocation174_spill] sm:$0xff] %v7753_v12  ;;  %v2633_v12 = vmul.f32 %v7302_v34, %v7677_v19 }
 0x218   :  { %2874 = vrot.lane.b32.xlu0 %v2855_v48, %s6378_s19  ;;  %2868 = vrot.lane.b32.xlu1 %v2852_v39, %s6378_s19  ;;  %v2634_v48 = vmul.f32 %v7317_v24, %v7677_v19  ;;  %v7771_v39 = vstv %s5814_s28  ;;  %s5816_s28 = sld [smem:[#allocation2 + $0x1e]] }
 0x21a   :  { %v7761_v62 = vpop.permute.xlu0 %1353  ;;  %v7763_v30 = vpop.permute.xlu1 %1795 }
 0x21b   :  { %12002 = vst [vmem:[#allocation175_spill] sm:$0xff] %v7761_v62  ;;  %12003 = vst [vmem:[#allocation176_spill] sm:$0xff] %v7763_v30 }
 0x21c   :  { %1190 = vrot.lane.b32.xlu0 %v1167_v53, %s6381_s9  ;;  %1632 = vrot.lane.b32.xlu1 %v1613_v61, %s6383_s13  ;;  %v2635_v53 = vmul.f32 %v7354_v18, %v7677_v19  ;;  %v3077_v61 = vmul.f32 %v7186_v20, %v7771_v39 }
 0x21e   :  { %v7773_v0 = vpop.permute.xlu0 %282  ;;  %v7775_v2 = vpop.permute.xlu1 %734 }
 0x21f   :  { %12004 = vst [vmem:[#allocation177_spill] sm:$0xff] %v7773_v0  ;;  %12005 = vst [vmem:[#allocation178_spill] sm:$0xff] %v7775_v2  ;;  %v3078_v2 = vmul.f32 %v7193_v1, %v7771_v39 }
 0x220   :  { %2654 = vrot.lane.b32.xlu0 %v2633_v12, %s6377_s15  ;;  %2656 = vrot.lane.b32.xlu1 %v2634_v48, %s6377_s15  ;;  %v3079_v12 = vmul.f32 %v7206_v7, %v7771_v39 }
 0x222   :  { %v7783_v62 = vpop.permute.xlu0 %736  ;;  %v7785_v30 = vpop.permute.xlu1 %738 }
 0x223   :  { %12006 = vst [vmem:[#allocation179_spill] sm:$0xff] %v7783_v62  ;;  %12007 = vst [vmem:[#allocation180_spill] sm:$0xff] %v7785_v30  ;;  %v2632_v30 = vmul.f32 %v7379_v25, %v7677_v19 }
 0x224   :  { %2658 = vrot.lane.b32.xlu0 %v2635_v53, %s6377_s15  ;;  %3094 = vrot.lane.b32.xlu1 %v3077_v61, %s6379_s24  ;;  %v3076_v53 = vmul.f32 %v7223_v26, %v7771_v39 }
 0x226   :  { %v7793_v48 = vpop.permute.xlu0 %1176  ;;  %v7795_v0 = vpop.permute.xlu1 %1178 }
 0x227   :  { %12008 = vst [vmem:[#allocation181_spill] sm:$0xff] %v7793_v48  ;;  %12009 = vst [vmem:[#allocation182_spill] sm:$0xff] %v7795_v0 }
 0x228   :  { %3096 = vrot.lane.b32.xlu0 %v3078_v2, %s6379_s24  ;;  %3098 = vrot.lane.b32.xlu1 %v3079_v12, %s6379_s24  ;;  %v1392_v2 = vmul.f32 %v7354_v18, %v7531_v29  ;;  %v1838_v12 = vmul.f32 %v7206_v7, %v7635_v3 }
 0x22a   :  { %v7803_v61 = vpop.permute.xlu0 %1180  ;;  %v7805_v62 = vpop.permute.xlu1 %1580 }
 0x22b   :  { %12010 = vst [vmem:[#allocation183_spill] sm:$0xff] %v7803_v61  ;;  %12011 = vst [vmem:[#allocation184_spill] sm:$0xff] %v7805_v62  ;;  %v2857_v61 = vmul.f32 %v7302_v34, %v7729_v6 }
 0x22c   :  { %2652 = vrot.lane.b32.xlu0 %v2632_v30, %s6377_s15  ;;  %3092 = vrot.lane.b32.xlu1 %v3076_v53, %s6379_s24  ;;  %v2858_v30 = vmul.f32 %v7317_v24, %v7729_v6  ;;  %v7823_v53 = vstv %s5818_s30  ;;  %s8546_s30 = sld [smem:[#allocation2 + $0x26]] }
 0x22e   :  { %v7813_v48 = vpop.permute.xlu0 %1582  ;;  %v7815_v19 = vpop.permute.xlu1 %1584 }
 0x22f   :  { %12012 = vst [vmem:[#allocation185_spill] sm:$0xff] %v7813_v48  ;;  %12013 = vst [vmem:[#allocation186_spill] sm:$0xff] %v7815_v19 }
 0x230   :  { %1415 = vrot.lane.b32.xlu0 %v1392_v2, %s6382_s10  ;;  %1857 = vrot.lane.b32.xlu1 %v1838_v12, %s6384_s17  ;;  %v2859_v2 = vmul.f32 %v7354_v18, %v7729_v6  ;;  %v3301_v12 = vmul.f32 %v7186_v20, %v7823_v53 }
 0x232   :  { %v7825_v29 = vpop.permute.xlu0 %1578  ;;  %v7827_v0 = vpop.permute.xlu1 %507 }
 0x233   :  { %12014 = vst [vmem:[#allocation187_spill] sm:$0xff] %v7825_v29  ;;  %12015 = vst [vmem:[#allocation188_spill] sm:$0xff] %v7827_v0 }
 0x234   :  { %2878 = vrot.lane.b32.xlu0 %v2857_v61, %s6378_s19  ;;  %2880 = vrot.lane.b32.xlu1 %v2858_v30, %s6378_s19  ;;  %v3302_v61 = vmul.f32 %v7193_v1, %v7823_v53  ;;  %v3303_v30 = vmul.f32 %v7206_v7, %v7823_v53 }
 0x236   :  { %v7835_v19 = vpop.permute.xlu0 %959  ;;  %v7837_v62 = vpop.permute.xlu1 %961 }
 0x237   :  { %12016 = vst [vmem:[#allocation189_spill] sm:$0xff] %v7835_v19  ;;  %12017 = vst [vmem:[#allocation190_spill] sm:$0xff] %v7837_v62  ;;  %v2856_v19 = vmul.f32 %v7379_v25, %v7729_v6 }
 0x238   :  { %2882 = vrot.lane.b32.xlu0 %v2859_v2, %s6378_s19  ;;  %3318 = vrot.lane.b32.xlu1 %v3301_v12, %s6380_s29  ;;  %v3300_v2 = vmul.f32 %v7223_v26, %v7823_v53  ;;  %v7855_v12 = vstv %s5807_s8  ;;  %s5823_s8 = sld [smem:[#allocation2 + $0x2d]] }
 0x23a   :  { %v7845_v0 = vpop.permute.xlu0 %963  ;;  %v7847_v29 = vpop.permute.xlu1 %1401 }
 0x23b   :  { %12018 = vst [vmem:[#allocation191_spill] sm:$0xff] %v7845_v0  ;;  %12019 = vst [vmem:[#allocation192_spill] sm:$0xff] %v7847_v29 }
 0x23c   :  { %3320 = vrot.lane.b32.xlu0 %v3302_v61, %s6380_s29  ;;  %3322 = vrot.lane.b32.xlu1 %v3303_v30, %s6380_s29  ;;  %v1617_v61 = vmul.f32 %v7354_v18, %v7593_v4  ;;  %v2684_v30 = vmul.f32 %v7223_v26, %v7855_v12 }
 0x23e   :  { %v7857_v62 = vpop.permute.xlu0 %1403  ;;  %v7859_v48 = vpop.permute.xlu1 %1405 }
 0x23f   :  { %12020 = vst [vmem:[#allocation193_spill] sm:$0xff] %v7857_v62  ;;  %12021 = vst [vmem:[#allocation194_spill] sm:$0xff] %v7859_v48  ;;  %v3081_v62 = vmul.f32 %v7302_v34, %v7771_v39 }
 0x240   :  { %2876 = vrot.lane.b32.xlu0 %v2856_v19, %s6378_s19  ;;  %3316 = vrot.lane.b32.xlu1 %v3300_v2, %s6380_s29  ;;  %v2685_v19 = vmul.f32 %v7186_v20, %v7855_v12  ;;  %v2686_v2 = vmul.f32 %v7193_v1, %v7855_v12 }
 0x242   :  { %v7867_v6 = vpop.permute.xlu0 %1805  ;;  %v7869_v29 = vpop.permute.xlu1 %1807 }
 0x243   :  { %12022 = vst [vmem:[#allocation195_spill] sm:$0xff] %v7867_v6  ;;  %12023 = vst [vmem:[#allocation196_spill] sm:$0xff] %v7869_v29 }
 0x244   :  { %1640 = vrot.lane.b32.xlu0 %v1617_v61, %s6383_s13  ;;  %2700 = vrot.lane.b32.xlu1 %v2684_v30, %s6377_s15  ;;  %v3082_v61 = vmul.f32 %v7317_v24, %v7771_v39  ;;  %v7887_v30 = vstv %s5822_s1  ;;  %s9242_s1 = sld [smem:[#allocation2 + $0x3e]] }
 0x246   :  { %v7877_v48 = vpop.permute.xlu0 %1809  ;;  %v7879_v4 = vpop.permute.xlu1 %1803 }
 0x247   :  { %12024 = vst [vmem:[#allocation197_spill] sm:$0xff] %v7877_v48  ;;  %12025 = vst [vmem:[#allocation198_spill] sm:$0xff] %v7879_v4 }
 0x248   :  { %2702 = vrot.lane.b32.xlu0 %v2685_v19, %s6377_s15  ;;  %2704 = vrot.lane.b32.xlu1 %v2686_v2, %s6377_s15  ;;  %v3083_v19 = vmul.f32 %v7354_v18, %v7771_v39  ;;  %v3525_v2 = vmul.f32 %v7186_v20, %v7887_v30 }
 0x24a   :  { %v7889_v0 = vpop.permute.xlu0 %290  ;;  %v7891_v6 = vpop.permute.xlu1 %732 }
 0x24b   :  { %12026 = vst [vmem:[#allocation199_spill] sm:$0xff] %v7889_v0  ;;  %12027 = vst [vmem:[#allocation200_spill] sm:$0xff] %v7891_v6 }
 0x24c   :  { %3102 = vrot.lane.b32.xlu0 %v3081_v62, %s6379_s24  ;;  %3104 = vrot.lane.b32.xlu1 %v3082_v61, %s6379_s24  ;;  %v3526_v62 = vmul.f32 %v7193_v1, %v7887_v30  ;;  %v3527_v61 = vmul.f32 %v7206_v7, %v7887_v30 }
 0x24e   :  { %v7899_v4 = vpop.permute.xlu0 %1184  ;;  %v7901_v48 = vpop.permute.xlu1 %1186 }
 0x24f   :  { %12028 = vst [vmem:[#allocation201_spill] sm:$0xff] %v7899_v4  ;;  %12029 = vst [vmem:[#allocation202_spill] sm:$0xff] %v7901_v48  ;;  %v3080_v4 = vmul.f32 %v7379_v25, %v7771_v39 }
 0x250   :  { %3106 = vrot.lane.b32.xlu0 %v3083_v19, %s6379_s24  ;;  %3542 = vrot.lane.b32.xlu1 %v3525_v2, %s6381_s9  ;;  %v3524_v19 = vmul.f32 %v7223_v26, %v7887_v30  ;;  %v7919_v2 = vstv %s5811_s11  ;;  %s10069_s11 = sld [smem:[#allocation2 + $0x3f]] }
 0x252   :  { %v7909_v6 = vpop.permute.xlu0 %1188  ;;  %v7911_v0 = vpop.permute.xlu1 %1626 }
 0x253   :  { %12030 = vst [vmem:[#allocation203_spill] sm:$0xff] %v7909_v6  ;;  %12031 = vst [vmem:[#allocation204_spill] sm:$0xff] %v7911_v0 }
 0x254   :  { %3544 = vrot.lane.b32.xlu0 %v3526_v62, %s6381_s9  ;;  %3546 = vrot.lane.b32.xlu1 %v3527_v61, %s6381_s9  ;;  %v1842_v62 = vmul.f32 %v7354_v18, %v7635_v3  ;;  %v2908_v61 = vmul.f32 %v7223_v26, %v7919_v2 }
 0x256   :  { %v7921_v48 = vpop.permute.xlu0 %1628  ;;  %v7923_v29 = vpop.permute.xlu1 %1630 }
 0x257   :  { %12032 = vst [vmem:[#allocation205_spill] sm:$0xff] %v7921_v48  ;;  %12033 = vst [vmem:[#allocation206_spill] sm:$0xff] %v7923_v29 }
 0x258   :  { %3100 = vrot.lane.b32.xlu0 %v3080_v4, %s6379_s24  ;;  %3540 = vrot.lane.b32.xlu1 %v3524_v19, %s6381_s9  ;;  %v2909_v4 = vmul.f32 %v7186_v20, %v7919_v2  ;;  %v2910_v19 = vmul.f32 %v7193_v1, %v7919_v2 }
 0x25a   :  { %v7931_v39 = vpop.permute.xlu0 %515  ;;  %v7933_v6 = vpop.permute.xlu1 %957 }
 0x25b   :  { %12034 = vst [vmem:[#allocation207_spill] sm:$0xff] %v7931_v39  ;;  %12035 = vst [vmem:[#allocation208_spill] sm:$0xff] %v7933_v6  ;;  %v3305_v6 = vmul.f32 %v7302_v34, %v7823_v53 }
 0x25c   :  { %1865 = vrot.lane.b32.xlu0 %v1842_v62, %s6384_s17  ;;  %2924 = vrot.lane.b32.xlu1 %v2908_v61, %s6378_s19  ;;  %v3306_v62 = vmul.f32 %v7317_v24, %v7823_v53  ;;  %v7951_v61 = vstv %s5826_s12 }
 0x25e   :  { %v7941_v29 = vpop.permute.xlu0 %1409  ;;  %v7943_v3 = vpop.permute.xlu1 %1411 }
 0x25f   :  { %12036 = vst [vmem:[#allocation209_spill] sm:$0xff] %v7941_v29  ;;  %12037 = vst [vmem:[#allocation210_spill] sm:$0xff] %v7943_v3 }
 0x260   :  { %2926 = vrot.lane.b32.xlu0 %v2909_v4, %s6378_s19  ;;  %2928 = vrot.lane.b32.xlu1 %v2910_v19, %s6378_s19  ;;  %v3307_v4 = vmul.f32 %v7354_v18, %v7823_v53  ;;  %v3749_v19 = vmul.f32 %v7186_v20, %v7951_v61 }
 0x262   :  { %v7953_v39 = vpop.permute.xlu0 %1413  ;;  %v7955_v0 = vpop.permute.xlu1 %1851 }
 0x263   :  { %12038 = vst [vmem:[#allocation211_spill] sm:$0xff] %v7953_v39  ;;  %12039 = vst [vmem:[#allocation212_spill] sm:$0xff] %v7955_v0  ;;  %v3750_v39 = vmul.f32 %v7193_v1, %v7951_v61 }
 0x264   :  { %3326 = vrot.lane.b32.xlu0 %v3305_v6, %s6380_s29  ;;  %3328 = vrot.lane.b32.xlu1 %v3306_v62, %s6380_s29  ;;  %v3751_v6 = vmul.f32 %v7206_v7, %v7951_v61 }
 0x266   :  { %v7963_v29 = vpop.permute.xlu0 %1853  ;;  %v7965_v3 = vpop.permute.xlu1 %1855 }
 0x267   :  { %12040 = vst [vmem:[#allocation213_spill] sm:$0xff] %v7963_v29  ;;  %12041 = vst [vmem:[#allocation214_spill] sm:$0xff] %v7965_v3 }
 0x268   :  { %3330 = vrot.lane.b32.xlu0 %v3307_v4, %s6380_s29  ;;  %3766 = vrot.lane.b32.xlu1 %v3749_v19, %s6382_s10  ;;  %v3304_v4 = vmul.f32 %v7379_v25, %v7823_v53  ;;  %v3748_v19 = vmul.f32 %v7223_v26, %v7951_v61 }
 0x26a   :  { %v7973_v62 = vpop.permute.xlu0 %740  ;;  %v7975_v0 = vpop.permute.xlu1 %1182 }
 0x26b   :  { %12042 = vst [vmem:[#allocation215_spill] sm:$0xff] %v7973_v62  ;;  %12043 = vst [vmem:[#allocation216_spill] sm:$0xff] %v7975_v0  ;;  %v2688_v0 = vmul.f32 %v7379_v25, %v7855_v12 }
 0x26c   :  { %3768 = vrot.lane.b32.xlu0 %v3750_v39, %s6382_s10  ;;  %3770 = vrot.lane.b32.xlu1 %v3751_v6, %s6382_s10  ;;  %v2689_v39 = vmul.f32 %v7302_v34, %v7855_v12  ;;  %v7993_v6 = vstv %s5815_s14  ;;  %s8975_s14 = sld [smem:[#allocation2 + $0x36]] }
 0x26e   :  { %v7983_v3 = vpop.permute.xlu0 %1634  ;;  %v7985_v29 = vpop.permute.xlu1 %1636 }
 0x26f   :  { %12044 = vst [vmem:[#allocation217_spill] sm:$0xff] %v7983_v3  ;;  %12045 = vst [vmem:[#allocation218_spill] sm:$0xff] %v7985_v29 }
 0x270   :  { %3324 = vrot.lane.b32.xlu0 %v3304_v4, %s6380_s29  ;;  %3764 = vrot.lane.b32.xlu1 %v3748_v19, %s6382_s10  ;;  %v2690_v4 = vmul.f32 %v7317_v24, %v7855_v12  ;;  %v3132_v19 = vmul.f32 %v7223_v26, %v7993_v6 }
 0x272   :  { %v7995_v53 = vpop.permute.xlu0 %1638  ;;  %v7997_v62 = vpop.permute.xlu1 %2646 }
 0x273   :  { %12046 = vst [vmem:[#allocation219_spill] sm:$0xff] %v7995_v53  ;;  %12047 = vst [vmem:[#allocation220_spill] sm:$0xff] %v7997_v62 }
 0x274   :  { %2708 = vrot.lane.b32.xlu0 %v2688_v0, %s6377_s15  ;;  %2710 = vrot.lane.b32.xlu1 %v2689_v39, %s6377_s15  ;;  %v3133_v0 = vmul.f32 %v7186_v20, %v7993_v6  ;;  %v3134_v39 = vmul.f32 %v7193_v1, %v7993_v6 }
 0x276   :  { %v8005_v3 = vpop.permute.xlu0 %2648  ;;  %v8007_v29 = vpop.permute.xlu1 %2650 }
 0x277   :  { %12048 = vst [vmem:[#allocation221_spill] sm:$0xff] %v8005_v3  ;;  %12049 = vst [vmem:[#allocation222_spill] sm:$0xff] %v8007_v29  ;;  %v3529_v29 = vmul.f32 %v7302_v34, %v7887_v30 }
 0x278   :  { %2712 = vrot.lane.b32.xlu0 %v2690_v4, %s6377_s15  ;;  %3148 = vrot.lane.b32.xlu1 %v3132_v19, %s6379_s24  ;;  %v3530_v4 = vmul.f32 %v7317_v24, %v7887_v30  ;;  %v8025_v19 = vstv %s5830_s16  ;;  %s5827_s16 = sld [smem:[#allocation2 + $0x35]] }
 0x27a   :  { %v8015_v62 = vpop.permute.xlu0 %2644  ;;  %v8017_v53 = vpop.permute.xlu1 %965 }
 0x27b   :  { %12050 = vst [vmem:[#allocation223_spill] sm:$0xff] %v8015_v62  ;;  %12051 = vst [vmem:[#allocation224_spill] sm:$0xff] %v8017_v53 }
 0x27c   :  { %3150 = vrot.lane.b32.xlu0 %v3133_v0, %s6379_s24  ;;  %3152 = vrot.lane.b32.xlu1 %v3134_v39, %s6379_s24  ;;  %v3531_v0 = vmul.f32 %v7354_v18, %v7887_v30  ;;  %v3973_v39 = vmul.f32 %v7186_v20, %v8025_v19  ;;  %v3528_v20 = vmul.f32 %v7379_v25, %v7887_v30 }
 0x27e   :  { %v8027_v3 = vpop.permute.xlu0 %1407  ;;  %v8029_v48 = vpop.permute.xlu1 %1859 }
 0x27f   :  { %12052 = vst [vmem:[#allocation225_spill] sm:$0xff] %v8027_v3  ;;  %12053 = vst [vmem:[#allocation226_spill] sm:$0xff] %v8029_v48  ;;  %v3974_v3 = vmul.f32 %v7193_v1, %v8025_v19 }
 0x280   :  { %3550 = vrot.lane.b32.xlu0 %v3529_v29, %s6381_s9  ;;  %3552 = vrot.lane.b32.xlu1 %v3530_v4, %s6381_s9  ;;  %v3975_v29 = vmul.f32 %v7206_v7, %v8025_v19  ;;  %v2912_v7 = vmul.f32 %v7379_v25, %v7919_v2 }
 0x282   :  { %v8037_v53 = vpop.permute.xlu0 %1861  ;;  %v8039_v62 = vpop.permute.xlu1 %1863 }
 0x283   :  { %12054 = vst [vmem:[#allocation227_spill] sm:$0xff] %v8037_v53  ;;  %12055 = vst [vmem:[#allocation228_spill] sm:$0xff] %v8039_v62 }
 0x284   :  { %3554 = vrot.lane.b32.xlu0 %v3531_v0, %s6381_s9  ;;  %3990 = vrot.lane.b32.xlu1 %v3973_v39, %s6383_s13  ;;  %v3972_v0 = vmul.f32 %v7223_v26, %v8025_v19  ;;  %v2914_v26 = vmul.f32 %v7317_v24, %v7919_v2 }
 0x286   :  { %v8047_v4 = vpop.permute.xlu0 %2870  ;;  %v8049_v48 = vpop.permute.xlu1 %2872 }
 0x287   :  { %12056 = vst [vmem:[#allocation229_spill] sm:$0xff] %v8047_v4  ;;  %12057 = vst [vmem:[#allocation230_spill] sm:$0xff] %v8049_v48  ;;  %v3754_v48 = vmul.f32 %v7317_v24, %v7951_v61 }
 0x288   :  { %3992 = vrot.lane.b32.xlu0 %v3974_v3, %s6383_s13  ;;  %3994 = vrot.lane.b32.xlu1 %v3975_v29, %s6383_s13  ;;  %v2913_v3 = vmul.f32 %v7302_v34, %v7919_v2  ;;  %v8067_v29 = vstv %s5819_s18  ;;  %s9422_s18 = sld [smem:[#allocation2 + $0x4a]] }
 0x28a   :  { %v8057_v39 = vpop.permute.xlu0 %2874  ;;  %v8059_v1 = vpop.permute.xlu1 %2868 }
 0x28b   :  { %12058 = vst [vmem:[#allocation231_spill] sm:$0xff] %v8057_v39  ;;  %12059 = vst [vmem:[#allocation232_spill] sm:$0xff] %v8059_v1  ;;  %v8100_v39 = vld [vmem:[%s11514_s0 + $0x10] sm:$0xff] }
 0x28c   :  { %3548 = vrot.lane.b32.xlu0 %v3528_v20, %s6381_s9  ;;  %3988 = vrot.lane.b32.xlu1 %v3972_v0, %s6383_s13  ;;  %v8080_v20 = vld [vmem:[%s11514_s0] sm:$0xff] }
 0x28d   :  { %v3356_v0 = vmul.f32 %v8080_v20, %v8067_v29 }
 0x28e   :  { %v8069_v30 = vpop.permute.xlu0 %1190  ;;  %v8071_v4 = vpop.permute.xlu1 %1632 }
 0x28f   :  { %12060 = vst [vmem:[#allocation233_spill] sm:$0xff] %v8069_v30  ;;  %12061 = vst [vmem:[#allocation234_spill] sm:$0xff] %v8071_v4  ;;  %v8114_v4 = vstv %s5834_s22  ;;  %s5809_s22 = sld [smem:[#allocation2 + $0xf]] }
 0x290   :  { %2932 = vrot.lane.b32.xlu0 %v2912_v7, %s6378_s19  ;;  %2934 = vrot.lane.b32.xlu1 %v2913_v3, %s6378_s19  ;;  %v8093_v7 = vld [vmem:[%s11514_s0 + $0x8] sm:$0xff] }
 0x291   :  { %v3357_v3 = vmul.f32 %v8093_v7, %v8067_v29 }
 0x292   :  { %v8084_v1 = vpop.permute.xlu0 %2654  ;;  %v8086_v30 = vpop.permute.xlu1 %2656 }
 0x293   :  { %12062 = vst [vmem:[#allocation235_spill] sm:$0xff] %v8084_v1  ;;  %12063 = vst [vmem:[#allocation236_spill] sm:$0xff] %v8086_v30  ;;  %v3358_v1 = vmul.f32 %v8100_v39, %v8067_v29 }
 0x294   :  { %2936 = vrot.lane.b32.xlu0 %v2914_v26, %s6378_s19  ;;  %3372 = vrot.lane.b32.xlu1 %v3356_v0, %s6380_s29  ;;  %v3753_v0 = vmul.f32 %v7302_v34, %v7951_v61 }
 0x296   :  { %v8104_v30 = vpop.permute.xlu0 %2658  ;;  %v8106_v26 = vpop.permute.xlu1 %3094 }
 0x297   :  { %12064 = vst [vmem:[#allocation237_spill] sm:$0xff] %v8104_v30  ;;  %12065 = vst [vmem:[#allocation238_spill] sm:$0xff] %v8106_v26 }
 0x298   :  { %3374 = vrot.lane.b32.xlu0 %v3357_v3, %s6380_s29  ;;  %3376 = vrot.lane.b32.xlu1 %v3358_v1, %s6380_s29  ;;  %v3755_v3 = vmul.f32 %v7354_v18, %v7951_v61  ;;  %v4197_v1 = vmul.f32 %v8093_v7, %v8114_v4 }
 0x29a   :  { %v8116_v62 = vpop.permute.xlu0 %3096  ;;  %v8118_v53 = vpop.permute.xlu1 %3098 }
 0x29b   :  { %12066 = vst [vmem:[#allocation239_spill] sm:$0xff] %v8116_v62  ;;  %12067 = vst [vmem:[#allocation240_spill] sm:$0xff] %v8118_v53  ;;  %v4198_v53 = vmul.f32 %v8100_v39, %v8114_v4 }
 0x29c   :  { %3774 = vrot.lane.b32.xlu0 %v3753_v0, %s6382_s10  ;;  %3776 = vrot.lane.b32.xlu1 %v3754_v48, %s6382_s10  ;;  %v8137_v48 = vld [vmem:[%s11514_s0 + $0x18] sm:$0xff] }
 0x29d   :  { %v4199_v0 = vmul.f32 %v8137_v48, %v8114_v4 }
 0x29e   :  { %v8126_v34 = vpop.permute.xlu0 %2652  ;;  %v8128_v26 = vpop.permute.xlu1 %3092 }
 0x29f   :  { %12068 = vst [vmem:[#allocation241_spill] sm:$0xff] %v8126_v34  ;;  %12069 = vst [vmem:[#allocation242_spill] sm:$0xff] %v8128_v26 }
 0x2a0   :  { %3778 = vrot.lane.b32.xlu0 %v3755_v3, %s6382_s10  ;;  %4214 = vrot.lane.b32.xlu1 %v4197_v1, %s6384_s17  ;;  %v3752_v3 = vmul.f32 %v7379_v25, %v7951_v61  ;;  %v4196_v1 = vmul.f32 %v8080_v20, %v8114_v4 }
 0x2a2   :  { %v8141_v62 = vpop.permute.xlu0 %1415  ;;  %v8143_v34 = vpop.permute.xlu1 %1857 }
 0x2a3   :  { %12070 = vst [vmem:[#allocation243_spill] sm:$0xff] %v8141_v62  ;;  %12071 = vst [vmem:[#allocation244_spill] sm:$0xff] %v8143_v34 }
 0x2a4   :  { %4216 = vrot.lane.b32.xlu0 %v4198_v53, %s6384_s17  ;;  %4218 = vrot.lane.b32.xlu1 %v4199_v0, %s6384_s17  ;;  %v2687_v53 = vmul.f32 %v8137_v48, %v7855_v12  ;;  %v3136_v0 = vmul.f32 %v7379_v25, %v7993_v6 }
 0x2a6   :  { %v8151_v26 = vpop.permute.xlu0 %2878  ;;  %v8153_v30 = vpop.permute.xlu1 %2880 }
 0x2a7   :  { %12072 = vst [vmem:[#allocation245_spill] sm:$0xff] %v8151_v26  ;;  %12073 = vst [vmem:[#allocation246_spill] sm:$0xff] %v8153_v30  ;;  %v3138_v26 = vmul.f32 %v7317_v24, %v7993_v6  ;;  %v8176_v30 = vstv %s5823_s8 }
 0x2a8   :  { %3772 = vrot.lane.b32.xlu0 %v3752_v3, %s6382_s10  ;;  %4212 = vrot.lane.b32.xlu1 %v4196_v1, %s6384_s17  ;;  %v8170_v3 = vld [vmem:[%s11514_s0 + $0x28] sm:$0xff]  ;;  %v3582_v24 = vmul.f32 %v8100_v39, %v8176_v30 }
 0x2a9   :  { %v3137_v1 = vmul.f32 %v8170_v3, %v7993_v6 }
 0x2aa   :  { %v8161_v62 = vpop.permute.xlu0 %2882  ;;  %v8163_v61 = vpop.permute.xlu1 %3318 }
 0x2ab   :  { %12074 = vst [vmem:[#allocation247_spill] sm:$0xff] %v8161_v62  ;;  %12075 = vst [vmem:[#allocation248_spill] sm:$0xff] %v8163_v61 }
 0x2ac   :  { %2706 = vrot.lane.b32.xlu0 %v2687_v53, %s6377_s15  ;;  %3156 = vrot.lane.b32.xlu1 %v3136_v0, %s6379_s24  ;;  %v3580_v53 = vmul.f32 %v8080_v20, %v8176_v30  ;;  %v3581_v0 = vmul.f32 %v8093_v7, %v8176_v30 }
 0x2ae   :  { %v8178_v62 = vpop.permute.xlu0 %3320  ;;  %v8180_v61 = vpop.permute.xlu1 %3322 }
 0x2af   :  { %12076 = vst [vmem:[#allocation249_spill] sm:$0xff] %v8178_v62  ;;  %12077 = vst [vmem:[#allocation250_spill] sm:$0xff] %v8180_v61 }
 0x2b0   :  { %3158 = vrot.lane.b32.xlu0 %v3137_v1, %s6379_s24  ;;  %3160 = vrot.lane.b32.xlu1 %v3138_v26, %s6379_s24  ;;  %v3977_v26 = vmul.f32 %v8170_v3, %v8025_v19 }
 0x2b2   :  { %v8188_v34 = vpop.permute.xlu0 %2876  ;;  %v8190_v15 = vpop.permute.xlu1 %3316 }
 0x2b3   :  { %12078 = vst [vmem:[#allocation251_spill] sm:$0xff] %v8188_v34  ;;  %12079 = vst [vmem:[#allocation252_spill] sm:$0xff] %v8190_v15  ;;  %v3979_v15 = vmul.f32 %v7354_v18, %v8025_v19  ;;  %v3360_v18 = vmul.f32 %v7379_v25, %v8067_v29 }
 0x2b4   :  { %3596 = vrot.lane.b32.xlu0 %v3580_v53, %s6381_s9  ;;  %3598 = vrot.lane.b32.xlu1 %v3581_v0, %s6381_s9  ;;  %v8207_v53 = vld [vmem:[%s11514_s0 + $0x30] sm:$0xff] }
 0x2b5   :  { %v3978_v0 = vmul.f32 %v8207_v53, %v8025_v19 }
 0x2b6   :  { %v8198_v1 = vpop.permute.xlu0 %1640  ;;  %v8200_v61 = vpop.permute.xlu1 %2700 }
 0x2b7   :  { %12080 = vst [vmem:[#allocation253_spill] sm:$0xff] %v8198_v1  ;;  %12081 = vst [vmem:[#allocation254_spill] sm:$0xff] %v8200_v61 }
 0x2b8   :  { %3600 = vrot.lane.b32.xlu0 %v3582_v24, %s6381_s9  ;;  %3998 = vrot.lane.b32.xlu1 %v3977_v26, %s6383_s13  ;;  %v3976_v24 = vmul.f32 %v7379_v25, %v8025_v19  ;;  %v2911_v26 = vmul.f32 %v8137_v48, %v7919_v2 }
 0x2ba   :  { %v8213_v34 = vpop.permute.xlu0 %2702  ;;  %v8215_v1 = vpop.permute.xlu1 %2704 }
 0x2bb   :  { %12082 = vst [vmem:[#allocation255_spill] sm:$0xff] %v8213_v34  ;;  %12083 = vst [vmem:[#allocation256_spill] sm:$0xff] %v8215_v1 }
 0x2bc   :  { %4000 = vrot.lane.b32.xlu0 %v3978_v0, %s6383_s13  ;;  %4002 = vrot.lane.b32.xlu1 %v3979_v15, %s6383_s13  ;;  %v3361_v15 = vmul.f32 %v8170_v3, %v8067_v29  ;;  %v8233_v0 = vstv %s5827_s16  ;;  %s9396_s16 = sld [smem:[#allocation2 + $0x4]] }
 0x2be   :  { %v8223_v61 = vpop.permute.xlu0 %3102  ;;  %v8225_v62 = vpop.permute.xlu1 %3104 }
 0x2bf   :  { %12084 = vst [vmem:[#allocation257_spill] sm:$0xff] %v8223_v61  ;;  %12085 = vst [vmem:[#allocation258_spill] sm:$0xff] %v8225_v62  ;;  %v3135_v62 = vmul.f32 %v8137_v48, %v7993_v6 }
 0x2c0   :  { %3996 = vrot.lane.b32.xlu0 %v3976_v24, %s6383_s13  ;;  %2930 = vrot.lane.b32.xlu1 %v2911_v26, %s6378_s19  ;;  %v3362_v24 = vmul.f32 %v8207_v53, %v8067_v29  ;;  %v3804_v26 = vmul.f32 %v8080_v20, %v8233_v0 }
 0x2c2   :  { %v8235_v19 = vpop.permute.xlu0 %3106  ;;  %v8237_v1 = vpop.permute.xlu1 %3542 }
 0x2c3   :  { %12086 = vst [vmem:[#allocation259_spill] sm:$0xff] %v8235_v19  ;;  %12087 = vst [vmem:[#allocation260_spill] sm:$0xff] %v8237_v1  ;;  %v3805_v1 = vmul.f32 %v8093_v7, %v8233_v0 }
 0x2c4   :  { %3380 = vrot.lane.b32.xlu0 %v3360_v18, %s6380_s29  ;;  %3382 = vrot.lane.b32.xlu1 %v3361_v15, %s6380_s29  ;;  %v3806_v18 = vmul.f32 %v8100_v39, %v8233_v0 }
 0x2c6   :  { %v8245_v25 = vpop.permute.xlu0 %3544  ;;  %v8247_v61 = vpop.permute.xlu1 %3546 }
 0x2c7   :  { %12088 = vst [vmem:[#allocation261_spill] sm:$0xff] %v8245_v25  ;;  %12089 = vst [vmem:[#allocation262_spill] sm:$0xff] %v8247_v61  ;;  %v4201_v61 = vmul.f32 %v8170_v3, %v8114_v4 }
 0x2c8   :  { %3384 = vrot.lane.b32.xlu0 %v3362_v24, %s6380_s29  ;;  %3820 = vrot.lane.b32.xlu1 %v3804_v26, %s6382_s10  ;;  %v4202_v24 = vmul.f32 %v8207_v53, %v8114_v4 }
 0x2ca   :  { %v8255_v15 = vpop.permute.xlu0 %3100  ;;  %v8257_v19 = vpop.permute.xlu1 %3540 }
 0x2cb   :  { %12090 = vst [vmem:[#allocation263_spill] sm:$0xff] %v8255_v15  ;;  %12091 = vst [vmem:[#allocation264_spill] sm:$0xff] %v8257_v19  ;;  %v8281_v19 = vld [vmem:[%s11514_s0 + $0x20] sm:$0xff] }
 0x2cc   :  { %3822 = vrot.lane.b32.xlu0 %v3805_v1, %s6382_s10  ;;  %3824 = vrot.lane.b32.xlu1 %v3806_v18, %s6382_s10  ;;  %v8274_v1 = vld [vmem:[%s11514_s0 + $0x38] sm:$0xff] }
 0x2cd   :  { %v4203_v18 = vmul.f32 %v8274_v1, %v8114_v4  ;;  %v2691_v15 = vmul.f32 %v8274_v1, %v7855_v12 }
 0x2ce   :  { %v8265_v26 = vpop.permute.xlu0 %1865  ;;  %v8267_v25 = vpop.permute.xlu1 %2924 }
 0x2cf   :  { %12092 = vst [vmem:[#allocation265_spill] sm:$0xff] %v8265_v26  ;;  %12093 = vst [vmem:[#allocation266_spill] sm:$0xff] %v8267_v25  ;;  %v4200_v25 = vmul.f32 %v8281_v19, %v8114_v4  ;;  %v3584_v4 = vmul.f32 %v8281_v19, %v8176_v30 }
 0x2d0   :  { %4222 = vrot.lane.b32.xlu0 %v4201_v61, %s6384_s17  ;;  %4224 = vrot.lane.b32.xlu1 %v4202_v24, %s6384_s17 }
 0x2d2   :  { %v8285_v61 = vpop.permute.xlu0 %2926  ;;  %v8287_v24 = vpop.permute.xlu1 %2928 }
 0x2d3   :  { %12094 = vst [vmem:[#allocation267_spill] sm:$0xff] %v8285_v61  ;;  %12095 = vst [vmem:[#allocation268_spill] sm:$0xff] %v8287_v24 }
 0x2d4   :  { %4226 = vrot.lane.b32.xlu0 %v4203_v18, %s6384_s17  ;;  %4220 = vrot.lane.b32.xlu1 %v4200_v25, %s6384_s17  ;;  %v3585_v25 = vmul.f32 %v8170_v3, %v8176_v30  ;;  %v8305_v18 = vstv %s5831_s23  ;;  %s8705_s23 = sld [smem:[#allocation2 + $0x2]] }
 0x2d6   :  { %v8295_v26 = vpop.permute.xlu0 %3326  ;;  %v8297_v34 = vpop.permute.xlu1 %3328 }
 0x2d7   :  { %12096 = vst [vmem:[#allocation269_spill] sm:$0xff] %v8295_v26  ;;  %12097 = vst [vmem:[#allocation270_spill] sm:$0xff] %v8297_v34 }
 0x2d8   :  { %2714 = vrot.lane.b32.xlu0 %v2691_v15, %s6377_s15  ;;  %3154 = vrot.lane.b32.xlu1 %v3135_v62, %s6379_s24  ;;  %v3586_v15 = vmul.f32 %v8207_v53, %v8176_v30  ;;  %v4028_v62 = vmul.f32 %v8080_v20, %v8305_v18 }
 0x2da   :  { %v8307_v12 = vpop.permute.xlu0 %3330  ;;  %v8309_v24 = vpop.permute.xlu1 %3766 }
 0x2db   :  { %12098 = vst [vmem:[#allocation271_spill] sm:$0xff] %v8307_v12  ;;  %12099 = vst [vmem:[#allocation272_spill] sm:$0xff] %v8309_v24  ;;  %v4029_v24 = vmul.f32 %v8093_v7, %v8305_v18 }
 0x2dc   :  { %3604 = vrot.lane.b32.xlu0 %v3584_v4, %s6381_s9  ;;  %3606 = vrot.lane.b32.xlu1 %v3585_v25, %s6381_s9  ;;  %v4030_v4 = vmul.f32 %v8100_v39, %v8305_v18 }
 0x2de   :  { %v8317_v26 = vpop.permute.xlu0 %3768  ;;  %v8319_v34 = vpop.permute.xlu1 %3770 }
 0x2df   :  { %12100 = vst [vmem:[#allocation273_spill] sm:$0xff] %v8317_v26  ;;  %12101 = vst [vmem:[#allocation274_spill] sm:$0xff] %v8319_v34 }
 0x2e0   :  { %3608 = vrot.lane.b32.xlu0 %v3586_v15, %s6381_s9  ;;  %4044 = vrot.lane.b32.xlu1 %v4028_v62, %s6383_s13  ;;  %v2915_v15 = vmul.f32 %v8274_v1, %v7919_v2  ;;  %v3359_v62 = vmul.f32 %v8137_v48, %v8067_v29 }
 0x2e2   :  { %v8327_v25 = vpop.permute.xlu0 %3324  ;;  %v8329_v12 = vpop.permute.xlu1 %3764 }
 0x2e3   :  { %12102 = vst [vmem:[#allocation275_spill] sm:$0xff] %v8327_v25  ;;  %12103 = vst [vmem:[#allocation276_spill] sm:$0xff] %v8329_v12  ;;  %v3808_v12 = vmul.f32 %v8281_v19, %v8233_v0 }
 0x2e4   :  { %4046 = vrot.lane.b32.xlu0 %v4029_v24, %s6383_s13  ;;  %4048 = vrot.lane.b32.xlu1 %v4030_v4, %s6383_s13  ;;  %v3809_v24 = vmul.f32 %v8170_v3, %v8233_v0  ;;  %v8347_v4 = vstv %s5835_s25  ;;  %s6385_s25 = smov 115  }
 0x2e6   :  { %v8337_v34 = vpop.permute.xlu0 %2708  ;;  %v8339_v26 = vpop.permute.xlu1 %2710 }
 0x2e7   :  { %12104 = vst [vmem:[#allocation277_spill] sm:$0xff] %v8337_v34  ;;  %12105 = vst [vmem:[#allocation278_spill] sm:$0xff] %v8339_v26 }
 0x2e8   :  { %2938 = vrot.lane.b32.xlu0 %v2915_v15, %s6378_s19  ;;  %3378 = vrot.lane.b32.xlu1 %v3359_v62, %s6380_s29  ;;  %v3810_v15 = vmul.f32 %v8207_v53, %v8233_v0  ;;  %v4252_v62 = vmul.f32 %v8080_v20, %v8347_v4 }
 0x2ea   :  { %v8349_v2 = vpop.permute.xlu0 %2712  ;;  %v8351_v25 = vpop.permute.xlu1 %3148 }
 0x2eb   :  { %12106 = vst [vmem:[#allocation279_spill] sm:$0xff] %v8349_v2  ;;  %12107 = vst [vmem:[#allocation280_spill] sm:$0xff] %v8351_v25  ;;  %v4253_v25 = vmul.f32 %v8093_v7, %v8347_v4 }
 0x2ec   :  { %3828 = vrot.lane.b32.xlu0 %v3808_v12, %s6382_s10  ;;  %3830 = vrot.lane.b32.xlu1 %v3809_v24, %s6382_s10  ;;  %v4254_v12 = vmul.f32 %v8100_v39, %v8347_v4  ;;  %v8369_v24 = vstv %s5808_s26  ;;  %s8745_s26 = sld [smem:[#allocation2 + $0x2e]] }
 0x2ee   :  { %v8359_v34 = vpop.permute.xlu0 %3150  ;;  %v8361_v26 = vpop.permute.xlu1 %3152 }
 0x2ef   :  { %12108 = vst [vmem:[#allocation281_spill] sm:$0xff] %v8359_v34  ;;  %12109 = vst [vmem:[#allocation282_spill] sm:$0xff] %v8361_v26 }
 0x2f0   :  { %3832 = vrot.lane.b32.xlu0 %v3810_v15, %s6382_s10  ;;  %4268 = vrot.lane.b32.xlu1 %v4252_v62, %s6384_s17  ;;  %v2741_v15 = vmul.f32 %v8093_v7, %v8369_v24  ;;  %v2742_v62 = vmul.f32 %v8100_v39, %v8369_v24 }
 0x2f2   :  { %v8371_v2 = vpop.permute.xlu0 %3550  ;;  %v8373_v61 = vpop.permute.xlu1 %3552 }
 0x2f3   :  { %12110 = vst [vmem:[#allocation283_spill] sm:$0xff] %v8371_v2  ;;  %12111 = vst [vmem:[#allocation284_spill] sm:$0xff] %v8373_v61  ;;  %v2743_v2 = vmul.f32 %v8137_v48, %v8369_v24 }
 0x2f4   :  { %4270 = vrot.lane.b32.xlu0 %v4253_v25, %s6384_s17  ;;  %4272 = vrot.lane.b32.xlu1 %v4254_v12, %s6384_s17  ;;  %v3139_v25 = vmul.f32 %v8274_v1, %v7993_v6  ;;  %v4033_v6 = vmul.f32 %v8170_v3, %v8305_v18 }
 0x2f6   :  { %v8381_v26 = vpop.permute.xlu0 %3554  ;;  %v8383_v34 = vpop.permute.xlu1 %3990 }
 0x2f7   :  { %12112 = vst [vmem:[#allocation285_spill] sm:$0xff] %v8381_v26  ;;  %12113 = vst [vmem:[#allocation286_spill] sm:$0xff] %v8383_v34 }
 0x2f8   :  { %2758 = vrot.lane.b32.xlu0 %v2741_v15, %s6377_s15  ;;  %2760 = vrot.lane.b32.xlu1 %v2742_v62, %s6377_s15  ;;  %v3583_v15 = vmul.f32 %v8137_v48, %v8176_v30  ;;  %v4032_v62 = vmul.f32 %v8281_v19, %v8305_v18 }
 0x2fa   :  { %v8391_v12 = vpop.permute.xlu0 %3992  ;;  %v8393_v61 = vpop.permute.xlu1 %3994 }
 0x2fb   :  { %12114 = vst [vmem:[#allocation287_spill] sm:$0xff] %v8391_v12  ;;  %12115 = vst [vmem:[#allocation288_spill] sm:$0xff] %v8393_v61 }
 0x2fc   :  { %2762 = vrot.lane.b32.xlu0 %v2743_v2, %s6377_s15  ;;  %3162 = vrot.lane.b32.xlu1 %v3139_v25, %s6379_s24  ;;  %v4034_v2 = vmul.f32 %v8207_v53, %v8305_v18  ;;  %v8411_v25 = vstv %s5812_s27  ;;  %s8851_s27 = sld [smem:[#allocation2 + $0x17]] }
 0x2fe   :  { %v8401_v26 = vpop.permute.xlu0 %3548  ;;  %v8403_v34 = vpop.permute.xlu1 %3988 }
 0x2ff   :  { %12116 = vst [vmem:[#allocation289_spill] sm:$0xff] %v8401_v26  ;;  %12117 = vst [vmem:[#allocation290_spill] sm:$0xff] %v8403_v34 }
 0x300   :  { %3602 = vrot.lane.b32.xlu0 %v3583_v15, %s6381_s9  ;;  %4052 = vrot.lane.b32.xlu1 %v4032_v62, %s6383_s13  ;;  %v2740_v15 = vmul.f32 %v8080_v20, %v8369_v24  ;;  %v2965_v62 = vmul.f32 %v8093_v7, %v8411_v25 }
 0x302   :  { %v8413_v61 = vpop.permute.xlu0 %2932  ;;  %v8415_v12 = vpop.permute.xlu1 %2934 }
 0x303   :  { %12118 = vst [vmem:[#allocation291_spill] sm:$0xff] %v8413_v61  ;;  %12119 = vst [vmem:[#allocation292_spill] sm:$0xff] %v8415_v12  ;;  %v2966_v61 = vmul.f32 %v8100_v39, %v8411_v25 }
 0x304   :  { %4054 = vrot.lane.b32.xlu0 %v4033_v6, %s6383_s13  ;;  %4056 = vrot.lane.b32.xlu1 %v4034_v2, %s6383_s13  ;;  %v2967_v6 = vmul.f32 %v8137_v48, %v8411_v25 }
 0x306   :  { %v8423_v34 = vpop.permute.xlu0 %2936  ;;  %v8425_v26 = vpop.permute.xlu1 %3372 }
 0x307   :  { %12120 = vst [vmem:[#allocation293_spill] sm:$0xff] %v8423_v34  ;;  %12121 = vst [vmem:[#allocation294_spill] sm:$0xff] %v8425_v26  ;;  %v3363_v26 = vmul.f32 %v8274_v1, %v8067_v29 }
 0x308   :  { %2756 = vrot.lane.b32.xlu0 %v2740_v15, %s6377_s15  ;;  %2982 = vrot.lane.b32.xlu1 %v2965_v62, %s6378_s19  ;;  %v3807_v15 = vmul.f32 %v8137_v48, %v8233_v0 }
 0x30a   :  { %v8433_v2 = vpop.permute.xlu0 %3374  ;;  %v8435_v12 = vpop.permute.xlu1 %3376 }
 0x30b   :  { %12122 = vst [vmem:[#allocation295_spill] sm:$0xff] %v8433_v2  ;;  %12123 = vst [vmem:[#allocation296_spill] sm:$0xff] %v8435_v12  ;;  %v4256_v12 = vmul.f32 %v8281_v19, %v8347_v4 }
 0x30c   :  { %2984 = vrot.lane.b32.xlu0 %v2966_v61, %s6378_s19  ;;  %2986 = vrot.lane.b32.xlu1 %v2967_v6, %s6378_s19  ;;  %v4257_v61 = vmul.f32 %v8170_v3, %v8347_v4 }
 0x30e   :  { %v8443_v62 = vpop.permute.xlu0 %3774  ;;  %v8445_v34 = vpop.permute.xlu1 %3776 }
 0x30f   :  { %12124 = vst [vmem:[#allocation297_spill] sm:$0xff] %v8443_v62  ;;  %12125 = vst [vmem:[#allocation298_spill] sm:$0xff] %v8445_v34 }
 0x310   :  { %3386 = vrot.lane.b32.xlu0 %v3363_v26, %s6380_s29  ;;  %3826 = vrot.lane.b32.xlu1 %v3807_v15, %s6382_s10  ;;  %v4258_v26 = vmul.f32 %v8207_v53, %v8347_v4  ;;  %v2964_v15 = vmul.f32 %v8080_v20, %v8411_v25 }
 0x312   :  { %v8453_v6 = vpop.permute.xlu0 %3778  ;;  %v8455_v29 = vpop.permute.xlu1 %4214 }
 0x313   :  { %12126 = vst [vmem:[#allocation299_spill] sm:$0xff] %v8453_v6  ;;  %12127 = vst [vmem:[#allocation300_spill] sm:$0xff] %v8455_v29  ;;  %v2745_v6 = vmul.f32 %v8170_v3, %v8369_v24 }
 0x314   :  { %4276 = vrot.lane.b32.xlu0 %v4256_v12, %s6384_s17  ;;  %4278 = vrot.lane.b32.xlu1 %v4257_v61, %s6384_s17  ;;  %v2746_v12 = vmul.f32 %v8207_v53, %v8369_v24  ;;  %v8473_v61 = vstv %s5816_s28  ;;  %s8863_s28 = sld [smem:[#allocation2 + $0x3]] }
 0x316   :  { %v8463_v62 = vpop.permute.xlu0 %4216  ;;  %v8465_v34 = vpop.permute.xlu1 %4218 }
 0x317   :  { %12128 = vst [vmem:[#allocation301_spill] sm:$0xff] %v8463_v62  ;;  %12129 = vst [vmem:[#allocation302_spill] sm:$0xff] %v8465_v34  ;;  %v53_v34 = vmul.f32 %v8100_v39, %v6959_v54 }
 0x318   :  { %4280 = vrot.lane.b32.xlu0 %v4258_v26, %s6384_s17  ;;  %2980 = vrot.lane.b32.xlu1 %v2964_v15, %s6378_s19  ;;  %v2747_v26 = vmul.f32 %v8274_v1, %v8369_v24  ;;  %v3189_v15 = vmul.f32 %v8093_v7, %v8473_v61 }
 0x31a   :  { %v8475_v2 = vpop.permute.xlu0 %3772  ;;  %v8477_v29 = vpop.permute.xlu1 %4212 }
 0x31b   :  { %12130 = vst [vmem:[#allocation303_spill] sm:$0xff] %v8475_v2  ;;  %12131 = vst [vmem:[#allocation304_spill] sm:$0xff] %v8477_v29  ;;  %v52_v2 = vmul.f32 %v8093_v7, %v6959_v54  ;;  %v125_v29 = vsel %vm123_vm0, %v6645_v22, %v6655_v27 }
 0x31c   :  { %2766 = vrot.lane.b32.xlu0 %v2745_v6, %s6377_s15  ;;  %2768 = vrot.lane.b32.xlu1 %v2746_v12, %s6377_s15  ;;  %v126_v6 = vsel %vm123_vm0, %v6655_v27, %v6643_v21  ;;  %v51_v12 = vmul.f32 %v8080_v20, %v6959_v54  ;;  %v351_v21 = vsel %vm348_vm1, %v6667_v32, %v6675_v35 }
 0x31d   :  { %v3190_v27 = vmul.f32 %v8100_v39, %v8473_v61  ;;  %v139_v22 = vadd.f32 %v125_v29, %v52_v2  ;;  %v140_v28 = vadd.f32 %v126_v6, %v53_v34  ;;  %v349_v32 = vsel %vm348_vm1, %v6677_v37, %v6665_v31 }
 0x31e   :  { %v8497_v62 = vpop.permute.xlu0 %2706  ;;  %v8499_v14 = vpop.permute.xlu1 %3156  ;;  %v138_v43 = vadd.f32 %v124_v10, %v51_v12  ;;  %v128_v35 = vsel %vm123_vm0, %v6687_v41, %v6689_v42  ;;  %v576_v10 = vsel %vm573_vm2, %v6707_v50, %v6709_v51  ;;  %v353_v31 = vsel %vm348_vm1, %v6727_v59, %v6729_v55 }
 0x31f   :  { %12132 = vst [vmem:[#allocation305_spill] sm:$0xff] %v8497_v62  ;;  %12133 = vst [vmem:[#allocation306_spill] sm:$0xff] %v8499_v14  ;;  %v3191_v14 = vmul.f32 %v8137_v48, %v8473_v61  ;;  %v56_v62 = vmul.f32 %v8170_v3, %v6959_v54  ;;  %v364_v2 = vadd.f32 %v350_v36, %v139_v22 }
 0x320   :  { %2770 = vrot.lane.b32.xlu0 %v2747_v26, %s6377_s15  ;;  %3206 = vrot.lane.b32.xlu1 %v3189_v15, %s6379_s24  ;;  %v575_v26 = vsel %vm573_vm2, %v6699_v46, %v6707_v50  ;;  %v365_v29 = vadd.f32 %v351_v21, %v140_v28  ;;  %v800_v37 = vsel %vm798_vm3, %v6741_v5, %v6749_v8 }
 0x321   :  { %v3587_v36 = vmul.f32 %v8274_v1, %v8176_v30  ;;  %v4031_v6 = vmul.f32 %v8137_v48, %v8305_v18  ;;  %v363_v50 = vadd.f32 %v349_v32, %v138_v43  ;;  %v143_v51 = vadd.f32 %v128_v35, %v56_v62 }
 0x322   :  { %v8527_v15 = vpop.permute.xlu0 %3158  ;;  %v8529_v34 = vpop.permute.xlu1 %3160  ;;  %v589_v12 = vadd.f32 %v575_v26, %v364_v2  ;;  %v590_v21 = vadd.f32 %v576_v10, %v365_v29  ;;  %v574_v22 = vsel %vm573_vm2, %v6719_v56, %v6699_v46  ;;  %v578_v30 = vsel %vm573_vm2, %v6781_v33, %v6791_v11 }
 0x323   :  { %12134 = vst [vmem:[#allocation307_spill] sm:$0xff] %v8527_v15  ;;  %12135 = vst [vmem:[#allocation308_spill] sm:$0xff] %v8529_v34  ;;  %v368_v62 = vadd.f32 %v353_v31, %v143_v51  ;;  %v1025_v32 = vsel %vm1023_vm4, %v6801_v49, %v6803_v52  ;;  %v1026_v46 = vsel %vm1023_vm4, %v6803_v52, %v6811_v58  ;;  %v12198_v34 = vld [vmem:[#allocation40_spill] sm:$0xff] }
 0x324   :  { %3208 = vrot.lane.b32.xlu0 %v3190_v27, %s6379_s24  ;;  %3210 = vrot.lane.b32.xlu1 %v3191_v14, %s6379_s24  ;;  %v801_v14 = vsel %vm798_vm3, %v6749_v8, %v6751_v9  ;;  %v814_v28 = vadd.f32 %v800_v37, %v589_v12  ;;  %v803_v56 = vsel %vm798_vm3, %v6841_v38, %v6843_v44 }
 0x325   :  { %v2744_v8 = vmul.f32 %v8281_v19, %v8369_v24  ;;  %v3188_v9 = vmul.f32 %v8080_v20, %v8473_v61  ;;  %v815_v35 = vadd.f32 %v801_v14, %v590_v21  ;;  %v593_v26 = vadd.f32 %v578_v30, %v368_v62  ;;  %v12144_v62 = vld [vmem:[#allocation15_spill] sm:$0xff] }
 0x326   :  { %v8557_v27 = vpop.permute.xlu0 %3596  ;;  %v8559_v43 = vpop.permute.xlu1 %3598  ;;  %v588_v2 = vadd.f32 %v574_v22, %v363_v50  ;;  %v799_v52 = vsel %vm798_vm3, %v6761_v16, %v6741_v5  ;;  %v1039_v58 = vadd.f32 %v1025_v32, %v814_v28  ;;  %v1250_v29 = vsel %vm1248_vm5, %v6855_v57, %v6863_v13  ;;  %v12141_v16 = vld [vmem:[#allocation31_spill] sm:$0xff]  ;;  %v12142_v50 = vld [vmem:[#allocation30_spill] sm:$0xff]  ;;  %v12143_v22 = vld [vmem:[#allocation32_spill] sm:$0xff] }
 0x327   :  { %12136 = vst [vmem:[#allocation309_spill] sm:$0xff] %v8557_v27  ;;  %12137 = vst [vmem:[#allocation310_spill] sm:$0xff] %v8559_v43  ;;  %v1040_v31 = vadd.f32 %v1026_v46, %v815_v35  ;;  %v818_v37 = vadd.f32 %v803_v56, %v593_v26  ;;  %v1475_v51 = vsel %vm1473_vm6, %v12142_v50, %v12141_v16  ;;  %v8605_v30 = vstv %s8546_s30  ;;  %v12145_v46 = vld [vmem:[#allocation21_spill] sm:$0xff]  ;;  %v12157_v43 = vld [vmem:[#allocation34_spill] sm:$0xff]  ;;  %s8920_s30 = sld [smem:[#allocation2 + $0x49]] }
 0x328   :  { %3610 = vrot.lane.b32.xlu0 %v3587_v36, %s6381_s9  ;;  %4050 = vrot.lane.b32.xlu1 %v4031_v6, %s6383_s13  ;;  %v1251_v36 = vsel %vm1248_vm5, %v6863_v13, %v6865_v17  ;;  %v12140_v6 = vld [vmem:[#allocation28_spill] sm:$0xff]  ;;  %v2969_v12 = vmul.f32 %v8170_v3, %v8411_v25  ;;  %v2970_v21 = vmul.f32 %v8207_v53, %v8411_v25 }
 0x329   :  { %v1028_v5 = vsel %vm1023_vm4, %v12140_v6, %v6919_v60  ;;  %v813_v13 = vadd.f32 %v799_v52, %v588_v2  ;;  %v1264_v17 = vadd.f32 %v1250_v29, %v1039_v58  ;;  %v1476_v14 = vsel %vm1473_vm6, %v12141_v16, %v12143_v22  ;;  %v12148_v2 = vld [vmem:[#allocation42_spill] sm:$0xff]  ;;  %v12149_v52 = vld [vmem:[#allocation41_spill] sm:$0xff]  ;;  %v12151_v16 = vld [vmem:[#allocation44_spill] sm:$0xff] }
 0x32a   :  { %v8582_v10 = vpop.permute.xlu0 %3600  ;;  %v8584_v24 = vpop.permute.xlu1 %3998  ;;  %v1024_v28 = vsel %vm1023_vm4, %v12144_v62, %v6801_v49  ;;  %v1265_v32 = vadd.f32 %v1251_v36, %v1040_v31  ;;  %v1249_v56 = vsel %vm1248_vm5, %v12145_v46, %v6855_v57  ;;  %v1253_v58 = vsel %vm1248_vm5, %v12149_v52, %v12148_v2  ;;  %v12150_v29 = vld [vmem:[#allocation45_spill] sm:$0xff]  ;;  %v12152_v49 = vld [vmem:[#allocation46_spill] sm:$0xff] }
 0x32b   :  { %12138 = vst [vmem:[#allocation311_spill] sm:$0xff] %v8582_v10  ;;  %12139 = vst [vmem:[#allocation312_spill] sm:$0xff] %v8584_v24  ;;  %v1489_v26 = vadd.f32 %v1475_v51, %v1264_v17  ;;  %v1700_v22 = vsel %vm1698_vm7, %v12151_v16, %v12150_v29  ;;  %v1701_v31 = vsel %vm1698_vm7, %v12150_v29, %v12152_v49  ;;  %v12153_v51 = vld [vmem:[#allocation58_spill] sm:$0xff]  ;;  %v12154_v17 = vld [vmem:[#allocation57_spill] sm:$0xff] }
 0x32c   :  { %2764 = vrot.lane.b32.xlu0 %v2744_v8, %s6377_s15  ;;  %3204 = vrot.lane.b32.xlu1 %v3188_v9, %s6379_s24  ;;  %v1043_v8 = vadd.f32 %v1028_v5, %v818_v37  ;;  %v1490_v36 = vadd.f32 %v1476_v14, %v1265_v32  ;;  %v2971_v57 = vmul.f32 %v8274_v1, %v8411_v25  ;;  %v2107_v46 = vld [vmem:[%s11516_s2 + $0x8] sm:$0xff]  ;;  %v2118_v10 = vld [vmem:[%s11516_s2 + $0x60] sm:$0x3] }
 0x32d   :  { %v3413_v37 = vmul.f32 %v8093_v7, %v8605_v30  ;;  %v1038_v5 = vadd.f32 %v1024_v28, %v813_v13  ;;  %v1478_v62 = vsel %vm1473_vm6, %v12154_v17, %v12153_v51  ;;  %v1714_v14 = vadd.f32 %v1700_v22, %v1489_v26  ;;  %v2106_v28 = vld [vmem:[%s11516_s2] sm:$0xff] }
 0x32e   :  { %v8613_v9 = vpop.permute.xlu0 %4000  ;;  %v8615_v35 = vpop.permute.xlu1 %4002  ;;  %v1715_v32 = vadd.f32 %v1701_v31, %v1490_v36  ;;  %v1703_v26 = vsel %vm1698_vm7, %v7149_v47, %v7151_v23  ;;  %v3414_v31 = vmul.f32 %v8100_v39, %v8605_v30  ;;  %v12158_v36 = vld [vmem:[#allocation49_spill] sm:$0xff]  ;;  %v12237_v24 = vld [vmem:[#allocation75_spill] sm:$0xff] }
 0x32f   :  { %12146 = vst [vmem:[#allocation28_spill] sm:$0xff] %v8613_v9  ;;  %12147 = vst [vmem:[#allocation31_spill] sm:$0xff] %v8615_v35  ;;  %v1263_v27 = vadd.f32 %v1249_v56, %v1038_v5  ;;  %v3415_v56 = vmul.f32 %v8137_v48, %v8605_v30 }
 0x330   :  { %2990 = vrot.lane.b32.xlu0 %v2969_v12, %s6378_s19  ;;  %2992 = vrot.lane.b32.xlu1 %v2970_v21, %s6378_s19  ;;  %v2119_v12 = vld [vmem:[%s11516_s2 + $0x68] sm:$0x3]  ;;  %v1268_v21 = vadd.f32 %v1253_v58, %v1043_v8  ;;  %v1474_v8 = vsel %vm1473_vm6, %v12157_v43, %v12142_v50  ;;  %v5996_v58 = vpack.c.bf16 %v2118_v10, %v2106_v28 }
 0x331   :  { %v5994_v13 = vpack.c.bf16 %v2119_v12, %v2107_v46  ;;  %v1699_v43 = vsel %vm1698_vm7, %v12158_v36, %v12151_v16  ;;  %v1488_v50 = vadd.f32 %v1474_v8, %v1263_v27  ;;  %v1892_v10 = vadd.f32 %v7020_v40, %v1714_v14 }
 0x332   :  { %v8641_v29 = vpop.permute.xlu0 %3996  ;;  %v8643_v49 = vpop.permute.xlu1 %2930  ;;  %v1493_v22 = vadd.f32 %v1478_v62, %v1268_v21  ;;  %v1893_v5 = vadd.f32 %v7020_v40, %v1715_v32  ;;  %v3811_v16 = vmul.f32 %v8274_v1, %v8233_v0  ;;  %v4255_v27 = vmul.f32 %v8137_v48, %v8347_v4 }
 0x333   :  { %12155 = vst [vmem:[#allocation30_spill] sm:$0xff] %v8641_v29  ;;  %12156 = vst [vmem:[#allocation32_spill] sm:$0xff] %v8643_v49  ;;  %5995 = vmatprep.subr.bf16.mxu0 %v5994_v13  ;;  %v1713_v46 = vadd.f32 %v1699_v43, %v1488_v50  ;;  %v1900_v12 = vmax.f32 %v1892_v10, 0.0  ;;  %v2968_v0 = vmul.f32 %v8281_v19, %v8411_v25  ;;  %v12165_v50 = vld [vmem:[#allocation8_spill] sm:$0xff] }
 0x334   :  { %2994 = vrot.lane.b32.xlu0 %v2971_v57, %s6378_s19  ;;  %3430 = vrot.lane.b32.xlu1 %v3413_v37, %s6380_s29  ;;  %v1718_v57 = vadd.f32 %v1703_v26, %v1493_v22  ;;  %v1901_v21 = vmax.f32 %v1893_v5, 0.0  ;;  %v57_v8 = vmul.f32 %v8207_v53, %v6959_v54  ;;  %v55_v26 = vmul.f32 %v8281_v19, %v6959_v54  ;;  %v12166_v5 = vld [vmem:[#allocation9_spill] sm:$0xff] }
 0x335   :  { %5997 = vmatpush1.bf16.xpose.msra.mxu0 %v5996_v58  ;;  %v1891_v28 = vadd.f32 %v7020_v40, %v1713_v46  ;;  %v129_v58 = vsel %vm123_vm0, %v6689_v42, %v6697_v45  ;;  %v60_v22 = vstv %s5762_s21  ;;  %v127_v25 = vsel %vm123_vm0, %v12165_v50, %v6687_v41 }
 0x336   :  { %v8668_v62 = vpop.permute.xlu0 %3380  ;;  %v8670_v37 = vpop.permute.xlu1 %3382  ;;  %v1896_v14 = vadd.f32 %v7020_v40, %v1718_v57  ;;  %v6110_v43 = vpack.i.bf16 %v1901_v21, %v1900_v12  ;;  %v354_v10 = vsel %vm348_vm1, %v6729_v55, %v6739_v63  ;;  %v3412_v42 = vmul.f32 %v8080_v20, %v8605_v30  ;;  %v12167_v63 = vld [vmem:[#allocation11_spill] sm:$0xff] }
 0x337   :  { %12159 = vst [vmem:[#allocation15_spill] sm:$0xff] %v8668_v62  ;;  %12160 = vst [vmem:[#allocation21_spill] sm:$0xff] %v8670_v37  ;;  %v1899_v54 = vmax.f32 %v1891_v28, 0.0  ;;  %v144_v45 = vadd.f32 %v129_v58, %v57_v8  ;;  %v352_v41 = vsel %vm348_vm1, %v12166_v5, %v6727_v59  ;;  %v61_v57 = vmul.f32 %v8080_v20, %v60_v22  ;;  %v12171_v8 = vld [vmem:[#allocation12_spill] sm:$0xff]  ;;  %v12172_v58 = vld [vmem:[#allocation13_spill] sm:$0xff] }
 0x338   :  { %3432 = vrot.lane.b32.xlu0 %v3414_v31, %s6380_s29  ;;  %3434 = vrot.lane.b32.xlu1 %v3415_v56, %s6380_s29  ;;  %v1904_v31 = vmax.f32 %v1896_v14, 0.0  ;;  %v8715_v46 = vstv %s5809_s22  ;;  %v142_v55 = vadd.f32 %v127_v25, %v55_v26  ;;  %v62_v12 = vmul.f32 %v8093_v7, %v60_v22 }
 0x339   :  { %v181_v59 = vsel %vm123_vm0, %v12167_v63, %v12171_v8  ;;  %v579_v26 = vsel %vm573_vm2, %v6791_v11, %v12172_v58  ;;  %v66_v11 = vmul.f32 %v8170_v3, %v60_v22  ;;  %v8743_v5 = vmul.f32 %v8137_v48, %v60_v22 }
 0x33a   :  { %v8679_v32 = vpop.permute.xlu0 %3384  ;;  %v8681_v13 = vpop.permute.xlu1 %3820  ;;  %v6115_v28 = vpack.i.bf16 %v1904_v31, %v1899_v54  ;;  %v367_v25 = vadd.f32 %v352_v41, %v142_v55  ;;  %v2796_v31 = vmul.f32 %v8080_v20, %v8715_v46  ;;  %v12174_v55 = vld [vmem:[#allocation17_spill] sm:$0xff] }
 0x33b   :  { %12161 = vst [vmem:[#allocation42_spill] sm:$0xff] %v8679_v32  ;;  %12162 = vst [vmem:[#allocation41_spill] sm:$0xff] %v8681_v13  ;;  %v8770_v13 = vstv %s8705_s23  ;;  %v12184_v32 = vld [vmem:[#allocation26_spill] sm:$0xff] }
 0x33c   :  { %3834 = vrot.lane.b32.xlu0 %v3811_v16, %s6382_s10  ;;  %4274 = vrot.lane.b32.xlu1 %v4255_v27, %s6384_s17  ;;  %v12168_v16 = vld [vmem:[#allocation10_spill] sm:$0xff] }
 0x33d   :  { %v180_v27 = vsel %vm123_vm0, %v12168_v16, %v12167_v63  ;;  %v12175_v63 = vld [vmem:[#allocation16_spill] sm:$0xff] }
 0x33e   :  { %v8695_v56 = vpop.permute.xlu0 %3822  ;;  %v8697_v36 = vpop.permute.xlu1 %3824  ;;  %v194_v54 = vadd.f32 %v180_v27, %v61_v57  ;;  %v405_v16 = vsel %vm348_vm1, %v12175_v63, %v12174_v55  ;;  %v12178_v27 = vld [vmem:[#allocation18_spill] sm:$0xff] }
 0x33f   :  { %12163 = vst [vmem:[#allocation45_spill] sm:$0xff] %v8695_v56  ;;  %12164 = vst [vmem:[#allocation44_spill] sm:$0xff] %v8697_v36  ;;  %v406_v58 = vsel %vm348_vm1, %v12174_v55, %v12178_v27 }
 0x340   :  { %6111 = vrot.lane.b32.xlu0 %v6110_v43, %s6385_s25  ;;  %2988 = vrot.lane.b32.xlu1 %v2968_v0, %s6378_s19  ;;  %v369_v0 = vadd.f32 %v354_v10, %v144_v45  ;;  %v12173_v43 = vld [vmem:[#allocation14_spill] sm:$0xff]  ;;  %v2797_v10 = vmul.f32 %v8093_v7, %v8715_v46  ;;  %v65_v45 = vmul.f32 %v8281_v19, %v60_v22 }
 0x341   :  { %v577_v50 = vsel %vm573_vm2, %v12173_v43, %v6781_v33  ;;  %v195_v33 = vadd.f32 %v181_v59, %v62_v12  ;;  %v12179_v43 = vld [vmem:[#allocation19_spill] sm:$0xff]  ;;  %v12180_v12 = vld [vmem:[#allocation20_spill] sm:$0xff]  ;;  %v419_v55 = vadd.f32 %v405_v16, %v194_v54 }
 0x342   :  { %v8721_v21 = vpop.permute.xlu0 %4222  ;;  %v8723_v14 = vpop.permute.xlu1 %4224  ;;  %v592_v41 = vadd.f32 %v577_v50, %v367_v25  ;;  %v804_v36 = vsel %vm798_vm3, %v6843_v44, %v12179_v43  ;;  %v12181_v59 = vld [vmem:[#allocation23_spill] sm:$0xff]  ;;  %v12183_v25 = vld [vmem:[#allocation24_spill] sm:$0xff]  ;;  %v2798_v44 = vmul.f32 %v8100_v39, %v8715_v46  ;;  %v63_v43 = vmul.f32 %v8100_v39, %v60_v22 }
 0x343   :  { %12169 = vst [vmem:[#allocation46_spill] sm:$0xff] %v8721_v21  ;;  %12170 = vst [vmem:[#allocation58_spill] sm:$0xff] %v8723_v14  ;;  %v184_v63 = vsel %vm123_vm0, %v12181_v59, %v12183_v25  ;;  %v12234_v21 = vld [vmem:[#allocation86_spill] sm:$0xff] }
 0x344   :  { %3428 = vrot.lane.b32.xlu0 %v3412_v42, %s6380_s29  ;;  %6116 = vrot.lane.b32.xlu1 %v6115_v28, %s6385_s25  ;;  %v594_v42 = vadd.f32 %v579_v26, %v369_v0  ;;  %v802_v0 = vsel %vm798_vm3, %v12180_v12, %v6841_v38  ;;  %v12182_v26 = vld [vmem:[#allocation22_spill] sm:$0xff]  ;;  %v3193_v38 = vmul.f32 %v8170_v3, %v8473_v61 }
 0x345   :  { %v183_v50 = vsel %vm123_vm0, %v12182_v26, %v12181_v59  ;;  %v8780_v12 = vmul.f32 %v8207_v53, %v60_v22  ;;  %v8783_v59 = vmul.f32 %v8274_v1, %v60_v22  ;;  %v420_v26 = vadd.f32 %v406_v58, %v195_v33  ;;  %v12190_v58 = vld [vmem:[#allocation33_spill] sm:$0xff] }
 0x346   :  { %v8750_v28 = vpop.permute.xlu0 %4226  ;;  %v8752_v57 = vpop.permute.xlu1 %4220  ;;  %v819_v56 = vadd.f32 %v804_v36, %v594_v42  ;;  %v198_v54 = vadd.f32 %v183_v50, %v65_v45  ;;  %v199_v16 = vadd.f32 %v184_v63, %v66_v11  ;;  %v8797_v22 = vmul.f32 %v8093_v7, %v8770_v13  ;;  %v12189_v36 = vld [vmem:[#allocation29_spill] sm:$0xff]  ;;  %v12191_v50 = vld [vmem:[#allocation36_spill] sm:$0xff]  ;;  %v12192_v63 = vld [vmem:[#allocation35_spill] sm:$0xff] }
 0x347   :  { %12176 = vst [vmem:[#allocation57_spill] sm:$0xff] %v8750_v28  ;;  %12177 = vst [vmem:[#allocation34_spill] sm:$0xff] %v8752_v57  ;;  %v12188_v57 = vld [vmem:[#allocation27_spill] sm:$0xff]  ;;  %v1029_v33 = vsel %vm1023_vm4, %v6919_v60, %v12189_v36  ;;  %v3194_v45 = vmul.f32 %v8207_v53, %v8473_v61  ;;  %v3195_v11 = vmul.f32 %v8274_v1, %v8473_v61  ;;  %v8817_v60 = vstv %s8745_s26 }
 0x348   :  { %2812 = vrot.lane.b32.xlu0 %v2796_v31, %s6377_s15  ;;  %2814 = vrot.lane.b32.xlu1 %v2797_v10, %s6377_s15  ;;  %v817_v31 = vadd.f32 %v802_v0, %v592_v41  ;;  %v12185_v10 = vld [vmem:[#allocation25_spill] sm:$0xff]  ;;  %v631_v28 = vsel %vm573_vm2, %v12184_v32, %v12188_v57  ;;  %v8814_v41 = vmul.f32 %v8137_v48, %v8770_v13 }
 0x349   :  { %v630_v62 = vsel %vm573_vm2, %v12185_v10, %v12184_v32  ;;  %v8810_v32 = vmul.f32 %v8100_v39, %v8770_v13  ;;  %v1027_v0 = vsel %vm1023_vm4, %v12190_v58, %v12140_v6  ;;  %v12195_v10 = vld [vmem:[#allocation38_spill] sm:$0xff]  ;;  %v645_v29 = vadd.f32 %v631_v28, %v420_v26 }
 0x34a   :  { %v8788_v37 = vpop.permute.xlu0 %2714  ;;  %v8790_v49 = vpop.permute.xlu1 %3154  ;;  %v644_v42 = vadd.f32 %v630_v62, %v419_v55  ;;  %v12194_v55 = vld [vmem:[#allocation39_spill] sm:$0xff]  ;;  %v1044_v35 = vadd.f32 %v1029_v33, %v819_v56  ;;  %v8840_v58 = vmul.f32 %v8080_v20, %v8770_v13  ;;  %v3637_v28 = vmul.f32 %v8093_v7, %v8817_v60 }
 0x34b   :  { %12186 = vst [vmem:[#allocation49_spill] sm:$0xff] %v8788_v37  ;;  %12187 = vst [vmem:[#allocation8_spill] sm:$0xff] %v8790_v49  ;;  %v855_v36 = vsel %vm798_vm3, %v12195_v10, %v12194_v55  ;;  %v856_v6 = vsel %vm798_vm3, %v12194_v55, %v12198_v34  ;;  %v3638_v56 = vmul.f32 %v8100_v39, %v8817_v60 }
 0x34c   :  { %2816 = vrot.lane.b32.xlu0 %v2798_v44, %s6377_s15  ;;  %3214 = vrot.lane.b32.xlu1 %v3193_v38, %s6379_s24  ;;  %v408_v44 = vsel %vm348_vm1, %v12192_v63, %v12191_v50  ;;  %v12193_v38 = vld [vmem:[#allocation37_spill] sm:$0xff]  ;;  %v12199_v63 = vld [vmem:[#allocation43_spill] sm:$0xff]  ;;  %v1042_v26 = vadd.f32 %v1027_v0, %v817_v31  ;;  %v869_v10 = vadd.f32 %v855_v36, %v644_v42 }
 0x34d   :  { %v409_v62 = vsel %vm348_vm1, %v12191_v50, %v12193_v38  ;;  %v1254_v50 = vsel %vm1248_vm5, %v12148_v2, %v12199_v63  ;;  %v423_v33 = vadd.f32 %v408_v44, %v198_v54  ;;  %v8861_v7 = vmul.f32 %v8170_v3, %v8770_v13 }
 0x34e   :  { %v8831_v49 = vpop.permute.xlu0 %3604  ;;  %v8833_v37 = vpop.permute.xlu1 %3606  ;;  %v424_v55 = vadd.f32 %v409_v62, %v199_v16  ;;  %v1269_v54 = vadd.f32 %v1254_v50, %v1044_v35  ;;  %v12205_v16 = vld [vmem:[#allocation51_spill] sm:$0xff]  ;;  %v3639_v35 = vmul.f32 %v8137_v48, %v8817_v60  ;;  %v4035_v44 = vmul.f32 %v8274_v1, %v8305_v18  ;;  %v12207_v50 = vld [vmem:[#allocation53_spill] sm:$0xff]  ;;  %v12210_v18 = vld [vmem:[#allocation60_spill] sm:$0xff] }
 0x34f   :  { %12196 = vst [vmem:[#allocation9_spill] sm:$0xff] %v8831_v49  ;;  %12197 = vst [vmem:[#allocation11_spill] sm:$0xff] %v8833_v37  ;;  %v870_v49 = vadd.f32 %v856_v6, %v645_v29  ;;  %v12200_v37 = vld [vmem:[#allocation48_spill] sm:$0xff]  ;;  %v8893_v63 = vmul.f32 %v8281_v19, %v8770_v13 }
 0x350   :  { %3216 = vrot.lane.b32.xlu0 %v3194_v45, %s6379_s24  ;;  %3218 = vrot.lane.b32.xlu1 %v3195_v11, %s6379_s24  ;;  %v1252_v2 = vsel %vm1248_vm5, %v12200_v37, %v12149_v52  ;;  %v12201_v45 = vld [vmem:[#allocation50_spill] sm:$0xff]  ;;  %v12204_v29 = vld [vmem:[#allocation52_spill] sm:$0xff]  ;;  %v8874_v52 = vmul.f32 %v8207_v53, %v8770_v13  ;;  %v8878_v37 = vmul.f32 %v8274_v1, %v8770_v13 }
 0x351   :  { %v182_v11 = vsel %vm123_vm0, %v12171_v8, %v12201_v45  ;;  %v633_v42 = vsel %vm573_vm2, %v12205_v16, %v12204_v29  ;;  %v12206_v8 = vld [vmem:[#allocation59_spill] sm:$0xff]  ;;  %v1267_v62 = vadd.f32 %v1252_v2, %v1042_v26  ;;  %v197_v6 = vadd.f32 %v12201_v45, %v8743_v5  ;;  %v12209_v16 = vld [vmem:[#allocation54_spill] sm:$0xff]  ;;  %v12213_v13 = vld [vmem:[#allocation56_spill] sm:$0xff] }
 0x352   :  { %v8865_v39 = vpop.permute.xlu0 %3608  ;;  %v8867_v31 = vpop.permute.xlu1 %4044  ;;  %v1479_v0 = vsel %vm1473_vm6, %v12153_v51, %v12206_v8  ;;  %v196_v36 = vadd.f32 %v182_v11, %v63_v43  ;;  %v648_v51 = vadd.f32 %v633_v42, %v423_v33  ;;  %v1477_v43 = vsel %vm1473_vm6, %v12210_v18, %v12154_v17  ;;  %v12214_v45 = vld [vmem:[#allocation61_spill] sm:$0xff] }
 0x353   :  { %12202 = vst [vmem:[#allocation10_spill] sm:$0xff] %v8865_v39  ;;  %12203 = vst [vmem:[#allocation12_spill] sm:$0xff] %v8867_v31  ;;  %v1494_v2 = vadd.f32 %v1479_v0, %v1269_v54  ;;  %v407_v11 = vsel %vm348_vm1, %v12178_v27, %v12214_v45  ;;  %v12216_v17 = vld [vmem:[#allocation69_spill] sm:$0xff]  ;;  %v3192_v54 = vmul.f32 %v8281_v19, %v8473_v61  ;;  %v12230_v31 = vld [vmem:[#allocation74_spill] sm:$0xff] }
 0x354   :  { %3654 = vrot.lane.b32.xlu0 %v3637_v28, %s6381_s9  ;;  %3656 = vrot.lane.b32.xlu1 %v3638_v56, %s6381_s9  ;;  %v634_v28 = vsel %vm573_vm2, %v12204_v29, %v12207_v50  ;;  %v12208_v56 = vld [vmem:[#allocation55_spill] sm:$0xff]  ;;  %v12215_v29 = vld [vmem:[#allocation68_spill] sm:$0xff]  ;;  %v1702_v8 = vsel %vm1698_vm7, %v12216_v17, %v7149_v47  ;;  %v3636_v27 = vmul.f32 %v8080_v20, %v8817_v60  ;;  %v12218_v47 = vld [vmem:[#allocation62_spill] sm:$0xff] }
 0x355   :  { %v1080_v48 = vsel %vm1023_vm4, %v12209_v16, %v12208_v56  ;;  %v1081_v33 = vsel %vm1023_vm4, %v12208_v56, %v12213_v13  ;;  %v1704_v42 = vsel %vm1698_vm7, %v7151_v23, %v12215_v29  ;;  %v649_v0 = vadd.f32 %v634_v28, %v424_v55  ;;  %v12217_v29 = vld [vmem:[#allocation63_spill] sm:$0xff]  ;;  %v12221_v55 = vld [vmem:[#allocation66_spill] sm:$0xff] }
 0x356   :  { %v8904_v26 = vpop.permute.xlu0 %4046  ;;  %v8906_v5 = vpop.permute.xlu1 %4048  ;;  %v1094_v56 = vadd.f32 %v1080_v48, %v869_v10  ;;  %v1492_v16 = vadd.f32 %v1477_v43, %v1267_v62  ;;  %v8929_v23 = vstv %s8851_s27  ;;  %v1095_v18 = vadd.f32 %v1081_v33, %v870_v49  ;;  %v12222_v10 = vld [vmem:[#allocation65_spill] sm:$0xff]  ;;  %v12223_v49 = vld [vmem:[#allocation67_spill] sm:$0xff]  ;;  %s9618_s27 = sld [smem:[#allocation2 + $0x5]] }
 0x357   :  { %12211 = vst [vmem:[#allocation13_spill] sm:$0xff] %v8904_v26  ;;  %12212 = vst [vmem:[#allocation14_spill] sm:$0xff] %v8906_v5  ;;  %v858_v17 = vsel %vm798_vm3, %v12218_v47, %v12217_v29  ;;  %v1719_v39 = vadd.f32 %v1704_v42, %v1494_v2  ;;  %v421_v61 = vadd.f32 %v407_v11, %v196_v36  ;;  %v8953_v43 = vld [vmem:[%s11514_s0] sm:$0xff]  ;;  %v12231_v26 = vld [vmem:[#allocation73_spill] sm:$0xff] }
 0x358   :  { %3658 = vrot.lane.b32.xlu0 %v3639_v35, %s6381_s9  ;;  %4058 = vrot.lane.b32.xlu1 %v4035_v44, %s6383_s13  ;;  %v8935_v35 = vstv %s8863_s28  ;;  %v422_v20 = vadd.f32 %v12214_v45, %v197_v6  ;;  %v1305_v62 = vsel %vm1248_vm5, %v12222_v10, %v12221_v55  ;;  %v1717_v28 = vadd.f32 %v1702_v8, %v1492_v16  ;;  %v8960_v6 = vld [vmem:[%s11514_s0 + $0x8] sm:$0xff]  ;;  %s9144_s28 = sld [smem:[#allocation2 + $0x1f]] }
 0x359   :  { %v1306_v48 = vsel %vm1248_vm5, %v12221_v55, %v12223_v49  ;;  %v3020_v36 = vmul.f32 %v8953_v43, %v8929_v23  ;;  %v3021_v33 = vmul.f32 %v8960_v6, %v8929_v23  ;;  %v873_v2 = vadd.f32 %v858_v17, %v648_v51  ;;  %v12224_v45 = vld [vmem:[#allocation64_spill] sm:$0xff]  ;;  %v12225_v16 = vld [vmem:[#allocation77_spill] sm:$0xff]  ;;  %v12227_v17 = vld [vmem:[#allocation78_spill] sm:$0xff] }
 0x35a   :  { %v8937_v44 = vpop.permute.xlu0 %2938  ;;  %v8939_v5 = vpop.permute.xlu1 %3378  ;;  %v859_v11 = vsel %vm798_vm3, %v12217_v29, %v12224_v45  ;;  %v8969_v42 = vmul.f32 %v8953_v43, %v8935_v35  ;;  %v8973_v8 = vmul.f32 %v8960_v6, %v8935_v35  ;;  %v12226_v47 = vld [vmem:[#allocation76_spill] sm:$0xff]  ;;  %v1531_v29 = vsel %vm1473_vm6, %v12225_v16, %v12227_v17 }
 0x35b   :  { %12219 = vst [vmem:[#allocation17_spill] sm:$0xff] %v8937_v44  ;;  %12220 = vst [vmem:[#allocation16_spill] sm:$0xff] %v8939_v5  ;;  %v1530_v51 = vsel %vm1473_vm6, %v12226_v47, %v12225_v16  ;;  %v1320_v5 = vadd.f32 %v1306_v48, %v1095_v18  ;;  %v1895_v44 = vadd.f32 %v7020_v40, %v1717_v28  ;;  %v8996_v47 = vstv %s8920_s30  ;;  %v12235_v48 = vld [vmem:[#allocation71_spill] sm:$0xff]  ;;  %s9701_s30 = sld [smem:[#allocation2 + $0x4b]] }
 0x35c   :  { %3212 = vrot.lane.b32.xlu0 %v3192_v54, %s6379_s24  ;;  %3652 = vrot.lane.b32.xlu1 %v3636_v27, %s6381_s9  ;;  %v1319_v54 = vadd.f32 %v1305_v62, %v1094_v56  ;;  %v1897_v27 = vadd.f32 %v7020_v40, %v1719_v39  ;;  %v1083_v56 = vsel %vm1023_vm4, %v12231_v26, %v12230_v31  ;;  %v12232_v39 = vld [vmem:[#allocation85_spill] sm:$0xff]  ;;  %v12233_v62 = vld [vmem:[#allocation84_spill] sm:$0xff] }
 0x35d   :  { %v1755_v15 = vsel %vm1698_vm7, %v12233_v62, %v12232_v39  ;;  %v1756_v16 = vsel %vm1698_vm7, %v12232_v39, %v12234_v21  ;;  %v9006_v40 = vld [vmem:[%s11514_s0 + $0x10] sm:$0xff]  ;;  %v3417_v18 = vmul.f32 %v8170_v3, %v8605_v30  ;;  %v874_v28 = vadd.f32 %v859_v11, %v649_v0 }
 0x35e   :  { %v8984_v55 = vpop.permute.xlu0 %3828  ;;  %v8986_v10 = vpop.permute.xlu1 %3830  ;;  %v3022_v26 = vmul.f32 %v9006_v40, %v8929_v23  ;;  %v185_v39 = vsel %vm123_vm0, %v12183_v25, %v12235_v48  ;;  %v1544_v62 = vadd.f32 %v1530_v51, %v1319_v54  ;;  %v1084_v9 = vsel %vm1023_vm4, %v12230_v31, %v12237_v24  ;;  %v12240_v11 = vld [vmem:[#allocation82_spill] sm:$0xff] }
 0x35f   :  { %12228 = vst [vmem:[#allocation18_spill] sm:$0xff] %v8984_v55  ;;  %12229 = vst [vmem:[#allocation19_spill] sm:$0xff] %v8986_v10  ;;  %v1905_v55 = vmax.f32 %v1897_v27, 0.0  ;;  %v12236_v10 = vld [vmem:[#allocation72_spill] sm:$0xff]  ;;  %v1098_v25 = vadd.f32 %v1083_v56, %v873_v2  ;;  %v1903_v51 = vmax.f32 %v1895_v44, 0.0  ;;  %v3418_v31 = vmul.f32 %v8207_v53, %v8605_v30 }
 0x360   :  { %3036 = vrot.lane.b32.xlu0 %v3020_v36, %s6378_s19  ;;  %3038 = vrot.lane.b32.xlu1 %v3021_v33, %s6378_s19  ;;  %v1545_v36 = vadd.f32 %v1531_v29, %v1320_v5  ;;  %v201_v33 = vadd.f32 %v12235_v48, %v8783_v59  ;;  %v632_v14 = vsel %vm573_vm2, %v12188_v57, %v12236_v10  ;;  %v12241_v5 = vld [vmem:[#allocation81_spill] sm:$0xff]  ;;  %v12242_v29 = vld [vmem:[#allocation83_spill] sm:$0xff] }
 0x361   :  { %v1308_v54 = vsel %vm1248_vm5, %v12241_v5, %v12240_v11  ;;  %v1769_v27 = vadd.f32 %v1755_v15, %v1544_v62  ;;  %v1309_v57 = vsel %vm1248_vm5, %v12240_v11, %v12242_v29  ;;  %v3419_v2 = vmul.f32 %v8274_v1, %v8605_v30  ;;  %v12244_v11 = vld [vmem:[#allocation92_spill] sm:$0xff] }
 0x362   :  { %v9023_v3 = vpop.permute.xlu0 %3832  ;;  %v9025_v0 = vpop.permute.xlu1 %4268  ;;  %v1770_v59 = vadd.f32 %v1756_v16, %v1545_v36  ;;  %v200_v56 = vadd.f32 %v185_v39, %v8780_v12  ;;  %v646_v48 = vadd.f32 %v632_v14, %v421_v61  ;;  %v1099_v15 = vadd.f32 %v1084_v9, %v874_v28  ;;  %v12243_v36 = vld [vmem:[#allocation93_spill] sm:$0xff]  ;;  %v12248_v61 = vld [vmem:[#allocation102_spill] sm:$0xff]  ;;  %v12250_v28 = vld [vmem:[#allocation103_spill] sm:$0xff] }
 0x363   :  { %12238 = vst [vmem:[#allocation20_spill] sm:$0xff] %v9023_v3  ;;  %12239 = vst [vmem:[#allocation23_spill] sm:$0xff] %v9025_v0  ;;  %v9041_v16 = vstv %s8975_s14  ;;  %v647_v44 = vadd.f32 %v12236_v10, %v422_v20  ;;  %v1323_v62 = vadd.f32 %v1308_v54, %v1098_v25  ;;  %v1909_v9 = vadd.f32 %v8996_v47, %v1769_v27  ;;  %v12249_v20 = vld [vmem:[#allocation101_spill] sm:$0xff]  ;;  %s9371_s14 = sld [smem:[#allocation2 + $0x27]] }
 0x364   :  { %3040 = vrot.lane.b32.xlu0 %v3022_v26, %s6378_s19  ;;  %3438 = vrot.lane.b32.xlu1 %v3417_v18, %s6380_s29  ;;  %v1533_v26 = vsel %vm1473_vm6, %v12244_v11, %v12243_v36  ;;  %v12245_v18 = vld [vmem:[#allocation94_spill] sm:$0xff]  ;;  %v1324_v12 = vadd.f32 %v1309_v57, %v1099_v15  ;;  %v1910_v14 = vadd.f32 %v8996_v47, %v1770_v59  ;;  %v12251_v59 = vld [vmem:[#allocation79_spill] sm:$0xff] }
 0x365   :  { %v1534_v53 = vsel %vm1473_vm6, %v12243_v36, %v12245_v18  ;;  %v1758_v10 = vsel %vm1698_vm7, %v12249_v20, %v12248_v61  ;;  %v1759_v39 = vsel %vm1698_vm7, %v12248_v61, %v12250_v28  ;;  %v3861_v25 = vmul.f32 %v8960_v6, %v9041_v16  ;;  %v12252_v61 = vld [vmem:[#allocation80_spill] sm:$0xff] }
 0x366   :  { %v9050_v5 = vpop.permute.xlu0 %4270  ;;  %v9052_v3 = vpop.permute.xlu1 %4272  ;;  %v3862_v54 = vmul.f32 %v9006_v40, %v9041_v16  ;;  %v6120_v27 = vpack.i.bf16 %v1903_v51, %v1905_v55  ;;  %v410_v57 = vsel %vm348_vm1, %v12193_v38, %v12251_v59  ;;  %v1548_v15 = vadd.f32 %v1533_v26, %v1323_v62  ;;  %v12253_v20 = vld [vmem:[#allocation88_spill] sm:$0xff] }
 0x367   :  { %12246 = vst [vmem:[#allocation22_spill] sm:$0xff] %v9050_v5  ;;  %12247 = vst [vmem:[#allocation24_spill] sm:$0xff] %v9052_v3  ;;  %v1549_v36 = vadd.f32 %v1534_v53, %v1324_v12  ;;  %v426_v11 = vadd.f32 %v12251_v59, %v201_v33  ;;  %v12254_v3 = vld [vmem:[#allocation87_spill] sm:$0xff]  ;;  %v1917_v51 = vmax.f32 %v1909_v9, 0.0  ;;  %v1918_v38 = vmax.f32 %v1910_v14, 0.0  ;;  %v12257_v9 = vld [vmem:[#allocation89_spill] sm:$0xff] }
 0x368   :  { %3440 = vrot.lane.b32.xlu0 %v3418_v31, %s6380_s29  ;;  %3442 = vrot.lane.b32.xlu1 %v3419_v2, %s6380_s29  ;;  %v857_v31 = vsel %vm798_vm3, %v12198_v34, %v12252_v61  ;;  %v872_v2 = vadd.f32 %v12252_v61, %v647_v44  ;;  %v237_v0 = vsel %vm123_vm0, %v12254_v3, %v12253_v20  ;;  %v9088_v34 = vld [vmem:[%s11514_s0 + $0x18] sm:$0xff] }
 0x369   :  { %v1773_v62 = vadd.f32 %v1758_v10, %v1548_v15  ;;  %v1774_v26 = vadd.f32 %v1759_v39, %v1549_v36  ;;  %v425_v53 = vadd.f32 %v410_v57, %v200_v56  ;;  %v3863_v33 = vmul.f32 %v9088_v34, %v9041_v16  ;;  %v9104_v10 = vld [vmem:[%s11514_s0 + $0x28] sm:$0xff]  ;;  %v12263_v61 = vld [vmem:[#allocation47_spill] sm:$0xff] }
 0x36a   :  { %v9079_v5 = vpop.permute.xlu0 %2758  ;;  %v9081_v55 = vpop.permute.xlu1 %2760  ;;  %v4259_v44 = vmul.f32 %v8274_v1, %v8347_v4  ;;  %v871_v12 = vadd.f32 %v857_v31, %v646_v48  ;;  %v238_v56 = vsel %vm123_vm0, %v12253_v20, %v12257_v9  ;;  %v9099_v14 = vmul.f32 %v8281_v19, %v8935_v35  ;;  %v12258_v4 = vld [vmem:[#allocation90_spill] sm:$0xff] }
 0x36b   :  { %12255 = vst [vmem:[#allocation26_spill] sm:$0xff] %v9079_v5  ;;  %12256 = vst [vmem:[#allocation25_spill] sm:$0xff] %v9081_v55  ;;  %v9108_v39 = vmul.f32 %v9104_v10, %v8935_v35  ;;  %v251_v1 = vadd.f32 %v237_v0, %v8797_v22  ;;  %v635_v48 = vsel %vm573_vm2, %v12207_v50, %v12258_v4  ;;  %v1902_v31 = vmax.f32 %v12263_v61, 0.0  ;;  %v12273_v61 = vld [vmem:[#allocation106_spill] sm:$0xff]  ;;  %v12275_v5 = vld [vmem:[#allocation107_spill] sm:$0xff] }
 0x36c   :  { %3878 = vrot.lane.b32.xlu0 %v3861_v25, %s6382_s10  ;;  %3880 = vrot.lane.b32.xlu1 %v3862_v54, %s6382_s10  ;;  %v12259_v25 = vld [vmem:[#allocation91_spill] sm:$0xff]  ;;  %v253_v36 = vadd.f32 %v12257_v9, %v8814_v41  ;;  %v1913_v22 = vadd.f32 %v8996_v47, %v1773_v62  ;;  %v1914_v0 = vadd.f32 %v8996_v47, %v1774_v26  ;;  %v12265_v26 = vld [vmem:[#allocation96_spill] sm:$0xff] }
 0x36d   :  { %v1082_v19 = vsel %vm1023_vm4, %v12213_v13, %v12259_v25  ;;  %v12260_v54 = vld [vmem:[#allocation95_spill] sm:$0xff]  ;;  %v9128_v50 = vpack.i.bf16 %v1918_v38, %v1917_v51  ;;  %v252_v13 = vadd.f32 %v238_v56, %v8810_v32  ;;  %v651_v20 = vadd.f32 %v12258_v4, %v426_v11  ;;  %v12264_v11 = vld [vmem:[#allocation97_spill] sm:$0xff] }
 0x36e   :  { %v236_v59 = vsel %vm123_vm0, %v12260_v54, %v12254_v3  ;;  %v9120_v57 = vpop.permute.xlu0 %2762  ;;  %v9122_v15 = vpop.permute.xlu1 %3162  ;;  %v9138_v41 = vld [vmem:[%s11514_s0 + $0x20] sm:$0xff]  ;;  %v650_v51 = vadd.f32 %v635_v48, %v425_v53  ;;  %v1096_v38 = vadd.f32 %v1082_v19, %v871_v12  ;;  %v1097_v62 = vadd.f32 %v12259_v25, %v872_v2 }
 0x36f   :  { %12261 = vst [vmem:[#allocation27_spill] sm:$0xff] %v9120_v57  ;;  %12262 = vst [vmem:[#allocation29_spill] sm:$0xff] %v9122_v15  ;;  %v3416_v3 = vmul.f32 %v9138_v41, %v8605_v30  ;;  %v250_v32 = vadd.f32 %v236_v59, %v8840_v58  ;;  %v12267_v4 = vld [vmem:[#allocation99_spill] sm:$0xff]  ;;  %v12270_v58 = vld [vmem:[#allocation100_spill] sm:$0xff]  ;;  %v1921_v48 = vmax.f32 %v1913_v22, 0.0  ;;  %v1922_v25 = vmax.f32 %v1914_v0, 0.0 }
 0x370   :  { %3882 = vrot.lane.b32.xlu0 %v3863_v33, %s6382_s10  ;;  %4282 = vrot.lane.b32.xlu1 %v4259_v44, %s6384_s17  ;;  %v462_v33 = vsel %vm348_vm1, %v12265_v26, %v12264_v11  ;;  %v12266_v44 = vld [vmem:[#allocation98_spill] sm:$0xff]  ;;  %v860_v30 = vsel %vm798_vm3, %v12224_v45, %v12267_v4  ;;  %v1307_v12 = vsel %vm1248_vm5, %v12223_v49, %v12270_v58  ;;  %v12271_v19 = vld [vmem:[#allocation104_spill] sm:$0xff] }
 0x371   :  { %v463_v9 = vsel %vm348_vm1, %v12264_v11, %v12266_v44  ;;  %v478_v56 = vadd.f32 %v12266_v44, %v253_v36  ;;  %v461_v54 = vsel %vm348_vm1, %v12271_v19, %v12265_v26  ;;  %v12272_v59 = vld [vmem:[#allocation70_spill] sm:$0xff]  ;;  %v12274_v11 = vld [vmem:[#allocation105_spill] sm:$0xff]  ;;  %v3860_v44 = vmul.f32 %v8953_v43, %v9041_v16 }
 0x372   :  { %v9156_v53 = vpop.permute.xlu0 %3602  ;;  %v9158_v2 = vpop.permute.xlu1 %4052  ;;  %v1906_v36 = vmax.f32 %v12272_v59, 0.0  ;;  %v240_v45 = vsel %vm123_vm0, %v12274_v11, %v12273_v61  ;;  %v2800_v49 = vmul.f32 %v9138_v41, %v8715_v46  ;;  %v476_v22 = vadd.f32 %v462_v33, %v251_v1  ;;  %v12278_v1 = vld [vmem:[#allocation109_spill] sm:$0xff] }
 0x373   :  { %12268 = vst [vmem:[#allocation33_spill] sm:$0xff] %v9156_v53  ;;  %12269 = vst [vmem:[#allocation36_spill] sm:$0xff] %v9158_v2  ;;  %v477_v0 = vadd.f32 %v463_v9, %v252_v13  ;;  %v876_v26 = vadd.f32 %v12267_v4, %v651_v20  ;;  %v1322_v19 = vadd.f32 %v12270_v58, %v1097_v62  ;;  %v12279_v13 = vld [vmem:[#allocation108_spill] sm:$0xff]  ;;  %v12282_v4 = vld [vmem:[#allocation110_spill] sm:$0xff]  ;;  %v9214_v58 = vstv %s9144_s28  ;;  %s9651_s28 = sld [smem:[#allocation2 + $0x2f]] }
 0x374   :  { %6121 = vrot.lane.b32.xlu0 %v6120_v27, %s6385_s25  ;;  %3436 = vrot.lane.b32.xlu1 %v3416_v3, %s6380_s29  ;;  %v875_v59 = vadd.f32 %v860_v30, %v650_v51  ;;  %v1321_v53 = vadd.f32 %v1307_v12, %v1096_v38  ;;  %v475_v15 = vadd.f32 %v461_v54, %v250_v32  ;;  %v12281_v38 = vld [vmem:[#allocation112_spill] sm:$0xff] }
 0x375   :  { %v241_v27 = vsel %vm123_vm0, %v12273_v61, %v12275_v5  ;;  %v255_v2 = vadd.f32 %v240_v45, %v8861_v7  ;;  %v687_v20 = vsel %vm573_vm2, %v12279_v13, %v12278_v1  ;;  %v9189_v33 = vpack.i.bf16 %v1921_v48, %v1902_v31  ;;  %v9203_v7 = vld [vmem:[%s11514_s0 + $0x30] sm:$0xff] }
 0x376   :  { %v9181_v3 = vpop.permute.xlu0 %4054  ;;  %v9183_v55 = vpop.permute.xlu1 %4056  ;;  %v9191_v51 = vpack.i.bf16 %v1906_v36, %v1922_v25  ;;  %v1532_v62 = vsel %vm1473_vm6, %v12227_v17, %v12281_v38  ;;  %v2801_v32 = vmul.f32 %v9104_v10, %v8715_v46  ;;  %v2802_v31 = vmul.f32 %v9203_v7, %v8715_v46  ;;  %v12283_v25 = vld [vmem:[#allocation111_spill] sm:$0xff]  ;;  %v12284_v36 = vld [vmem:[#allocation122_spill] sm:$0xff] }
 0x377   :  { %12276 = vst [vmem:[#allocation35_spill] sm:$0xff] %v9181_v3  ;;  %12277 = vst [vmem:[#allocation37_spill] sm:$0xff] %v9183_v55  ;;  %v256_v9 = vadd.f32 %v241_v27, %v8874_v52  ;;  %v257_v17 = vadd.f32 %v12275_v5, %v8878_v37  ;;  %v688_v30 = vsel %vm573_vm2, %v12278_v1, %v12282_v4 }
 0x378   :  { %12280 = vst [vmem:[#allocation39_spill] sm:$0xff] %v9191_v51  ;;  %3876 = vrot.lane.b32.xlu0 %v3860_v44, %s6382_s10  ;;  %2820 = vrot.lane.b32.xlu1 %v2800_v49, %s6377_s15  ;;  %v701_v12 = vadd.f32 %v687_v20, %v476_v22  ;;  %v703_v48 = vadd.f32 %v12282_v4, %v478_v56  ;;  %v12287_v44 = vld [vmem:[#allocation113_spill] sm:$0xff]  ;;  %v12288_v56 = vld [vmem:[#allocation114_spill] sm:$0xff]  ;;  %v12289_v20 = vld [vmem:[#allocation116_spill] sm:$0xff] }
 0x379   :  { %v1085_v54 = vsel %vm1023_vm4, %v12237_v24, %v12283_v25  ;;  %v1757_v52 = vsel %vm1698_vm7, %v12234_v21, %v12284_v36  ;;  %v1546_v5 = vadd.f32 %v1532_v62, %v1321_v53  ;;  %v1547_v45 = vadd.f32 %v12281_v38, %v1322_v19  ;;  %v12290_v38 = vld [vmem:[#allocation115_spill] sm:$0xff] }
 0x37a   :  { %v9223_v61 = vpop.permute.xlu0 %2756  ;;  %v9225_v37 = vpop.permute.xlu1 %2982  ;;  %v239_v49 = vsel %vm123_vm0, %v12287_v44, %v12274_v11  ;;  %v686_v22 = vsel %vm573_vm2, %v12288_v56, %v12279_v13  ;;  %v702_v24 = vadd.f32 %v688_v30, %v477_v0  ;;  %v3244_v21 = vmul.f32 %v8953_v43, %v9214_v58  ;;  %v12294_v30 = vld [vmem:[#allocation119_spill] sm:$0xff] }
 0x37b   :  { %12285 = vst [vmem:[#allocation38_spill] sm:$0xff] %v9223_v61  ;;  %12286 = vst [vmem:[#allocation40_spill] sm:$0xff] %v9225_v37  ;;  %v3245_v53 = vmul.f32 %v8960_v6, %v9214_v58  ;;  %v1100_v19 = vadd.f32 %v1085_v54, %v875_v59  ;;  %v1101_v27 = vadd.f32 %v12283_v25, %v876_v26  ;;  %v12293_v26 = vld [vmem:[#allocation117_spill] sm:$0xff]  ;;  %v12295_v25 = vld [vmem:[#allocation118_spill] sm:$0xff] }
 0x37c   :  { %2822 = vrot.lane.b32.xlu0 %v2801_v32, %s6377_s15  ;;  %2824 = vrot.lane.b32.xlu1 %v2802_v31, %s6377_s15  ;;  %v1771_v1 = vadd.f32 %v1757_v52, %v1546_v5  ;;  %v1772_v11 = vadd.f32 %v12284_v36, %v1547_v45  ;;  %v254_v0 = vadd.f32 %v239_v49, %v8893_v63  ;;  %v12297_v52 = vld [vmem:[#allocation121_spill] sm:$0xff] }
 0x37d   :  { %v700_v13 = vadd.f32 %v686_v22, %v475_v15  ;;  %v465_v62 = vsel %vm348_vm1, %v12290_v38, %v12289_v20  ;;  %v9250_v32 = vmul.f32 %v9088_v34, %v8935_v35  ;;  %v466_v4 = vsel %vm348_vm1, %v12289_v20, %v12293_v26  ;;  %v12296_v15 = vld [vmem:[#allocation120_spill] sm:$0xff] }
 0x37e   :  { %v9252_v31 = vpop.permute.xlu0 %2984  ;;  %v9254_v59 = vpop.permute.xlu1 %2986  ;;  %v912_v63 = vsel %vm798_vm3, %v12295_v25, %v12294_v30  ;;  %v913_v54 = vsel %vm798_vm3, %v12294_v30, %v12296_v15  ;;  %v9267_v36 = vmul.f32 %v9006_v40, %v8935_v35  ;;  %v1310_v5 = vsel %vm1248_vm5, %v12242_v29, %v12297_v52 }
 0x37f   :  { %12291 = vst [vmem:[#allocation43_spill] sm:$0xff] %v9252_v31  ;;  %12292 = vst [vmem:[#allocation48_spill] sm:$0xff] %v9254_v59  ;;  %v3246_v45 = vmul.f32 %v9006_v40, %v9214_v58  ;;  %v3641_v44 = vmul.f32 %v9104_v10, %v8817_v60  ;;  %v480_v49 = vadd.f32 %v465_v62, %v255_v2 }
 0x380   :  { %3260 = vrot.lane.b32.xlu0 %v3244_v21, %s6379_s24  ;;  %3262 = vrot.lane.b32.xlu1 %v3245_v53, %s6379_s24  ;;  %v482_v56 = vadd.f32 %v12293_v26, %v257_v17  ;;  %v1911_v22 = vadd.f32 %v8996_v47, %v1771_v1  ;;  %v1912_v20 = vadd.f32 %v8996_v47, %v1772_v11  ;;  %v12298_v21 = vld [vmem:[#allocation123_spill] sm:$0xff]  ;;  %v12301_v1 = vld [vmem:[#allocation124_spill] sm:$0xff] }
 0x381   :  { %v481_v30 = vadd.f32 %v466_v4, %v256_v9  ;;  %v926_v37 = vadd.f32 %v912_v63, %v701_v12  ;;  %v928_v29 = vadd.f32 %v12296_v15, %v703_v48  ;;  %v464_v53 = vsel %vm348_vm1, %v12298_v21, %v12290_v38  ;;  %v12302_v12 = vld [vmem:[#allocation134_spill] sm:$0xff]  ;;  %v12304_v63 = vld [vmem:[#allocation125_spill] sm:$0xff] }
 0x382   :  { %v9285_v31 = vpop.permute.xlu0 %3386  ;;  %v9287_v61 = vpop.permute.xlu1 %3826  ;;  %v927_v2 = vadd.f32 %v913_v54, %v702_v24  ;;  %v1325_v62 = vadd.f32 %v1310_v5, %v1100_v19  ;;  %v1326_v17 = vadd.f32 %v12297_v52, %v1101_v27  ;;  %v911_v9 = vsel %vm798_vm3, %v12301_v1, %v12295_v25  ;;  %v9303_v24 = vld [vmem:[%s11514_s0 + $0x38] sm:$0xff] }
 0x383   :  { %12299 = vst [vmem:[#allocation50_spill] sm:$0xff] %v9285_v31  ;;  %12300 = vst [vmem:[#allocation52_spill] sm:$0xff] %v9287_v61  ;;  %v1535_v48 = vsel %vm1473_vm6, %v12245_v18, %v12302_v12  ;;  %v3642_v11 = vmul.f32 %v9203_v7, %v8817_v60  ;;  %v3643_v19 = vmul.f32 %v9303_v24, %v8817_v60  ;;  %v1919_v27 = vmax.f32 %v1911_v22, 0.0  ;;  %v12303_v25 = vld [vmem:[#allocation126_spill] sm:$0xff]  ;;  %v12305_v54 = vld [vmem:[#allocation127_spill] sm:$0xff] }
 0x384   :  { %3264 = vrot.lane.b32.xlu0 %v3246_v45, %s6379_s24  ;;  %3662 = vrot.lane.b32.xlu1 %v3641_v44, %s6381_s9  ;;  %v1920_v38 = vmax.f32 %v1912_v20, 0.0  ;;  %v479_v26 = vadd.f32 %v464_v53, %v254_v0  ;;  %v9308_v4 = vstv %s9242_s1  ;;  %v925_v18 = vadd.f32 %v911_v9, %v700_v13  ;;  %v12306_v5 = vld [vmem:[#allocation146_spill] sm:$0xff]  ;;  %v12309_v0 = vld [vmem:[#allocation129_spill] sm:$0xff]  ;;  %v12310_v20 = vld [vmem:[#allocation128_spill] sm:$0xff] }
 0x385   :  { %v292_v15 = vsel %vm123_vm0, %v12304_v63, %v12303_v25  ;;  %v293_v52 = vsel %vm123_vm0, %v12303_v25, %v12305_v54  ;;  %v1760_v45 = vsel %vm1698_vm7, %v12250_v28, %v12306_v5  ;;  %v690_v13 = vsel %vm573_vm2, %v12310_v20, %v12309_v0  ;;  %v12311_v21 = vld [vmem:[#allocation130_spill] sm:$0xff]  ;;  %v12312_v25 = vld [vmem:[#allocation132_spill] sm:$0xff]  ;;  %v12313_v63 = vld [vmem:[#allocation131_spill] sm:$0xff] }
 0x386   :  { %v9319_v44 = vpop.permute.xlu0 %4276  ;;  %v9321_v22 = vpop.permute.xlu1 %4278  ;;  %v691_v53 = vsel %vm573_vm2, %v12309_v0, %v12311_v21  ;;  %v1550_v1 = vadd.f32 %v1535_v48, %v1325_v62  ;;  %v1551_v9 = vadd.f32 %v12302_v12, %v1326_v17  ;;  %v1137_v61 = vsel %vm1023_vm4, %v12313_v63, %v12312_v25 }
 0x387   :  { %12307 = vst [vmem:[#allocation51_spill] sm:$0xff] %v9319_v44  ;;  %12308 = vst [vmem:[#allocation59_spill] sm:$0xff] %v9321_v22  ;;  %v4085_v28 = vmul.f32 %v8960_v6, %v9308_v4  ;;  %v4086_v31 = vmul.f32 %v9006_v40, %v9308_v4  ;;  %v306_v44 = vadd.f32 %v292_v15, %v8969_v42  ;;  %v12315_v22 = vld [vmem:[#allocation133_spill] sm:$0xff]  ;;  %v12318_v15 = vld [vmem:[#allocation135_spill] sm:$0xff] }
 0x388   :  { %3664 = vrot.lane.b32.xlu0 %v3642_v11, %s6381_s9  ;;  %3666 = vrot.lane.b32.xlu1 %v3643_v19, %s6381_s9  ;;  %v1775_v0 = vadd.f32 %v1760_v45, %v1550_v1  ;;  %v1776_v62 = vadd.f32 %v12306_v5, %v1551_v9  ;;  %v9341_v17 = vpack.i.bf16 %v1920_v38, %v1919_v27  ;;  %v12319_v38 = vld [vmem:[#allocation136_spill] sm:$0xff]  ;;  %v12327_v9 = vld [vmem:[#allocation142_spill] sm:$0xff] }
 0x389   :  { %v307_v12 = vadd.f32 %v293_v52, %v8973_v8  ;;  %v705_v48 = vadd.f32 %v690_v13, %v480_v49  ;;  %v707_v11 = vadd.f32 %v12311_v21, %v482_v56  ;;  %v1138_v19 = vsel %vm1023_vm4, %v12312_v25, %v12315_v22  ;;  %v12322_v13 = vld [vmem:[#allocation139_spill] sm:$0xff] }
 0x38a   :  { %12314 = vst [vmem:[#allocation53_spill] sm:$0xff] %v9341_v17  ;;  %v9348_v55 = vpop.permute.xlu0 %4280  ;;  %v9350_v3 = vpop.permute.xlu1 %2980  ;;  %v706_v59 = vadd.f32 %v691_v53, %v481_v30  ;;  %v1151_v42 = vadd.f32 %v1137_v61, %v926_v37  ;;  %v689_v27 = vsel %vm573_vm2, %v12318_v15, %v12310_v20  ;;  %v1136_v8 = vsel %vm1023_vm4, %v12319_v38, %v12313_v63  ;;  %v12326_v53 = vld [vmem:[#allocation140_spill] sm:$0xff]  ;;  %v12329_v25 = vld [vmem:[#allocation143_spill] sm:$0xff]  ;;  %v12368_v17 = vld [vmem:[#allocation166_spill] sm:$0xff] }
 0x38b   :  { %12316 = vst [vmem:[#allocation55_spill] sm:$0xff] %v9348_v55  ;;  %12317 = vst [vmem:[#allocation54_spill] sm:$0xff] %v9350_v3  ;;  %v1153_v49 = vadd.f32 %v12315_v22, %v928_v29  ;;  %v4087_v56 = vmul.f32 %v9088_v34, %v9308_v4  ;;  %v3640_v61 = vmul.f32 %v9138_v41, %v8817_v60  ;;  %v12321_v22 = vld [vmem:[#allocation137_spill] sm:$0xff] }
 0x38c   :  { %4102 = vrot.lane.b32.xlu0 %v4085_v28, %s6383_s13  ;;  %4104 = vrot.lane.b32.xlu1 %v4086_v31, %s6383_s13  ;;  %v1152_v37 = vadd.f32 %v1138_v19, %v927_v2  ;;  %v1915_v30 = vadd.f32 %v8996_v47, %v1775_v0  ;;  %v1916_v52 = vadd.f32 %v8996_v47, %v1776_v62  ;;  %v12320_v31 = vld [vmem:[#allocation138_spill] sm:$0xff]  ;;  %v12325_v47 = vld [vmem:[#allocation141_spill] sm:$0xff] }
 0x38d   :  { %v9369_v5 = vmul.f32 %v9303_v24, %v8935_v35  ;;  %v704_v29 = vadd.f32 %v689_v27, %v479_v26  ;;  %v1150_v45 = vadd.f32 %v1136_v8, %v925_v18  ;;  %v517_v20 = vsel %vm348_vm1, %v12321_v22, %v12320_v31  ;;  %v12328_v18 = vld [vmem:[#allocation144_spill] sm:$0xff]  ;;  %v12330_v0 = vld [vmem:[#allocation145_spill] sm:$0xff] }
 0x38e   :  { %v518_v60 = vsel %vm348_vm1, %v12320_v31, %v12322_v13  ;;  %v9379_v2 = vpop.permute.xlu0 %2766  ;;  %v9381_v21 = vpop.permute.xlu1 %2768  ;;  %v915_v1 = vsel %vm798_vm3, %v12326_v53, %v12325_v47  ;;  %v916_v26 = vsel %vm798_vm3, %v12325_v47, %v12327_v9  ;;  %v1362_v63 = vsel %vm1248_vm5, %v12329_v25, %v12328_v18  ;;  %v12331_v47 = vld [vmem:[#allocation147_spill] sm:$0xff] }
 0x38f   :  { %12323 = vst [vmem:[#allocation60_spill] sm:$0xff] %v9379_v2  ;;  %12324 = vst [vmem:[#allocation56_spill] sm:$0xff] %v9381_v21  ;;  %v9394_v28 = vmul.f32 %v9203_v7, %v8935_v35  ;;  %v1363_v62 = vsel %vm1248_vm5, %v12328_v18, %v12330_v0  ;;  %v4084_v19 = vmul.f32 %v8953_v43, %v9308_v4  ;;  %v1923_v35 = vmax.f32 %v1915_v30, 0.0 }
 0x390   :  { %4106 = vrot.lane.b32.xlu0 %v4087_v56, %s6383_s13  ;;  %3660 = vrot.lane.b32.xlu1 %v3640_v61, %s6381_s9  ;;  %v3024_v15 = vmul.f32 %v9138_v41, %v8929_v23  ;;  %v531_v27 = vadd.f32 %v517_v20, %v306_v44  ;;  %v532_v38 = vadd.f32 %v518_v60, %v307_v12  ;;  %v1924_v8 = vmax.f32 %v1916_v52, 0.0  ;;  %v12332_v56 = vld [vmem:[#allocation148_spill] sm:$0xff]  ;;  %v12335_v52 = vld [vmem:[#allocation150_spill] sm:$0xff] }
 0x391   :  { %v930_v31 = vadd.f32 %v915_v1, %v705_v48  ;;  %v932_v22 = vadd.f32 %v12327_v9, %v707_v11  ;;  %v914_v18 = vsel %vm798_vm3, %v12331_v47, %v12326_v53  ;;  %v1361_v61 = vsel %vm1248_vm5, %v12332_v56, %v12329_v25  ;;  %v12336_v11 = vld [vmem:[#allocation149_spill] sm:$0xff]  ;;  %v12339_v1 = vld [vmem:[#allocation151_spill] sm:$0xff]  ;;  %v12341_v25 = vld [vmem:[#allocation152_spill] sm:$0xff] }
 0x392   :  { %v9414_v2 = vpop.permute.xlu0 %2770  ;;  %v9416_v21 = vpop.permute.xlu1 %3206  ;;  %v931_v44 = vadd.f32 %v916_v26, %v706_v59  ;;  %v1376_v12 = vadd.f32 %v1362_v63, %v1151_v42  ;;  %v1377_v30 = vadd.f32 %v1363_v62, %v1152_v37  ;;  %v1378_v48 = vadd.f32 %v12330_v0, %v1153_v49  ;;  %v12340_v26 = vld [vmem:[#allocation153_spill] sm:$0xff]  ;;  %v12342_v0 = vld [vmem:[#allocation154_spill] sm:$0xff]  ;;  %v12348_v56 = vld [vmem:[#allocation159_spill] sm:$0xff] }
 0x393   :  { %12333 = vst [vmem:[#allocation61_spill] sm:$0xff] %v9414_v2  ;;  %12334 = vst [vmem:[#allocation68_spill] sm:$0xff] %v9416_v21  ;;  %v295_v20 = vsel %vm123_vm0, %v12336_v11, %v12335_v52  ;;  %v3025_v60 = vmul.f32 %v9104_v10, %v8929_v23  ;;  %v3026_v59 = vmul.f32 %v9203_v7, %v8929_v23  ;;  %v9431_v49 = vstv %s9371_s14  ;;  %v12347_v47 = vld [vmem:[#allocation157_spill] sm:$0xff]  ;;  %v12367_v2 = vld [vmem:[#allocation167_spill] sm:$0xff]  ;;  %s9848_s14 = sld [smem:[#allocation2 + $0x37]] }
 0x394   :  { %4100 = vrot.lane.b32.xlu0 %v4084_v19, %s6383_s13  ;;  %3044 = vrot.lane.b32.xlu1 %v3024_v15, %s6378_s19  ;;  %v929_v42 = vadd.f32 %v914_v18, %v704_v29  ;;  %v1375_v37 = vadd.f32 %v1361_v61, %v1150_v45  ;;  %12337 = vst [vmem:[#allocation69_spill] sm:$0xff] %v9431_v49  ;;  %v12343_v19 = vld [vmem:[#allocation156_spill] sm:$0xff]  ;;  %v12344_v15 = vld [vmem:[#allocation155_spill] sm:$0xff]  ;;  %v12349_v61 = vld [vmem:[#allocation158_spill] sm:$0xff]  ;;  %v9459_v11 = vstv %s9396_s16  ;;  %s10202_s16 = sld [smem:[#allocation2 + $0x47]] }
 0x395   :  { %v9433_v53 = vpack.i.bf16 %v1924_v8, %v1923_v35  ;;  %v296_v9 = vsel %vm123_vm0, %v12335_v52, %v12339_v1  ;;  %v742_v63 = vsel %vm573_vm2, %v12341_v25, %v12340_v26  ;;  %v743_v62 = vsel %vm573_vm2, %v12340_v26, %v12342_v0  ;;  %v12350_v26 = vld [vmem:[#allocation160_spill] sm:$0xff] }
 0x396   :  { %v1140_v29 = vsel %vm1023_vm4, %v12344_v15, %v12343_v19  ;;  %v9447_v45 = vpop.permute.xlu0 %3208  ;;  %v9449_v35 = vpop.permute.xlu1 %3210  ;;  %v310_v8 = vadd.f32 %v295_v20, %v9099_v14  ;;  %v1141_v18 = vsel %vm1023_vm4, %v12343_v19, %v12347_v47  ;;  %v1587_v52 = vsel %vm1473_vm6, %v12349_v61, %v12348_v56 }
 0x397   :  { %12338 = vst [vmem:[#allocation63_spill] sm:$0xff] %v9433_v53  ;;  %12345 = vst [vmem:[#allocation62_spill] sm:$0xff] %v9447_v45  ;;  %v1588_v25 = vsel %vm1473_vm6, %v12348_v56, %v12350_v26  ;;  %v3468_v14 = vmul.f32 %v8953_v43, %v9431_v49  ;;  %v3469_v20 = vmul.f32 %v8960_v6, %v9431_v49 }
 0x398   :  { %12346 = vst [vmem:[#allocation66_spill] sm:$0xff] %v9449_v35  ;;  %3046 = vrot.lane.b32.xlu0 %v3025_v60, %s6378_s19  ;;  %3048 = vrot.lane.b32.xlu1 %v3026_v59, %s6378_s19  ;;  %v311_v19 = vadd.f32 %v296_v9, %v9108_v39  ;;  %v756_v21 = vadd.f32 %v742_v63, %v531_v27  ;;  %v12354_v39 = vld [vmem:[#allocation161_spill] sm:$0xff]  ;;  %v12357_v9 = vld [vmem:[#allocation174_spill] sm:$0xff] }
 0x399   :  { %v757_v45 = vadd.f32 %v743_v62, %v532_v38  ;;  %v1155_v3 = vadd.f32 %v1140_v29, %v930_v31  ;;  %v1156_v55 = vadd.f32 %v1141_v18, %v931_v44  ;;  %v1157_v56 = vadd.f32 %v12347_v47, %v932_v22  ;;  %v12355_v38 = vld [vmem:[#allocation173_spill] sm:$0xff]  ;;  %v12356_v31 = vld [vmem:[#allocation172_spill] sm:$0xff] }
 0x39a   :  { %v1601_v60 = vadd.f32 %v1587_v52, %v1376_v12  ;;  %v9476_v59 = vmul.f32 %v8960_v6, %v9459_v11  ;;  %v9478_v53 = vpop.permute.xlu0 %3610  ;;  %v9480_v35 = vpop.permute.xlu1 %4050  ;;  %v1602_v57 = vadd.f32 %v1588_v25, %v1377_v30  ;;  %v1139_v27 = vsel %vm1023_vm4, %v12354_v39, %v12344_v15  ;;  %v12358_v12 = vld [vmem:[#allocation162_spill] sm:$0xff]  ;;  %v12362_v52 = vld [vmem:[#allocation164_spill] sm:$0xff]  ;;  %v12363_v25 = vld [vmem:[#allocation163_spill] sm:$0xff] }
 0x39b   :  { %12352 = vst [vmem:[#allocation67_spill] sm:$0xff] %v9478_v53  ;;  %12353 = vst [vmem:[#allocation64_spill] sm:$0xff] %v9480_v35  ;;  %v1812_v44 = vsel %vm1698_vm7, %v12356_v31, %v12355_v38  ;;  %v1813_v22 = vsel %vm1698_vm7, %v12355_v38, %v12357_v9  ;;  %v1586_v63 = vsel %vm1473_vm6, %v12358_v12, %v12349_v61  ;;  %v9495_v62 = vstv %s9422_s18  ;;  %s10223_s18 = sld [smem:[#allocation2 + $0x4c]] }
 0x39c   :  { %12351 = vst [vmem:[#allocation65_spill] sm:$0xff] %v9476_v59  ;;  %3484 = vrot.lane.b32.xlu0 %v3468_v14, %s6380_s29  ;;  %3486 = vrot.lane.b32.xlu1 %v3469_v20, %s6380_s29  ;;  %v3470_v30 = vmul.f32 %v9006_v40, %v9431_v49  ;;  %v3865_v15 = vmul.f32 %v9104_v10, %v9041_v16  ;;  %v12364_v20 = vld [vmem:[#allocation165_spill] sm:$0xff] }
 0x39d   :  { %v1603_v29 = vadd.f32 %v12350_v26, %v1378_v48  ;;  %v9506_v47 = vmul.f32 %v9006_v40, %v9459_v11  ;;  %v9510_v18 = vmul.f32 %v9088_v34, %v9459_v11  ;;  %v9514_v61 = vmul.f32 %v8953_v43, %v9459_v11 }
 0x39e   :  { %v520_v14 = vsel %vm348_vm1, %v12363_v25, %v12362_v52  ;;  %v521_v48 = vsel %vm348_vm1, %v12362_v52, %v12364_v20  ;;  %v1826_v26 = vadd.f32 %v1812_v44, %v1601_v60  ;;  %v1827_v39 = vadd.f32 %v1813_v22, %v1602_v57  ;;  %v9522_v38 = vpop.permute.xlu0 %2764  ;;  %v9524_v12 = vpop.permute.xlu1 %3204  ;;  %v2109_v22 = vld [vmem:[%s11516_s2 + $0x18] sm:$0xff] }
 0x39f   :  { %12359 = vst [vmem:[#allocation77_spill] sm:$0xff] %v9506_v47  ;;  %12360 = vst [vmem:[#allocation76_spill] sm:$0xff] %v9510_v18  ;;  %v1154_v35 = vadd.f32 %v1139_v27, %v929_v42  ;;  %v1600_v53 = vadd.f32 %v1586_v63, %v1375_v37  ;;  %v967_v51 = vsel %vm798_vm3, %v12368_v17, %v12367_v2  ;;  %v12370_v47 = vld [vmem:[#allocation170_spill] sm:$0xff]  ;;  %v12371_v18 = vld [vmem:[#allocation169_spill] sm:$0xff]  ;;  %v9545_v44 = vstv %s9471_s20  ;;  %s6388_s20 = smov 64  }
 0x3a0   :  { %12361 = vst [vmem:[#allocation78_spill] sm:$0xff] %v9514_v61  ;;  %12365 = vst [vmem:[#allocation74_spill] sm:$0xff] %v9522_v38  ;;  %v12369_v61 = vld [vmem:[#allocation168_spill] sm:$0xff]  ;;  %v1365_v60 = vsel %vm1248_vm5, %v12371_v18, %v12370_v47  ;;  %3488 = vrot.lane.b32.xlu0 %v3470_v30, %s6380_s29  ;;  %3886 = vrot.lane.b32.xlu1 %v3865_v15, %s6382_s10  ;;  %v3866_v57 = vmul.f32 %v9203_v7, %v9041_v16  ;;  %v12372_v27 = vld [vmem:[#allocation171_spill] sm:$0xff] }
 0x3a1   :  { %12366 = vst [vmem:[#allocation73_spill] sm:$0xff] %v9524_v12  ;;  %v968_v25 = vsel %vm798_vm3, %v12367_v2, %v12369_v61  ;;  %v3867_v42 = vmul.f32 %v9303_v24, %v9041_v16  ;;  %v535_v37 = vadd.f32 %v520_v14, %v310_v8  ;;  %v536_v17 = vadd.f32 %v521_v48, %v311_v19  ;;  %v2121_v63 = vld [vmem:[%s11516_s2 + $0x78] sm:$0x3]  ;;  %v12373_v8 = vld [vmem:[#allocation176_spill] sm:$0xff] }
 0x3a2   :  { %v1366_v2 = vsel %vm1248_vm5, %v12370_v47, %v12372_v27  ;;  %v1928_v30 = vadd.f32 %v9495_v62, %v1826_v26  ;;  %v1929_v15 = vadd.f32 %v9495_v62, %v1827_v39  ;;  %v1811_v19 = vsel %vm1698_vm7, %v12373_v8, %v12356_v31  ;;  %v9558_v52 = vpop.permute.xlu0 %2990  ;;  %v9560_v47 = vpop.permute.xlu1 %2992 }
 0x3a3   :  { %12374 = vst [vmem:[#allocation85_spill] sm:$0xff] %v9558_v52  ;;  %12375 = vst [vmem:[#allocation84_spill] sm:$0xff] %v9560_v47  ;;  %v5998_v14 = vpack.c.bf16 %v2121_v63, %v2109_v22  ;;  %v981_v48 = vadd.f32 %v967_v51, %v756_v21  ;;  %v982_v12 = vadd.f32 %v968_v25, %v757_v45  ;;  %v12383_v63 = vld [vmem:[#allocation178_spill] sm:$0xff] }
 0x3a4   :  { %v1380_v38 = vadd.f32 %v1365_v60, %v1155_v3  ;;  %v1828_v59 = vadd.f32 %v12357_v9, %v1603_v29  ;;  %v9565_v49 = vmul.f32 %v9104_v10, %v9459_v11  ;;  %3888 = vrot.lane.b32.xlu0 %v3866_v57, %s6382_s10  ;;  %3890 = vrot.lane.b32.xlu1 %v3867_v42, %s6382_s10  ;;  %v1936_v45 = vmax.f32 %v1928_v30, 0.0  ;;  %v12376_v29 = vld [vmem:[#allocation175_spill] sm:$0xff]  ;;  %v12377_v60 = vld [vmem:[#allocation185_spill] sm:$0xff]  ;;  %v12378_v57 = vld [vmem:[#allocation184_spill] sm:$0xff] }
 0x3a5   :  { %v4309_v31 = vmul.f32 %v8960_v6, %v9545_v44  ;;  %v4310_v26 = vmul.f32 %v9006_v40, %v9545_v44  ;;  %v1381_v39 = vadd.f32 %v1366_v2, %v1156_v55  ;;  %v1382_v51 = vadd.f32 %v12372_v27, %v1157_v56  ;;  %5999 = vmatprep.subr.bf16.mxu0 %v5998_v14  ;;  %v12381_v56 = vld [vmem:[#allocation177_spill] sm:$0xff]  ;;  %v12382_v2 = vld [vmem:[#allocation179_spill] sm:$0xff] }
 0x3a6   :  { %v1825_v3 = vadd.f32 %v1811_v19, %v1600_v53  ;;  %v9576_v21 = vmul.f32 %v9203_v7, %v9459_v11  ;;  %v1937_v9 = vmax.f32 %v1929_v15, 0.0  ;;  %v1364_v25 = vsel %vm1248_vm5, %v12376_v29, %v12371_v18  ;;  %v9584_v22 = vpop.permute.xlu0 %2994  ;;  %v9586_v55 = vpop.permute.xlu1 %3430  ;;  %v12385_v15 = vld [vmem:[#allocation180_spill] sm:$0xff]  ;;  %v12387_v14 = vld [vmem:[#allocation195_spill] sm:$0xff] }
 0x3a7   :  { %v1590_v42 = vsel %vm1473_vm6, %v12378_v57, %v12377_v60  ;;  %12379 = vst [vmem:[#allocation86_spill] sm:$0xff] %v9584_v22  ;;  %12380 = vst [vmem:[#allocation71_spill] sm:$0xff] %v9586_v55  ;;  %v9589_v53 = vadd.f32 %v9495_v62, %v1828_v59  ;;  %v294_v27 = vsel %vm123_vm0, %v12305_v54, %v12381_v56  ;;  %v12386_v19 = vld [vmem:[#allocation196_spill] sm:$0xff]  ;;  %v12390_v55 = vld [vmem:[#allocation181_spill] sm:$0xff] }
 0x3a8   :  { %v745_v30 = vsel %vm573_vm2, %v12383_v63, %v12382_v2  ;;  %v9599_v18 = vmul.f32 %v9303_v24, %v9459_v11  ;;  %v746_v8 = vsel %vm573_vm2, %v12382_v2, %v12385_v15  ;;  %v1815_v59 = vsel %vm1698_vm7, %v12387_v14, %v12386_v19  ;;  %4326 = vrot.lane.b32.xlu0 %v4309_v31, %s6384_s17  ;;  %v12389_v31 = vld [vmem:[#allocation182_spill] sm:$0xff]  ;;  %v12391_v22 = vld [vmem:[#allocation183_spill] sm:$0xff] }
 0x3a9   :  { %4328 = vrot.lane.b32.xlu1 %v4310_v26, %s6384_s17  ;;  %v4311_v54 = vmul.f32 %v9088_v34, %v9545_v44  ;;  %v1379_v29 = vadd.f32 %v1364_v25, %v1154_v35  ;;  %v9612_v63 = vadd.f32 %v9495_v62, %v1825_v3  ;;  %v1605_v52 = vadd.f32 %v1590_v42, %v1380_v38 }
 0x3aa   :  { %12384 = vst [vmem:[#allocation72_spill] sm:$0xff] %v9599_v18  ;;  %v9616_v47 = vmul.f32 %v9138_v41, %v9459_v11  ;;  %v309_v2 = vadd.f32 %v12381_v56, %v9250_v32  ;;  %v1192_v26 = vsel %vm1023_vm4, %v12390_v55, %v12389_v31  ;;  %v1193_v35 = vsel %vm1023_vm4, %v12389_v31, %v12391_v22  ;;  %v9628_v3 = vpop.permute.xlu0 %3432  ;;  %v9630_v38 = vpop.permute.xlu1 %3434  ;;  %v12394_v32 = vld [vmem:[#allocation186_spill] sm:$0xff] }
 0x3ab   :  { %12392 = vst [vmem:[#allocation82_spill] sm:$0xff] %v9628_v3  ;;  %v9632_v25 = vpack.i.bf16 %v1937_v9, %v1936_v45  ;;  %v308_v11 = vadd.f32 %v294_v27, %v9267_v36  ;;  %v760_v42 = vadd.f32 %v745_v30, %v535_v37  ;;  %v1830_v18 = vadd.f32 %v1815_v59, %v1605_v52  ;;  %v12395_v37 = vld [vmem:[#allocation187_spill] sm:$0xff]  ;;  %v12396_v52 = vld [vmem:[#allocation188_spill] sm:$0xff]  ;;  %v12397_v27 = vld [vmem:[#allocation190_spill] sm:$0xff] }
 0x3ac   :  { %12388 = vst [vmem:[#allocation75_spill] sm:$0xff] %v9616_v47  ;;  %v761_v47 = vadd.f32 %v746_v8, %v536_v17  ;;  %v1591_v56 = vsel %vm1473_vm6, %v12377_v60, %v12394_v32  ;;  %4330 = vrot.lane.b32.xlu0 %v4311_v54, %s6384_s17  ;;  %v3864_v55 = vmul.f32 %v9138_v41, %v9041_v16  ;;  %v12398_v30 = vld [vmem:[#allocation189_spill] sm:$0xff]  ;;  %v12399_v8 = vld [vmem:[#allocation191_spill] sm:$0xff] }
 0x3ad   :  { %12393 = vst [vmem:[#allocation81_spill] sm:$0xff] %v9632_v25  ;;  %6126 = vrot.lane.b32.xlu1 %v9128_v50, %s6385_s25  ;;  %v4308_v45 = vmul.f32 %v8953_v43, %v9545_v44  ;;  %v1206_v9 = vadd.f32 %v1192_v26, %v981_v48  ;;  %v1207_v36 = vadd.f32 %v1193_v35, %v982_v12  ;;  %v12400_v48 = vld [vmem:[#allocation197_spill] sm:$0xff]  ;;  %v12403_v26 = vld [vmem:[#allocation198_spill] sm:$0xff]  ;;  %v9783_v25 = vstv %s9701_s30 }
 0x3ae   :  { %v1589_v17 = vsel %vm1473_vm6, %v12395_v37, %v12378_v57  ;;  %v519_v60 = vsel %vm348_vm1, %v12322_v13, %v12396_v52  ;;  %v1607_v50 = vadd.f32 %v12394_v32, %v1382_v51  ;;  %v970_v16 = vsel %vm798_vm3, %v12398_v30, %v12397_v27  ;;  %v9663_v59 = vpop.permute.xlu0 %3834  ;;  %v9665_v13 = vpop.permute.xlu1 %4274 }
 0x3af   :  { %v971_v12 = vsel %vm798_vm3, %v12397_v27, %v12399_v8  ;;  %v1816_v57 = vsel %vm1698_vm7, %v12386_v19, %v12400_v48  ;;  %12401 = vst [vmem:[#allocation83_spill] sm:$0xff] %v9663_v59  ;;  %12402 = vst [vmem:[#allocation93_spill] sm:$0xff] %v9665_v13  ;;  %v1606_v54 = vadd.f32 %v1591_v56, %v1381_v39  ;;  %v12405_v27 = vld [vmem:[#allocation192_spill] sm:$0xff] }
 0x3b0   :  { %v9668_v51 = vadd.f32 %v12396_v52, %v309_v2  ;;  %v1932_v31 = vadd.f32 %v9495_v62, %v1830_v18  ;;  %v1814_v35 = vsel %vm1698_vm7, %v12403_v26, %v12387_v14  ;;  %v1604_v32 = vadd.f32 %v1589_v17, %v1379_v29  ;;  %3884 = vrot.lane.b32.xlu0 %v3864_v55, %s6382_s10  ;;  %v12404_v52 = vld [vmem:[#allocation193_spill] sm:$0xff]  ;;  %v12408_v17 = vld [vmem:[#allocation194_spill] sm:$0xff]  ;;  %v12411_v13 = vld [vmem:[#allocation204_spill] sm:$0xff] }
 0x3b1   :  { %v9674_v37 = vadd.f32 %v519_v60, %v308_v11  ;;  %4324 = vrot.lane.b32.xlu1 %v4308_v45, %s6384_s17  ;;  %v2799_v19 = vmul.f32 %v9088_v34, %v8715_v46  ;;  %v9680_v39 = vadd.f32 %v970_v16, %v760_v42  ;;  %v9682_v2 = vadd.f32 %v971_v12, %v761_v47 }
 0x3b2   :  { %v1831_v56 = vadd.f32 %v1816_v57, %v1606_v54  ;;  %v9685_v18 = vstv %s9618_s27  ;;  %v1417_v14 = vsel %vm1248_vm5, %v12405_v27, %v12404_v52  ;;  %v1832_v29 = vadd.f32 %v12400_v48, %v1607_v50  ;;  %v9691_v55 = vpop.permute.xlu0 %6111  ;;  %v9693_v45 = vpop.permute.xlu1 %2988  ;;  %v2120_v57 = vld [vmem:[%s11516_s2 + $0x70] sm:$0x3] }
 0x3b3   :  { %v1829_v11 = vadd.f32 %v1814_v35, %v1604_v32  ;;  %12406 = vst [vmem:[#allocation92_spill] sm:$0xff] %v9691_v55  ;;  %12407 = vst [vmem:[#allocation94_spill] sm:$0xff] %v9693_v45  ;;  %v1418_v47 = vsel %vm1248_vm5, %v12404_v52, %v12408_v17  ;;  %v1940_v42 = vmax.f32 %v1932_v31, 0.0  ;;  %v11795_v60 = vunpack.i.h.bf16 %v9691_v55  ;;  %v12410_v45 = vld [vmem:[#allocation205_spill] sm:$0xff] }
 0x3b4   :  { %v6113_v30 = vunpack.i.l.bf16 %v9691_v55  ;;  %v1935_v16 = vmax.f32 %v9612_v63, 0.0  ;;  %v9705_v50 = vmul.f32 %v8953_v43, %v9685_v18  ;;  %6131 = vrot.lane.b32.xlu0 %v9189_v33, %s6385_s25  ;;  %v3248_v12 = vmul.f32 %v9138_v41, %v9214_v58  ;;  %v2108_v63 = vld [vmem:[%s11516_s2 + $0x10] sm:$0xff] }
 0x3b5   :  { %2818 = vrot.lane.b32.xlu1 %v2799_v19, %s6377_s15  ;;  %v3249_v48 = vmul.f32 %v9104_v10, %v9214_v58  ;;  %v1933_v54 = vadd.f32 %v9495_v62, %v1831_v56  ;;  %v9723_v33 = vmul.f32 %v8960_v6, %v9685_v18  ;;  %v9729_v26 = vstv %s9651_s28 }
 0x3b6   :  { %v1987_v31 = vsel %vm1985_vm8, %v6113_v30, %v11795_v60  ;;  %v1431_v35 = vadd.f32 %v1417_v14, %v1206_v9  ;;  %v1432_v32 = vadd.f32 %v1418_v47, %v1207_v36  ;;  %v9732_v19 = vadd.f32 %v9495_v62, %v1832_v29  ;;  %v9735_v27 = vpop.permute.xlu0 %3428  ;;  %v9737_v56 = vpop.permute.xlu1 %6116  ;;  %v12413_v9 = vld [vmem:[#allocation206_spill] sm:$0xff]  ;;  %v12414_v29 = vld [vmem:[#allocation199_spill] sm:$0xff] }
 0x3b7   :  { %v1931_v52 = vadd.f32 %v9495_v62, %v1829_v11  ;;  %12409 = vst [vmem:[#allocation102_spill] sm:$0xff] %v9735_v27  ;;  %2194 = vmatprep.mubr.f32.mxu0 %v1987_v31  ;;  %v1642_v59 = vsel %vm1473_vm6, %v12411_v13, %v12410_v45  ;;  %v6118_v60 = vunpack.i.l.bf16 %v9737_v56  ;;  %v6000_v3 = vpack.c.bf16 %v2120_v57, %v2108_v63  ;;  %v12417_v63 = vld [vmem:[#allocation213_spill] sm:$0xff]  ;;  %v12418_v57 = vld [vmem:[#allocation212_spill] sm:$0xff] }
 0x3b8   :  { %v9743_v55 = vpack.i.bf16 %v1940_v42, %v1935_v16  ;;  %v1643_v36 = vsel %vm1473_vm6, %v12410_v45, %v12413_v9  ;;  %3268 = vrot.lane.b32.xlu0 %v3248_v12, %s6379_s24  ;;  %v3250_v62 = vmul.f32 %v9203_v7, %v9214_v58  ;;  %v3692_v14 = vmul.f32 %v8953_v43, %v9729_v26  ;;  %v12415_v16 = vld [vmem:[#allocation202_spill] sm:$0xff]  ;;  %v12416_v12 = vld [vmem:[#allocation201_spill] sm:$0xff] }
 0x3b9   :  { %3270 = vrot.lane.b32.xlu1 %v3249_v48, %s6379_s24  ;;  %v1941_v13 = vmax.f32 %v1933_v54, 0.0  ;;  %v297_v11 = vsel %vm123_vm0, %v12339_v1, %v12414_v29  ;;  %v313_v47 = vadd.f32 %v12414_v29, %v9369_v5  ;;  %v1986_v45 = vsel %vm1985_vm8, %v6118_v60, %v6113_v30  ;;  %v12419_v54 = vld [vmem:[#allocation214_spill] sm:$0xff]  ;;  %v12422_v5 = vld [vmem:[#allocation200_spill] sm:$0xff]  ;;  %v12423_v30 = vld [vmem:[#allocation203_spill] sm:$0xff] }
 0x3ba   :  { %12412 = vst [vmem:[#allocation101_spill] sm:$0xff] %v9743_v55  ;;  %v1939_v42 = vmax.f32 %v1931_v52, 0.0  ;;  %v1195_v48 = vsel %vm1023_vm4, %v12416_v12, %v12415_v16  ;;  %v1867_v43 = vsel %vm1698_vm7, %v12418_v57, %v12417_v63  ;;  %v1868_v31 = vsel %vm1698_vm7, %v12417_v63, %v12419_v54  ;;  %v9769_v1 = vpop.permute.xlu0 %2812  ;;  %v9771_v27 = vpop.permute.xlu1 %2814  ;;  %2195 = vmatmul.mubr.f32.vlgmr.msra.gmra.mrb[0].mxu0 %v1986_v45  ;;  %v12424_v57 = vld [vmem:[#allocation210_spill] sm:$0xff]  ;;  %v12425_v55 = vld [vmem:[#allocation209_spill] sm:$0xff] }
 0x3bb   :  { %12420 = vst [vmem:[#allocation103_spill] sm:$0xff] %v9769_v1  ;;  %12421 = vst [vmem:[#allocation79_spill] sm:$0xff] %v9771_v27  ;;  %v744_v60 = vsel %vm573_vm2, %v12342_v0, %v12422_v5  ;;  %v1196_v52 = vsel %vm1023_vm4, %v12415_v16, %v12423_v30  ;;  %v1656_v29 = vadd.f32 %v1642_v59, %v1431_v35  ;;  %6001 = vmatpush1.bf16.xpose.msra.mxu0 %v6000_v3  ;;  %v12452_v1 = vld [vmem:[#allocation223_spill] sm:$0xff]  ;;  %v12453_v27 = vld [vmem:[#allocation234_spill] sm:$0xff] }
 0x3bc   :  { %v1657_v12 = vadd.f32 %v1643_v36, %v1432_v32  ;;  %v1420_v63 = vsel %vm1248_vm5, %v12425_v55, %v12424_v57  ;;  %3272 = vrot.lane.b32.xlu0 %v3250_v62, %s6379_s24  ;;  %v3693_v0 = vmul.f32 %v8960_v6, %v9729_v26  ;;  %v3694_v45 = vmul.f32 %v9006_v40, %v9729_v26 }
 0x3bd   :  { %3708 = vrot.lane.b32.xlu1 %v3692_v14, %s6381_s9  ;;  %v312_v59 = vadd.f32 %v297_v11, %v9394_v28  ;;  %v1210_v3 = vadd.f32 %v1195_v48, %v9680_v39  ;;  %v1881_v35 = vadd.f32 %v1867_v43, %v1656_v29  ;;  %v9793_v36 = vpack.i.bf16 %v1939_v42, %v1941_v13  ;;  %v12427_v14 = vld [vmem:[#allocation211_spill] sm:$0xff]  ;;  %v12431_v42 = vld [vmem:[#allocation218_spill] sm:$0xff] }
 0x3be   :  { %v1882_v32 = vadd.f32 %v1868_v31, %v1657_v12  ;;  %v758_v55 = vadd.f32 %v744_v60, %v9674_v37  ;;  %v759_v62 = vadd.f32 %v12422_v5, %v9668_v51  ;;  %v1421_v6 = vsel %vm1248_vm5, %v12424_v57, %v12427_v14  ;;  %v9801_v16 = vpop.permute.xlu0 %2816  ;;  %v9803_v40 = vpop.permute.xlu1 %3214  ;;  %v12430_v39 = vld [vmem:[#allocation207_spill] sm:$0xff]  ;;  %v12432_v37 = vld [vmem:[#allocation217_spill] sm:$0xff]  ;;  %v12435_v29 = vld [vmem:[#allocation226_spill] sm:$0xff] }
 0x3bf   :  { %12426 = vst [vmem:[#allocation80_spill] sm:$0xff] %v9793_v36  ;;  %12428 = vst [vmem:[#allocation88_spill] sm:$0xff] %v9801_v16  ;;  %v1211_v28 = vadd.f32 %v1196_v52, %v9682_v2  ;;  %v522_v13 = vsel %vm348_vm1, %v12364_v20, %v12430_v39  ;;  %v1435_v11 = vadd.f32 %v1420_v63, %v1210_v3  ;;  %v12433_v51 = vld [vmem:[#allocation219_spill] sm:$0xff]  ;;  %v12436_v63 = vld [vmem:[#allocation208_spill] sm:$0xff] }
 0x3c0   :  { %12429 = vst [vmem:[#allocation87_spill] sm:$0xff] %v9803_v40  ;;  %v1645_v48 = vsel %vm1473_vm6, %v12432_v37, %v12431_v42  ;;  %v1646_v43 = vsel %vm1473_vm6, %v12431_v42, %v12433_v51  ;;  %3710 = vrot.lane.b32.xlu0 %v3693_v0, %s6381_s9  ;;  %v4089_v2 = vmul.f32 %v9104_v10, %v9308_v4  ;;  %v12434_v52 = vld [vmem:[#allocation227_spill] sm:$0xff]  ;;  %v12437_v3 = vld [vmem:[#allocation228_spill] sm:$0xff] }
 0x3c1   :  { %3712 = vrot.lane.b32.xlu1 %v3694_v45, %s6381_s9  ;;  %v4090_v31 = vmul.f32 %v9203_v7, %v9308_v4  ;;  %v1436_v20 = vadd.f32 %v1421_v6, %v1211_v28  ;;  %v1945_v5 = vadd.f32 %v9783_v25, %v1881_v35  ;;  %v1946_v60 = vadd.f32 %v9783_v25, %v1882_v32  ;;  %v12440_v37 = vld [vmem:[#allocation215_spill] sm:$0xff] }
 0x3c2   :  { %v1870_v12 = vsel %vm1698_vm7, %v12435_v29, %v12434_v52  ;;  %v538_v57 = vadd.f32 %v12430_v39, %v313_v47  ;;  %v969_v0 = vsel %vm798_vm3, %v12369_v61, %v12436_v63  ;;  %v1660_v45 = vadd.f32 %v1645_v48, %v1435_v11  ;;  %v9833_v6 = vpop.permute.xlu0 %3216  ;;  %v9835_v35 = vpop.permute.xlu1 %3218  ;;  %v12462_v16 = vld [vmem:[#allocation231_spill] sm:$0xff] }
 0x3c3   :  { %v1871_v42 = vsel %vm1698_vm7, %v12434_v52, %v12437_v3  ;;  %12438 = vst [vmem:[#allocation89_spill] sm:$0xff] %v9833_v6  ;;  %12439 = vst [vmem:[#allocation90_spill] sm:$0xff] %v9835_v35  ;;  %v537_v32 = vadd.f32 %v522_v13, %v312_v59  ;;  %v984_v28 = vadd.f32 %v12436_v63, %v759_v62  ;;  %v1953_v62 = vmax.f32 %v1945_v5, 0.0  ;;  %v12461_v6 = vld [vmem:[#allocation78_spill] sm:$0xff] }
 0x3c4   :  { %v747_v47 = vsel %vm573_vm2, %v12385_v15, %v12440_v37  ;;  %v1661_v39 = vadd.f32 %v1646_v43, %v1436_v20  ;;  %v1885_v61 = vadd.f32 %v1870_v12, %v1660_v45  ;;  %4110 = vrot.lane.b32.xlu0 %v4089_v2, %s6383_s13  ;;  %v4091_v11 = vmul.f32 %v9303_v24, %v9308_v4  ;;  %v12441_v43 = vld [vmem:[#allocation216_spill] sm:$0xff]  ;;  %v12444_v12 = vld [vmem:[#allocation221_spill] sm:$0xff] }
 0x3c5   :  { %4112 = vrot.lane.b32.xlu1 %v4090_v31, %s6383_s13  ;;  %v4088_v59 = vmul.f32 %v9138_v41, %v9308_v4  ;;  %v983_v13 = vadd.f32 %v969_v0, %v758_v55  ;;  %v1954_v48 = vmax.f32 %v1946_v60, 0.0  ;;  %v763_v15 = vadd.f32 %v12440_v37, %v538_v57  ;;  %v12445_v57 = vld [vmem:[#allocation220_spill] sm:$0xff] }
 0x3c6   :  { %v1886_v52 = vadd.f32 %v1871_v42, %v1661_v39  ;;  %v1194_v2 = vsel %vm1023_vm4, %v12391_v22, %v12441_v43  ;;  %v9856_v31 = vmul.f32 %v9138_v41, %v9685_v18  ;;  %v9860_v20 = vmul.f32 %v9104_v10, %v9685_v18  ;;  %v9862_v4 = vpop.permute.xlu0 %3654  ;;  %v9864_v55 = vpop.permute.xlu1 %3656  ;;  %v12446_v22 = vld [vmem:[#allocation225_spill] sm:$0xff]  ;;  %v12448_v39 = vld [vmem:[#allocation222_spill] sm:$0xff] }
 0x3c7   :  { %12442 = vst [vmem:[#allocation91_spill] sm:$0xff] %v9862_v4  ;;  %12443 = vst [vmem:[#allocation95_spill] sm:$0xff] %v9864_v55  ;;  %v762_v5 = vadd.f32 %v747_v47, %v537_v32  ;;  %v1209_v60 = vadd.f32 %v12441_v43, %v984_v28  ;;  %v2661_v63 = vsel %vm123_vm0, %v12445_v57, %v12444_v12  ;;  %v1942_v45 = vmax.f32 %v9732_v19, 0.0  ;;  %v12447_v28 = vld [vmem:[#allocation69_spill] sm:$0xff] }
 0x3c8   :  { %v1419_v0 = vsel %vm1248_vm5, %v12408_v17, %v12446_v22  ;;  %v1949_v42 = vadd.f32 %v9783_v25, %v1885_v61  ;;  %4114 = vrot.lane.b32.xlu0 %v4091_v11, %s6383_s13  ;;  %v3023_v32 = vmul.f32 %v9088_v34, %v8929_v23  ;;  %v3472_v37 = vmul.f32 %v9138_v41, %v12447_v28  ;;  %v12450_v61 = vld [vmem:[#allocation65_spill] sm:$0xff]  ;;  %v12451_v11 = vld [vmem:[#allocation76_spill] sm:$0xff] }
 0x3c9   :  { %4108 = vrot.lane.b32.xlu1 %v4088_v59, %s6383_s13  ;;  %v1208_v47 = vadd.f32 %v1194_v2, %v983_v13  ;;  %v2662_v43 = vsel %vm123_vm0, %v12444_v12, %v12448_v39  ;;  %v1950_v17 = vadd.f32 %v9783_v25, %v1886_v52  ;;  %v9885_v19 = vpack.i.bf16 %v1954_v48, %v1953_v62  ;;  %v12456_v62 = vld [vmem:[#allocation224_spill] sm:$0xff]  ;;  %v12496_v55 = vld [vmem:[#allocation253_spill] sm:$0xff] }
 0x3ca   :  { %v2675_v29 = vadd.f32 %v2661_v63, %v12450_v61  ;;  %v2677_v59 = vadd.f32 %v12448_v39, %v12451_v11  ;;  %v2660_v34 = vsel %vm123_vm0, %v12452_v1, %v12445_v57  ;;  %v1644_v41 = vsel %vm1473_vm6, %v12413_v9, %v12453_v27  ;;  %v9896_v13 = vpop.permute.xlu0 %3658  ;;  %v9898_v2 = vpop.permute.xlu1 %4058  ;;  %v12457_v63 = vld [vmem:[#allocation230_spill] sm:$0xff]  ;;  %v12458_v39 = vld [vmem:[#allocation229_spill] sm:$0xff]  ;;  %v12459_v61 = vld [vmem:[#allocation244_spill] sm:$0xff] }
 0x3cb   :  { %12449 = vst [vmem:[#allocation47_spill] sm:$0xff] %v9885_v19  ;;  %12454 = vst [vmem:[#allocation97_spill] sm:$0xff] %v9896_v13  ;;  %v972_v48 = vsel %vm798_vm3, %v12399_v8, %v12456_v62  ;;  %v1433_v52 = vadd.f32 %v1419_v0, %v1208_v47  ;;  %v1434_v12 = vadd.f32 %v12446_v22, %v1209_v60  ;;  %v1957_v57 = vmax.f32 %v1949_v42, 0.0  ;;  %v12460_v42 = vld [vmem:[#allocation77_spill] sm:$0xff] }
 0x3cc   :  { %12455 = vst [vmem:[#allocation96_spill] sm:$0xff] %v9898_v2  ;;  %v2885_v1 = vsel %vm348_vm1, %v12458_v39, %v12457_v63  ;;  %v1869_v9 = vsel %vm1698_vm7, %v12419_v54, %v12459_v61  ;;  %3042 = vrot.lane.b32.xlu0 %v3023_v32, %s6378_s19  ;;  %v3473_v11 = vmul.f32 %v9104_v10, %v12447_v28  ;;  %v1958_v60 = vmax.f32 %v1950_v17, 0.0 }
 0x3cd   :  { %3492 = vrot.lane.b32.xlu1 %v3472_v37, %s6380_s29  ;;  %v3474_v8 = vmul.f32 %v9203_v7, %v12447_v28  ;;  %v1658_v22 = vadd.f32 %v1644_v41, %v1433_v52  ;;  %v1659_v0 = vadd.f32 %v12453_v27, %v1434_v12  ;;  %v9918_v47 = vstv %s9848_s14  ;;  %v12465_v41 = vld [vmem:[#allocation232_spill] sm:$0xff] }
 0x3ce   :  { %v2676_v40 = vadd.f32 %v2662_v43, %v12460_v42  ;;  %v2674_v54 = vadd.f32 %v2660_v34, %v12461_v6  ;;  %v988_v32 = vadd.f32 %v12456_v62, %v763_v15  ;;  %v2886_v37 = vsel %vm348_vm1, %v12457_v63, %v12462_v16  ;;  %v9926_v10 = vpop.permute.xlu0 %3212  ;;  %v9928_v4 = vpop.permute.xlu1 %3652  ;;  %v9939_v6 = vld [vmem:[%s11514_s0] sm:$0xff] }
 0x3cf   :  { %12463 = vst [vmem:[#allocation98_spill] sm:$0xff] %v9926_v10  ;;  %12464 = vst [vmem:[#allocation99_spill] sm:$0xff] %v9928_v4  ;;  %v987_v17 = vadd.f32 %v972_v48, %v762_v5  ;;  %v2884_v27 = vsel %vm348_vm1, %v12465_v41, %v12458_v39  ;;  %v1883_v52 = vadd.f32 %v1869_v9, %v1658_v22  ;;  %v9946_v5 = vld [vmem:[%s11514_s0 + $0x8] sm:$0xff]  ;;  %v12466_v48 = vmax.f32 %v9589_v53, 0.0  ;;  %v12481_v10 = vld [vmem:[#allocation242_spill] sm:$0xff] }
 0x3d0   :  { %v1884_v43 = vadd.f32 %v12459_v61, %v1659_v0  ;;  %v2899_v12 = vadd.f32 %v2885_v1, %v2675_v29  ;;  %3494 = vrot.lane.b32.xlu0 %v3473_v11, %s6380_s29  ;;  %v3916_v15 = vmul.f32 %v9939_v6, %v9918_v47  ;;  %v3917_v29 = vmul.f32 %v9946_v5, %v9918_v47  ;;  %v12469_v61 = vld [vmem:[#allocation233_spill] sm:$0xff]  ;;  %v12470_v11 = vld [vmem:[#allocation236_spill] sm:$0xff] }
 0x3d1   :  { %3496 = vrot.lane.b32.xlu1 %v3474_v8, %s6380_s29  ;;  %v2900_v34 = vadd.f32 %v2886_v37, %v2676_v40  ;;  %v2901_v62 = vadd.f32 %v12462_v16, %v2677_v59  ;;  %v9953_v63 = vpack.i.bf16 %v1957_v57, %v12466_v48  ;;  %v9955_v39 = vpack.i.bf16 %v1942_v45, %v1958_v60  ;;  %v12471_v8 = vld [vmem:[#allocation235_spill] sm:$0xff]  ;;  %v12472_v0 = vld [vmem:[#allocation237_spill] sm:$0xff]  ;;  %v12476_v57 = vld [vmem:[#allocation238_spill] sm:$0xff] }
 0x3d2   :  { %v2898_v1 = vadd.f32 %v2884_v27, %v2674_v54  ;;  %v1197_v9 = vsel %vm1023_vm4, %v12423_v30, %v12469_v61  ;;  %v2664_v22 = vsel %vm123_vm0, %v12471_v8, %v12470_v11  ;;  %v2665_v40 = vsel %vm123_vm0, %v12470_v11, %v12472_v0  ;;  %v9966_v16 = vpop.permute.xlu0 %3036  ;;  %v9968_v53 = vpop.permute.xlu1 %3038  ;;  %v12475_v59 = vld [vmem:[#allocation239_spill] sm:$0xff]  ;;  %v12477_v54 = vld [vmem:[#allocation240_spill] sm:$0xff] }
 0x3d3   :  { %12467 = vst [vmem:[#allocation100_spill] sm:$0xff] %v9953_v63  ;;  %12468 = vst [vmem:[#allocation104_spill] sm:$0xff] %v9955_v39  ;;  %v1213_v45 = vadd.f32 %v12469_v61, %v988_v32  ;;  %v3109_v60 = vsel %vm573_vm2, %v12476_v57, %v12475_v59  ;;  %v1947_v30 = vadd.f32 %v9783_v25, %v1883_v52  ;;  %v9984_v32 = vld [vmem:[%s11514_s0 + $0x10] sm:$0xff]  ;;  %v9991_v27 = vld [vmem:[%s11514_s0 + $0x28] sm:$0xff] }
 0x3d4   :  { %12473 = vst [vmem:[#allocation70_spill] sm:$0xff] %v9966_v16  ;;  %12474 = vst [vmem:[#allocation106_spill] sm:$0xff] %v9968_v53  ;;  %v1948_v42 = vadd.f32 %v9783_v25, %v1884_v43  ;;  %v3110_v37 = vsel %vm573_vm2, %v12475_v59, %v12477_v54  ;;  %3932 = vrot.lane.b32.xlu0 %v3916_v15, %s6382_s10  ;;  %v3918_v41 = vmul.f32 %v9984_v32, %v9918_v47  ;;  %v12479_v48 = vld [vmem:[#allocation72_spill] sm:$0xff]  ;;  %v12480_v16 = vld [vmem:[#allocation241_spill] sm:$0xff] }
 0x3d5   :  { %3934 = vrot.lane.b32.xlu1 %v3917_v29, %s6382_s10  ;;  %12478 = vst [vmem:[#allocation105_spill] sm:$0xff] %v9984_v32  ;;  %v4313_v52 = vmul.f32 %v9991_v27, %v9545_v44  ;;  %v1212_v43 = vadd.f32 %v1197_v9, %v987_v17  ;;  %v2679_v15 = vadd.f32 %v2664_v22, %v9565_v49  ;;  %v12550_v63 = vld [vmem:[#allocation302_spill] sm:$0xff] }
 0x3d6   :  { %v2680_v29 = vadd.f32 %v2665_v40, %v9576_v21  ;;  %v2681_v61 = vadd.f32 %v12472_v0, %v12479_v48  ;;  %v3123_v11 = vadd.f32 %v3109_v60, %v2899_v12  ;;  %v3125_v59 = vadd.f32 %v12477_v54, %v2901_v62  ;;  %v10006_v2 = vpop.permute.xlu0 %3040  ;;  %v10008_v17 = vpop.permute.xlu1 %3438  ;;  %v12484_v21 = vld [vmem:[#allocation243_spill] sm:$0xff]  ;;  %v12485_v62 = vld [vmem:[#allocation246_spill] sm:$0xff]  ;;  %v12486_v0 = vld [vmem:[#allocation245_spill] sm:$0xff] }
 0x3d7   :  { %v2663_v53 = vsel %vm123_vm0, %v12480_v16, %v12471_v8  ;;  %v3108_v4 = vsel %vm573_vm2, %v12481_v10, %v12476_v57  ;;  %12482 = vst [vmem:[#allocation107_spill] sm:$0xff] %v10006_v2  ;;  %12483 = vst [vmem:[#allocation109_spill] sm:$0xff] %v10008_v17  ;;  %v3124_v49 = vadd.f32 %v3110_v37, %v2900_v34  ;;  %v1955_v12 = vmax.f32 %v1947_v30, 0.0  ;;  %v12487_v8 = vld [vmem:[#allocation75_spill] sm:$0xff]  ;;  %v12491_v37 = vld [vmem:[#allocation250_spill] sm:$0xff] }
 0x3d8   :  { %v1422_v9 = vsel %vm1248_vm5, %v12427_v14, %v12484_v21  ;;  %v1956_v22 = vmax.f32 %v1948_v42, 0.0  ;;  %v2888_v40 = vsel %vm348_vm1, %v12486_v0, %v12485_v62  ;;  %3936 = vrot.lane.b32.xlu0 %v3918_v41, %s6382_s10  ;;  %v4314_v10 = vmul.f32 %v9203_v7, %v9545_v44  ;;  %v10030_v60 = vld [vmem:[%s11514_s0 + $0x18] sm:$0xff] }
 0x3d9   :  { %4334 = vrot.lane.b32.xlu1 %v4313_v52, %s6384_s17  ;;  %v4315_v34 = vmul.f32 %v9303_v24, %v9545_v44  ;;  %v2678_v16 = vadd.f32 %v2663_v53, %v12487_v8  ;;  %v3122_v57 = vadd.f32 %v3108_v4, %v2898_v1  ;;  %v10025_v14 = vmul.f32 %v9984_v32, %v9685_v18  ;;  %v12488_v42 = vld [vmem:[#allocation247_spill] sm:$0xff]  ;;  %v12489_v4 = vld [vmem:[#allocation249_spill] sm:$0xff]  ;;  %v12490_v1 = vld [vmem:[#allocation248_spill] sm:$0xff] }
 0x3da   :  { %v10034_v30 = vmul.f32 %v10030_v60, %v9685_v18  ;;  %v1438_v7 = vadd.f32 %v12484_v21, %v1213_v45  ;;  %v2889_v53 = vsel %vm348_vm1, %v12485_v62, %v12488_v42  ;;  %v3333_v54 = vsel %vm798_vm3, %v12490_v1, %v12489_v4  ;;  %v10046_v52 = vpop.permute.xlu0 %3440  ;;  %v10048_v48 = vpop.permute.xlu1 %3442  ;;  %v12494_v45 = vld [vmem:[#allocation251_spill] sm:$0xff] }
 0x3db   :  { %v3334_v41 = vsel %vm798_vm3, %v12489_v4, %v12491_v37  ;;  %12492 = vst [vmem:[#allocation108_spill] sm:$0xff] %v10046_v52  ;;  %12493 = vst [vmem:[#allocation112_spill] sm:$0xff] %v10048_v48  ;;  %v1437_v8 = vadd.f32 %v1422_v9, %v1212_v43  ;;  %v2903_v17 = vadd.f32 %v2888_v40, %v2679_v15  ;;  %v10064_v43 = vld [vmem:[%s11514_s0 + $0x20] sm:$0xff]  ;;  %v12500_v4 = vld [vmem:[#allocation265_spill] sm:$0xff] }
 0x3dc   :  { %v2887_v21 = vsel %vm348_vm1, %v12494_v45, %v12486_v0  ;;  %v10053_v2 = vpack.i.bf16 %v1956_v22, %v1955_v12  ;;  %v2905_v62 = vadd.f32 %v12488_v42, %v2681_v61  ;;  %v1647_v39 = vsel %vm1473_vm6, %v12433_v51, %v12496_v55  ;;  %4336 = vrot.lane.b32.xlu0 %v4314_v10, %s6384_s17  ;;  %v12497_v0 = vld [vmem:[#allocation252_spill] sm:$0xff]  ;;  %v12498_v10 = vld [vmem:[#allocation255_spill] sm:$0xff] }
 0x3dd   :  { %4338 = vrot.lane.b32.xlu1 %v4315_v34, %s6384_s17  ;;  %v4312_v15 = vmul.f32 %v10064_v43, %v9545_v44  ;;  %v2904_v9 = vadd.f32 %v2889_v53, %v2680_v29  ;;  %v3347_v12 = vadd.f32 %v3333_v54, %v3123_v11  ;;  %v3348_v22 = vadd.f32 %v3334_v41, %v3124_v49  ;;  %v12499_v34 = vld [vmem:[#allocation254_spill] sm:$0xff]  ;;  %v12505_v54 = vld [vmem:[#allocation257_spill] sm:$0xff]  ;;  %v12506_v41 = vld [vmem:[#allocation259_spill] sm:$0xff] }
 0x3de   :  { %12495 = vst [vmem:[#allocation110_spill] sm:$0xff] %v10053_v2  ;;  %v3349_v61 = vadd.f32 %v12491_v37, %v3125_v59  ;;  %v2902_v51 = vadd.f32 %v2887_v21, %v2678_v16  ;;  %v3332_v40 = vsel %vm798_vm3, %v12497_v0, %v12490_v1  ;;  %v2716_v42 = vsel %vm123_vm0, %v12499_v34, %v12498_v10  ;;  %v10080_v29 = vpop.permute.xlu0 %3878  ;;  %v10082_v11 = vpop.permute.xlu1 %3880  ;;  %v12503_v16 = vld [vmem:[#allocation256_spill] sm:$0xff]  ;;  %v12504_v1 = vld [vmem:[#allocation258_spill] sm:$0xff] }
 0x3df   :  { %v1872_v44 = vsel %vm1698_vm7, %v12437_v3, %v12500_v4  ;;  %12501 = vst [vmem:[#allocation111_spill] sm:$0xff] %v10080_v29  ;;  %12502 = vst [vmem:[#allocation122_spill] sm:$0xff] %v10082_v11  ;;  %v1662_v59 = vadd.f32 %v1647_v39, %v1437_v8  ;;  %v1663_v49 = vadd.f32 %v12496_v55, %v1438_v7  ;;  %v12507_v3 = vld [vmem:[#allocation39_spill] sm:$0xff]  ;;  %v12509_v52 = vld [vmem:[#allocation260_spill] sm:$0xff] }
 0x3e0   :  { %v2717_v53 = vsel %vm123_vm0, %v12498_v10, %v12503_v16  ;;  %v3112_v37 = vsel %vm573_vm2, %v12505_v54, %v12504_v1  ;;  %v3113_v45 = vsel %vm573_vm2, %v12504_v1, %v12506_v41  ;;  %6136 = vrot.lane.b32.xlu0 %v12507_v3, %s6385_s25  ;;  %v2803_v55 = vmul.f32 %v9303_v24, %v8715_v46  ;;  %v12508_v3 = vld [vmem:[#allocation261_spill] sm:$0xff] }
 0x3e1   :  { %4332 = vrot.lane.b32.xlu1 %v4312_v15, %s6384_s17  ;;  %v3247_v39 = vmul.f32 %v10030_v60, %v9214_v58  ;;  %v3346_v7 = vadd.f32 %v3332_v40, %v3122_v57  ;;  %v2730_v8 = vadd.f32 %v2716_v42, %v9705_v50  ;;  %v1887_v21 = vadd.f32 %v1872_v44, %v1662_v59  ;;  %v12512_v40 = vld [vmem:[#allocation262_spill] sm:$0xff]  ;;  %v12513_v42 = vld [vmem:[#allocation263_spill] sm:$0xff] }
 0x3e2   :  { %v1888_v0 = vadd.f32 %v12500_v4, %v1663_v49  ;;  %v2731_v10 = vadd.f32 %v2717_v53, %v9723_v33  ;;  %v3127_v34 = vadd.f32 %v3112_v37, %v2903_v17  ;;  %v3129_v1 = vadd.f32 %v12506_v41, %v2905_v62  ;;  %v10108_v46 = vpop.permute.xlu0 %3882  ;;  %v10110_v29 = vpop.permute.xlu1 %4282  ;;  %v12514_v17 = vld [vmem:[#allocation264_spill] sm:$0xff] }
 0x3e3   :  { %v3557_v15 = vsel %vm1023_vm4, %v12509_v52, %v12508_v3  ;;  %12510 = vst [vmem:[#allocation113_spill] sm:$0xff] %v10108_v46  ;;  %12511 = vst [vmem:[#allocation114_spill] sm:$0xff] %v10110_v29  ;;  %v3128_v57 = vadd.f32 %v3113_v45, %v2904_v9  ;;  %v3558_v50 = vsel %vm1023_vm4, %v12508_v3, %v12512_v40  ;;  %v12549_v29 = vld [vmem:[#allocation300_spill] sm:$0xff] }
 0x3e4   :  { %v3111_v33 = vsel %vm573_vm2, %v12513_v42, %v12505_v54  ;;  %v3556_v62 = vsel %vm1023_vm4, %v12514_v17, %v12509_v52  ;;  %v3573_v4 = vadd.f32 %v12512_v40, %v3349_v61  ;;  %2826 = vrot.lane.b32.xlu0 %v2803_v55, %s6377_s15  ;;  %v3696_v9 = vmul.f32 %v10064_v43, %v9729_v26  ;;  %s10137_s15 = sld [smem:[#allocation2 + $0x6]]  ;;  %v12520_v17 = vld [vmem:[#allocation270_spill] sm:$0xff] }
 0x3e5   :  { %3266 = vrot.lane.b32.xlu1 %v3247_v39, %s6379_s24  ;;  %v3697_v44 = vmul.f32 %v9991_v27, %v9729_v26  ;;  %v3571_v59 = vadd.f32 %v3557_v15, %v3347_v12  ;;  %v1951_v49 = vadd.f32 %v9783_v25, %v1887_v21  ;;  %v1952_v53 = vadd.f32 %v9783_v25, %v1888_v0  ;;  %v12517_v12 = vld [vmem:[#allocation267_spill] sm:$0xff]  ;;  %v12518_v39 = vld [vmem:[#allocation266_spill] sm:$0xff] }
 0x3e6   :  { %v10131_v54 = vstv %s10069_s11  ;;  %v3572_v52 = vadd.f32 %v3558_v50, %v3348_v22  ;;  %v3126_v37 = vadd.f32 %v3111_v33, %v2902_v51  ;;  %v3570_v61 = vadd.f32 %v3556_v62, %v3346_v7  ;;  %v10139_v45 = vpop.permute.xlu0 %6121  ;;  %v10141_v55 = vpop.permute.xlu1 %3436  ;;  %v12519_v7 = vld [vmem:[#allocation268_spill] sm:$0xff]  ;;  %v10157_v0 = vld [vmem:[%s11514_s0 + $0x30] sm:$0xff] }
 0x3e7   :  { %v10135_v41 = vmul.f32 %v9303_v24, %v9685_v18  ;;  %12515 = vst [vmem:[#allocation116_spill] sm:$0xff] %v10139_v45  ;;  %12516 = vst [vmem:[#allocation115_spill] sm:$0xff] %v10141_v55  ;;  %v2940_v21 = vsel %vm348_vm1, %v12518_v39, %v12517_v12  ;;  %v6119_v25 = vunpack.i.h.bf16 %v9737_v56  ;;  %v6124_v22 = vunpack.i.h.bf16 %v10139_v45  ;;  %v12521_v62 = vld [vmem:[#allocation269_spill] sm:$0xff]  ;;  %v12529_v55 = vld [vmem:[#allocation276_spill] sm:$0xff] }
 0x3e8   :  { %v11810_v51 = vunpack.i.l.bf16 %v10139_v45  ;;  %v2941_v24 = vsel %vm348_vm1, %v12517_v12, %v12519_v7  ;;  %3716 = vrot.lane.b32.xlu0 %v3696_v9, %s6381_s9  ;;  %v3698_v56 = vmul.f32 %v10157_v0, %v9729_v26  ;;  %v4140_v3 = vmul.f32 %v9939_v6, %v10131_v54 }
 0x3e9   :  { %3718 = vrot.lane.b32.xlu1 %v3697_v44, %s6381_s9  ;;  %v1959_v15 = vmax.f32 %v1951_v49, 0.0  ;;  %v1960_v40 = vmax.f32 %v1952_v53, 0.0  ;;  %v1989_v42 = vsel %vm1985_vm8, %v6124_v22, %v6119_v25  ;;  %v2954_v33 = vadd.f32 %v2940_v21, %v2730_v8  ;;  %v12522_v44 = vld [vmem:[#allocation271_spill] sm:$0xff]  ;;  %v12526_v8 = vld [vmem:[#allocation272_spill] sm:$0xff]  ;;  %v12527_v22 = vld [vmem:[#allocation274_spill] sm:$0xff] }
 0x3ea   :  { %v1990_v50 = vsel %vm1985_vm8, %v6119_v25, %v11810_v51  ;;  %v3336_v9 = vsel %vm798_vm3, %v12521_v62, %v12520_v17  ;;  %v3337_v12 = vsel %vm798_vm3, %v12520_v17, %v12522_v44  ;;  %v10175_v39 = vmul.f32 %v10157_v0, %v9685_v18  ;;  %v10177_v49 = vpop.permute.xlu0 %3876  ;;  %v10179_v53 = vpop.permute.xlu1 %2820  ;;  %v12525_v25 = vld [vmem:[#allocation273_spill] sm:$0xff]  ;;  %v12528_v17 = vld [vmem:[#allocation275_spill] sm:$0xff] }
 0x3eb   :  { %12523 = vst [vmem:[#allocation117_spill] sm:$0xff] %v10177_v49  ;;  %12524 = vst [vmem:[#allocation119_spill] sm:$0xff] %v10179_v53  ;;  %2199 = vmatprep.mubr.f32.mxu0 %v1990_v50  ;;  %v2955_v51 = vadd.f32 %v2941_v24, %v2731_v10  ;;  %v3781_v21 = vsel %vm1248_vm5, %v12526_v8, %v12525_v25  ;;  %v3782_v45 = vsel %vm1248_vm5, %v12525_v25, %v12527_v22 }
 0x3ec   :  { %v3335_v18 = vsel %vm798_vm3, %v12528_v17, %v12521_v62  ;;  %2200 = vmatmul.mubr.f32.gmra.mrb[2].mxu0 %v1989_v42  ;;  %v3780_v49 = vsel %vm1248_vm5, %v12529_v55, %v12526_v8  ;;  %3720 = vrot.lane.b32.xlu0 %v3698_v56, %s6381_s9  ;;  %v4141_v10 = vmul.f32 %v9946_v5, %v10131_v54  ;;  %v12531_v56 = vld [vmem:[#allocation278_spill] sm:$0xff]  ;;  %v12532_v8 = vld [vmem:[#allocation277_spill] sm:$0xff]  ;;  %v12533_v17 = vld [vmem:[#allocation279_spill] sm:$0xff]  ;;  %v10214_v2 = vstv %s10137_s15 }
 0x3ed   :  { %4156 = vrot.lane.b32.xlu1 %v4140_v3, %s6383_s13  ;;  %v4142_v24 = vmul.f32 %v9984_v32, %v10131_v54  ;;  %v3351_v50 = vadd.f32 %v3336_v9, %v3127_v34  ;;  %v10199_v25 = vadd.f32 %v3337_v12, %v3128_v57  ;;  %v3353_v62 = vadd.f32 %v12522_v44, %v3129_v1  ;;  %v12536_v44 = vld [vmem:[#allocation281_spill] sm:$0xff] }
 0x3ee   :  { %v10204_v42 = vpack.i.bf16 %v1960_v40, %v1959_v15  ;;  %v3797_v55 = vadd.f32 %v12527_v22, %v3573_v4  ;;  %v2719_v3 = vsel %vm123_vm0, %v12532_v8, %v12531_v56  ;;  %v2720_v53 = vsel %vm123_vm0, %v12531_v56, %v12533_v17  ;;  %v10216_v34 = vpop.permute.xlu0 %2822  ;;  %v10218_v57 = vpop.permute.xlu1 %2824  ;;  %v12537_v4 = vld [vmem:[#allocation280_spill] sm:$0xff]  ;;  %v10230_v22 = vld [vmem:[%s11514_s0 + $0x38] sm:$0xff] }
 0x3ef   :  { %12534 = vst [vmem:[#allocation120_spill] sm:$0xff] %v10216_v34  ;;  %12535 = vst [vmem:[#allocation121_spill] sm:$0xff] %v10218_v57  ;;  %v3795_v1 = vadd.f32 %v3781_v21, %v3571_v59  ;;  %v3796_v9 = vadd.f32 %v3782_v45, %v3572_v52  ;;  %v3350_v15 = vadd.f32 %v3335_v18, %v3126_v37  ;;  %v12540_v21 = vld [vmem:[#allocation282_spill] sm:$0xff]  ;;  %v12543_v56 = vld [vmem:[#allocation288_spill] sm:$0xff] }
 0x3f0   :  { %12530 = vst [vmem:[#allocation118_spill] sm:$0xff] %v10204_v42  ;;  %v3794_v40 = vadd.f32 %v3780_v49, %v3570_v61  ;;  %v3164_v12 = vsel %vm573_vm2, %v12537_v4, %v12536_v44  ;;  %4158 = vrot.lane.b32.xlu0 %v4141_v10, %s6383_s13  ;;  %v3027_v59 = vmul.f32 %v10230_v22, %v8929_v23  ;;  %v12541_v23 = vld [vmem:[#allocation287_spill] sm:$0xff]  ;;  %v12542_v10 = vld [vmem:[#allocation286_spill] sm:$0xff]  ;;  %v12546_v57 = vld [vmem:[#allocation284_spill] sm:$0xff] }
 0x3f1   :  { %4160 = vrot.lane.b32.xlu1 %v4142_v24, %s6383_s13  ;;  %v3471_v52 = vmul.f32 %v10030_v60, %v12447_v28  ;;  %v2734_v37 = vadd.f32 %v2719_v3, %v9856_v31  ;;  %v2735_v61 = vadd.f32 %v2720_v53, %v9860_v20  ;;  %v10240_v45 = vmul.f32 %v9946_v5, %v10214_v2  ;;  %v2111_v3 = vld [vmem:[%s11516_s2 + $0x28] sm:$0xff] }
 0x3f2   :  { %v10244_v49 = vmul.f32 %v9984_v32, %v10214_v2  ;;  %v3165_v18 = vsel %vm573_vm2, %v12536_v44, %v12540_v21  ;;  %v4005_v24 = vsel %vm1473_vm6, %v12542_v10, %v12541_v23  ;;  %v4006_v31 = vsel %vm1473_vm6, %v12541_v23, %v12543_v56  ;;  %v10259_v53 = vpop.permute.xlu0 %3260  ;;  %v10261_v8 = vpop.permute.xlu1 %3262  ;;  %v2123_v44 = vld [vmem:[%s11516_s2 + $0x88] sm:$0x3]  ;;  %v12547_v23 = vld [vmem:[#allocation283_spill] sm:$0xff]  ;;  %v12548_v42 = vld [vmem:[#allocation301_spill] sm:$0xff] }
 0x3f3   :  { %12538 = vst [vmem:[#allocation123_spill] sm:$0xff] %v10240_v45  ;;  %v10257_v20 = vmul.f32 %v10030_v60, %v10214_v2  ;;  %12544 = vst [vmem:[#allocation134_spill] sm:$0xff] %v10259_v53  ;;  %v3178_v4 = vadd.f32 %v3164_v12, %v2954_v33  ;;  %v3560_v34 = vsel %vm1023_vm4, %v12547_v23, %v12546_v57  ;;  %v10285_v45 = vstv %s10202_s16  ;;  %s5841_s16 = sld [smem:[#allocation2 + $0x4f]] }
 0x3f4   :  { %12539 = vst [vmem:[#allocation124_spill] sm:$0xff] %v10244_v49  ;;  %12545 = vst [vmem:[#allocation126_spill] sm:$0xff] %v10261_v8  ;;  %v4229_v53 = vsel %vm1698_vm7, %v12549_v29, %v12548_v42  ;;  %v6002_v11 = vpack.c.bf16 %v2123_v44, %v2111_v3  ;;  %v4230_v8 = vsel %vm1698_vm7, %v12548_v42, %v12550_v63  ;;  %3050 = vrot.lane.b32.xlu0 %v3027_v59, %s6378_s19  ;;  %v12551_v44 = vld [vmem:[#allocation285_spill] sm:$0xff]  ;;  %s10470_s19 = sld [smem:[#allocation2 + $0x4d]] }
 0x3f5   :  { %3490 = vrot.lane.b32.xlu1 %v3471_v52, %s6380_s29  ;;  %v3920_v33 = vmul.f32 %v10064_v43, %v9918_v47  ;;  %v3921_v12 = vmul.f32 %v9991_v27, %v9918_v47  ;;  %v3179_v19 = vadd.f32 %v3165_v18, %v2955_v51  ;;  %v4019_v36 = vadd.f32 %v4005_v24, %v3795_v1  ;;  %v12552_v52 = vld [vmem:[#allocation289_spill] sm:$0xff]  ;;  %v12555_v1 = vld [vmem:[#allocation290_spill] sm:$0xff] }
 0x3f6   :  { %v4020_v49 = vadd.f32 %v4006_v31, %v3796_v9  ;;  %6003 = vmatprep.subr.bf16.mxu0 %v6002_v11  ;;  %v3575_v3 = vadd.f32 %v3560_v34, %v3351_v50  ;;  %v3561_v42 = vsel %vm1023_vm4, %v12546_v57, %v12551_v44  ;;  %v3577_v59 = vadd.f32 %v12551_v44, %v3353_v62  ;;  %v10294_v13 = vpop.permute.xlu0 %3264  ;;  %v10296_v51 = vpop.permute.xlu1 %3662  ;;  %v12556_v11 = vld [vmem:[#allocation292_spill] sm:$0xff]  ;;  %v12557_v50 = vld [vmem:[#allocation291_spill] sm:$0xff]  ;;  %v12558_v24 = vld [vmem:[#allocation293_spill] sm:$0xff] }
 0x3f7   :  { %v3559_v46 = vsel %vm1023_vm4, %v12552_v52, %v12547_v23  ;;  %12553 = vst [vmem:[#allocation125_spill] sm:$0xff] %v10294_v13  ;;  %12554 = vst [vmem:[#allocation127_spill] sm:$0xff] %v10296_v51  ;;  %v4004_v9 = vsel %vm1473_vm6, %v12555_v1, %v12542_v10  ;;  %v2943_v34 = vsel %vm348_vm1, %v12557_v50, %v12556_v11  ;;  %v10308_v31 = vstv %s10223_s18  ;;  %v12559_v52 = vld [vmem:[#allocation295_spill] sm:$0xff]  ;;  %v12561_v1 = vld [vmem:[#allocation296_spill] sm:$0xff] }
 0x3f8   :  { %v4243_v18 = vadd.f32 %v4229_v53, %v4019_v36  ;;  %v4244_v57 = vadd.f32 %v4230_v8, %v4020_v49  ;;  %v2944_v62 = vsel %vm348_vm1, %v12556_v11, %v12558_v24  ;;  %3940 = vrot.lane.b32.xlu0 %v3920_v33, %s6382_s10  ;;  %v3922_v23 = vmul.f32 %v10157_v0, %v9918_v47  ;;  %v12560_v33 = vld [vmem:[#allocation294_spill] sm:$0xff]  ;;  %v12563_v13 = vld [vmem:[#allocation297_spill] sm:$0xff] }
 0x3f9   :  { %3942 = vrot.lane.b32.xlu1 %v3921_v12, %s6382_s10  ;;  %v4364_v10 = vmul.f32 %v9939_v6, %v10285_v45  ;;  %v3576_v44 = vadd.f32 %v3561_v42, %v10199_v25  ;;  %v4021_v36 = vadd.f32 %v12543_v56, %v3797_v55  ;;  %v3574_v49 = vadd.f32 %v3559_v46, %v3350_v15  ;;  %v12562_v50 = vld [vmem:[#allocation298_spill] sm:$0xff]  ;;  %v12566_v56 = vld [vmem:[#allocation304_spill] sm:$0xff] }
 0x3fa   :  { %v10320_v53 = vmul.f32 %v9939_v6, %v10214_v2  ;;  %v4018_v8 = vadd.f32 %v4004_v9, %v3794_v40  ;;  %v3388_v12 = vsel %vm798_vm3, %v12560_v33, %v12559_v52  ;;  %v3389_v11 = vsel %vm798_vm3, %v12559_v52, %v12561_v1  ;;  %v10331_v42 = vpop.permute.xlu0 %3664  ;;  %v10333_v46 = vpop.permute.xlu1 %3666 }
 0x3fb   :  { %v3784_v25 = vsel %vm1248_vm5, %v12563_v13, %v12562_v50  ;;  %12564 = vst [vmem:[#allocation146_spill] sm:$0xff] %v10331_v42  ;;  %12565 = vst [vmem:[#allocation129_spill] sm:$0xff] %v10333_v46  ;;  %v2958_v55 = vadd.f32 %v2943_v34, %v2734_v37  ;;  %v2959_v6 = vadd.f32 %v2944_v62, %v2735_v61  ;;  %v12568_v62 = vld [vmem:[#allocation28_spill] sm:$0xff] }
 0x3fc   :  { %v4421_v15 = vadd.f32 %v10308_v31, %v4243_v18  ;;  %v4422_v40 = vadd.f32 %v10308_v31, %v4244_v57  ;;  %v4228_v9 = vsel %vm1698_vm7, %v12566_v56, %v12549_v29  ;;  %3944 = vrot.lane.b32.xlu0 %v3922_v23, %s6382_s10  ;;  %v4365_v52 = vmul.f32 %v9946_v5, %v10285_v45  ;;  %v12567_v57 = vld [vmem:[#allocation299_spill] sm:$0xff]  ;;  %v12569_v23 = vld [vmem:[#allocation312_spill] sm:$0xff]  ;;  %v12576_v56 = vld [vmem:[#allocation46_spill] sm:$0xff] }
 0x3fd   :  { %4380 = vrot.lane.b32.xlu1 %v4364_v10, %s6384_s17  ;;  %v4366_v33 = vmul.f32 %v9984_v32, %v10285_v45  ;;  %v3402_v37 = vadd.f32 %v3388_v12, %v3178_v4  ;;  %v10346_v61 = vadd.f32 %v3389_v11, %v3179_v19  ;;  %v3799_v34 = vadd.f32 %v3784_v25, %v3575_v3  ;;  %v12574_v12 = vld [vmem:[#allocation303_spill] sm:$0xff]  ;;  %v12575_v25 = vld [vmem:[#allocation58_spill] sm:$0xff] }
 0x3fe   :  { %v4245_v18 = vadd.f32 %v12550_v63, %v4021_v36  ;;  %v3785_v29 = vsel %vm1248_vm5, %v12562_v50, %v12567_v57  ;;  %v4008_v10 = vsel %vm1473_vm6, %v12569_v23, %v12568_v62  ;;  %v10357_v5 = vmul.f32 %v9991_v27, %v10214_v2  ;;  %v10363_v19 = vpop.permute.xlu0 %4102  ;;  %v10365_v3 = vpop.permute.xlu1 %4104 }
 0x3ff   :  { %v10361_v4 = vmul.f32 %v10157_v0, %v10214_v2  ;;  %12572 = vst [vmem:[#allocation132_spill] sm:$0xff] %v10363_v19  ;;  %12573 = vst [vmem:[#allocation131_spill] sm:$0xff] %v10365_v3  ;;  %v4429_v63 = vmax.f32 %v4421_v15, 0.0  ;;  %v4430_v36 = vmax.f32 %v4422_v40, 0.0  ;;  %v3783_v11 = vsel %vm1248_vm5, %v12574_v12, %v12563_v13  ;;  %v12577_v12 = vld [vmem:[#allocation305_spill] sm:$0xff]  ;;  %v12578_v3 = vld [vmem:[#allocation307_spill] sm:$0xff] }
 0x400   :  { %12570 = vst [vmem:[#allocation128_spill] sm:$0xff] %v10357_v5  ;;  %v4242_v50 = vadd.f32 %v4228_v9, %v4018_v8  ;;  %v4232_v51 = vsel %vm1698_vm7, %v12576_v56, %v12575_v25  ;;  %v10375_v42 = vmul.f32 %v10230_v22, %v10214_v2  ;;  %4382 = vrot.lane.b32.xlu0 %v4365_v52, %s6384_s17 }
 0x401   :  { %12571 = vst [vmem:[#allocation130_spill] sm:$0xff] %v10361_v4  ;;  %4384 = vrot.lane.b32.xlu1 %v4366_v33, %s6384_s17  ;;  %v3251_v15 = vmul.f32 %v10230_v22, %v9214_v58  ;;  %v3800_v40 = vadd.f32 %v3785_v29, %v3576_v44  ;;  %v3801_v32 = vadd.f32 %v12567_v57, %v3577_v59  ;;  %v12579_v4 = vld [vmem:[#allocation306_spill] sm:$0xff]  ;;  %v12584_v57 = vld [vmem:[#allocation31_spill] sm:$0xff] }
 0x402   :  { %v10383_v13 = vadd.f32 %v10308_v31, %v4245_v18  ;;  %v4023_v8 = vadd.f32 %v4008_v10, %v3799_v34  ;;  %v3798_v9 = vadd.f32 %v3783_v11, %v3574_v49  ;;  %v2718_v19 = vsel %vm123_vm0, %v12503_v16, %v12577_v12  ;;  %v10395_v58 = vpop.permute.xlu0 %4106  ;;  %v10397_v59 = vpop.permute.xlu1 %3660  ;;  %v12582_v49 = vld [vmem:[#allocation308_spill] sm:$0xff] }
 0x403   :  { %v3167_v52 = vsel %vm573_vm2, %v12579_v4, %v12578_v3  ;;  %v10393_v33 = vmul.f32 %v10064_v43, %v10214_v2  ;;  %12581 = vst [vmem:[#allocation135_spill] sm:$0xff] %v10397_v59  ;;  %v10400_v44 = vadd.f32 %v10308_v31, %v4242_v50  ;;  %v3168_v34 = vsel %vm573_vm2, %v12578_v3, %v12582_v49  ;;  %v12585_v2 = vld [vmem:[#allocation53_spill] sm:$0xff]  ;;  %v12587_v50 = vld [vmem:[#allocation310_spill] sm:$0xff] }
 0x404   :  { %v4247_v16 = vadd.f32 %v4232_v51, %v4023_v8  ;;  %v10405_v18 = vpack.i.bf16 %v4430_v36, %v4429_v63  ;;  %v4009_v29 = vsel %vm1473_vm6, %v12568_v62, %v12584_v57  ;;  %6141 = vrot.lane.b32.xlu0 %v12585_v2, %s6385_s25  ;;  %v3695_v10 = vmul.f32 %v10030_v60, %v9729_v26  ;;  %v12586_v36 = vld [vmem:[#allocation30_spill] sm:$0xff]  ;;  %v12588_v8 = vld [vmem:[#allocation309_spill] sm:$0xff]  ;;  %v12589_v2 = vld [vmem:[#allocation311_spill] sm:$0xff] }
 0x405   :  { %12580 = vst [vmem:[#allocation133_spill] sm:$0xff] %v10393_v33  ;;  %3274 = vrot.lane.b32.xlu1 %v3251_v15, %s6379_s24  ;;  %v4144_v4 = vmul.f32 %v10064_v43, %v10131_v54  ;;  %v2732_v3 = vadd.f32 %v2718_v19, %v10025_v14  ;;  %v2733_v51 = vadd.f32 %v12577_v12, %v10034_v30  ;;  %v12592_v12 = vld [vmem:[#allocation57_spill] sm:$0xff]  ;;  %v4428_v5 = vmax.f32 %v10400_v44, 0.0  ;;  %s10534_s24 = sld [smem:[#allocation2 + $0x7]] }
 0x406   :  { %12583 = vst [vmem:[#allocation136_spill] sm:$0xff] %v10405_v18  ;;  %v3182_v63 = vadd.f32 %v3167_v52, %v2958_v55  ;;  %v4007_v62 = vsel %vm1473_vm6, %v12586_v36, %v12569_v23  ;;  %v3183_v11 = vadd.f32 %v3168_v34, %v2959_v6  ;;  %v3612_v15 = vsel %vm1023_vm4, %v12588_v8, %v12587_v50  ;;  %v10430_v14 = vpop.permute.xlu0 %4100  ;;  %v10432_v19 = vpop.permute.xlu1 %3044  ;;  %v12593_v23 = vld [vmem:[#allocation34_spill] sm:$0xff]  ;;  %v12596_v36 = vld [vmem:[#allocation15_spill] sm:$0xff] }
 0x407   :  { %v3613_v59 = vsel %vm1023_vm4, %v12587_v50, %v12589_v2  ;;  %v4025_v18 = vadd.f32 %v12584_v57, %v3801_v32  ;;  %12590 = vst [vmem:[#allocation138_spill] sm:$0xff] %v10430_v14  ;;  %12591 = vst [vmem:[#allocation137_spill] sm:$0xff] %v10432_v19  ;;  %v4024_v30 = vadd.f32 %v4009_v29, %v3800_v40  ;;  %v12594_v57 = vld [vmem:[#allocation32_spill] sm:$0xff]  ;;  %v12595_v29 = vld [vmem:[#allocation21_spill] sm:$0xff] }
 0x408   :  { %v4425_v55 = vadd.f32 %v10308_v31, %v4247_v16  ;;  %v4233_v6 = vsel %vm1698_vm7, %v12575_v25, %v12592_v12  ;;  %v4231_v52 = vsel %vm1698_vm7, %v12593_v23, %v12576_v56  ;;  %v4022_v34 = vadd.f32 %v4007_v62, %v3798_v9  ;;  %3714 = vrot.lane.b32.xlu0 %v3695_v10, %s6381_s9  ;;  %v12597_v9 = vld [vmem:[#allocation42_spill] sm:$0xff]  ;;  %v12599_v62 = vld [vmem:[#allocation41_spill] sm:$0xff]  ;;  %v12602_v19 = vld [vmem:[#allocation44_spill] sm:$0xff] }
 0x409   :  { %4164 = vrot.lane.b32.xlu1 %v4144_v4, %s6383_s13  ;;  %v4145_v32 = vmul.f32 %v9991_v27, %v10131_v54  ;;  %v4146_v40 = vmul.f32 %v10157_v0, %v10131_v54  ;;  %v3626_v16 = vadd.f32 %v3612_v15, %v3402_v37  ;;  %v2942_v25 = vsel %vm348_vm1, %v12519_v7, %v12594_v57  ;;  %v12598_v4 = vld [vmem:[#allocation45_spill] sm:$0xff] }
 0x40a   :  { %v3391_v56 = vsel %vm798_vm3, %v12596_v36, %v12595_v29  ;;  %v3392_v10 = vsel %vm798_vm3, %v12595_v29, %v12597_v9  ;;  %v3836_v50 = vsel %vm1248_vm5, %v12599_v62, %v12598_v4  ;;  %v4248_v8 = vadd.f32 %v4233_v6, %v4024_v30  ;;  %v10460_v15 = vpop.permute.xlu0 %3046  ;;  %v10462_v14 = vpop.permute.xlu1 %3048 }
 0x40b   :  { %v4249_v23 = vadd.f32 %v12592_v12, %v4025_v18  ;;  %v4246_v37 = vadd.f32 %v4231_v52, %v4022_v34  ;;  %12600 = vst [vmem:[#allocation139_spill] sm:$0xff] %v10460_v15  ;;  %12601 = vst [vmem:[#allocation141_spill] sm:$0xff] %v10462_v14  ;;  %v3627_v7 = vadd.f32 %v3613_v59, %v10346_v61  ;;  %v4433_v33 = vmax.f32 %v4425_v55, 0.0  ;;  %v12603_v55 = vld [vmem:[#allocation61_spill] sm:$0xff] }
 0x40c   :  { %v2957_v36 = vadd.f32 %v12594_v57, %v2733_v51  ;;  %v3837_v29 = vsel %vm1248_vm5, %v12598_v4, %v12602_v19  ;;  %v2956_v62 = vadd.f32 %v2942_v25, %v2732_v3  ;;  %4166 = vrot.lane.b32.xlu0 %v4145_v32, %s6383_s13  ;;  %v3475_v18 = vmul.f32 %v10230_v22, %v12447_v28  ;;  %v12606_v32 = vld [vmem:[#allocation49_spill] sm:$0xff]  ;;  %v12608_v57 = vld [vmem:[#allocation8_spill] sm:$0xff] }
 0x40d   :  { %4168 = vrot.lane.b32.xlu1 %v4146_v40, %s6383_s13  ;;  %v3919_v61 = vmul.f32 %v10030_v60, %v9918_v47  ;;  %v3406_v59 = vadd.f32 %v3391_v56, %v3182_v63  ;;  %v3407_v51 = vadd.f32 %v3392_v10, %v3183_v11  ;;  %v3850_v30 = vadd.f32 %v3836_v50, %v3626_v16  ;;  %v12609_v56 = vld [vmem:[#allocation13_spill] sm:$0xff] }
 0x40e   :  { %v2793_v12 = vadd.f32 %v12603_v55, %v10375_v42  ;;  %v3851_v44 = vadd.f32 %v3837_v29, %v3627_v7  ;;  %v4426_v3 = vadd.f32 %v10308_v31, %v4248_v8  ;;  %v10482_v6 = vadd.f32 %v10308_v31, %v4249_v23  ;;  %v10485_v34 = vpop.permute.xlu0 %3484  ;;  %v10487_v28 = vpop.permute.xlu1 %3486  ;;  %v12607_v42 = vld [vmem:[#allocation86_spill] sm:$0xff]  ;;  %v12613_v7 = vld [vmem:[#allocation11_spill] sm:$0xff]  ;;  %v12614_v29 = vld [vmem:[#allocation9_spill] sm:$0xff] }
 0x40f   :  { %v4424_v52 = vadd.f32 %v10308_v31, %v4246_v37  ;;  %12604 = vst [vmem:[#allocation140_spill] sm:$0xff] %v10485_v34  ;;  %12605 = vst [vmem:[#allocation142_spill] sm:$0xff] %v10487_v28  ;;  %v2721_v63 = vsel %vm123_vm0, %v12533_v17, %v12606_v32  ;;  %v2737_v11 = vadd.f32 %v12606_v32, %v10135_v41  ;;  %v12610_v41 = vld [vmem:[#allocation12_spill] sm:$0xff]  ;;  %v12617_v32 = vld [vmem:[#allocation22_spill] sm:$0xff]  ;;  %v10532_v28 = vstv %s10470_s19  ;;  %s5895_s19 = sld [smem:[#allocation2 + $0x50]] }
 0x410   :  { %v3017_v40 = vadd.f32 %v12607_v42, %v2793_v12  ;;  %v10495_v16 = vpack.i.bf16 %v4433_v33, %v4428_v5  ;;  %v3166_v25 = vsel %vm573_vm2, %v12540_v21, %v12608_v57  ;;  %3498 = vrot.lane.b32.xlu0 %v3475_v18, %s6380_s29  ;;  %v4368_v31 = vmul.f32 %v10064_v43, %v10285_v45  ;;  %v12611_v5 = vld [vmem:[#allocation14_spill] sm:$0xff]  ;;  %v12612_v21 = vld [vmem:[#allocation27_spill] sm:$0xff]  ;;  %v12619_v34 = vld [vmem:[#allocation24_spill] sm:$0xff]  ;;  %s10566_s29 = sld [smem:[#allocation2 + $0x4e]] }
 0x411   :  { %3938 = vrot.lane.b32.xlu1 %v3919_v61, %s6382_s10  ;;  %v4369_v17 = vmul.f32 %v9991_v27, %v10285_v45  ;;  %v4060_v10 = vsel %vm1473_vm6, %v12610_v41, %v12609_v56  ;;  %v4061_v33 = vsel %vm1473_vm6, %v12609_v56, %v12611_v5  ;;  %v2789_v4 = vadd.f32 %v12612_v21, %v10257_v20  ;;  %v12618_v41 = vld [vmem:[#allocation23_spill] sm:$0xff] }
 0x412   :  { %v3241_v50 = vadd.f32 %v9835_v35, %v3017_v40  ;;  %v4434_v8 = vmax.f32 %v4426_v3, 0.0  ;;  %v4432_v23 = vmax.f32 %v4424_v52, 0.0  ;;  %v2736_v37 = vadd.f32 %v2721_v63, %v10175_v39  ;;  %v10519_v61 = vpop.permute.xlu0 %3488  ;;  %v10521_v12 = vpop.permute.xlu1 %3886  ;;  %v12620_v3 = vld [vmem:[#allocation48_spill] sm:$0xff]  ;;  %v12642_v35 = vld [vmem:[#allocation55_spill] sm:$0xff] }
 0x413   :  { %v3615_v18 = vsel %vm1023_vm4, %v12614_v29, %v12613_v7  ;;  %12615 = vst [vmem:[#allocation144_spill] sm:$0xff] %v10519_v61  ;;  %12616 = vst [vmem:[#allocation143_spill] sm:$0xff] %v10521_v12  ;;  %v4284_v56 = vsel %vm1698_vm7, %v12618_v41, %v12617_v32  ;;  %v4285_v20 = vsel %vm1698_vm7, %v12617_v32, %v12619_v34  ;;  %v12621_v61 = vld [vmem:[#allocation66_spill] sm:$0xff] }
 0x414   :  { %v3013_v52 = vadd.f32 %v12620_v3, %v2789_v4  ;;  %v3465_v39 = vadd.f32 %v10048_v48, %v3241_v50  ;;  %v4074_v63 = vadd.f32 %v4060_v10, %v3850_v30  ;;  %v4075_v40 = vadd.f32 %v4061_v33, %v3851_v44  ;;  %4388 = vrot.lane.b32.xlu0 %v4368_v31, %s6384_s17  ;;  %v12623_v44 = vld [vmem:[#allocation10_spill] sm:$0xff] }
 0x415   :  { %4390 = vrot.lane.b32.xlu1 %v4369_v17, %s6384_s17  ;;  %v4370_v29 = vmul.f32 %v10157_v0, %v10285_v45  ;;  %v3180_v41 = vadd.f32 %v3166_v25, %v2956_v62  ;;  %v3181_v32 = vadd.f32 %v12608_v57, %v2957_v36  ;;  %v10543_v30 = vpack.i.bf16 %v4432_v23, %v4434_v8  ;;  %v12626_v62 = vld [vmem:[#allocation17_spill] sm:$0xff]  ;;  %v12628_v23 = vld [vmem:[#allocation19_spill] sm:$0xff]  ;;  %v12635_v8 = vld [vmem:[#allocation36_spill] sm:$0xff] }
 0x416   :  { %v3237_v4 = vadd.f32 %v12621_v61, %v3013_v52  ;;  %v3689_v50 = vadd.f32 %v10333_v46, %v3465_v39  ;;  %v3616_v10 = vsel %vm1023_vm4, %v12613_v7, %v12623_v44  ;;  %v4298_v33 = vadd.f32 %v4284_v56, %v4074_v63  ;;  %v10548_v12 = vpop.permute.xlu0 %3888  ;;  %v10550_v17 = vpop.permute.xlu1 %3890  ;;  %v12629_v7 = vld [vmem:[#allocation18_spill] sm:$0xff]  ;;  %v12631_v39 = vld [vmem:[#allocation16_spill] sm:$0xff] }
 0x417   :  { %12622 = vst [vmem:[#allocation145_spill] sm:$0xff] %v10543_v30  ;;  %v4299_v31 = vadd.f32 %v4285_v20, %v4075_v40  ;;  %12624 = vst [vmem:[#allocation147_spill] sm:$0xff] %v10548_v12  ;;  %v3630_v0 = vadd.f32 %v3615_v18, %v3406_v59  ;;  %v2945_v36 = vsel %vm348_vm1, %v12558_v24, %v12626_v62  ;;  %v12630_v20 = vld [vmem:[#allocation63_spill] sm:$0xff]  ;;  %v12632_v40 = vld [vmem:[#allocation97_spill] sm:$0xff]  ;;  %v10597_v12 = vstv %s10534_s24 }
 0x418   :  { %12625 = vst [vmem:[#allocation148_spill] sm:$0xff] %v10550_v17  ;;  %v3461_v57 = vadd.f32 %v9630_v38, %v3237_v4  ;;  %v10557_v25 = vadd.f32 %v10550_v17, %v3689_v50  ;;  %v3839_v56 = vsel %vm1248_vm5, %v12629_v7, %v12628_v23  ;;  %4392 = vrot.lane.b32.xlu0 %v4370_v29, %s6384_s17  ;;  %v12633_v50 = vld [vmem:[#allocation20_spill] sm:$0xff]  ;;  %v12637_v17 = vld [vmem:[#allocation37_spill] sm:$0xff] }
 0x419   :  { %6146 = vrot.lane.b32.xlu1 %v12630_v20, %s6385_s25  ;;  %v3699_v24 = vmul.f32 %v10230_v22, %v9729_v26  ;;  %v4143_v59 = vmul.f32 %v10030_v60, %v10131_v54  ;;  %v3631_v18 = vadd.f32 %v3616_v10, %v3407_v51  ;;  %v2961_v52 = vadd.f32 %v12626_v62, %v2737_v11 }
 0x41a   :  { %12627 = vst [vmem:[#allocation150_spill] sm:$0xff] %v10557_v25  ;;  %v3390_v63 = vsel %vm798_vm3, %v12561_v1, %v12631_v39  ;;  %v3685_v29 = vadd.f32 %v12632_v40, %v3461_v57  ;;  %v10578_v4 = vadd.f32 %v12631_v39, %v3181_v32  ;;  %v3840_v26 = vsel %vm1248_vm5, %v12628_v23, %v12633_v50  ;;  %v10585_v51 = vpop.permute.xlu0 %4326  ;;  %v12634_v1 = vld [vmem:[#allocation35_spill] sm:$0xff]  ;;  %v12636_v32 = vld [vmem:[#allocation113_spill] sm:$0xff] }
 0x41b   :  { %v4438_v7 = vadd.f32 %v10532_v28, %v4298_v33  ;;  %v4439_v20 = vadd.f32 %v10532_v28, %v4299_v31  ;;  %v10587_v11 = vpop.permute.xlu1 %4328  ;;  %v2960_v10 = vadd.f32 %v2945_v36, %v2736_v37  ;;  %v3854_v62 = vadd.f32 %v3839_v56, %v3630_v0  ;;  %v12638_v0 = vld [vmem:[#allocation25_spill] sm:$0xff]  ;;  %v12639_v36 = vld [vmem:[#allocation26_spill] sm:$0xff]  ;;  %v12640_v56 = vld [vmem:[#allocation59_spill] sm:$0xff] }
 0x41c   :  { %v4063_v57 = vsel %vm1473_vm6, %v12635_v8, %v12634_v1  ;;  %v3909_v39 = vadd.f32 %v12636_v32, %v3685_v29  ;;  %v4064_v23 = vsel %vm1473_vm6, %v12634_v1, %v12637_v17  ;;  %3722 = vrot.lane.b32.xlu0 %v3699_v24, %s6381_s9  ;;  %v3923_v37 = vmul.f32 %v10230_v22, %v9918_v47  ;;  %v12641_v29 = vld [vmem:[#allocation51_spill] sm:$0xff] }
 0x41d   :  { %4162 = vrot.lane.b32.xlu1 %v4143_v59, %s6383_s13  ;;  %v4367_v33 = vmul.f32 %v10030_v60, %v10285_v45  ;;  %v3855_v31 = vadd.f32 %v3840_v26, %v3631_v18  ;;  %v2773_v8 = vsel %vm123_vm0, %v12639_v36, %v12638_v0  ;;  %v4287_v1 = vsel %vm1698_vm7, %v12641_v29, %v12640_v56 }
 0x41e   :  { %v4133_v24 = vadd.f32 %v10395_v58, %v3909_v39  ;;  %v4446_v46 = vmax.f32 %v4438_v7, 0.0  ;;  %v4447_v59 = vmax.f32 %v4439_v20, 0.0  ;;  %v4078_v48 = vadd.f32 %v4063_v57, %v3854_v62  ;;  %v10615_v14 = vpop.permute.xlu0 %4330  ;;  %v12643_v39 = vld [vmem:[#allocation123_spill] sm:$0xff] }
 0x41f   :  { %v4288_v47 = vsel %vm1698_vm7, %v12640_v56, %v12642_v35  ;;  %v10617_v18 = vpop.permute.xlu1 %6126  ;;  %v4079_v26 = vadd.f32 %v4064_v23, %v3855_v31  ;;  %v3404_v25 = vadd.f32 %v3390_v63, %v3180_v41  ;;  %v2787_v7 = vadd.f32 %v2773_v8, %v12643_v39  ;;  %v12644_v63 = vld [vmem:[#allocation29_spill] sm:$0xff]  ;;  %v12651_v39 = vld [vmem:[#allocation124_spill] sm:$0xff] }
 0x420   :  { %v4357_v30 = vadd.f32 %v10615_v14, %v4133_v24  ;;  %v6129_v15 = vunpack.i.h.bf16 %v10617_v18  ;;  %v6128_v29 = vunpack.i.l.bf16 %v10617_v18  ;;  %v4302_v20 = vadd.f32 %v4287_v1, %v4078_v48  ;;  %3946 = vrot.lane.b32.xlu0 %v3923_v37, %s6382_s10  ;;  %v12645_v56 = vld [vmem:[#allocation33_spill] sm:$0xff]  ;;  %v12646_v24 = vld [vmem:[#allocation38_spill] sm:$0xff] }
 0x421   :  { %v10624_v62 = vstv %s10566_s29  ;;  %4386 = vrot.lane.b32.xlu1 %v4367_v33, %s6384_s17  ;;  %v4303_v57 = vadd.f32 %v4288_v47, %v4079_v26  ;;  %v10630_v23 = vmul.f32 %v10064_v43, %v10597_v12  ;;  %v2774_v48 = vsel %vm123_vm0, %v12638_v0, %v12612_v21  ;;  %v12647_v0 = vld [vmem:[#allocation43_spill] sm:$0xff]  ;;  %v12648_v47 = vld [vmem:[#allocation40_spill] sm:$0xff] }
 0x422   :  { %v10633_v31 = vadd.f32 %v10624_v62, %v4357_v30  ;;  %v2022_v41 = vsel %vm1985_vm8, %v6128_v29, %v6129_v15  ;;  %v3169_v37 = vsel %vm573_vm2, %v12582_v49, %v12644_v63  ;;  %v3185_v33 = vadd.f32 %v12644_v63, %v2961_v52  ;;  %v10645_v8 = vpop.permute.xlu0 %3884 }
 0x423   :  { %v10647_v43 = vpop.permute.xlu1 %4324  ;;  %2269 = vmatprep.mubr.f32.mxu0 %v2022_v41  ;;  %v10649_v30 = vpack.i.bf16 %v4447_v59, %v4446_v46  ;;  %v3614_v1 = vsel %vm1023_vm4, %v12589_v2, %v12645_v56  ;;  %v2772_v21 = vsel %vm123_vm0, %v12646_v24, %v12639_v36  ;;  %v2997_v49 = vsel %vm348_vm1, %v12648_v47, %v12647_v0  ;;  %v12649_v59 = vld [vmem:[#allocation81_spill] sm:$0xff] }
 0x424   :  { %v2998_v52 = vsel %vm348_vm1, %v12647_v0, %v12620_v3  ;;  %v4435_v26 = vmax.f32 %v10482_v6, 0.0  ;;  %v4442_v46 = vadd.f32 %v10532_v28, %v4302_v20  ;;  %6151 = vrot.lane.b32.xlu0 %v12649_v59, %s6385_s25  ;;  %v12650_v2 = vld [vmem:[#allocation101_spill] sm:$0xff]  ;;  %v4147_v36 = vmul.f32 %v10230_v22, %v10131_v54  ;;  %v2110_v3 = vld [vmem:[%s11516_s2 + $0x20] sm:$0xff] }
 0x425   :  { %6156 = vrot.lane.b32.xlu1 %v12650_v2, %s6385_s25  ;;  %v4371_v29 = vmul.f32 %v10230_v22, %v10285_v45  ;;  %v2122_v6 = vld [vmem:[%s11516_s2 + $0x80] sm:$0x3]  ;;  %v2788_v20 = vadd.f32 %v2774_v48, %v12651_v39  ;;  %v3184_v41 = vadd.f32 %v3169_v37, %v2960_v10  ;;  %v4443_v63 = vadd.f32 %v10532_v28, %v4303_v57  ;;  %v2113_v10 = vld [vmem:[%s11516_s2 + $0x38] sm:$0xff]  ;;  %v12653_v37 = vld [vmem:[#allocation52_spill] sm:$0xff] }
 0x426   :  { %v10683_v24 = vmul.f32 %v9991_v27, %v10597_v12  ;;  %v3628_v54 = vadd.f32 %v3614_v1, %v3404_v25  ;;  %v3629_v22 = vadd.f32 %v12645_v56, %v10578_v4  ;;  %v2786_v45 = vadd.f32 %v2772_v21, %v10320_v53  ;;  %v10688_v59 = vpop.permute.xlu0 %6131  ;;  %v2125_v27 = vld [vmem:[%s11516_s2 + $0x98] sm:$0x3]  ;;  %v12655_v39 = vld [vmem:[#allocation92_spill] sm:$0xff] }
 0x427   :  { %v3011_v0 = vadd.f32 %v2997_v49, %v2787_v7  ;;  %v10690_v2 = vpop.permute.xlu1 %2818  ;;  %v3012_v57 = vadd.f32 %v2998_v52, %v2788_v20  ;;  %v12652_v25 = vld [vmem:[#allocation50_spill] sm:$0xff]  ;;  %v6133_v53 = vunpack.i.l.bf16 %v10688_v59  ;;  %v6004_v7 = vpack.c.bf16 %v2122_v6, %v2110_v3 }
 0x428   :  { %v3393_v4 = vsel %vm798_vm3, %v12597_v9, %v12652_v25  ;;  %v3409_v48 = vadd.f32 %v12652_v25, %v3185_v33  ;;  %v3838_v56 = vsel %vm1248_vm5, %v12602_v19, %v12653_v37  ;;  %v3853_v1 = vadd.f32 %v12653_v37, %v3629_v22  ;;  %4170 = vrot.lane.b32.xlu0 %v4147_v36, %s6383_s13  ;;  %v12654_v52 = vld [vmem:[#allocation54_spill] sm:$0xff]  ;;  %v12657_v25 = vld [vmem:[#allocation56_spill] sm:$0xff] }
 0x429   :  { %v4450_v21 = vmax.f32 %v4442_v46, 0.0  ;;  %4394 = vrot.lane.b32.xlu1 %v4371_v29, %s6384_s17  ;;  %v4451_v49 = vmax.f32 %v4443_v63, 0.0  ;;  %v2996_v9 = vsel %vm348_vm1, %v12654_v52, %v12648_v47  ;;  %v12656_v3 = vunpack.i.h.bf16 %v12655_v39  ;;  %v12658_v19 = vld [vmem:[#allocation60_spill] sm:$0xff]  ;;  %v12659_v36 = vld [vmem:[#allocation62_spill] sm:$0xff] }
 0x42a   :  { %v6006_v6 = vpack.c.bf16 %v2125_v27, %v2113_v10  ;;  %v3408_v20 = vadd.f32 %v3393_v4, %v3184_v41  ;;  %v2776_v22 = vsel %vm123_vm0, %v12658_v19, %v12657_v25  ;;  %v2777_v46 = vsel %vm123_vm0, %v12657_v25, %v12603_v55  ;;  %v12660_v29 = vld [vmem:[#allocation68_spill] sm:$0xff]  ;;  %v3269_v37 = vpop.permute.xlu0 %3268  ;;  %v12661_v10 = vld [vmem:[#allocation67_spill] sm:$0xff]  ;;  %v12667_v25 = vld [vmem:[#allocation130_spill] sm:$0xff] }
 0x42b   :  { %v1988_v33 = vsel %vm1985_vm8, %v12656_v3, %v6133_v53  ;;  %v3221_v63 = vsel %vm573_vm2, %v12660_v29, %v12659_v36  ;;  %v10724_v47 = vpop.permute.xlu1 %3270  ;;  %v3852_v52 = vadd.f32 %v3838_v56, %v3628_v54  ;;  %v3222_v41 = vsel %vm573_vm2, %v12659_v36, %v12621_v61  ;;  %v12662_v53 = vld [vmem:[#allocation64_spill] sm:$0xff]  ;;  %v12664_v56 = vld [vmem:[#allocation47_spill] sm:$0xff] }
 0x42c   :  { %2270 = vmatmul.mubr.f32.vlgmr.msra.gmra.mrb[0].mxu0 %v1988_v33  ;;  %v3617_v27 = vsel %vm1023_vm4, %v12623_v44, %v12661_v10  ;;  %v10734_v55 = vsel %vm573_vm2, %v3269_v37, %v10724_v47  ;;  %v3010_v4 = vadd.f32 %v2996_v9, %v2786_v45  ;;  %v4062_v39 = vsel %vm1473_vm6, %v12611_v5, %v12662_v53  ;;  %v12663_v54 = vld [vmem:[#allocation80_spill] sm:$0xff] }
 0x42d   :  { %6005 = vmatpush1.bf16.xpose.msra.mxu0 %v6004_v7  ;;  %6161 = vrot.lane.b32.xlu0 %v12663_v54, %s6385_s25  ;;  %v12665_v61 = vmax.f32 %v10383_v13, 0.0  ;;  %v12666_v44 = vld [vmem:[#allocation128_spill] sm:$0xff]  ;;  %v10749_v36 = vadd.f32 %v2777_v46, %v12667_v25  ;;  %v3235_v45 = vadd.f32 %v3221_v63, %v3011_v0  ;;  %v10751_v7 = vpack.i.bf16 %v4435_v26, %v4451_v49  ;;  %v12670_v0 = vld [vmem:[#allocation83_spill] sm:$0xff]  ;;  %v12672_v49 = vld [vmem:[#allocation73_spill] sm:$0xff] }
 0x42e   :  { %6166 = vrot.lane.b32.xlu1 %v12664_v56, %s6385_s25  ;;  %v2791_v33 = vadd.f32 %v2776_v22, %v12666_v44  ;;  %6007 = vmatprep.subr.bf16.mxu0 %v6006_v6  ;;  %v3236_v5 = vadd.f32 %v3222_v41, %v3012_v57  ;;  %v3632_v9 = vadd.f32 %v3617_v27, %v3408_v20  ;;  %v10755_v56 = vpop.permute.xlu0 %3272  ;;  %v12669_v22 = vld [vmem:[#allocation71_spill] sm:$0xff]  ;;  %v12673_v20 = vld [vmem:[#allocation84_spill] sm:$0xff]  ;;  %v12674_v63 = vld [vmem:[#allocation85_spill] sm:$0xff] }
 0x42f   :  { %v10745_v3 = vpack.i.bf16 %v4450_v21, %v12665_v61  ;;  %v3633_v37 = vadd.f32 %v12661_v10, %v3409_v48  ;;  %v4077_v54 = vadd.f32 %v12662_v53, %v3853_v1  ;;  %v10757_v13 = vpop.permute.xlu1 %3708  ;;  %v4076_v21 = vadd.f32 %v4062_v39, %v3852_v52  ;;  %v12668_v61 = vld [vmem:[#allocation82_spill] sm:$0xff]  ;;  %v12675_v41 = vld [vmem:[#allocation100_spill] sm:$0xff]  ;;  %v12677_v10 = vld [vmem:[#allocation93_spill] sm:$0xff] }
 0x430   :  { %v3445_v46 = vsel %vm798_vm3, %v12669_v22, %v12668_v61  ;;  %v3446_v26 = vsel %vm798_vm3, %v12668_v61, %v9630_v38  ;;  %v3841_v57 = vsel %vm1248_vm5, %v12633_v50, %v12670_v0  ;;  %v12671_v48 = vld [vmem:[#allocation74_spill] sm:$0xff]  ;;  %v3220_v6 = vsel %vm573_vm2, %v12672_v49, %v12660_v29  ;;  %v12676_v38 = vld [vmem:[#allocation104_spill] sm:$0xff]  ;;  %v12678_v27 = vld [vmem:[#allocation95_spill] sm:$0xff] }
 0x431   :  { %v2775_v1 = vsel %vm123_vm0, %v12671_v48, %v12658_v19  ;;  %v3000_v52 = vsel %vm348_vm1, %v12674_v63, %v12673_v20  ;;  %6171 = vrot.lane.b32.xlu0 %v12675_v41, %s6385_s25  ;;  %v3857_v50 = vadd.f32 %v12670_v0, %v3633_v37  ;;  %v4286_v19 = vsel %vm1698_vm7, %v12619_v34, %v12677_v10  ;;  %v12679_v53 = vld [vmem:[#allocation96_spill] sm:$0xff]  ;;  %v12680_v0 = vld [vmem:[#allocation91_spill] sm:$0xff] }
 0x432   :  { %6176 = vrot.lane.b32.xlu1 %v12676_v38, %s6385_s25  ;;  %v3670_v29 = vsel %vm1023_vm4, %v12678_v27, %v12632_v40  ;;  %v4065_v39 = vsel %vm1473_vm6, %v12637_v17, %v12679_v53  ;;  %v3459_v44 = vadd.f32 %v3445_v46, %v3235_v45  ;;  %v3460_v25 = vadd.f32 %v3446_v26, %v3236_v5  ;;  %v10792_v49 = vpop.permute.xlu0 %3710  ;;  %v12681_v40 = vld [vmem:[#allocation122_spill] sm:$0xff] }
 0x433   :  { %v3856_v61 = vadd.f32 %v3841_v57, %v3632_v9  ;;  %v4301_v48 = vadd.f32 %v12677_v10, %v4077_v54  ;;  %v10794_v37 = vpop.permute.xlu1 %3712  ;;  %v3669_v34 = vsel %vm1023_vm4, %v12680_v0, %v12678_v27  ;;  %v4081_v41 = vadd.f32 %v12679_v53, %v3857_v50  ;;  %v12682_v17 = vld [vmem:[#allocation114_spill] sm:$0xff]  ;;  %v12685_v57 = vld [vmem:[#allocation133_spill] sm:$0xff]  ;;  %v12686_v50 = vld [vmem:[#allocation111_spill] sm:$0xff] }
 0x434   :  { %v3894_v38 = vsel %vm1248_vm5, %v12681_v40, %v12636_v32  ;;  %v4289_v45 = vsel %vm1698_vm7, %v12642_v35, %v12682_v17  ;;  %v4300_v5 = vadd.f32 %v4286_v19, %v4076_v21  ;;  %v3684_v9 = vadd.f32 %v3670_v29, %v3460_v25  ;;  %v12683_v46 = vld [vmem:[#allocation110_spill] sm:$0xff]  ;;  %v12687_v35 = vld [vmem:[#allocation131_spill] sm:$0xff] }
 0x435   :  { %v4080_v54 = vadd.f32 %v4065_v39, %v3856_v61  ;;  %6181 = vrot.lane.b32.xlu0 %v12683_v46, %s6385_s25  ;;  %v12684_v26 = vld [vmem:[#allocation118_spill] sm:$0xff]  ;;  %v10811_v10 = vadd.f32 %v2775_v1, %v12685_v57  ;;  %v3893_v32 = vsel %vm1248_vm5, %v12686_v50, %v12681_v40  ;;  %v4305_v27 = vadd.f32 %v12682_v17, %v4081_v41  ;;  %v12688_v40 = vld [vmem:[#allocation132_spill] sm:$0xff] }
 0x436   :  { %6186 = vrot.lane.b32.xlu1 %v12684_v26, %s6385_s25  ;;  %v4118_v21 = vsel %vm1473_vm6, %v12687_v35, %v10395_v58  ;;  %v10820_v19 = vadd.f32 %v3220_v6, %v3010_v4  ;;  %v3683_v29 = vadd.f32 %v3669_v34, %v3459_v44  ;;  %v3908_v53 = vadd.f32 %v3894_v38, %v3684_v9  ;;  %v10822_v25 = vpop.permute.xlu0 %4110  ;;  %v12689_v34 = vld [vmem:[#allocation136_spill] sm:$0xff] }
 0x437   :  { %v4304_v39 = vadd.f32 %v4289_v45, %v4080_v54  ;;  %v10824_v61 = vpop.permute.xlu1 %4112  ;;  %v10826_v1 = vadd.f32 %v3000_v52, %v2791_v33  ;;  %v4441_v46 = vadd.f32 %v10532_v28, %v4301_v48  ;;  %v4117_v41 = vsel %vm1473_vm6, %v12688_v40, %v12687_v35  ;;  %v12690_v48 = vld [vmem:[#allocation105_spill] sm:$0xff]  ;;  %v12691_v45 = vld [vmem:[#allocation120_spill] sm:$0xff]  ;;  %v12695_v35 = vld [vmem:[#allocation150_spill] sm:$0xff] }
 0x438   :  { %v4342_v58 = vsel %vm1698_vm7, %v10587_v11, %v10615_v14  ;;  %v4440_v4 = vadd.f32 %v10532_v28, %v4300_v5  ;;  %v3907_v6 = vadd.f32 %v3893_v32, %v3683_v29  ;;  %v4132_v44 = vadd.f32 %v4118_v21, %v3908_v53  ;;  %v12692_v5 = vld [vmem:[#allocation119_spill] sm:$0xff]  ;;  %v12693_v32 = vld [vmem:[#allocation121_spill] sm:$0xff] }
 0x439   :  { %6191 = vrot.lane.b32.xlu0 %v12689_v34, %s6385_s25  ;;  %v4445_v33 = vadd.f32 %v10532_v28, %v4305_v27  ;;  %v4341_v52 = vsel %vm1698_vm7, %v10585_v51, %v10587_v11  ;;  %v2620_v38 = vmul.f32 %v12690_v48, %v10597_v12  ;;  %v2621_v14 = vmul.f32 %v10030_v60, %v10597_v12  ;;  %v12699_v34 = vld [vmem:[#allocation141_spill] sm:$0xff] }
 0x43a   :  { %6196 = vrot.lane.b32.xlu1 %v10495_v16, %s6385_s25  ;;  %v4444_v17 = vadd.f32 %v10532_v28, %v4304_v39  ;;  %v2831_v9 = vsel %vm123_vm0, %v12692_v5, %v12691_v45  ;;  %v4131_v54 = vadd.f32 %v4117_v41, %v3907_v6  ;;  %v4356_v16 = vadd.f32 %v4342_v58, %v4132_v44  ;;  %v10852_v26 = vpop.permute.xlu0 %4114  ;;  %v12694_v28 = vld [vmem:[#allocation88_spill] sm:$0xff]  ;;  %v12696_v39 = vld [vmem:[#allocation139_spill] sm:$0xff]  ;;  %v12697_v41 = vld [vmem:[#allocation137_spill] sm:$0xff] }
 0x43b   :  { %v10854_v57 = vpop.permute.xlu1 %4108  ;;  %v3001_v11 = vsel %vm348_vm1, %v12673_v20, %v12607_v42  ;;  %v2832_v60 = vsel %vm123_vm0, %v12691_v45, %v12693_v32  ;;  %v2830_v27 = vsel %vm123_vm0, %v12694_v28, %v10690_v2  ;;  %v10867_v21 = vadd.f32 %v10852_v26, %v12695_v35  ;;  %v12698_v42 = vld [vmem:[#allocation145_spill] sm:$0xff] }
 0x43c   :  { %v4448_v29 = vmax.f32 %v4440_v4, 0.0  ;;  %v4449_v53 = vmax.f32 %v4441_v46, 0.0  ;;  %v3055_v58 = vsel %vm348_vm1, %v12697_v41, %v12696_v39  ;;  %v4355_v6 = vadd.f32 %v4341_v52, %v4131_v54 }
 0x43d   :  { %6201 = vrot.lane.b32.xlu0 %v12698_v42, %s6385_s25  ;;  %v4453_v20 = vmax.f32 %v4445_v33, 0.0  ;;  %v2846_v44 = vadd.f32 %v2831_v9, %v10630_v23  ;;  %v3056_v48 = vsel %vm348_vm1, %v12696_v39, %v12699_v34  ;;  %v2845_v46 = vadd.f32 %v10690_v2, %v2621_v14  ;;  %v12700_v23 = vld [vmem:[#allocation107_spill] sm:$0xff] }
 0x43e   :  { %6206 = vrot.lane.b32.xlu1 %v10649_v30, %s6385_s25  ;;  %v4452_v4 = vmax.f32 %v4444_v17, 0.0  ;;  %v2847_v45 = vadd.f32 %v2832_v60, %v10683_v24  ;;  %v4458_v52 = vadd.f32 %v10624_v62, %v4356_v16  ;;  %v2844_v5 = vadd.f32 %v2830_v27, %v2620_v38  ;;  %v3043_v54 = vpop.permute.xlu0 %3042  ;;  %v12702_v17 = vld [vmem:[#allocation89_spill] sm:$0xff]  ;;  %v12703_v16 = vld [vmem:[#allocation87_spill] sm:$0xff] }
 0x43f   :  { %v3493_v35 = vpop.permute.xlu1 %3492  ;;  %v3070_v41 = vadd.f32 %v3055_v58, %v2846_v44  ;;  %v3280_v30 = vsel %vm573_vm2, %v10724_v47, %v10755_v56  ;;  %v3054_v33 = vsel %vm348_vm1, %v12700_v23, %v3043_v54  ;;  %v10888_v9 = vadd.f32 %v3043_v54, %v2845_v46  ;;  %v12701_v47 = vld [vmem:[#allocation102_spill] sm:$0xff] }
 0x440   :  { %v3071_v39 = vadd.f32 %v3056_v48, %v2847_v45  ;;  %v4457_v2 = vadd.f32 %v10624_v62, %v4355_v6  ;;  %v10891_v14 = vadd.f32 %v3054_v33, %v2844_v5  ;;  %v3016_v24 = vadd.f32 %v3001_v11, %v10749_v36  ;;  %v12705_v11 = vld [vmem:[#allocation99_spill] sm:$0xff]  ;;  %v12708_v5 = vld [vmem:[#allocation109_spill] sm:$0xff] }
 0x441   :  { %6211 = vrot.lane.b32.xlu0 %v10745_v3, %s6385_s25  ;;  %v3444_v38 = vsel %vm798_vm3, %v12701_v47, %v12669_v22  ;;  %v3224_v60 = vsel %vm573_vm2, %v12703_v16, %v12702_v17  ;;  %v6220_v27 = vpack.i.bf16 %v4449_v53, %v4448_v29  ;;  %v4466_v58 = vmax.f32 %v4458_v52, 0.0 }
 0x442   :  { %6216 = vrot.lane.b32.xlu1 %v10751_v7, %s6385_s25  ;;  %v3294_v6 = vadd.f32 %v10734_v55, %v3070_v41  ;;  %v3295_v42 = vadd.f32 %v3280_v30, %v3071_v39  ;;  %v3495_v44 = vpop.permute.xlu0 %3494  ;;  %v6225_v48 = vpack.i.bf16 %v4453_v20, %v4452_v4  ;;  %v12704_v7 = vld [vmem:[#allocation90_spill] sm:$0xff]  ;;  %v3668_v22 = vsel %vm1023_vm4, %v12705_v11, %v12680_v0  ;;  %v12707_v4 = vld [vmem:[#allocation108_spill] sm:$0xff]  ;;  %v12710_v41 = vld [vmem:[#allocation117_spill] sm:$0xff] }
 0x443   :  { %v10905_v3 = vpop.permute.xlu1 %3496  ;;  %v3225_v36 = vsel %vm573_vm2, %v12702_v17, %v12704_v7  ;;  %v3503_v46 = vsel %vm798_vm3, %v3493_v35, %v3495_v44  ;;  %v3458_v55 = vadd.f32 %v3444_v38, %v10820_v19  ;;  %v4465_v53 = vmax.f32 %v4457_v2, 0.0  ;;  %v12706_v20 = vld [vmem:[#allocation94_spill] sm:$0xff]  ;;  %v12709_v35 = vld [vmem:[#allocation112_spill] sm:$0xff] }
 0x444   :  { %v3504_v29 = vsel %vm798_vm3, %v3495_v44, %v10905_v3  ;;  %v10917_v45 = vadd.f32 %v3503_v46, %v3294_v6  ;;  %v2999_v0 = vsel %vm348_vm1, %v12706_v20, %v12674_v63  ;;  %v3448_v54 = vsel %vm798_vm3, %v12708_v5, %v12707_v4  ;;  %v12711_v17 = vld [vmem:[#allocation98_spill] sm:$0xff]  ;;  %v12718_v46 = vld [vmem:[#allocation143_spill] sm:$0xff] }
 0x445   :  { %v10919_v52 = vadd.f32 %v3504_v29, %v3295_v42  ;;  %6221 = vrot.lane.b32.xlu0 %v6220_v27, %s6385_s25  ;;  %v3449_v19 = vsel %vm798_vm3, %v12707_v4, %v12709_v35  ;;  %v3892_v30 = vsel %vm1248_vm5, %v12710_v41, %v12686_v50  ;;  %v3239_v33 = vadd.f32 %v3224_v60, %v10826_v1  ;;  %v12712_v6 = vld [vmem:[#allocation146_spill] sm:$0xff]  ;;  %v12713_v42 = vld [vmem:[#allocation127_spill] sm:$0xff] }
 0x446   :  { %6226 = vrot.lane.b32.xlu1 %v6225_v48, %s6385_s25  ;;  %v3240_v39 = vadd.f32 %v3225_v36, %v3016_v24  ;;  %v3682_v2 = vadd.f32 %v3668_v22, %v3458_v55  ;;  %v6230_v47 = vpack.i.bf16 %v4466_v58, %v4465_v53  ;;  %v10936_v38 = vpop.permute.xlu0 %3932  ;;  %v3223_v27 = vsel %vm573_vm2, %v12711_v17, %v12703_v16  ;;  %v12714_v48 = vld [vmem:[#allocation129_spill] sm:$0xff]  ;;  %v12715_v1 = vld [vmem:[#allocation138_spill] sm:$0xff]  ;;  %v12716_v16 = vld [vmem:[#allocation115_spill] sm:$0xff] }
 0x447   :  { %v10938_v63 = vpop.permute.xlu1 %3934  ;;  %v3672_v44 = vsel %vm1023_vm4, %v12713_v42, %v12712_v6  ;;  %v3673_v50 = vsel %vm1023_vm4, %v12712_v6, %v12714_v48  ;;  %v4116_v24 = vsel %vm1473_vm6, %v12715_v1, %v12688_v40  ;;  %v3014_v60 = vadd.f32 %v2999_v0, %v10811_v10  ;;  %v12717_v22 = vld [vmem:[#allocation147_spill] sm:$0xff]  ;;  %v12719_v55 = vld [vmem:[#allocation148_spill] sm:$0xff] }
 0x448   :  { %v3463_v58 = vadd.f32 %v3448_v54, %v3239_v33  ;;  %v3464_v7 = vadd.f32 %v3449_v19, %v3240_v39  ;;  %v3906_v36 = vadd.f32 %v3892_v30, %v3682_v2  ;;  %v3447_v11 = vsel %vm798_vm3, %v12716_v16, %v12708_v5  ;;  %v12720_v5 = vld [vmem:[#allocation135_spill] sm:$0xff] }
 0x449   :  { %6231 = vrot.lane.b32.xlu0 %v6230_v47, %s6385_s25  ;;  %v3896_v29 = vsel %vm1248_vm5, %v12718_v46, %v12717_v22  ;;  %v3897_v53 = vsel %vm1248_vm5, %v12717_v22, %v12719_v55  ;;  %v4340_v10 = vsel %vm1698_vm7, %v10647_v43, %v10585_v51  ;;  %v3238_v40 = vadd.f32 %v3223_v27, %v3014_v60 }
 0x44a   :  { %v3687_v20 = vadd.f32 %v3672_v44, %v3463_v58  ;;  %v3688_v0 = vadd.f32 %v3673_v50, %v3464_v7  ;;  %v4130_v4 = vadd.f32 %v4116_v24, %v3906_v36  ;;  %v10966_v54 = vpop.permute.xlu0 %3936  ;;  %v3671_v19 = vsel %vm1023_vm4, %v12720_v5, %v12713_v42 }
 0x44b   :  { %v4335_v35 = vpop.permute.xlu1 %4334  ;;  %v4120_v41 = vsel %vm1473_vm6, %v10822_v25, %v10824_v61  ;;  %v4121_v30 = vsel %vm1473_vm6, %v10824_v61, %v10852_v26  ;;  %v3462_v51 = vadd.f32 %v3447_v11, %v3238_v40  ;;  %v3895_v2 = vsel %vm1248_vm5, %v10645_v8, %v12718_v46 }
 0x44c   :  { %v3911_v43 = vadd.f32 %v3896_v29, %v3687_v20  ;;  %v3912_v33 = vadd.f32 %v3897_v53, %v3688_v0  ;;  %v4354_v39 = vadd.f32 %v4340_v10, %v4130_v4  ;;  %v4119_v44 = vsel %vm1473_vm6, %v10854_v57, %v10822_v25  ;;  %v12721_v10 = vld [vmem:[#allocation116_spill] sm:$0xff] }
 0x44d   :  { %v3686_v47 = vadd.f32 %v3671_v19, %v3462_v51  ;;  %v6134_v57 = vunpack.i.h.bf16 %v10688_v59  ;;  %v12722_v40 = vunpack.i.l.bf16 %v12721_v10 }
 0x44e   :  { %v4135_v17 = vadd.f32 %v4120_v41, %v3911_v43  ;;  %v4136_v27 = vadd.f32 %v4121_v30, %v3912_v33  ;;  %v4337_v6 = vpop.permute.xlu0 %4336  ;;  %v4456_v1 = vadd.f32 %v10624_v62, %v4354_v39  ;;  %v6334_v33 = vld [vmem:[%s11514_s0] sm:$0xff] }
 0x44f   :  { %v4339_v42 = vpop.permute.xlu1 %4338  ;;  %v4344_v48 = vsel %vm1698_vm7, %v4335_v35, %v4337_v6  ;;  %v3910_v50 = vadd.f32 %v3895_v2, %v3686_v47  ;;  %v2618_v39 = vmul.f32 %v6334_v33, %v10597_v12  ;;  %v6335_v2 = vld [vmem:[%s11514_s0 + $0x8] sm:$0xff] }
 0x450   :  { %v4345_v61 = vsel %vm1698_vm7, %v4337_v6, %v4339_v42  ;;  %v4361_v26 = vadd.f32 %v4339_v42, %v10867_v21  ;;  %v4359_v24 = vadd.f32 %v4344_v48, %v4135_v17  ;;  %v4464_v22 = vmax.f32 %v4456_v1, 0.0  ;;  %v12723_v6 = vld [vmem:[#allocation79_spill] sm:$0xff] }
 0x451   :  { %v4360_v8 = vadd.f32 %v4345_v61, %v4136_v27  ;;  %v4134_v58 = vadd.f32 %v4119_v44, %v3910_v50  ;;  %v2619_v47 = vmul.f32 %v6335_v2, %v10597_v12  ;;  %v12724_v42 = vld [vmem:[#allocation103_spill] sm:$0xff]  ;;  %v2829_v48 = vsel %vm123_vm0, %v12723_v6, %v12694_v28  ;;  %v12725_v61 = vld [vmem:[#allocation106_spill] sm:$0xff] }
 0x452   :  { %v10988_v60 = vadd.f32 %v10624_v62, %v4361_v26  ;;  %v4461_v7 = vadd.f32 %v10624_v62, %v4359_v24  ;;  %v10991_v36 = vpop.permute.xlu0 %6136  ;;  %v2828_v44 = vsel %vm123_vm0, %v12724_v42, %v12723_v6  ;;  %v12726_v26 = vld [vmem:[#allocation70_spill] sm:$0xff]  ;;  %v3053_v1 = vsel %vm348_vm1, %v12725_v61, %v12700_v23 }
 0x453   :  { %v4333_v25 = vpop.permute.xlu1 %4332  ;;  %v6139_v16 = vunpack.i.h.bf16 %v10991_v36  ;;  %v6138_v21 = vunpack.i.l.bf16 %v10991_v36  ;;  %v4462_v29 = vadd.f32 %v10624_v62, %v4360_v8  ;;  %v3052_v50 = vsel %vm348_vm1, %v12726_v26, %v12725_v61 }
 0x454   :  { %v4343_v11 = vsel %vm1698_vm7, %v4333_v25, %v4335_v35  ;;  %v4469_v46 = vmax.f32 %v4461_v7, 0.0  ;;  %v2842_v24 = vadd.f32 %v2828_v44, %v2618_v39  ;;  %v2843_v8 = vadd.f32 %v2829_v48, %v2619_v47  ;;  %v12727_v25 = vld [vmem:[#allocation126_spill] sm:$0xff] }
 0x455   :  { %v4358_v55 = vadd.f32 %v4343_v11, %v4134_v58  ;;  %v2025_v53 = vsel %vm1985_vm8, %v6134_v57, %v6138_v21  ;;  %v1991_v20 = vsel %vm1985_vm8, %v12722_v40, %v6139_v16  ;;  %v4470_v35 = vmax.f32 %v4462_v29, 0.0  ;;  %v12728_v57 = vld [vmem:[#allocation134_spill] sm:$0xff]  ;;  %v12729_v11 = vld [vmem:[#allocation125_spill] sm:$0xff] }
 0x456   :  { %v6235_v59 = vpack.i.bf16 %v4469_v46, %v4464_v22  ;;  %v11005_v4 = vpop.permute.xlu0 %2826  ;;  %2274 = vmatprep.mubr.f32.mxu0 %v2025_v53  ;;  %v3276_v16 = vsel %vm573_vm2, %v12728_v57, %v12727_v25  ;;  %v3277_v28 = vsel %vm573_vm2, %v12727_v25, %v12729_v11  ;;  %v3066_v22 = vadd.f32 %v3052_v50, %v2842_v24  ;;  %v12730_v29 = vld [vmem:[#allocation142_spill] sm:$0xff]  ;;  %v12732_v53 = vld [vmem:[#allocation144_spill] sm:$0xff] }
 0x457   :  { %v4460_v0 = vadd.f32 %v10624_v62, %v4358_v55  ;;  %v11007_v5 = vpop.permute.xlu1 %3266  ;;  %2275 = vmatmul.mubr.f32.gmra.mrb[2].mxu0 %v1991_v20  ;;  %v3067_v46 = vadd.f32 %v3053_v1, %v2843_v8  ;;  %v12731_v55 = vld [vmem:[#allocation140_spill] sm:$0xff]  ;;  %v3501_v10 = vsel %vm798_vm3, %v12730_v29, %v12732_v53  ;;  %v3948_v39 = vsel %vm1248_vm5, %v10936_v38, %v10938_v63 }
 0x458   :  { %6236 = vrot.lane.b32.xlu1 %v6235_v59, %s6385_s25  ;;  %v3500_v23 = vsel %vm798_vm3, %v12731_v55, %v12730_v29  ;;  %v3290_v40 = vadd.f32 %v3276_v16, %v3066_v22  ;;  %v3949_v2 = vsel %vm1248_vm5, %v10938_v63, %v10966_v54  ;;  %v11076_v24 = vstv %s5841_s16  ;;  %v2115_v29 = vld [vmem:[%s11516_s2 + $0x48] sm:$0xff] }
 0x459   :  { %v4468_v19 = vmax.f32 %v4460_v0, 0.0  ;;  %v3291_v20 = vadd.f32 %v3277_v28, %v3067_v46  ;;  %v2127_v55 = vld [vmem:[%s11516_s2 + $0xa8] sm:$0x3]  ;;  %v4471_v36 = vmax.f32 %v10988_v60, 0.0 }
 0x45a   :  { %v11010_v30 = vpop.permute.xlu0 %3716 }
 0x45b   :  { %v6240_v41 = vpack.i.bf16 %v4468_v19, %v4470_v35  ;;  %v11012_v51 = vpop.permute.xlu1 %3718  ;;  %v3724_v35 = vsel %vm1023_vm4, %v10757_v13, %v10792_v49  ;;  %v3725_v19 = vsel %vm1023_vm4, %v10792_v49, %v10794_v37  ;;  %v3515_v33 = vadd.f32 %v3501_v10, %v3291_v20 }
 0x45d   :  { %6241 = vrot.lane.b32.xlu0 %v6240_v41, %s6385_s25  ;;  %v3514_v41 = vadd.f32 %v3500_v23, %v3290_v40  ;;  %v3739_v6 = vadd.f32 %v3725_v19, %v3515_v33  ;;  %v6010_v33 = vpack.c.bf16 %v2127_v55, %v2115_v29 }
 0x45e   :  { %v11015_v43 = vpop.permute.xlu0 %3720 }
 0x45f   :  { %v4157_v62 = vpop.permute.xlu1 %4156  ;;  %v3738_v47 = vadd.f32 %v3724_v35, %v3514_v41  ;;  %v3963_v61 = vadd.f32 %v3949_v2, %v3739_v6  ;;  %v3278_v6 = vsel %vm573_vm2, %v12729_v11, %v11007_v5 }
 0x461   :  { %v3962_v48 = vadd.f32 %v3948_v39, %v3738_v47 }
 0x462   :  { %v4159_v17 = vpop.permute.xlu0 %4158 }
 0x463   :  { %v11025_v27 = vpop.permute.xlu1 %4160  ;;  %v4172_v44 = vsel %vm1473_vm6, %v4157_v62, %v4159_v17  ;;  %v2112_v62 = vld [vmem:[%s11516_s2 + $0x30] sm:$0xff] }
 0x464   :  { %v4173_v49 = vsel %vm1473_vm6, %v4159_v17, %v11025_v27  ;;  %v4186_v26 = vadd.f32 %v4172_v44, %v3962_v48  ;;  %v2124_v17 = vld [vmem:[%s11516_s2 + $0x90] sm:$0x3] }
 0x465   :  { %v4187_v50 = vadd.f32 %v4173_v49, %v3963_v61  ;;  %v6008_v35 = vpack.c.bf16 %v2124_v17, %v2112_v62  ;;  %v3727_v49 = vsel %vm1023_vm4, %v11010_v30, %v11012_v51 }
 0x466   :  { %v11039_v58 = vpop.permute.xlu0 %3050 }
 0x467   :  { %v11041_v7 = vpop.permute.xlu1 %3490 }
 0x46a   :  { %v3941_v59 = vpop.permute.xlu0 %3940 }
 0x46b   :  { %v11055_v0 = vpop.permute.xlu1 %3942 }
 0x46c   :  { %v3951_v61 = vsel %vm1248_vm5, %v3941_v59, %v11055_v0 }
 0x46e   :  { %v11069_v42 = vpop.permute.xlu0 %3944 }
 0x46f   :  { %v4381_v13 = vpop.permute.xlu1 %4380  ;;  %v3952_v59 = vsel %vm1248_vm5, %v11055_v0, %v11069_v42 }
 0x472   :  { %v4383_v1 = vpop.permute.xlu0 %4382 }
 0x473   :  { %v11074_v38 = vpop.permute.xlu1 %4384  ;;  %v4396_v63 = vsel %vm1698_vm7, %v4381_v13, %v4383_v1  ;;  %v3502_v13 = vsel %vm798_vm3, %v12732_v53, %v11041_v7 }
 0x474   :  { %v4397_v8 = vsel %vm1698_vm7, %v4383_v1, %v11074_v38  ;;  %v4410_v25 = vadd.f32 %v4396_v63, %v4186_v26  ;;  %v3742_v26 = vadd.f32 %v3727_v49, %v10917_v45  ;;  %v3728_v1 = vsel %vm1023_vm4, %v11012_v51, %v11015_v43 }
 0x475   :  { %v4411_v57 = vadd.f32 %v4397_v8, %v4187_v50  ;;  %v3743_v45 = vadd.f32 %v3728_v1, %v10919_v52  ;;  %v3057_v49 = vsel %vm348_vm1, %v12699_v34, %v11039_v58  ;;  %vm5727_vm1 = vcmask 130048  }
 0x476   :  { %v4474_v16 = vadd.f32 %v11076_v24, %v4410_v25  ;;  %v6142_v22 = vpop.permute.xlu0 %6141 }
 0x477   :  { %v4475_v28 = vadd.f32 %v11076_v24, %v4411_v57  ;;  %v11089_v46 = vpop.permute.xlu1 %3274  ;;  %v6144_v23 = vunpack.i.h.bf16 %v6142_v22  ;;  %v6143_v10 = vunpack.i.l.bf16 %v6142_v22  ;;  %v6336_v22 = vld [vmem:[%s11514_s0 + $0x38] sm:$0xff] }
 0x478   :  { %v4482_v40 = vmax.f32 %v4474_v16, 0.0  ;;  %v3967_v16 = vadd.f32 %v3952_v59, %v3743_v45  ;;  %v2625_v0 = vmul.f32 %v6336_v22, %v10597_v12  ;;  %v2114_v59 = vld [vmem:[%s11516_s2 + $0x40] sm:$0xff] }
 0x479   :  { %v4483_v20 = vmax.f32 %v4475_v28, 0.0  ;;  %v2024_v19 = vsel %vm1985_vm8, %v6143_v10, %v6144_v23  ;;  %v2023_v41 = vsel %vm1985_vm8, %v6129_v15, %v6143_v10  ;;  %v3292_v15 = vadd.f32 %v3278_v6, %v10891_v14 }
 0x47a   :  { %v3715_v2 = vpop.permute.xlu0 %3714  ;;  %2344 = vmatprep.mubr.f32.mxu0 %v2024_v19 }
 0x47b   :  { %v6245_v39 = vpack.i.bf16 %v4483_v20, %v4482_v40  ;;  %v4165_v47 = vpop.permute.xlu1 %4164  ;;  %2345 = vmatmul.mubr.f32.vlgmr.msra.gmra.mrb[0].mxu0 %v2023_v41  ;;  %v3726_v11 = vsel %vm1023_vm4, %v10794_v37, %v3715_v2  ;;  %v3516_v48 = vadd.f32 %v3502_v13, %v3292_v15  ;;  %v3966_v37 = vadd.f32 %v3951_v61, %v3742_v26 }
 0x47c   :  { %6009 = vmatpush1.bf16.xpose.msra.mxu0 %v6008_v35 }
 0x47d   :  { %6246 = vrot.lane.b32.xlu1 %v6245_v39, %s6385_s25  ;;  %6011 = vmatprep.subr.bf16.mxu0 %v6010_v33  ;;  %v3740_v53 = vadd.f32 %v3726_v11, %v3516_v48  ;;  %v2833_v39 = vsel %vm123_vm0, %v12693_v32, %v11005_v4  ;;  %v3281_v48 = vsel %vm573_vm2, %v10755_v56, %v11089_v46 }
 0x47e   :  { %v4167_v18 = vpop.permute.xlu0 %4166 }
 0x47f   :  { %v11109_v44 = vpop.permute.xlu1 %4168  ;;  %v4175_v63 = vsel %vm1473_vm6, %v4165_v47, %v4167_v18 }
 0x480   :  { %v4190_v25 = vadd.f32 %v4175_v63, %v3966_v37  ;;  %v4176_v17 = vsel %vm1473_vm6, %v4167_v18, %v11109_v44 }
 0x481   :  { %v4191_v52 = vadd.f32 %v4176_v17, %v3967_v16 }
 0x482   :  { %v11119_v50 = vpop.permute.xlu0 %3498 }
 0x483   :  { %v3939_v14 = vpop.permute.xlu1 %3938  ;;  %v3505_v60 = vsel %vm798_vm3, %v10905_v3, %v11119_v50  ;;  %v2126_v3 = vld [vmem:[%s11516_s2 + $0xa0] sm:$0x3] }
 0x484   :  { %v3950_v30 = vsel %vm1248_vm5, %v10966_v54, %v3939_v14  ;;  %v3293_v54 = vadd.f32 %v11007_v5, %v10888_v9  ;;  %v4467_v9 = vmax.f32 %v10633_v31, 0.0  ;;  %v6337_v5 = vld [vmem:[%s11514_s0 + $0x30] sm:$0xff]  ;;  %v2849_v31 = vadd.f32 %v11005_v4, %v2625_v0 }
 0x485   :  { %v3964_v8 = vadd.f32 %v3950_v30, %v3740_v53  ;;  %v2624_v19 = vmul.f32 %v6337_v5, %v10597_v12 }
 0x486   :  { %v4389_v57 = vpop.permute.xlu0 %4388  ;;  %v3517_v10 = vadd.f32 %v11041_v7, %v3293_v54  ;;  %v3073_v4 = vadd.f32 %v11039_v58, %v2849_v31 }
 0x487   :  { %v4391_v62 = vpop.permute.xlu1 %4390 }
 0x488   :  { %v4399_v51 = vsel %vm1698_vm7, %v4389_v57, %v4391_v62  ;;  %v3741_v7 = vadd.f32 %v3715_v2, %v3517_v10  ;;  %v3297_v34 = vadd.f32 %v11089_v46, %v3073_v4 }
 0x489   :  { %v4414_v28 = vadd.f32 %v4399_v51, %v4190_v25 }
 0x48a   :  { %v11141_v55 = vpop.permute.xlu0 %4392  ;;  %v3965_v32 = vadd.f32 %v3939_v14, %v3741_v7  ;;  %v3521_v37 = vadd.f32 %v11119_v50, %v3297_v34 }
 0x48b   :  { %v4478_v29 = vadd.f32 %v11076_v24, %v4414_v28  ;;  %v6147_v23 = vpop.permute.xlu1 %6146  ;;  %v4400_v40 = vsel %vm1698_vm7, %v4391_v62, %v11141_v55  ;;  %v2129_v62 = vld [vmem:[%s11516_s2 + $0xb8] sm:$0x3] }
 0x48c   :  { %v6149_v20 = vunpack.i.h.bf16 %v6147_v23  ;;  %v6148_v35 = vunpack.i.l.bf16 %v6147_v23  ;;  %v4415_v33 = vadd.f32 %v4400_v40, %v4191_v52  ;;  %v6012_v52 = vpack.c.bf16 %v2126_v3, %v2114_v59  ;;  %v5842_v59 = vld [vmem:[%s11516_s2 + $0xc0] sm:$0xff] }
 0x48d   :  { %v4486_v41 = vmax.f32 %v4478_v29, 0.0  ;;  %v5854_v3 = vld [vmem:[%s11516_s2 + $0x120] sm:$0x3] }
 0x48e   :  { %v2027_v47 = vsel %vm1985_vm8, %v6148_v35, %v6149_v20  ;;  %v2026_v6 = vsel %vm1985_vm8, %v6138_v21, %v6148_v35  ;;  %v4479_v15 = vadd.f32 %v11076_v24, %v4415_v33  ;;  %v3723_v18 = vpop.permute.xlu0 %3722  ;;  %v2848_v21 = vadd.f32 %v2833_v39, %v2624_v19 }
 0x48f   :  { %v6250_v13 = vpack.i.bf16 %v4486_v41, %v4467_v9  ;;  %v4163_v12 = vpop.permute.xlu1 %4162  ;;  %2349 = vmatprep.mubr.f32.mxu0 %v2027_v47  ;;  %v3729_v46 = vsel %vm1023_vm4, %v11015_v43, %v3723_v18  ;;  %v3745_v45 = vadd.f32 %v3723_v18, %v3521_v37  ;;  %v2117_v43 = vld [vmem:[%s11516_s2 + $0x58] sm:$0xff] }
 0x490   :  { %v4174_v2 = vsel %vm1473_vm6, %v11025_v27, %v4163_v12  ;;  %2350 = vmatmul.mubr.f32.gmra.mrb[2].mxu0 %v2026_v6  ;;  %v4487_v11 = vmax.f32 %v4479_v15, 0.0  ;;  %v4189_v61 = vadd.f32 %v4163_v12, %v3965_v32  ;;  %v3072_v26 = vadd.f32 %v3057_v49, %v2848_v21  ;;  %v2128_v21 = vld [vmem:[%s11516_s2 + $0xb0] sm:$0x3] }
 0x491   :  { %6251 = vrot.lane.b32.xlu0 %v6250_v13, %s6385_s25  ;;  %v4188_v14 = vadd.f32 %v4174_v2, %v3964_v8  ;;  %v6014_v10 = vpack.c.bf16 %v2129_v62, %v2117_v43 }
 0x492   :  { %v6255_v53 = vpack.i.bf16 %v4471_v36, %v4487_v11  ;;  %v3947_v27 = vpop.permute.xlu0 %3946  ;;  %v3296_v30 = vadd.f32 %v3281_v48, %v3072_v26 }
 0x493   :  { %v4387_v1 = vpop.permute.xlu1 %4386  ;;  %v3953_v17 = vsel %vm1248_vm5, %v11069_v42, %v3947_v27  ;;  %v3969_v29 = vadd.f32 %v3947_v27, %v3745_v45 }
 0x494   :  { %v4398_v58 = vsel %vm1698_vm7, %v11074_v38, %v4387_v1  ;;  %v4413_v63 = vadd.f32 %v4387_v1, %v4189_v61  ;;  %6256 = vrot.lane.b32.xlu1 %v6255_v53, %s6385_s25  ;;  %v3520_v38 = vadd.f32 %v3505_v60, %v3296_v30  ;;  %v5855_v61 = vld [vmem:[%s11516_s2 + $0x128] sm:$0x3] }
 0x495   :  { %v4412_v56 = vadd.f32 %v4398_v58, %v4188_v14 }
 0x496   :  { %v4477_v8 = vadd.f32 %v11076_v24, %v4413_v63  ;;  %v6152_v25 = vpop.permute.xlu0 %6151  ;;  %v3744_v54 = vadd.f32 %v3729_v46, %v3520_v38 }
 0x497   :  { %v4476_v50 = vadd.f32 %v11076_v24, %v4412_v56  ;;  %v6157_v57 = vpop.permute.xlu1 %6156  ;;  %v6154_v16 = vunpack.i.h.bf16 %v6152_v25  ;;  %v6153_v28 = vunpack.i.l.bf16 %v6152_v25  ;;  %v5857_v25 = vld [vmem:[%s11516_s2 + $0x138] sm:$0x3] }
 0x498   :  { %v4485_v51 = vmax.f32 %v4477_v8, 0.0  ;;  %v6158_v0 = vunpack.i.l.bf16 %v6157_v57  ;;  %v3968_v40 = vadd.f32 %v3953_v17, %v3744_v54  ;;  %v6159_v7 = vunpack.i.h.bf16 %v6157_v57 }
 0x499   :  { %v4484_v22 = vmax.f32 %v4476_v50, 0.0  ;;  %v2059_v23 = vsel %vm1985_vm8, %v6153_v28, %v6154_v16  ;;  %v5845_v50 = vld [vmem:[%s11516_s2 + $0xd8] sm:$0xff] }
 0x49a   :  { %v4171_v35 = vpop.permute.xlu0 %4170  ;;  %2419 = vmatprep.mubr.f32.mxu0 %v2059_v23  ;;  %v2058_v5 = vsel %vm1985_vm8, %v6158_v0, %v6153_v28  ;;  %v5856_v23 = vld [vmem:[%s11516_s2 + $0x130] sm:$0x3] }
 0x49b   :  { %v6260_v20 = vpack.i.bf16 %v4485_v51, %v4484_v22  ;;  %v4395_v9 = vpop.permute.xlu1 %4394  ;;  %v4177_v42 = vsel %vm1473_vm6, %v11109_v44, %v4171_v35  ;;  %v4193_v19 = vadd.f32 %v4171_v35, %v3969_v29  ;;  %2420 = vmatmul.mubr.f32.vlgmr.msra.gmra.mrb[0].mxu0 %v2058_v5  ;;  %v6020_v51 = vpack.c.bf16 %v5854_v3, %v5842_v59  ;;  %v5844_v29 = vld [vmem:[%s11516_s2 + $0xd0] sm:$0xff]  ;;  %v5847_v35 = vld [vmem:[%s11516_s2 + $0xe8] sm:$0xff] }
 0x49c   :  { %v4192_v41 = vadd.f32 %v4177_v42, %v3968_v40  ;;  %6013 = vmatpush1.bf16.xpose.msra.mxu0 %v6012_v52  ;;  %v4401_v33 = vsel %vm1698_vm7, %v11141_v55, %v4395_v9  ;;  %v2116_v55 = vld [vmem:[%s11516_s2 + $0x50] sm:$0xff] }
 0x49d   :  { %6261 = vrot.lane.b32.xlu0 %v6260_v20, %s6385_s25  ;;  %v4417_v39 = vadd.f32 %v4395_v9, %v4193_v19  ;;  %6015 = vmatprep.subr.bf16.mxu0 %v6014_v10  ;;  %v6016_v1 = vpack.c.bf16 %v2128_v21, %v2116_v55  ;;  %v5859_v9 = vld [vmem:[%s11516_s2 + $0x148] sm:$0x3]  ;;  %v6024_v19 = vpack.c.bf16 %v5856_v23, %v5844_v29 }
 0x49e   :  { %v4416_v47 = vadd.f32 %v4401_v33, %v4192_v41  ;;  %v6026_v33 = vpack.c.bf16 %v5859_v9, %v5847_v35 }
 0x49f   :  { %v6162_v6 = vpop.permute.xlu0 %6161  ;;  %v4481_v13 = vadd.f32 %v11076_v24, %v4417_v39 }
 0x4a0   :  { %v6167_v31 = vpop.permute.xlu1 %6166  ;;  %v6164_v15 = vunpack.i.h.bf16 %v6162_v6  ;;  %v6163_v18 = vunpack.i.l.bf16 %v6162_v6  ;;  %v4480_v12 = vadd.f32 %v11076_v24, %v4416_v47  ;;  %v5843_v24 = vld [vmem:[%s11516_s2 + $0xc8] sm:$0xff] }
 0x4a1   :  { %v6169_v44 = vunpack.i.h.bf16 %v6167_v31  ;;  %v6168_v49 = vunpack.i.l.bf16 %v6167_v31  ;;  %v4489_v32 = vmax.f32 %v4481_v13, 0.0  ;;  %v6018_v58 = vpack.c.bf16 %v5855_v61, %v5843_v24 }
 0x4a2   :  { %v2062_v2 = vsel %vm1985_vm8, %v6159_v7, %v6163_v18  ;;  %v2061_v36 = vsel %vm1985_vm8, %v6164_v15, %v6159_v7  ;;  %v4488_v4 = vmax.f32 %v4480_v12, 0.0 }
 0x4a3   :  { %v6172_v11 = vpop.permute.xlu0 %6171  ;;  %2424 = vmatprep.mubr.f32.mxu0 %v2062_v2  ;;  %v2094_v14 = vsel %vm1985_vm8, %v6168_v49, %v6169_v44  ;;  %v5861_v2 = vld [vmem:[%s11516_s2 + $0x158] sm:$0x3] }
 0x4a4   :  { %v6177_v48 = vpop.permute.xlu1 %6176  ;;  %v6174_v26 = vunpack.i.h.bf16 %v6172_v11  ;;  %v6173_v34 = vunpack.i.l.bf16 %v6172_v11  ;;  %2425 = vmatmul.mubr.f32.gmra.mrb[2].mxu0 %v2061_v36  ;;  %v6265_v27 = vpack.i.bf16 %v4489_v32, %v4488_v4  ;;  %v5849_v32 = vld [vmem:[%s11516_s2 + $0xf8] sm:$0xff] }
 0x4a5   :  { %v6178_v53 = vunpack.i.l.bf16 %v6177_v48  ;;  %2494 = vmatprep.mubr.f32.mxu0 %v2094_v14  ;;  %v6179_v63 = vunpack.i.h.bf16 %v6177_v48  ;;  %v6030_v48 = vpack.c.bf16 %v5861_v2, %v5849_v32 }
 0x4a6   :  { %v2060_v60 = vsel %vm1985_vm8, %v6154_v16, %v6173_v34  ;;  %6266 = vrot.lane.b32.xlu1 %v6265_v27, %s6385_s25  ;;  %v6022_v16 = vpack.c.bf16 %v5857_v25, %v5845_v50  ;;  %v5848_v27 = vld [vmem:[%s11516_s2 + $0xf0] sm:$0xff]  ;;  %v5850_v25 = vld [vmem:[%s11516_s2 + $0x100] sm:$0xff]  ;;  %s6391_s25 = smov [#allocation5]  }
 0x4a7   :  { %v6182_v30 = vpop.permute.xlu0 %6181  ;;  %v2097_v8 = vsel %vm1985_vm8, %v6174_v26, %v6178_v53  ;;  %v2063_v45 = vsel %vm1985_vm8, %v6163_v18, %v6179_v63  ;;  %v5846_v18 = vld [vmem:[%s11516_s2 + $0xe0] sm:$0xff]  ;;  %v5863_v63 = vld [vmem:[%s11516_s2 + $0x168] sm:$0x3]  ;;  %s5749_s24 = sshll.u32 %s6391_s25, 4  ;;  %s5750_s24 = int_to_ptr.vmem [resolvable:$true] %s5749_s24 }
 0x4a8   :  { %v6187_v37 = vpop.permute.xlu1 %6186  ;;  %v6184_v56 = vunpack.i.h.bf16 %v6182_v30  ;;  %v6183_v46 = vunpack.i.l.bf16 %v6182_v30  ;;  %2495 = vmatmul.mubr.f32.vlgmr.msra.gmra.mrb[0].mxu0 %v2060_v60  ;;  %p6355_p6 = scmp.lt.s32.totalorder %s5750_s24, %s5750_s24 }
 0x4a9   :  { %2499 = vmatprep.mubr.f32.mxu0 %v2097_v8  ;;  %6017 = vmatpush1.bf16.xpose.msra.mxu0 %v6016_v1  ;;  %v6189_v57 = vunpack.i.h.bf16 %v6187_v37  ;;  %v6188_v43 = vunpack.i.l.bf16 %v6187_v37  ;;  %v5860_v1 = vld [vmem:[%s11516_s2 + $0x150] sm:$0x3] }
 0x4aa   :  { %6019 = vmatprep.subr.bf16.mxu0 %v6018_v58  ;;  %v2096_v62 = vsel %vm1985_vm8, %v6183_v46, %v6184_v56  ;;  %v2095_v28 = vsel %vm1985_vm8, %v6169_v44, %v6183_v46  ;;  %v5858_v44 = vld [vmem:[%s11516_s2 + $0x140] sm:$0x3]  ;;  %v5851_v58 = vld [vmem:[%s11516_s2 + $0x108] sm:$0xff]  ;;  %v6032_v8 = vpack.c.bf16 %v5860_v1, %v5848_v27 }
 0x4ab   :  { %v11230_v38 = vpop.permute.xlu0 %6191  ;;  %v2099_v0 = vsel %vm1985_vm8, %v6188_v43, %v6189_v57  ;;  %v2098_v20 = vsel %vm1985_vm8, %v6178_v53, %v6188_v43  ;;  %v6028_v11 = vpack.c.bf16 %v5858_v44, %v5846_v18  ;;  %v6034_v59 = vpack.c.bf16 %v5863_v63, %v5851_v58  ;;  %v5862_v57 = vld [vmem:[%s11516_s2 + $0x160] sm:$0x3] }
 0x4ac   :  { %2500 = vmatmul.mubr.f32.gmra.mrb[2].mxu0 %v2063_v45  ;;  %v6197_v17 = vpop.permute.xlu1 %6196  ;;  %v6194_v54 = vunpack.i.h.bf16 %v11230_v38  ;;  %v6193_v22 = vunpack.i.l.bf16 %v11230_v38 }
 0x4ad   :  { %2569 = vmatprep.mubr.f32.mxu0 %v2096_v62  ;;  %v6198_v10 = vunpack.i.l.bf16 %v6197_v17  ;;  %v6199_v41 = vunpack.i.h.bf16 %v6197_v17  ;;  %v5853_v17 = vld [vmem:[%s11516_s2 + $0x118] sm:$0xff] }
 0x4ae   :  { %v4515_v42 = vsel %vm1985_vm8, %v6193_v22, %v6194_v54 }
 0x4af   :  { %v6202_v52 = vpop.permute.xlu0 %6201  ;;  %v4514_v47 = vsel %vm1985_vm8, %v6198_v10, %v6193_v22 }
 0x4b0   :  { %2570 = vmatmul.mubr.f32.vlgmr.msra.gmra.mrb[0].mxu0 %v2095_v28  ;;  %v6207_v40 = vpop.permute.xlu1 %6206  ;;  %v6203_v5 = vunpack.i.l.bf16 %v6202_v52  ;;  %v6204_v39 = vunpack.i.h.bf16 %v6202_v52 }
 0x4b1   :  { %2574 = vmatprep.mubr.f32.mxu0 %v2099_v0  ;;  %6021 = vmatpush1.bf16.xpose.msra.mxu0 %v6020_v51  ;;  %v6209_v6 = vunpack.i.h.bf16 %v6207_v40  ;;  %v6208_v31 = vunpack.i.l.bf16 %v6207_v40  ;;  %v5865_v51 = vld [vmem:[%s11516_s2 + $0x178] sm:$0x3] }
 0x4b2   :  { %6023 = vmatprep.subr.bf16.mxu0 %v6022_v16  ;;  %v4518_v13 = vsel %vm1985_vm8, %v6199_v41, %v6203_v5  ;;  %v4517_v49 = vsel %vm1985_vm8, %v6204_v39, %v6199_v41  ;;  %v6038_v0 = vpack.c.bf16 %v5865_v51, %v5853_v17  ;;  %v5864_v41 = vld [vmem:[%s11516_s2 + $0x170] sm:$0x3] }
 0x4b3   :  { %v6212_v7 = vpop.permute.xlu0 %6211  ;;  %v4550_v21 = vsel %vm1985_vm8, %v6208_v31, %v6209_v6 }
 0x4b4   :  { %2575 = vmatmul.mubr.f32.gmra.mrb[2].mxu0 %v2098_v20  ;;  %v6217_v15 = vpop.permute.xlu1 %6216  ;;  %v6213_v12 = vunpack.i.l.bf16 %v6212_v7  ;;  %v6214_v36 = vunpack.i.h.bf16 %v6212_v7 }
 0x4b5   :  { %4723 = vmatprep.mubr.f32.mxu0 %v4515_v42  ;;  %v6218_v55 = vunpack.i.l.bf16 %v6217_v15  ;;  %v6219_v24 = vunpack.i.h.bf16 %v6217_v15 }
 0x4b6   :  { %v4516_v61 = vsel %vm1985_vm8, %v6194_v54, %v6213_v12  ;;  %v6036_v54 = vpack.c.bf16 %v5862_v57, %v5850_v25 }
 0x4b7   :  { %v6222_v4 = vpop.permute.xlu0 %6221  ;;  %v4553_v53 = vsel %vm1985_vm8, %v6214_v36, %v6218_v55  ;;  %v4519_v60 = vsel %vm1985_vm8, %v6203_v5, %v6219_v24  ;;  %v6275_v24 = vld [vmem:[%s11518_s4] sm:$0x1f]  }
 0x4b8   :  { %4724 = vmatmul.mubr.f32.vlgmr.msra.gmra.mrb[0].mxu0 %v4514_v47  ;;  %v6224_v26 = vunpack.i.h.bf16 %v6222_v4  ;;  %v6223_v34 = vunpack.i.l.bf16 %v6222_v4  ;;  %v6227_v14 = vpop.permute.xlu1 %6226 }
 0x4b9   :  { %4728 = vmatprep.mubr.f32.mxu0 %v4518_v13  ;;  %6025 = vmatpush1.bf16.xpose.msra.mxu0 %v6024_v19  ;;  %v6229_v30 = vunpack.i.h.bf16 %v6227_v14  ;;  %v6228_v37 = vunpack.i.l.bf16 %v6227_v14  ;;  %v5852_v19 = vld [vmem:[%s11516_s2 + $0x110] sm:$0xff] }
 0x4ba   :  { %6027 = vmatprep.subr.bf16.mxu0 %v6026_v33  ;;  %v4552_v56 = vsel %vm1985_vm8, %v6223_v34, %v6224_v26  ;;  %v4551_v3 = vsel %vm1985_vm8, %v6209_v6, %v6223_v34  ;;  %v6040_v7 = vpack.c.bf16 %v5864_v41, %v5852_v19  ;;  %v5125_v26 = vsel %vm5123_vm9, %v6275_v24, 0  ;;  %v5801_v34 = vld [vmem:[%s11517_s3] ss:$0 sm:$0xff] }
 0x4bb   :  { %v6232_v46 = vpop.permute.xlu0 %6231  ;;  %v4555_v50 = vsel %vm1985_vm8, %v6228_v37, %v6229_v30  ;;  %v4554_v62 = vsel %vm1985_vm8, %v6218_v55, %v6228_v37 }
 0x4bc   :  { %4729 = vmatmul.mubr.f32.gmra.mrb[2].mxu0 %v4517_v49  ;;  %v6234_v38 = vunpack.i.h.bf16 %v6232_v46  ;;  %v6233_v45 = vunpack.i.l.bf16 %v6232_v46 }
 0x4bd   :  { %4798 = vmatprep.mubr.f32.mxu0 %v4550_v21 }
 0x4be   :  { %v4587_v28 = vsel %vm1985_vm8, %v6233_v45, %v6234_v38 }
 0x4c0   :  { %4799 = vmatmul.mubr.f32.vlgmr.msra.gmra.mrb[0].mxu0 %v4516_v61  ;;  %v6386_v61 = vmov 0.0  }
 0x4c1   :  { %4803 = vmatprep.mubr.f32.mxu0 %v4553_v53  ;;  %6029 = vmatpush1.bf16.xpose.msra.mxu0 %v6028_v11 }
 0x4c2   :  { %6031 = vmatprep.subr.bf16.mxu0 %v6030_v48  ;;  %5931 = vmatprep.subr.bf16.mxu1 %v6386_v61 }
 0x4c3   :  { %5935 = vmatprep.mubr.msk.bf16.mxu1 %vm6387_vm10, %v6386_v61 }
 0x4c4   :  { %4804 = vmatmul.mubr.f32.gmra.mrb[2].mxu0 %v4519_v60 }
 0x4c5   :  { %4873 = vmatprep.mubr.f32.mxu0 %v4552_v56 }
 0x4c8   :  { %4874 = vmatmul.mubr.f32.vlgmr.msra.gmra.mrb[0].mxu0 %v4551_v3 }
 0x4c9   :  { %4878 = vmatprep.mubr.f32.mxu0 %v4555_v50  ;;  %6033 = vmatpush1.bf16.xpose.msra.mxu0 %v6032_v8 }
 0x4ca   :  { %6035 = vmatprep.subr.bf16.mxu0 %v6034_v59  ;;  %v6237_v43 = vpop.permute.xlu1 %6236 }
 0x4cb   :  { %v6238_v16 = vunpack.i.l.bf16 %v6237_v43  ;;  %v6239_v29 = vunpack.i.h.bf16 %v6237_v43 }
 0x4cc   :  { %4879 = vmatmul.mubr.f32.gmra.mrb[2].mxu0 %v4554_v62 }
 0x4cd   :  { %4948 = vmatprep.mubr.f32.mxu0 %v4587_v28  ;;  %v4586_v22 = vsel %vm1985_vm8, %v6238_v16, %v6233_v45  ;;  %v6276_v28 = vld [vmem:[%s11519_s5] sm:$0xff]  }
 0x4cf   :  { %v6242_v52 = vpop.permute.xlu0 %6241 }
 0x4d0   :  { %v6244_v23 = vunpack.i.h.bf16 %v6242_v52  ;;  %v6243_v10 = vunpack.i.l.bf16 %v6242_v52  ;;  %4949 = vmatmul.mubr.f32.vlgmr.msra.gmra.mrb[0].mxu0 %v4586_v22  ;;  %v6278_v22 = vld [vmem:[%s11519_s5 + $0x10] sm:$0xff]   ;;  %v6280_v52 = vld [vmem:[%s11519_s5 + $0x20] sm:$0xff]  }
 0x4d1   :  { %6037 = vmatpush1.bf16.xpose.msra.mxu0 %v6036_v54  ;;  %v6277_v54 = vld [vmem:[%s11519_s5 + $0x8] sm:$0xff]  }
 0x4d2   :  { %v4590_v40 = vsel %vm1985_vm8, %v6239_v29, %v6243_v10  ;;  %v4589_v20 = vsel %vm1985_vm8, %v6244_v23, %v6239_v29  ;;  %6039 = vmatprep.subr.bf16.mxu0 %v6038_v0  ;;  %v6279_v0 = vld [vmem:[%s11519_s5 + $0x18] sm:$0xff]   ;;  %v6281_v29 = vld [vmem:[%s11519_s5 + $0x28] sm:$0xff]   ;;  %v6282_v23 = vld [vmem:[%s11519_s5 + $0x30] sm:$0xff]  }
 0x4d3   :  { %4953 = vmatprep.mubr.f32.mxu0 %v4590_v40 }
 0x4d4   :  { %4954 = vmatmul.mubr.f32.gmra.mrb[2].mxu0 %v4589_v20  ;;  %v6283_v20 = vld [vmem:[%s11519_s5 + $0x38] sm:$0xff]  }
 0x4ef   :  { %v6247_v35 = vpop.permute.xlu1 %6246 }
 0x4f0   :  { %v6249_v9 = vunpack.i.h.bf16 %v6247_v35  ;;  %v6248_v5 = vunpack.i.l.bf16 %v6247_v35 }
 0x4f2   :  { %v4622_v42 = vsel %vm1985_vm8, %v6248_v5, %v6249_v9  ;;  %v6284_v5 = vld [vmem:[%s11519_s5 + $0x40] sm:$0xff]  }
 0x4f3   :  { %5023 = vmatprep.mubr.f32.mxu0 %v4622_v42 }
 0x503   :  { %v6252_v33 = vpop.permute.xlu0 %6251 }
 0x504   :  { %v6253_v39 = vunpack.i.l.bf16 %v6252_v33  ;;  %v6254_v31 = vunpack.i.h.bf16 %v6252_v33 }
 0x506   :  { %v4588_v47 = vsel %vm1985_vm8, %v6234_v38, %v6253_v39  ;;  %v6257_v6 = vpop.permute.xlu1 %6256  ;;  %v6285_v39 = vld [vmem:[%s11519_s5 + $0x48] sm:$0xff]  }
 0x507   :  { %5024 = vmatmul.mubr.f32.vlgmr.msra.gmra.mrb[0].mxu0 %v4588_v47  ;;  %v6259_v13 = vunpack.i.h.bf16 %v6257_v6  ;;  %v6258_v15 = vunpack.i.l.bf16 %v6257_v6  ;;  %v6286_v47 = vld [vmem:[%s11519_s5 + $0x50] sm:$0xff]   ;;  %v6287_v6 = vld [vmem:[%s11519_s5 + $0x58] sm:$0xff]  }
 0x508   :  { %6041 = vmatpush1.bf16.xpose.msra.mxu0 %v6040_v7 }
 0x509   :  { %v4625_v18 = vsel %vm1985_vm8, %v6254_v31, %v6258_v15  ;;  %v4591_v44 = vsel %vm1985_vm8, %v6243_v10, %v6259_v13  ;;  %5925 = vmatprep.subr.bf16.mxu0 %v6386_v61  ;;  %v6288_v31 = vld [vmem:[%s11519_s5 + $0x60] ss:$0 sps:$4 sm:$0x33]   ;;  %v6389_v13 = vmov 0  }
 0x50a   :  { %5028 = vmatprep.mubr.f32.mxu0 %v4625_v18  ;;  %v11429_v18 = vld [vmem:[%s11517_s3 + $0x1] ss:$0 sm:$0xff] }
 0x50b   :  { %5029 = vmatmul.mubr.f32.gmra.mrb[2].mxu0 %v4591_v44 }
 0x50f   :  { %v6262_v12 = vpop.permute.xlu0 %6261 }
 0x510   :  { %v6264_v49 = vunpack.i.h.bf16 %v6262_v12  ;;  %v6263_v32 = vunpack.i.l.bf16 %v6262_v12 }
 0x512   :  { %v4624_v2 = vsel %vm1985_vm8, %v6263_v32, %v6264_v49  ;;  %v4623_v36 = vsel %vm1985_vm8, %v6249_v9, %v6263_v32 }
 0x513   :  { %5098 = vmatprep.mubr.f32.mxu0 %v4624_v2 }
 0x514   :  { %5099 = vmatmul.mubr.f32.vlgmr.msra.gmra.mrb[0].mxu0 %v4623_v36 }
 0x515   :  { %5926 = vmatpush3.bf16.msra.mxu0 %v5125_v26 }
 0x518   :  { %v6267_v55 = vpop.permute.xlu1 %6266 }
 0x519   :  { %v6269_v21 = vunpack.i.h.bf16 %v6267_v55  ;;  %v6268_v4 = vunpack.i.l.bf16 %v6267_v55 }
 0x51b   :  { %v4627_v11 = vsel %vm1985_vm8, %v6268_v4, %v6269_v21  ;;  %v4626_v48 = vsel %vm1985_vm8, %v6258_v15, %v6268_v4 }
 0x51c   :  { %5103 = vmatprep.mubr.f32.mxu0 %v4627_v11 }
 0x51d   :  { %5104 = vmatmul.mubr.f32.gmra.mrb[2].mxu0 %v4626_v48 }
 0x51e   :  { %5927 = vmatprep.mubr.msk.bf16.mxu0 %vm6387_vm10, %v6386_v61 }
 0x5e7   :  { %v5100_v53 = vpop.f32.mrb[0].mxu0 }
 0x5e8   :  { %v6048_v14 = vadd.f32 %v5801_v34, %v5100_v53  ;;  %v5102_v27 = vpop.f32.mrb[1].mxu0 }
 0x5ea   :  { %v5599_v1 = vsel %vm5119_vm11, %v6048_v14, -inf }
 0x5eb   :  { %5600 = vmax.xlane.f32.xlu1 %v5599_v1 }
 0x5f0   :  { %v5105_v60 = vpop.f32.mrb[2].mxu0 }
 0x5f1   :  { %v6049_v58 = vadd.f32 %v5801_v34, %v5105_v60  ;;  %v5107_v63 = vpop.f32.mrb[3].mxu0 }
 0x5f3   :  { %v5111_v30 = vpack.c.bf16 %v6049_v58, %v6048_v14  ;;  %v5602_v25 = vsel %vm5119_vm11, %v6049_v58, -inf }
 0x5f5   :  { %5928 = vmatmul.mubr.msk.bf16.vlgmr.msra.gmra.mrb[4].mxu0 %vm5119_vm11, %v5111_v30 }
 0x678   :  { %v5601_v38 = vpop.xlane.xlu1 %5600 }
 0x679   :  { %v5605_v45 = vsub.f32 %v6048_v14, %v5601_v38 }
 0x67b   :  { %v5607_v50 = vmul.f32 1.442695, %v5605_v45 }
 0x67d   :  { %6290 = vpow2.f32 %v5607_v50 }
 0x687   :  { %v11339_v57 = vpop.eup %6290 }
 0x688   :  { %v5611_v43 = vsel %vm5119_vm11, %v11339_v57, 0.0 }
 0x6c8   :  { %v5161_v37 = vpop.f32.mrb[4].mxu0 }
 0x6c9   :  { %v5929_v56 = vpop.f32.mrb[5].mxu0 }
 0x6ca   :  { %v5164_v46 = vpop.f32.mrb[6].mxu0 }
 0x6cb   :  { %v6270_v8 = vpack.i.bf16 %v5164_v46, %v5161_v37  ;;  %v5930_v59 = vpop.f32.mrb[7].mxu0  ;;  %v5201_v3 = vpack.c.bf16 %v5164_v46, %v5161_v37 }
 0x6cd   :  { %6271 = vrot.lane.b32.xlu0 %v6270_v8, %s6388_s20  ;;  %5932 = vmatpush3.bf16.msra.mxu1 %v5201_v3 }
 0x6ce   :  { %5933 = vmatprep.subr.bf16.mxu1 %v6386_v61 }
 0x6ec   :  { %5603 = vmax.xlane.f32.xlu0 %v5602_v25 }
 0x6f0   :  { %5612 = vadd.xlane.f32.xlu0 %v5611_v43 }
 0x73f   :  { %v6272_v62 = vpop.permute.xlu0 %6271 }
 0x740   :  { %v6274_v17 = vunpack.i.h.bf16 %v6272_v62  ;;  %v6273_v51 = vunpack.i.l.bf16 %v6272_v62 }
 0x742   :  { %v5202_v16 = vpack.c.bf16 %v6274_v17, %v6273_v51 }
 0x744   :  { %5934 = vmatpush3.bf16.msra.mxu1 %v5202_v16 }
 0x745   :  { %5535 = vmatprep.subr.bf16.mxu1 %v6389_v13 }
 0x747   :  { %5936 = vmatmul.mubr.msk.bf16.vlgmr.msra.gmra.mrb[0].mxu1 %vm5271_vm12, %v6276_v28 }
 0x748   :  { %5939 = vmatprep.mubr.msk.bf16.mxu1 %vm6387_vm10, %v6386_v61 }
 0x74f   :  { %5940 = vmatmul.mubr.msk.bf16.gmra.mrb[4].mxu1 %vm5271_vm12, %v6277_v54 }
 0x750   :  { %5943 = vmatprep.mubr.msk.bf16.mxu1 %vm6387_vm10, %v6386_v61 }
 0x757   :  { %5944 = vmatmul.mubr.msk.bf16.gmra.mrb[8].mxu1 %vm5271_vm12, %v6278_v22 }
 0x758   :  { %5947 = vmatprep.mubr.msk.bf16.mxu1 %vm6387_vm10, %v6386_v61 }
 0x75f   :  { %5948 = vmatmul.mubr.msk.bf16.gmra.mrb[12].mxu1 %vm5271_vm12, %v6279_v0 }
 0x760   :  { %5951 = vmatprep.mubr.msk.bf16.mxu1 %vm6387_vm10, %v6386_v61 }
 0x767   :  { %5952 = vmatmul.mubr.msk.bf16.gmra.mrb[16].mxu1 %vm5271_vm12, %v6280_v52 }
 0x768   :  { %5955 = vmatprep.mubr.msk.bf16.mxu1 %vm6387_vm10, %v6386_v61 }
 0x76f   :  { %5956 = vmatmul.mubr.msk.bf16.gmra.mrb[20].mxu1 %vm5271_vm12, %v6281_v29 }
 0x770   :  { %5959 = vmatprep.mubr.msk.bf16.mxu1 %vm6387_vm10, %v6386_v61 }
 0x777   :  { %5960 = vmatmul.mubr.msk.bf16.gmra.mrb[24].mxu1 %vm5271_vm12, %v6282_v23 }
 0x778   :  { %5963 = vmatprep.mubr.msk.bf16.mxu1 %vm6387_vm10, %v6386_v61 }
 0x779   :  { %v5604_v10 = vpop.xlane.xlu0 %5603 }
 0x77a   :  { %v11385_v40 = vsub.f32 %v6049_v58, %v5604_v10 }
 0x77c   :  { %v5609_v35 = vmul.f32 1.442695, %v11385_v40 }
 0x77d   :  { %v5613_v9 = vpop.xlane.xlu0 %5612 }
 0x77e   :  { %6292 = vpow2.f32 %v5609_v35 }
 0x77f   :  { %5964 = vmatmul.mubr.msk.bf16.gmra.mrb[28].mxu1 %vm5271_vm12, %v6283_v20  ;;  %6294 = vlog2.f32 %v5613_v9 }
 0x780   :  { %5967 = vmatprep.mubr.msk.bf16.mxu1 %vm6387_vm10, %v6386_v61  ;;  %6296 = vrcp.f32 %v5613_v9 }
 0x787   :  { %5968 = vmatmul.mubr.msk.bf16.gmra.mrb[32].mxu1 %vm5271_vm12, %v6284_v5 }
 0x788   :  { %v6293_v42 = vpop.eup %6292  ;;  %5971 = vmatprep.mubr.msk.bf16.mxu1 %vm6387_vm10, %v6386_v61 }
 0x789   :  { %v5614_v19 = vsel %vm5119_vm11, %v6293_v42, 0.0  ;;  %v6295_v41 = vpop.eup %6294 }
 0x78a   :  { %5615 = vadd.xlane.f32.xlu1 %v5614_v19  ;;  %v5622_v33 = vmul.f32 0.6931472, %v6295_v41  ;;  %v6297_v4 = vpop.eup %6296 }
 0x78b   :  { %v5618_v14 = vmul.f32 %v6297_v4, %v11339_v57 }
 0x78c   :  { %v5625_v7 = vsub.f32 %v5605_v45, %v5622_v33 }
 0x78e   :  { %5991 = vmatprep.mubr.msk.f32.mxu0 %vm5119_vm11, %v5625_v7 }
 0x78f   :  { %5972 = vmatmul.mubr.msk.bf16.gmra.mrb[36].mxu1 %vm5271_vm12, %v6285_v39 }
 0x790   :  { %5975 = vmatprep.mubr.msk.bf16.mxu1 %vm6387_vm10, %v6386_v61 }
 0x797   :  { %5976 = vmatmul.mubr.msk.bf16.gmra.mrb[40].mxu1 %vm5271_vm12, %v6286_v47 }
 0x798   :  { %5979 = vmatprep.mubr.msk.bf16.mxu1 %vm6387_vm10, %v6386_v61 }
 0x79f   :  { %5980 = vmatmul.mubr.msk.bf16.gmra.mrb[44].mxu1 %vm5271_vm12, %v6287_v6 }
 0x7a0   :  { %5983 = vmatprep.mubr.msk.bf16.mxu1 %vm6387_vm10, %v6386_v61 }
 0x7a7   :  { %5984 = vmatmul.mubr.msk.bf16.gmra.mrb[48].mxu1 %vm5271_vm12, %v6288_v31 }
 0x7a8   :  { %5567 = vmatprep.mubr.bf16.mxu1 %v6389_v13 }
 0x817   :  { %v5616_v15 = vpop.xlane.xlu1 %5615 }
 0x818   :  { %6298 = vrcp.f32 %v5616_v15 }
 0x819   :  { %6300 = vlog2.f32 %v5616_v15 }
 0x81a   :  { %v5345_v44 = vpop.f32.mrb[0].mxu1 }
 0x81b   :  { %v5346_v12 = vadd.f32 %v11429_v18, %v5345_v44  ;;  %v5937_v49 = vpop.f32.mrb[1].mxu1 }
 0x81c   :  { %v5348_v32 = vpop.f32.mrb[2].mxu1 }
 0x81d   :  { %v5349_v2 = vadd.f32 %v11429_v18, %v5348_v32  ;;  %v5938_v36 = vpop.f32.mrb[3].mxu1  ;;  %v5447_v55 = vmax.f32 %v5346_v12, 0.0 }
 0x81f   :  { %v5448_v21 = vmax.f32 %v5349_v2, 0.0 }
 0x821   :  { %v5473_v11 = vpack.c.bf16 %v5448_v21, %v5447_v55 }
 0x822   :  { %v6299_v48 = vpop.eup %6298  ;;  %v5353_v24 = vpop.f32.mrb[4].mxu1 }
 0x823   :  { %v5354_v26 = vadd.f32 %v11429_v18, %v5353_v24  ;;  %v5941_v34 = vpop.f32.mrb[5].mxu1  ;;  %v5497_v53 = vsel %vm5492_vm13, %v5473_v11, 0  ;;  %v5620_v27 = vmul.f32 %v6299_v48, %v6293_v42  ;;  %v6301_v30 = vpop.eup %6300 }
 0x824   :  { %v5356_v1 = vpop.f32.mrb[6].mxu1  ;;  %5536 = vmatpush1.bf16.xpose.msra.mxu1 %v5497_v53  ;;  %v5624_v46 = vmul.f32 0.6931472, %v6301_v30 }
 0x825   :  { %v5357_v60 = vadd.f32 %v11429_v18, %v5356_v1  ;;  %v5942_v58 = vpop.f32.mrb[7].mxu1  ;;  %v6042_v63 = vpack.c.bf16 %v5620_v27, %v5618_v14  ;;  %5537 = vmatprep.subr.bf16.mxu1 %v6389_v13  ;;  %v5449_v37 = vmax.f32 %v5354_v26, 0.0 }
 0x826   :  { %v5626_v25 = vsub.f32 %v11385_v40, %v5624_v46 }
 0x827   :  { %v5450_v56 = vmax.f32 %v5357_v60, 0.0  ;;  %6044 = vmatprep.subr.msk.bf16.mxu0 %vm6043_vm14, %v6042_v63 }
 0x828   :  { %6047 = vmatpush3.bf16.xpose.msk.msra.mxu0 %vm6043_vm14, %v6042_v63 }
 0x829   :  { %v5474_v8 = vpack.c.bf16 %v5450_v56, %v5449_v37 }
 0x82a   :  { %v5361_v59 = vpop.f32.mrb[8].mxu1 }
 0x82b   :  { %v5362_v3 = vadd.f32 %v11429_v18, %v5361_v59  ;;  %v5945_v38 = vpop.f32.mrb[9].mxu1  ;;  %v5500_v45 = vsel %vm5492_vm13, %v5474_v8, 0 }
 0x82c   :  { %v5364_v50 = vpop.f32.mrb[10].mxu1  ;;  %5538 = vmatpush1.bf16.xpose.msra.mxu1 %v5500_v45 }
 0x82d   :  { %v5365_v57 = vadd.f32 %v11429_v18, %v5364_v50  ;;  %v5946_v43 = vpop.f32.mrb[11].mxu1  ;;  %5539 = vmatprep.subr.bf16.mxu1 %v6389_v13  ;;  %v5451_v62 = vmax.f32 %v5362_v3, 0.0 }
 0x82f   :  { %v5452_v17 = vmax.f32 %v5365_v57, 0.0  ;;  %5992 = vmatmul.mubr.msk.f32.vlgmr.msra.gmra.mrb[8].mxu0 %vm5119_vm11, %v5626_v25 }
 0x831   :  { %v5475_v51 = vpack.c.bf16 %v5452_v17, %v5451_v62 }
 0x832   :  { %v5369_v16 = vpop.f32.mrb[12].mxu1 }
 0x833   :  { %v5370_v28 = vadd.f32 %v11429_v18, %v5369_v16  ;;  %v5949_v54 = vpop.f32.mrb[13].mxu1  ;;  %v5503_v22 = vsel %vm5492_vm13, %v5475_v51, 0 }
 0x834   :  { %v5372_v0 = vpop.f32.mrb[14].mxu1  ;;  %5540 = vmatpush1.bf16.xpose.msra.mxu1 %v5503_v22 }
 0x835   :  { %v5373_v52 = vadd.f32 %v11429_v18, %v5372_v0  ;;  %v5950_v29 = vpop.f32.mrb[15].mxu1  ;;  %5541 = vmatprep.subr.bf16.mxu1 %v6389_v13  ;;  %v5453_v23 = vmax.f32 %v5370_v28, 0.0 }
 0x837   :  { %v5454_v10 = vmax.f32 %v5373_v52, 0.0 }
 0x839   :  { %v5476_v40 = vpack.c.bf16 %v5454_v10, %v5453_v23 }
 0x83a   :  { %v5377_v20 = vpop.f32.mrb[16].mxu1 }
 0x83b   :  { %v5378_v35 = vadd.f32 %v11429_v18, %v5377_v20  ;;  %v5953_v9 = vpop.f32.mrb[17].mxu1  ;;  %v5506_v5 = vsel %vm5492_vm13, %v5476_v40, 0 }
 0x83c   :  { %v5380_v42 = vpop.f32.mrb[18].mxu1  ;;  %5542 = vmatpush1.bf16.xpose.msra.mxu1 %v5506_v5 }
 0x83d   :  { %v5381_v19 = vadd.f32 %v11429_v18, %v5380_v42  ;;  %v5954_v41 = vpop.f32.mrb[19].mxu1  ;;  %5543 = vmatprep.subr.bf16.mxu1 %v6389_v13  ;;  %v5455_v33 = vmax.f32 %v5378_v35, 0.0 }
 0x83f   :  { %v5456_v39 = vmax.f32 %v5381_v19, 0.0 }
 0x841   :  { %v5477_v7 = vpack.c.bf16 %v5456_v39, %v5455_v33 }
 0x842   :  { %v5385_v47 = vpop.f32.mrb[20].mxu1 }
 0x843   :  { %v5386_v6 = vadd.f32 %v11429_v18, %v5385_v47  ;;  %v5957_v31 = vpop.f32.mrb[21].mxu1  ;;  %v5509_v15 = vsel %vm5492_vm13, %v5477_v7, 0 }
 0x844   :  { %v5388_v44 = vpop.f32.mrb[22].mxu1  ;;  %5544 = vmatpush1.bf16.xpose.msra.mxu1 %v5509_v15 }
 0x845   :  { %v5389_v12 = vadd.f32 %v11429_v18, %v5388_v44  ;;  %v5958_v49 = vpop.f32.mrb[23].mxu1  ;;  %5545 = vmatprep.subr.bf16.mxu1 %v6389_v13  ;;  %v5457_v32 = vmax.f32 %v5386_v6, 0.0 }
 0x847   :  { %v5458_v2 = vmax.f32 %v5389_v12, 0.0 }
 0x849   :  { %v5478_v36 = vpack.c.bf16 %v5458_v2, %v5457_v32 }
 0x84a   :  { %v5393_v55 = vpop.f32.mrb[24].mxu1 }
 0x84b   :  { %v5394_v21 = vadd.f32 %v11429_v18, %v5393_v55  ;;  %v5961_v4 = vpop.f32.mrb[25].mxu1  ;;  %v5512_v11 = vsel %vm5492_vm13, %v5478_v36, 0 }
 0x84c   :  { %v5396_v48 = vpop.f32.mrb[26].mxu1  ;;  %5546 = vmatpush1.bf16.xpose.msra.mxu1 %v5512_v11 }
 0x84d   :  { %v5397_v24 = vadd.f32 %v11429_v18, %v5396_v48  ;;  %v5962_v26 = vpop.f32.mrb[27].mxu1  ;;  %5547 = vmatprep.subr.bf16.mxu1 %v6389_v13  ;;  %v5459_v34 = vmax.f32 %v5394_v21, 0.0 }
 0x84f   :  { %v5460_v53 = vmax.f32 %v5397_v24, 0.0 }
 0x851   :  { %v5479_v14 = vpack.c.bf16 %v5460_v53, %v5459_v34  ;;  %v6289_v53 = vld [vmem:[%s11518_s4 + $0x4] ss:$0 sps:$4 sm:$0x22]  }
 0x852   :  { %v5401_v27 = vpop.f32.mrb[28].mxu1 }
 0x853   :  { %v5402_v1 = vadd.f32 %v11429_v18, %v5401_v27  ;;  %v5965_v60 = vpop.f32.mrb[29].mxu1  ;;  %v5515_v58 = vsel %vm5492_vm13, %v5479_v14, 0  ;;  %v5491_v14 = vrot.slane %v6289_v53, 1 }
 0x854   :  { %v5404_v63 = vpop.f32.mrb[30].mxu1  ;;  %5548 = vmatpush1.bf16.xpose.msra.mxu1 %v5515_v58 }
 0x855   :  { %v5405_v30 = vadd.f32 %v11429_v18, %v5404_v63  ;;  %v5966_v37 = vpop.f32.mrb[31].mxu1  ;;  %5549 = vmatprep.subr.bf16.mxu1 %v6389_v13  ;;  %v5461_v56 = vmax.f32 %v5402_v1, 0.0 }
 0x857   :  { %v5462_v46 = vmax.f32 %v5405_v30, 0.0 }
 0x859   :  { %v5480_v8 = vpack.c.bf16 %v5462_v46, %v5461_v56 }
 0x85a   :  { %v5409_v59 = vpop.f32.mrb[32].mxu1 }
 0x85b   :  { %v5410_v3 = vadd.f32 %v11429_v18, %v5409_v59  ;;  %v5969_v38 = vpop.f32.mrb[33].mxu1  ;;  %v5518_v45 = vsel %vm5492_vm13, %v5480_v8, 0 }
 0x85c   :  { %v5412_v50 = vpop.f32.mrb[34].mxu1  ;;  %5550 = vmatpush1.bf16.xpose.msra.mxu1 %v5518_v45 }
 0x85d   :  { %v5413_v25 = vadd.f32 %v11429_v18, %v5412_v50  ;;  %v5970_v57 = vpop.f32.mrb[35].mxu1  ;;  %5551 = vmatprep.subr.bf16.mxu1 %v6389_v13  ;;  %v5463_v43 = vmax.f32 %v5410_v3, 0.0 }
 0x85f   :  { %v5464_v62 = vmax.f32 %v5413_v25, 0.0 }
 0x861   :  { %v5481_v17 = vpack.c.bf16 %v5464_v62, %v5463_v43 }
 0x862   :  { %v5417_v51 = vpop.f32.mrb[36].mxu1 }
 0x863   :  { %v5418_v16 = vadd.f32 %v11429_v18, %v5417_v51  ;;  %v5973_v28 = vpop.f32.mrb[37].mxu1  ;;  %v5521_v54 = vsel %vm5492_vm13, %v5481_v17, 0  ;;  %v6390_v51 = vmov 1966171168  }
 0x864   :  { %v5420_v22 = vpop.f32.mrb[38].mxu1  ;;  %5552 = vmatpush1.bf16.xpose.msra.mxu1 %v5521_v54  ;;  %v5487_v28 = vstv %s5895_s19 }
 0x865   :  { %v5421_v0 = vadd.f32 %v11429_v18, %v5420_v22  ;;  %v5974_v52 = vpop.f32.mrb[39].mxu1  ;;  %5553 = vmatprep.subr.bf16.mxu1 %v6389_v13  ;;  %v5465_v29 = vmax.f32 %v5418_v16, 0.0  ;;  %v5580_v16 = vunpack.c.l.s4 %v6390_v51 }
 0x867   :  { %v5466_v23 = vmax.f32 %v5421_v0, 0.0  ;;  %v5581_v54 = vunpack.c.0.s8 %v5580_v16 }
 0x869   :  { %v5482_v10 = vpack.c.bf16 %v5466_v23, %v5465_v29 }
 0x86a   :  { %v5425_v40 = vpop.f32.mrb[40].mxu1 }
 0x86b   :  { %v5426_v20 = vadd.f32 %v11429_v18, %v5425_v40  ;;  %v5977_v35 = vpop.f32.mrb[41].mxu1  ;;  %v5524_v9 = vsel %vm5492_vm13, %v5482_v10, 0 }
 0x86c   :  { %v5428_v5 = vpop.f32.mrb[42].mxu1  ;;  %5554 = vmatpush1.bf16.xpose.msra.mxu1 %v5524_v9 }
 0x86d   :  { %v5429_v42 = vadd.f32 %v11429_v18, %v5428_v5  ;;  %v5978_v19 = vpop.f32.mrb[43].mxu1  ;;  %5555 = vmatprep.subr.bf16.mxu1 %v6389_v13  ;;  %v5467_v41 = vmax.f32 %v5426_v20, 0.0 }
 0x86f   :  { %v5468_v33 = vmax.f32 %v5429_v42, 0.0 }
 0x871   :  { %v5483_v39 = vpack.c.bf16 %v5468_v33, %v5467_v41 }
 0x872   :  { %v5433_v7 = vpop.f32.mrb[44].mxu1 }
 0x873   :  { %v5434_v47 = vadd.f32 %v11429_v18, %v5433_v7  ;;  %v5981_v6 = vpop.f32.mrb[45].mxu1  ;;  %v5527_v31 = vsel %vm5492_vm13, %v5483_v39, 0 }
 0x874   :  { %v5436_v15 = vpop.f32.mrb[46].mxu1  ;;  %5556 = vmatpush1.bf16.xpose.msra.mxu1 %v5527_v31 }
 0x875   :  { %v5437_v44 = vadd.f32 %v11429_v18, %v5436_v15  ;;  %v5982_v12 = vpop.f32.mrb[47].mxu1  ;;  %5557 = vmatprep.subr.bf16.mxu1 %v6389_v13  ;;  %v5469_v49 = vmax.f32 %v5434_v47, 0.0 }
 0x877   :  { %v5470_v32 = vmax.f32 %v5437_v44, 0.0 }
 0x879   :  { %v5484_v2 = vpack.c.bf16 %v5470_v32, %v5469_v49 }
 0x87a   :  { %v5441_v36 = vpop.f32.mrb[48].mxu1 }
 0x87b   :  { %v5442_v55 = vadd.f32 %v11429_v18, %v5441_v36  ;;  %v5985_v21 = vpop.f32.mrb[49].mxu1  ;;  %v5530_v4 = vsel %vm5492_vm13, %v5484_v2, 0  ;;  %v5582_v18 = vlaneseq }
 0x87c   :  { %v5444_v11 = vpop.f32.mrb[50].mxu1  ;;  %5558 = vmatpush1.bf16.xpose.msra.mxu1 %v5530_v4 }
 0x87d   :  { %v5471_v48 = vmax.f32 %v5442_v55, 0.0  ;;  %v5986_v24 = vpop.f32.mrb[51].mxu1  ;;  %5559 = vmatprep.subr.bf16.mxu1 %v6389_v13  ;;  %v5583_v27 = vshrl.u32 %v5582_v18, 7  ;;  %v5718_v60 = vand.u32 127, %v5582_v18  ;;  %vm5596_vm2 = vcmp.lt.s32.totalorder %v5582_v18, 196 }
 0x87f   :  { %v5485_v26 = vpack.c.bf16 %v5471_v48, %v5471_v48  ;;  %v5716_v1 = vadd.s32 8, %v5583_v27  ;;  %vm5719_vm0 = vcmp.eq.s32.totalorder %v5583_v27, %v5718_v60  ;;  %v5584_v10 = vsub.s32 %v5581_v54, %v5583_v27 }
 0x880   :  { %v5902_v13 = vsel %vm5719_vm0, 1.0, %v6386_v61 }
 0x881   :  { %v5533_v34 = vsel %vm5492_vm13, %v5485_v26, 0  ;;  %vm5720_vm15 = vcmp.eq.s32.totalorder %v5716_v1, %v5718_v60 }
 0x882   :  { %v5903_v58 = vsel %vm5720_vm15, 1.0, %v6386_v61 }
 0x884   :  { %5560 = vmatpush1.bf16.xpose.msra.mxu1 %v5533_v34 }
 0x88b   :  { %5897 = vmatmul.mubr.msk.bf16.vlgmr.msra.gmra.mrb[52].mxu1 %vm5492_vm13, %v5491_v14 }
 0x902   :  { %v5993_v63 = vpop.f32.mrb[8].mxu0 }
 0x903   :  { %v5726_v30 = vmul.f32 %v5993_v63, %v5903_v58  ;;  %v5705_v37 = vpop.f32.mrb[9].mxu0 }
 0x904   :  { %v5725_v56 = vmul.f32 %v5902_v13, %v5705_v37 }
 0x905   :  { %v5729_v46 = vsel %vm5727_vm1, %v5726_v30, 0.0 }
 0x906   :  { %v5728_v8 = vsel %vm5727_vm1, %v5725_v56, 0.0 }
 0x907   :  { %v5730_v59 = vadd.f32 %v5729_v46, %v5728_v8 }
 0x909   :  { %v5731_v3 = vrot.slane %v5730_v59, 4 }
 0x90b   :  { %v5732_v38 = vadd.f32 %v5731_v3, %v5730_v59 }
 0x90d   :  { %v5733_v45 = vrot.slane %v5732_v38, 2 }
 0x90f   :  { %v5734_v50 = vadd.f32 %v5733_v45, %v5732_v38 }
 0x911   :  { %v5735_v25 = vrot.slane %v5734_v50, 1 }
 0x913   :  { %v5736_v57 = vadd.f32 %v5735_v25, %v5734_v50 }
 0x915   :  { %v5737_v43 = vsub.f32 %v5736_v57, %v5705_v37  ;;  %v5738_v62 = vsub.f32 %v5736_v57, %v5993_v63 }
 0x917   :  { %v5739_v17 = vmul.f32 0.1, %v5737_v43  ;;  %v5740_v61 = vmul.f32 0.1, %v5738_v62 }
 0x919   :  { %5741 = vst.msk [vmem:[%s11521_s7] sm:$0xff] %vm5727_vm1, %v5739_v17  ;;  %5742 = vst.msk [vmem:[%s11521_s7 + $0x8] sm:$0xff] %vm5727_vm1, %v5740_v61  ;;  %s6350_s7 = scalar_lea.vmem %s5750_s24, 32 }
 0x91a   :  { %p6351_p5 = scmp.ne.s32.totalorder %s5750_s24, %s6350_s7  ;;  %p6356_p7 = scmp.lt.s32.totalorder %s6350_s7, %s6350_s7 }
 0x91c   :  { %p6357_p8 = por %p6356_p7, %p6355_p6 }
 0x91e   :  { %p6358_p9 = pnand %p6357_p8, %p6351_p5 }
 0x95e   :  { %v5569_v22 = vpop.f32.mrb[52].mxu1 }
 0x95f   :  { %v5570_v0 = vadd.f32 %v5569_v22, %v5487_v28  ;;  %v5571_v52 = vpop.f32.mrb[53].mxu1 }
 0x960   :  { %v5572_v29 = vadd.f32 %v5571_v52, %v5487_v28  ;;  %v5573_v23 = vpop.f32.mrb[54].mxu1 }
 0x961   :  { %v5574_v40 = vpop.f32.mrb[55].mxu1 }
 0x962   :  { %v5578_v20 = vcombine.low %v5570_v0, %v5572_v29 }
 0x964   :  { %v5585_v35 = vrot.slane %v5578_v20, %v5584_v10 }
 0x966   :  { %v5592_v9 = vrot.slane %v5585_v35, %v5584_v10 }
 0x968   :  { %5598 = vst.msk [vmem:[#allocation5] sm:$0x3] %vm5596_vm2, %v5592_v9 }
 0x969   :  { %6361 = shalt.err (!%p6358_p9)
}
 0x96a   :  { %s6362_s10 = scalar_lea.hbm %s11520_s6, 32 }
 0x96b   :  { %p6363_p10 = scmp.ne.s32.totalorder %s11520_s6, %s6362_s10  ;;  %p6366_p11 = scmp.lt.u32.totalorder %s6362_s10, %s11520_s6 }
 0x96d   :  { %p6368_p12 = pnand %p6366_p11, %p6363_p10 }
 0x96f   :  { %6371 = shalt.err (!%p6368_p12)
}
 0x970   :  { %5752 = dma.vmem_to_hbm [thread:$0]  %s5750_s24, 32, %s11520_s6, [#allocation3]  }
 0x971   :  { %6374 = dma.done.wait [#allocation3], 32  }
 0x972   :  { %6375 = vsyncadd [#allocation3], 4294967264 }
 0x973   :  { %5760 = vsyncpa [#allocation3], 1 }
 0x974   :  { %5761 = vsyncpa [#allocation4], 1 }

</bundles_post_ra>
